<compile_context>
chip_gen: v7x
topology: tpu7x:2x2x1
jax: 0.10.0
libtpu: 0.0.40
codegen_flags: <defaults>
</compile_context>

<pallas_src>
import functools

import jax
import jax.numpy as jnp
from jax import lax
from jax.experimental import pallas as pl
from jax.experimental.pallas import tpu as pltpu

KSIZE = 4
BN_EPS = 1e-5


def _round_up(x, m):
    return (x + m - 1) // m * m


@functools.partial(jax.jit, static_argnames=("compute_dtype",))
def unet_up_block(x_nchw, skip_nchw, weight_pt, gamma, beta, *, compute_dtype=jnp.bfloat16):
    """Forward pass matching UNetUpBlock.forward(x, skip_input) (dropout=False).

    x_nchw   : (N, Cin, H, W)        float32
    skip_nchw: (N, Cskip, H+1, W+1)  float32
    weight_pt: (Cin, Cout, 4, 4)     PyTorch ConvTranspose2d weight layout
    gamma    : (Cout,)               BatchNorm2d weight
    beta     : (Cout,)               BatchNorm2d bias
    returns  : (N, Cout + Cskip, H+1, W+1) float32
    """
    n, cin, h, w = x_nchw.shape
    cout = weight_pt.shape[1]
    ho, wo = h + 1, w + 1                       # ConvTranspose2d(k=4,s=1,p=1) output size
    kk = KSIZE * KSIZE

    # alignment: Wo -> multiple of 8 (clean sublane merge of the (Ho,Wo,K)->(Ho*Wo,K) reshape),
    #            Cout -> multiple of 128 (lane-dense MXU result / unmasked stores).
    # Ho needs NO padding: the whole height is a single block.
    wo_p = _round_up(wo, 8)
    coutp = _round_up(cout, 128)
    hp, wp = ho + KSIZE - 1, wo_p + KSIZE - 1   # padded-input spatial dims

    # ---- wrapper-side layout prep (one-time XLA ops) ------------------------------------------
    x_nhwc = jnp.transpose(x_nchw, (0, 2, 3, 1)).astype(compute_dtype)
    # transposed conv == correlation over the input zero-padded by k-1-p = 2 with the flipped
    # kernel; extra right zero padding is alignment only (masked out of BN stats, sliced off).
    xp = jnp.pad(x_nhwc, ((0, 0), (2, 2), (2, 2 + wo_p - wo), (0, 0)))
    # (Cin,Cout,4,4) -> spatial flip -> (4,4,Cin,Cout) -> (16*Cin, Cout) -> zero-pad to 128 lanes
    w_mat = jnp.transpose(weight_pt[:, :, ::-1, ::-1], (2, 3, 0, 1)).astype(compute_dtype)
    w_mat = jnp.pad(w_mat.reshape(kk * cin, cout), ((0, 0), (0, coutp - cout)))
    gamma_p = jnp.pad(gamma.astype(jnp.float32), (0, coutp - cout)).reshape(1, coutp)
    beta_p = jnp.pad(beta.astype(jnp.float32), (0, coutp - cout)).reshape(1, coutp)

    inv_cnt = 1.0 / float(n * ho * wo)          # BN uses only the real (unpadded) pixels

    # ---- fused kernel: conv (im2col matmul) + BN stats + final scale/shift + ReLU --------------
    def fused_kernel(xp_ref, w_ref, gamma_ref, beta_ref, out_ref, sum_scr, sumsq_scr):
        bi = pl.program_id(0)

        @pl.when(bi == 0)
        def _init():
            sum_scr[...] = jnp.zeros_like(sum_scr)
            sumsq_scr[...] = jnp.zeros_like(sumsq_scr)

        # im2col: 16 shifted taps concatenated on the lane axis -> K = 16*Cin (=128 for Cin=8),
        # then ONE 2-D MXU matmul for the whole image of this batch element (M = ho*wo_p = 408).
        taps = []
        for kh in range(KSIZE):
            for kw in range(KSIZE):
                taps.append(xp_ref[kh:kh + ho, kw:kw + wo_p, :])
        patch = jnp.concatenate(taps, axis=-1).reshape(ho * wo_p, kk * cin)
        acc = jnp.dot(patch, w_ref[...], preferred_element_type=jnp.float32)
        acc = acc.reshape(ho, wo_p, coutp)                                   # (Ho, Wo_p, 128) f32

        # conv result parked in the (full-array, VMEM-resident) output block; no HBM round trip.
        out_ref[bi] = acc.astype(out_ref.dtype)

        # fused BatchNorm batch statistics (exclude the width alignment-padding columns).
        cid = lax.broadcasted_iota(jnp.int32, (ho, wo_p, 1), 1)
        mask = (cid < wo).astype(jnp.float32)
        m = acc * mask
        sum_scr[...] += jnp.sum(m, axis=(0, 1)).reshape(1, coutp)
        sumsq_scr[...] += jnp.sum(m * m, axis=(0, 1)).reshape(1, coutp)

        # Last grid step: fold stats -> scale/shift, apply BN + ReLU in place, single writeback.
        @pl.when(bi == pl.num_programs(0) - 1)
        def _apply():
            mean = sum_scr[...] * inv_cnt
            var = sumsq_scr[...] * inv_cnt - mean * mean      # biased variance (BN training mode)
            scale = gamma_ref[...] * lax.rsqrt(var + BN_EPS)
            shift = beta_ref[...] - mean * scale
            scale3 = scale.reshape(1, 1, coutp)
            shift3 = shift.reshape(1, 1, coutp)
            for b in range(n):                                # per-batch to bound live temporaries
                out_ref[b] = jnp.maximum(out_ref[b] * scale3 + shift3, 0.0)

    y = pl.pallas_call(
        fused_kernel,
        grid=(n,),
        in_specs=[
            # whole padded image of this batch element (tiny; see module-level TODO for scaling)
            pl.BlockSpec((None, hp, wp, cin), lambda bi: (bi, 0, 0, 0)),
            pl.BlockSpec((kk * cin, coutp), lambda bi: (0, 0)),
            pl.BlockSpec((1, coutp), lambda bi: (0, 0)),
            pl.BlockSpec((1, coutp), lambda bi: (0, 0)),
        ],
        # constant block index -> output stays VMEM-resident across the grid, written to HBM once
        out_specs=pl.BlockSpec((n, ho, wo_p, coutp), lambda bi: (0, 0, 0, 0)),
        out_shape=jax.ShapeDtypeStruct((n, ho, wo_p, coutp), jnp.float32),
        scratch_shapes=[pltpu.VMEM((1, coutp), jnp.float32),     # BN sum
                        pltpu.VMEM((1, coutp), jnp.float32)],    # BN sum of squares
        compiler_params=pltpu.CompilerParams(
            # stats accumulation + final in-place apply couple every grid step -> sequential.
            dimension_semantics=("arbitrary",),
            vmem_limit_bytes=32 * 1024 * 1024),
    )(xp, w_mat, gamma_p, beta_p)

    # ---- strip alignment padding, channel-concat with the skip connection (pure memcpy) --------
    y_nchw = jnp.transpose(y[:, :, :wo, :cout], (0, 3, 1, 2))
    return jnp.concatenate([y_nchw, skip_nchw.astype(y_nchw.dtype)], axis=1)


def _reference(x_nchw, skip_nchw, weight_pt, gamma, beta):
    """Independent pure-JAX/XLA f32 reference: ConvTranspose2d + BN(train) + ReLU + concat."""
    x_nhwc = jnp.transpose(x_nchw, (0, 2, 3, 1))
    w_hwio = jnp.transpose(weight_pt[:, :, ::-1, ::-1], (2, 3, 0, 1))
    y = lax.conv_general_dilated(
        x_nhwc, w_hwio, window_strides=(1, 1), padding=[(2, 2), (2, 2)],
        dimension_numbers=("NHWC", "HWIO", "NHWC"))
    mean = jnp.mean(y, axis=(0, 1, 2), keepdims=True)
    var = jnp.mean((y - mean) ** 2, axis=(0, 1, 2), keepdims=True)
    y = (y - mean) * lax.rsqrt(var + BN_EPS) * gamma + beta
    y = jnp.maximum(y, 0.0)
    out_nhwc = jnp.concatenate([y, jnp.transpose(skip_nchw, (0, 2, 3, 1))], axis=-1)
    return jnp.transpose(out_nhwc, (0, 3, 1, 2))


if __name__ == "__main__":
    key = jax.random.PRNGKey(0)
    k_x, k_s, k_w, k_g, k_b = jax.random.split(key, 5)

    N, Cin, Cout, Cskip, H, W = 2, 8, 4, 4, 16, 16

    x = jax.random.normal(k_x, (N, Cin, H, W), jnp.float32)
    skip = jax.random.normal(k_s, (N, Cskip, H + 1, W + 1), jnp.float32)
    weight = jax.random.normal(k_w, (Cin, Cout, KSIZE, KSIZE), jnp.float32) * 0.1
    gamma = jax.random.uniform(k_g, (Cout,), jnp.float32, 0.5, 1.5)
    beta = jax.random.normal(k_b, (Cout,), jnp.float32) * 0.1

    ref = jax.block_until_ready(_reference(x, skip, weight, gamma, beta))

    # strict check of the kernel structure on the f32 matmul path
    out_f32 = jax.block_until_ready(
        unet_up_block(x, skip, weight, gamma, beta, compute_dtype=jnp.float32))
    assert out_f32.shape == (N, Cout + Cskip, H + 1, W + 1), out_f32.shape
    assert jnp.allclose(out_f32, ref, atol=2e-4, rtol=2e-4), \
        float(jnp.max(jnp.abs(out_f32 - ref)))

    # default fast path: bf16 MXU inputs, f32 accumulation / f32 BN math / f32 output
    out_bf16 = jax.block_until_ready(unet_up_block(x, skip, weight, gamma, beta))
    assert out_bf16.shape == (N, Cout + Cskip, H + 1, W + 1), out_bf16.shape
    assert jnp.allclose(out_bf16, ref, atol=1e-1, rtol=1e-1), \
        float(jnp.max(jnp.abs(out_bf16 - ref)))

    print("KERNEL_OK")
</pallas_src>

<mosaic_0001>
module attributes {stable_mosaic.version = 11 : i64} {
  func.func @fused_kernel(%arg0: i32, %arg1: memref<1x20x27x8xf32, #tpu.memory_space<vmem>>, %arg2: memref<128x128xf32, #tpu.memory_space<vmem>>, %arg3: memref<1x128xf32, #tpu.memory_space<vmem>>, %arg4: memref<1x128xf32, #tpu.memory_space<vmem>>, %arg5: memref<2x17x24x128xf32, #tpu.memory_space<vmem>>, %arg6: memref<1x128xf32, #tpu.memory_space<vmem>>, %arg7: memref<1x128xf32, #tpu.memory_space<vmem>>) attributes {dimension_semantics = [#tpu.dimension_semantics<arbitrary>], iteration_bounds = array<i64: 2>, scalar_prefetch = 0 : i64, scratch_operands = 2 : i64, tpu.core_type = #tpu.core_type<tc>, window_params = [{transform_indices = @transform_0, window_bounds = array<i64: 1, 20, 27, 8>}, {pipeline_mode = #tpu.pipeline_mode<synchronous>, transform_indices = @transform_1, window_bounds = array<i64: 128, 128>}, {pipeline_mode = #tpu.pipeline_mode<synchronous>, transform_indices = @transform_2, window_bounds = array<i64: 1, 128>}, {pipeline_mode = #tpu.pipeline_mode<synchronous>, transform_indices = @transform_3, window_bounds = array<i64: 1, 128>}, {pipeline_mode = #tpu.pipeline_mode<synchronous>, transform_indices = @transform_4, window_bounds = array<i64: 2, 17, 24, 128>}]} {
    %c0_i32 = arith.constant 0 : i32
    %0 = arith.cmpi eq, %arg0, %c0_i32 : i32
    %1 = arith.extui %0 : i1 to i32
    %c0_i32_0 = arith.constant 0 : i32
    %2 = arith.cmpi ne, %1, %c0_i32_0 : i32
    scf.if %2 {
      %cst_77 = arith.constant 0.000000e+00 : f32
      %65 = vector.broadcast %cst_77 : f32 to vector<1x128xf32>
      %c0_78 = arith.constant 0 : index
      %c0_79 = arith.constant 0 : index
      %66 = vector.load %arg6[%c0_78, %c0_79] : memref<1x128xf32, #tpu.memory_space<vmem>>, vector<1x128xf32>
      tpu.vector_store %arg6[%c0_78, %c0_79], %65 {strides = array<i32>} : memref<1x128xf32, #tpu.memory_space<vmem>>, vector<1x128xf32>,
      %cst_80 = arith.constant 0.000000e+00 : f32
      %67 = vector.broadcast %cst_80 : f32 to vector<1x128xf32>
      %c0_81 = arith.constant 0 : index
      %c0_82 = arith.constant 0 : index
      %68 = vector.load %arg7[%c0_81, %c0_82] : memref<1x128xf32, #tpu.memory_space<vmem>>, vector<1x128xf32>
      tpu.vector_store %arg7[%c0_81, %c0_82], %67 {strides = array<i32>} : memref<1x128xf32, #tpu.memory_space<vmem>>, vector<1x128xf32>,
    } else {
    }
    %c0 = arith.constant 0 : index
    %c0_1 = arith.constant 0 : index
    %c0_2 = arith.constant 0 : index
    %c0_3 = arith.constant 0 : index
    %3 = vector.load %arg1[%c0, %c0_1, %c0_2, %c0_3] : memref<1x20x27x8xf32, #tpu.memory_space<vmem>>, vector<1x17x24x8xf32>
    %4 = vector.shape_cast %3 : vector<1x17x24x8xf32> to vector<17x24x8xf32>
    %c0_4 = arith.constant 0 : index
    %c0_5 = arith.constant 0 : index
    %c1 = arith.constant 1 : index
    %c0_6 = arith.constant 0 : index
    %5 = vector.load %arg1[%c0_4, %c0_5, %c1, %c0_6] : memref<1x20x27x8xf32, #tpu.memory_space<vmem>>, vector<1x17x24x8xf32>
    %6 = vector.shape_cast %5 : vector<1x17x24x8xf32> to vector<17x24x8xf32>
    %c0_7 = arith.constant 0 : index
    %c0_8 = arith.constant 0 : index
    %c2 = arith.constant 2 : index
    %c0_9 = arith.constant 0 : index
    %7 = vector.load %arg1[%c0_7, %c0_8, %c2, %c0_9] : memref<1x20x27x8xf32, #tpu.memory_space<vmem>>, vector<1x17x24x8xf32>
    %8 = vector.shape_cast %7 : vector<1x17x24x8xf32> to vector<17x24x8xf32>
    %c0_10 = arith.constant 0 : index
    %c0_11 = arith.constant 0 : index
    %c3 = arith.constant 3 : index
    %c0_12 = arith.constant 0 : index
    %9 = vector.load %arg1[%c0_10, %c0_11, %c3, %c0_12] : memref<1x20x27x8xf32, #tpu.memory_space<vmem>>, vector<1x17x24x8xf32>
    %10 = vector.shape_cast %9 : vector<1x17x24x8xf32> to vector<17x24x8xf32>
    %c0_13 = arith.constant 0 : index
    %c1_14 = arith.constant 1 : index
    %c0_15 = arith.constant 0 : index
    %c0_16 = arith.constant 0 : index
    %11 = vector.load %arg1[%c0_13, %c1_14, %c0_15, %c0_16] : memref<1x20x27x8xf32, #tpu.memory_space<vmem>>, vector<1x17x24x8xf32>
    %12 = vector.shape_cast %11 : vector<1x17x24x8xf32> to vector<17x24x8xf32>
    %c0_17 = arith.constant 0 : index
    %c1_18 = arith.constant 1 : index
    %c1_19 = arith.constant 1 : index
    %c0_20 = arith.constant 0 : index
    %13 = vector.load %arg1[%c0_17, %c1_18, %c1_19, %c0_20] : memref<1x20x27x8xf32, #tpu.memory_space<vmem>>, vector<1x17x24x8xf32>
    %14 = vector.shape_cast %13 : vector<1x17x24x8xf32> to vector<17x24x8xf32>
    %c0_21 = arith.constant 0 : index
    %c1_22 = arith.constant 1 : index
    %c2_23 = arith.constant 2 : index
    %c0_24 = arith.constant 0 : index
    %15 = vector.load %arg1[%c0_21, %c1_22, %c2_23, %c0_24] : memref<1x20x27x8xf32, #tpu.memory_space<vmem>>, vector<1x17x24x8xf32>
    %16 = vector.shape_cast %15 : vector<1x17x24x8xf32> to vector<17x24x8xf32>
    %c0_25 = arith.constant 0 : index
    %c1_26 = arith.constant 1 : index
    %c3_27 = arith.constant 3 : index
    %c0_28 = arith.constant 0 : index
    %17 = vector.load %arg1[%c0_25, %c1_26, %c3_27, %c0_28] : memref<1x20x27x8xf32, #tpu.memory_space<vmem>>, vector<1x17x24x8xf32>
    %18 = vector.shape_cast %17 : vector<1x17x24x8xf32> to vector<17x24x8xf32>
    %c0_29 = arith.constant 0 : index
    %c2_30 = arith.constant 2 : index
    %c0_31 = arith.constant 0 : index
    %c0_32 = arith.constant 0 : index
    %19 = vector.load %arg1[%c0_29, %c2_30, %c0_31, %c0_32] : memref<1x20x27x8xf32, #tpu.memory_space<vmem>>, vector<1x17x24x8xf32>
    %20 = vector.shape_cast %19 : vector<1x17x24x8xf32> to vector<17x24x8xf32>
    %c0_33 = arith.constant 0 : index
    %c2_34 = arith.constant 2 : index
    %c1_35 = arith.constant 1 : index
    %c0_36 = arith.constant 0 : index
    %21 = vector.load %arg1[%c0_33, %c2_34, %c1_35, %c0_36] : memref<1x20x27x8xf32, #tpu.memory_space<vmem>>, vector<1x17x24x8xf32>
    %22 = vector.shape_cast %21 : vector<1x17x24x8xf32> to vector<17x24x8xf32>
    %c0_37 = arith.constant 0 : index
    %c2_38 = arith.constant 2 : index
    %c2_39 = arith.constant 2 : index
    %c0_40 = arith.constant 0 : index
    %23 = vector.load %arg1[%c0_37, %c2_38, %c2_39, %c0_40] : memref<1x20x27x8xf32, #tpu.memory_space<vmem>>, vector<1x17x24x8xf32>
    %24 = vector.shape_cast %23 : vector<1x17x24x8xf32> to vector<17x24x8xf32>
    %c0_41 = arith.constant 0 : index
    %c2_42 = arith.constant 2 : index
    %c3_43 = arith.constant 3 : index
    %c0_44 = arith.constant 0 : index
    %25 = vector.load %arg1[%c0_41, %c2_42, %c3_43, %c0_44] : memref<1x20x27x8xf32, #tpu.memory_space<vmem>>, vector<1x17x24x8xf32>
    %26 = vector.shape_cast %25 : vector<1x17x24x8xf32> to vector<17x24x8xf32>
    %c0_45 = arith.constant 0 : index
    %c3_46 = arith.constant 3 : index
    %c0_47 = arith.constant 0 : index
    %c0_48 = arith.constant 0 : index
    %27 = vector.load %arg1[%c0_45, %c3_46, %c0_47, %c0_48] : memref<1x20x27x8xf32, #tpu.memory_space<vmem>>, vector<1x17x24x8xf32>
    %28 = vector.shape_cast %27 : vector<1x17x24x8xf32> to vector<17x24x8xf32>
    %c0_49 = arith.constant 0 : index
    %c3_50 = arith.constant 3 : index
    %c1_51 = arith.constant 1 : index
    %c0_52 = arith.constant 0 : index
    %29 = vector.load %arg1[%c0_49, %c3_50, %c1_51, %c0_52] : memref<1x20x27x8xf32, #tpu.memory_space<vmem>>, vector<1x17x24x8xf32>
    %30 = vector.shape_cast %29 : vector<1x17x24x8xf32> to vector<17x24x8xf32>
    %c0_53 = arith.constant 0 : index
    %c3_54 = arith.constant 3 : index
    %c2_55 = arith.constant 2 : index
    %c0_56 = arith.constant 0 : index
    %31 = vector.load %arg1[%c0_53, %c3_54, %c2_55, %c0_56] : memref<1x20x27x8xf32, #tpu.memory_space<vmem>>, vector<1x17x24x8xf32>
    %32 = vector.shape_cast %31 : vector<1x17x24x8xf32> to vector<17x24x8xf32>
    %c0_57 = arith.constant 0 : index
    %c3_58 = arith.constant 3 : index
    %c3_59 = arith.constant 3 : index
    %c0_60 = arith.constant 0 : index
    %33 = vector.load %arg1[%c0_57, %c3_58, %c3_59, %c0_60] : memref<1x20x27x8xf32, #tpu.memory_space<vmem>>, vector<1x17x24x8xf32>
    %34 = vector.shape_cast %33 : vector<1x17x24x8xf32> to vector<17x24x8xf32>
    %35 = tpu.concatenate %4, %6, %8, %10, %12, %14, %16, %18, %20, %22, %24, %26, %28, %30, %32, %34 in 2 : vector<17x24x8xf32>, vector<17x24x8xf32>, vector<17x24x8xf32>, vector<17x24x8xf32>, vector<17x24x8xf32>, vector<17x24x8xf32>, vector<17x24x8xf32>, vector<17x24x8xf32>, vector<17x24x8xf32>, vector<17x24x8xf32>, vector<17x24x8xf32>, vector<17x24x8xf32>, vector<17x24x8xf32>, vector<17x24x8xf32>, vector<17x24x8xf32>, vector<17x24x8xf32> -> vector<17x24x128xf32>
    %36 = vector.shape_cast %35 : vector<17x24x128xf32> to vector<408x128xf32>
    %c0_61 = arith.constant 0 : index
    %c0_62 = arith.constant 0 : index
    %37 = vector.load %arg2[%c0_61, %c0_62] : memref<128x128xf32, #tpu.memory_space<vmem>>, vector<128x128xf32>
    %cst = arith.constant dense<0.000000e+00> : vector<408x128xf32>
    %38 = tpu.matmul %36, %37, %cst {dimension_numbers = #tpu.dot_dimension_numbers<[1], [0], [0], [1], [0, 0, 1, 1], [], []>} : vector<408x128xf32>, vector<128x128xf32>, vector<408x128xf32> -> vector<408x128xf32>
    %39 = vector.shape_cast %38 : vector<408x128xf32> to vector<17x24x128xf32>
    %40 = arith.index_cast %arg0 : i32 to index
    %c0_63 = arith.constant 0 : index
    %c0_64 = arith.constant 0 : index
    %c0_65 = arith.constant 0 : index
    %41 = vector.load %arg5[%40, %c0_63, %c0_64, %c0_65] : memref<2x17x24x128xf32, #tpu.memory_space<vmem>>, vector<1x17x24x128xf32>
    %42 = vector.shape_cast %41 : vector<1x17x24x128xf32> to vector<17x24x128xf32>
    %43 = vector.shape_cast %39 : vector<17x24x128xf32> to vector<1x17x24x128xf32>
    tpu.vector_store %arg5[%40, %c0_63, %c0_64, %c0_65], %43 {strides = array<i32>} : memref<2x17x24x128xf32, #tpu.memory_space<vmem>>, vector<1x17x24x128xf32>,
    %44 = tpu.iota {dimensions = array<i32: 1>} : vector<17x24x1xi32>
    %c17_i32 = arith.constant 17 : i32
    %45 = vector.broadcast %c17_i32 : i32 to vector<17x24x1xi32>
    %46 = arith.cmpi slt, %44, %45 : vector<17x24x1xi32>
    %47 = arith.extui %46 : vector<17x24x1xi1> to vector<17x24x1xi32>
    %48 = arith.sitofp %47 : vector<17x24x1xi32> to vector<17x24x1xf32>
    %49 = vector.broadcast %48 : vector<17x24x1xf32> to vector<17x24x128xf32>
    %50 = arith.mulf %39, %49 : vector<17x24x128xf32>
    %c0_66 = arith.constant 0 : index
    %c0_67 = arith.constant 0 : index
    %51 = vector.load %arg6[%c0_66, %c0_67] : memref<1x128xf32, #tpu.memory_space<vmem>>, vector<1x128xf32>
    %cst_68 = arith.constant dense<0.000000e+00> : vector<128xf32>
    %52 = vector.multi_reduction <add>, %50, %cst_68 [0, 1] : vector<17x24x128xf32> to vector<128xf32>
    %53 = vector.shape_cast %52 : vector<128xf32> to vector<1x128xf32>
    %54 = arith.addf %51, %53 : vector<1x128xf32>
    %c0_69 = arith.constant 0 : index
    %c0_70 = arith.constant 0 : index
    %55 = vector.load %arg6[%c0_69, %c0_70] : memref<1x128xf32, #tpu.memory_space<vmem>>, vector<1x128xf32>
    tpu.vector_store %arg6[%c0_69, %c0_70], %54 {strides = array<i32>} : memref<1x128xf32, #tpu.memory_space<vmem>>, vector<1x128xf32>,
    %c0_71 = arith.constant 0 : index
    %c0_72 = arith.constant 0 : index
    %56 = vector.load %arg7[%c0_71, %c0_72] : memref<1x128xf32, #tpu.memory_space<vmem>>, vector<1x128xf32>
    %57 = arith.mulf %50, %50 : vector<17x24x128xf32>
    %cst_73 = arith.constant dense<0.000000e+00> : vector<128xf32>
    %58 = vector.multi_reduction <add>, %57, %cst_73 [0, 1] : vector<17x24x128xf32> to vector<128xf32>
    %59 = vector.shape_cast %58 : vector<128xf32> to vector<1x128xf32>
    %60 = arith.addf %56, %59 : vector<1x128xf32>
    %c0_74 = arith.constant 0 : index
    %c0_75 = arith.constant 0 : index
    %61 = vector.load %arg7[%c0_74, %c0_75] : memref<1x128xf32, #tpu.memory_space<vmem>>, vector<1x128xf32>
    tpu.vector_store %arg7[%c0_74, %c0_75], %60 {strides = array<i32>} : memref<1x128xf32, #tpu.memory_space<vmem>>, vector<1x128xf32>,
    %c1_i32 = arith.constant 1 : i32
    %62 = arith.cmpi eq, %arg0, %c1_i32 : i32
    %63 = arith.extui %62 : i1 to i32
    %c0_i32_76 = arith.constant 0 : i32
    %64 = arith.cmpi ne, %63, %c0_i32_76 : i32
    scf.if %64 {
      %c0_77 = arith.constant 0 : index
      %c0_78 = arith.constant 0 : index
      %65 = vector.load %arg6[%c0_77, %c0_78] : memref<1x128xf32, #tpu.memory_space<vmem>>, vector<1x128xf32>
      %cst_79 = arith.constant 0.00173010386 : f32
      %66 = vector.broadcast %cst_79 : f32 to vector<1x128xf32>
      %67 = arith.mulf %65, %66 : vector<1x128xf32>
      %c0_80 = arith.constant 0 : index
      %c0_81 = arith.constant 0 : index
      %68 = vector.load %arg7[%c0_80, %c0_81] : memref<1x128xf32, #tpu.memory_space<vmem>>, vector<1x128xf32>
      %cst_82 = arith.constant 0.00173010386 : f32
      %69 = vector.broadcast %cst_82 : f32 to vector<1x128xf32>
      %70 = arith.mulf %68, %69 : vector<1x128xf32>
      %71 = arith.mulf %67, %67 : vector<1x128xf32>
      %72 = arith.subf %70, %71 : vector<1x128xf32>
      %c0_83 = arith.constant 0 : index
      %c0_84 = arith.constant 0 : index
      %73 = vector.load %arg3[%c0_83, %c0_84] : memref<1x128xf32, #tpu.memory_space<vmem>>, vector<1x128xf32>
      %cst_85 = arith.constant 9.99999974E-6 : f32
      %74 = vector.broadcast %cst_85 : f32 to vector<1x128xf32>
      %75 = arith.addf %72, %74 : vector<1x128xf32>
      %76 = math.rsqrt %75 : vector<1x128xf32>
      %77 = arith.mulf %73, %76 : vector<1x128xf32>
      %c0_86 = arith.constant 0 : index
      %c0_87 = arith.constant 0 : index
      %78 = vector.load %arg4[%c0_86, %c0_87] : memref<1x128xf32, #tpu.memory_space<vmem>>, vector<1x128xf32>
      %79 = arith.mulf %67, %77 : vector<1x128xf32>
      %80 = arith.subf %78, %79 : vector<1x128xf32>
      %81 = vector.shape_cast %77 : vector<1x128xf32> to vector<1x1x128xf32>
      %82 = vector.shape_cast %80 : vector<1x128xf32> to vector<1x1x128xf32>
      %c0_88 = arith.constant 0 : index
      %c0_89 = arith.constant 0 : index
      %c0_90 = arith.constant 0 : index
      %c0_91 = arith.constant 0 : index
      %83 = vector.load %arg5[%c0_88, %c0_89, %c0_90, %c0_91] : memref<2x17x24x128xf32, #tpu.memory_space<vmem>>, vector<1x17x24x128xf32>
      %84 = vector.shape_cast %83 : vector<1x17x24x128xf32> to vector<17x24x128xf32>
      %85 = vector.broadcast %81 : vector<1x1x128xf32> to vector<17x24x128xf32>
      %86 = arith.mulf %84, %85 : vector<17x24x128xf32>
      %87 = vector.broadcast %82 : vector<1x1x128xf32> to vector<17x24x128xf32>
      %88 = arith.addf %86, %87 : vector<17x24x128xf32>
      %cst_92 = arith.constant 0.000000e+00 : f32
      %89 = vector.broadcast %cst_92 : f32 to vector<17x24x128xf32>
      %90 = arith.maximumf %88, %89 : vector<17x24x128xf32>
      %c0_93 = arith.constant 0 : index
      %c0_94 = arith.constant 0 : index
      %c0_95 = arith.constant 0 : index
      %c0_96 = arith.constant 0 : index
      %91 = vector.load %arg5[%c0_93, %c0_94, %c0_95, %c0_96] : memref<2x17x24x128xf32, #tpu.memory_space<vmem>>, vector<1x17x24x128xf32>
      %92 = vector.shape_cast %91 : vector<1x17x24x128xf32> to vector<17x24x128xf32>
      %93 = vector.shape_cast %90 : vector<17x24x128xf32> to vector<1x17x24x128xf32>
      tpu.vector_store %arg5[%c0_93, %c0_94, %c0_95, %c0_96], %93 {strides = array<i32>} : memref<2x17x24x128xf32, #tpu.memory_space<vmem>>, vector<1x17x24x128xf32>,
      %c1_97 = arith.constant 1 : index
      %c0_98 = arith.constant 0 : index
      %c0_99 = arith.constant 0 : index
      %c0_100 = arith.constant 0 : index
      %94 = vector.load %arg5[%c1_97, %c0_98, %c0_99, %c0_100] : memref<2x17x24x128xf32, #tpu.memory_space<vmem>>, vector<1x17x24x128xf32>
      %95 = vector.shape_cast %94 : vector<1x17x24x128xf32> to vector<17x24x128xf32>
      %96 = vector.broadcast %81 : vector<1x1x128xf32> to vector<17x24x128xf32>
      %97 = arith.mulf %95, %96 : vector<17x24x128xf32>
      %98 = vector.broadcast %82 : vector<1x1x128xf32> to vector<17x24x128xf32>
      %99 = arith.addf %97, %98 : vector<17x24x128xf32>
      %cst_101 = arith.constant 0.000000e+00 : f32
      %100 = vector.broadcast %cst_101 : f32 to vector<17x24x128xf32>
      %101 = arith.maximumf %99, %100 : vector<17x24x128xf32>
      %c1_102 = arith.constant 1 : index
      %c0_103 = arith.constant 0 : index
      %c0_104 = arith.constant 0 : index
      %c0_105 = arith.constant 0 : index
      %102 = vector.load %arg5[%c1_102, %c0_103, %c0_104, %c0_105] : memref<2x17x24x128xf32, #tpu.memory_space<vmem>>, vector<1x17x24x128xf32>
      %103 = vector.shape_cast %102 : vector<1x17x24x128xf32> to vector<17x24x128xf32>
      %104 = vector.shape_cast %101 : vector<17x24x128xf32> to vector<1x17x24x128xf32>
      tpu.vector_store %arg5[%c1_102, %c0_103, %c0_104, %c0_105], %104 {strides = array<i32>} : memref<2x17x24x128xf32, #tpu.memory_space<vmem>>, vector<1x17x24x128xf32>,
    } else {
    }
    return
  }
  func.func @transform_0(%arg0: i32) -> (i32, i32, i32, i32) {
    %c0_i32 = arith.constant 0 : i32
    %c0_i32_0 = arith.constant 0 : i32
    %c0_i32_1 = arith.constant 0 : i32
    %c0_i32_2 = arith.constant 0 : i32
    return %arg0, %c0_i32, %c0_i32_0, %c0_i32_1 : i32, i32, i32, i32
  }
  func.func @transform_1(%arg0: i32) -> (i32, i32) {
    %c0_i32 = arith.constant 0 : i32
    %c0_i32_0 = arith.constant 0 : i32
    %c0_i32_1 = arith.constant 0 : i32
    return %c0_i32, %c0_i32_0 : i32, i32
  }
  func.func @transform_2(%arg0: i32) -> (i32, i32) {
    %c0_i32 = arith.constant 0 : i32
    %c0_i32_0 = arith.constant 0 : i32
    %c0_i32_1 = arith.constant 0 : i32
    return %c0_i32, %c0_i32_0 : i32, i32
  }
  func.func @transform_3(%arg0: i32) -> (i32, i32) {
    %c0_i32 = arith.constant 0 : i32
    %c0_i32_0 = arith.constant 0 : i32
    %c0_i32_1 = arith.constant 0 : i32
    return %c0_i32, %c0_i32_0 : i32, i32
  }
  func.func @transform_4(%arg0: i32) -> (i32, i32, i32, i32) {
    %c0_i32 = arith.constant 0 : i32
    %c0_i32_0 = arith.constant 0 : i32
    %c0_i32_1 = arith.constant 0 : i32
    %c0_i32_2 = arith.constant 0 : i32
    %c0_i32_3 = arith.constant 0 : i32
    return %c0_i32, %c0_i32_0, %c0_i32_1, %c0_i32_2 : i32, i32, i32, i32
  }
}

</mosaic_0001>

<bundles_post_ra>
// kernel: unet_up_block.1
= control target key start
LH: loop header
LB: loop body
LE: loop exit
PB: predicated region body
PF: predicated region fallthrough
CT: control target
= control target key end

     0   :  { %s9031_s15 = smov 0   ;;  %s14160_s0 = inlined_call_operand.vmem [shape: f32[2,20,27,8], index: 0, kind: input, shape index: {}]   ;;  %s14161_s1 = inlined_call_operand.vmem [shape: f32[128,128], index: 1, kind: input, shape index: {}]   ;;  %s14162_s2 = inlined_call_operand.vmem [shape: f32[1,128], index: 2, kind: input, shape index: {}]   ;;  %s14163_s3 = inlined_call_operand.vmem [shape: f32[1,128], index: 3, kind: input, shape index: {}]   ;;  %s14164_s4 = inlined_call_operand.vmem [shape: f32[2,17,24,128], index: 4, kind: output, shape index: {}]  }
   0x1 LB: > { %s9037_s16 = sadd.s32 4294967295, %s8985_s15   ;;  %p6043_p0 = scmp.ge.s32.totalorder %s8985_s15, 1  ;;  %s8985_s15 = sphi %s9031_s15, %s14_s15  }
   0x2   : > { %p157_p1 = scmp.lt.s32.totalorder %s8985_s15, 3 }
   0x4   : > { %p158_p2 = pnand %p6043_p0, %p157_p1 }
   0x6   : > { %161 = sbr.rel (%p158_p2) target bundleno = 1267 (0x4f3), region = 36 }
   0xd   : > { %p178_p3 = scmp.lt.s32.totalorder %s9037_s16, 1  ;;  %p6045_p4 = scmp.ne.s32.totalorder %s9037_s16, 0 }
   0xe   : > { %v8987_v0 = vmov (!%p6045_p4), 0.0  }
   0xf   : > { %s179_s17 = scalar_select %p178_p3, %s9037_s16, 1 }
  0x10   : > { %186 = sbr.rel (%p6045_p4) target bundleno = 23 (0x17), region = 40  ;;  %187 = vst [vmem:[#allocation2] sm:$0x1] (!%p6045_p4), %v8987_v0  ;;  %188 = vst [vmem:[#allocation3] sm:$0x1] (!%p6045_p4), %v8987_v0 }
  0x11   : > { %s7056_s18 = smul.u32 640, %s179_s17 }
  0x13   : > { %s9046_s21 = scalar_lea.vmem %s14160_s0, %s7056_s18 }
  0x17 PF: > { %v244_v1 = vld [vmem:[%s9046_s21 + $0x29] sm:$0xff]  ;;  %v245_v2 = vld [vmem:[%s9046_s21 + $0x31] sm:$0xff]  ;;  %v240_v3 = vld [vmem:[%s9046_s21 + $0x1] sm:$0xff]  ;;  %s8988_s22 = smov 8   ;;  %s8989_s23 = smov 16   ;;  %vm4068_vm0 = vcmask 64512  }
  0x18   : > { %v7094_v4 = vpack.i.bf16 %v245_v2, %v244_v1  ;;  %v241_v5 = vld [vmem:[%s9046_s21 + $0x9] sm:$0xff]  ;;  %v246_v6 = vld [vmem:[%s9046_s21 + $0x41] sm:$0xff]  ;;  %v242_v9 = vld [vmem:[%s9046_s21 + $0x11] sm:$0xff]  ;;  %s8990_s24 = smov 24   ;;  %s8991_s25 = smov 32   ;;  %vm4120_vm1 = vcmask 130048  }
  0x19   : > { %v247_v7 = vld [vmem:[%s9046_s21 + $0x49] sm:$0xff]  ;;  %v7084_v8 = vpack.i.bf16 %v241_v5, %v240_v3  ;;  %v243_v10 = vld [vmem:[%s9046_s21 + $0x21] sm:$0xff]  ;;  %v251_v14 = vld [vmem:[%s9046_s21 + $0x71] sm:$0xff]  ;;  %s8992_s26 = smov 40   ;;  %vm4172_vm2 = vcmask 195584   ;;  %s8993_s27 = smov 48  }
  0x1a   : > { %7095 = vrot.lane.b32.xlu1 %v7094_v4, %s8988_s22  ;;  %v7099_v11 = vpack.i.bf16 %v247_v7, %v246_v6  ;;  %v7089_v12 = vpack.i.bf16 %v243_v10, %v242_v9  ;;  %v250_v13 = vld [vmem:[%s9046_s21 + $0x69] sm:$0xff]  ;;  %v248_v15 = vld [vmem:[%s9046_s21 + $0x51] sm:$0xff]  ;;  %v249_v16 = vld [vmem:[%s9046_s21 + $0x61] sm:$0xff]  ;;  %vm4224_vm3 = vcmask 261120   ;;  %s8994_s28 = smov 56   ;;  %vm4276_vm4 = vcmask 326656  }
  0x1b   : > { %7085 = vrot.lane.b32.xlu0 %v7084_v8, %s8988_s22  ;;  %v7109_v17 = vpack.i.bf16 %v251_v14, %v250_v13  ;;  %v7104_v18 = vpack.i.bf16 %v249_v16, %v248_v15  ;;  %v254_v19 = vld [vmem:[%s9046_s21 + $0x91] sm:$0xff]  ;;  %v255_v20 = vld [vmem:[%s9046_s21 + $0xa1] sm:$0xff]  ;;  %v253_v22 = vld [vmem:[%s9046_s21 + $0x89] sm:$0xff]  ;;  %s8995_s29 = smov 64   ;;  %vm4328_vm5 = vcmask 392192   ;;  %s8996_s30 = smov 72  }
  0x1c   : > { %v252_v21 = vld [vmem:[%s9046_s21 + $0x81] sm:$0xff]  ;;  %v7119_v23 = vpack.i.bf16 %v255_v20, %v254_v19  ;;  %v259_v26 = vld [vmem:[%s9046_s21 + $0xc9] sm:$0xff]  ;;  %v257_v28 = vld [vmem:[%s9046_s21 + $0xb1] sm:$0xff]  ;;  %vm4380_vm6 = vcmask 457728   ;;  %s8997_s5 = smov 80   ;;  %vm4432_vm7 = vcmask 523264  }
  0x1d   : > { %v7114_v24 = vpack.i.bf16 %v253_v22, %v252_v21  ;;  %v258_v25 = vld [vmem:[%s9046_s21 + $0xc1] sm:$0xff]  ;;  %v256_v27 = vld [vmem:[%s9046_s21 + $0xa9] sm:$0xff]  ;;  %v263_v32 = vld [vmem:[%s9046_s21 + $0xf1] sm:$0xff]  ;;  %s8999_s10 = smov 88   ;;  %vm4484_vm8 = vcmask 588800   ;;  %vm9000_vm9 = vmmov 0  }
  0x1e   : > { %7100 = vrot.lane.b32.xlu1 %v7099_v11, %s8988_s22  ;;  %v7129_v29 = vpack.i.bf16 %v259_v26, %v258_v25  ;;  %v7124_v30 = vpack.i.bf16 %v257_v28, %v256_v27  ;;  %v262_v31 = vld [vmem:[%s9046_s21 + $0xe9] sm:$0xff]  ;;  %v260_v33 = vld [vmem:[%s9046_s21 + $0xd1] sm:$0xff]  ;;  %v261_v34 = vld [vmem:[%s9046_s21 + $0xe1] sm:$0xff]  ;;  %s9002_s19 = smov 96   ;;  %s9003_s20 = smov 112   ;;  %vm4536_vm10 = vcmask 654336  }
  0x1f   : > { %7090 = vrot.lane.b32.xlu0 %v7089_v12, %s8988_s22  ;;  %v7139_v35 = vpack.i.bf16 %v263_v32, %v262_v31  ;;  %v7134_v36 = vpack.i.bf16 %v261_v34, %v260_v33  ;;  %v266_v37 = vld [vmem:[%s9046_s21 + $0x111] sm:$0xff]  ;;  %v267_v38 = vld [vmem:[%s9046_s21 + $0x121] sm:$0xff]  ;;  %v265_v40 = vld [vmem:[%s9046_s21 + $0x109] sm:$0xff]  ;;  %vm4588_vm11 = vcmask 719872   ;;  %vm4640_vm12 = vcmask 785408   ;;  %p6659_p5 = scmp.ne.s32.totalorder %s9037_s16, 1 }
  0x20   : > { %v264_v39 = vld [vmem:[%s9046_s21 + $0x101] sm:$0xff]  ;;  %v7149_v41 = vpack.i.bf16 %v267_v38, %v266_v37  ;;  %v271_v44 = vld [vmem:[%s9046_s21 + $0x149] sm:$0xff]  ;;  %v269_v46 = vld [vmem:[%s9046_s21 + $0x131] sm:$0xff]  ;;  %vm4692_vm13 = vcmask 850944   ;;  %vm4744_vm14 = vcmask 916480   ;;  %vm4796_vm15 = vcmask 982016  }
  0x21   : > { %v7144_v42 = vpack.i.bf16 %v265_v40, %v264_v39  ;;  %v270_v43 = vld [vmem:[%s9046_s21 + $0x141] sm:$0xff]  ;;  %v268_v45 = vld [vmem:[%s9046_s21 + $0x129] sm:$0xff]  ;;  %v275_v50 = vld [vmem:[%s9046_s21 + $0x171] sm:$0xff] }
  0x22   : > { %7110 = vrot.lane.b32.xlu1 %v7109_v17, %s8988_s22  ;;  %v7159_v47 = vpack.i.bf16 %v271_v44, %v270_v43  ;;  %v7154_v48 = vpack.i.bf16 %v269_v46, %v268_v45  ;;  %v274_v49 = vld [vmem:[%s9046_s21 + $0x169] sm:$0xff]  ;;  %v272_v51 = vld [vmem:[%s9046_s21 + $0x151] sm:$0xff]  ;;  %v273_v52 = vld [vmem:[%s9046_s21 + $0x161] sm:$0xff] }
  0x23   : > { %7105 = vrot.lane.b32.xlu0 %v7104_v18, %s8988_s22  ;;  %v7169_v53 = vpack.i.bf16 %v275_v50, %v274_v49  ;;  %v7164_v54 = vpack.i.bf16 %v273_v52, %v272_v51  ;;  %v278_v55 = vld [vmem:[%s9046_s21 + $0x191] sm:$0xff]  ;;  %v279_v56 = vld [vmem:[%s9046_s21 + $0x1a1] sm:$0xff]  ;;  %v277_v58 = vld [vmem:[%s9046_s21 + $0x189] sm:$0xff] }
  0x24   : > { %v276_v57 = vld [vmem:[%s9046_s21 + $0x181] sm:$0xff]  ;;  %v7179_v59 = vpack.i.bf16 %v279_v56, %v278_v55  ;;  %v283_v62 = vld [vmem:[%s9046_s21 + $0x1c9] sm:$0xff]  ;;  %v281_v0 = vld [vmem:[%s9046_s21 + $0x1b1] sm:$0xff] }
  0x25   : > { %v7174_v60 = vpack.i.bf16 %v277_v58, %v276_v57  ;;  %v282_v61 = vld [vmem:[%s9046_s21 + $0x1c1] sm:$0xff]  ;;  %v280_v63 = vld [vmem:[%s9046_s21 + $0x1a9] sm:$0xff]  ;;  %v287_v4 = vld [vmem:[%s9046_s21 + $0x1f1] sm:$0xff] }
  0x26   : > { %7120 = vrot.lane.b32.xlu1 %v7119_v23, %s8988_s22  ;;  %v7189_v1 = vpack.i.bf16 %v283_v62, %v282_v61  ;;  %v7184_v2 = vpack.i.bf16 %v281_v0, %v280_v63  ;;  %v286_v3 = vld [vmem:[%s9046_s21 + $0x1e9] sm:$0xff]  ;;  %v284_v5 = vld [vmem:[%s9046_s21 + $0x1d1] sm:$0xff]  ;;  %v285_v6 = vld [vmem:[%s9046_s21 + $0x1e1] sm:$0xff] }
  0x27   : > { %7115 = vrot.lane.b32.xlu0 %v7114_v24, %s8988_s22  ;;  %v7199_v7 = vpack.i.bf16 %v287_v4, %v286_v3  ;;  %v7194_v8 = vpack.i.bf16 %v285_v6, %v284_v5  ;;  %v288_v9 = vld [vmem:[%s9046_s21 + $0x201] sm:$0xff]  ;;  %v289_v10 = vld [vmem:[%s9046_s21 + $0x209] sm:$0xff]  ;;  %v290_v11 = vld [vmem:[%s9046_s21 + $0x211] sm:$0xff] }
  0x28   : > { %v7204_v12 = vpack.i.bf16 %v289_v10, %v288_v9  ;;  %v293_v13 = vld [vmem:[%s9046_s21 + $0x12] sm:$0xff]  ;;  %v294_v14 = vld [vmem:[%s9046_s21 + $0x22] sm:$0xff]  ;;  %v292_v16 = vld [vmem:[%s9046_s21 + $0xa] sm:$0xff] }
  0x29   : > { %v291_v15 = vld [vmem:[%s9046_s21 + $0x2] sm:$0xff]  ;;  %v7214_v17 = vpack.i.bf16 %v294_v14, %v293_v13  ;;  %v298_v20 = vld [vmem:[%s9046_s21 + $0x4a] sm:$0xff]  ;;  %v296_v22 = vld [vmem:[%s9046_s21 + $0x32] sm:$0xff] }
  0x2a   : > { %7130 = vrot.lane.b32.xlu1 %v7129_v29, %s8988_s22  ;;  %v7209_v18 = vpack.i.bf16 %v292_v16, %v291_v15  ;;  %v297_v19 = vld [vmem:[%s9046_s21 + $0x42] sm:$0xff]  ;;  %v295_v21 = vld [vmem:[%s9046_s21 + $0x2a] sm:$0xff]  ;;  %v302_v26 = vld [vmem:[%s9046_s21 + $0x72] sm:$0xff] }
  0x2b   : > { %7125 = vrot.lane.b32.xlu0 %v7124_v30, %s8988_s22  ;;  %v7224_v23 = vpack.i.bf16 %v298_v20, %v297_v19  ;;  %v7219_v24 = vpack.i.bf16 %v296_v22, %v295_v21  ;;  %v301_v25 = vld [vmem:[%s9046_s21 + $0x6a] sm:$0xff]  ;;  %v299_v27 = vld [vmem:[%s9046_s21 + $0x52] sm:$0xff]  ;;  %v300_v28 = vld [vmem:[%s9046_s21 + $0x62] sm:$0xff] }
  0x2c   : > { %v7234_v29 = vpack.i.bf16 %v302_v26, %v301_v25  ;;  %v7229_v30 = vpack.i.bf16 %v300_v28, %v299_v27  ;;  %v305_v31 = vld [vmem:[%s9046_s21 + $0x92] sm:$0xff]  ;;  %v306_v32 = vld [vmem:[%s9046_s21 + $0xa2] sm:$0xff]  ;;  %v304_v34 = vld [vmem:[%s9046_s21 + $0x8a] sm:$0xff] }
  0x2d   : > { %v303_v33 = vld [vmem:[%s9046_s21 + $0x82] sm:$0xff]  ;;  %v310_v38 = vld [vmem:[%s9046_s21 + $0xca] sm:$0xff]  ;;  %v308_v40 = vld [vmem:[%s9046_s21 + $0xb2] sm:$0xff] }
  0x2e   : > { %7140 = vrot.lane.b32.xlu1 %v7139_v35, %s8988_s22  ;;  %v7244_v35 = vpack.i.bf16 %v306_v32, %v305_v31  ;;  %v309_v37 = vld [vmem:[%s9046_s21 + $0xc2] sm:$0xff]  ;;  %v307_v39 = vld [vmem:[%s9046_s21 + $0xaa] sm:$0xff]  ;;  %v314_v44 = vld [vmem:[%s9046_s21 + $0xf2] sm:$0xff] }
  0x2f   : > { %7135 = vrot.lane.b32.xlu0 %v7134_v36, %s8988_s22  ;;  %v7239_v36 = vpack.i.bf16 %v304_v34, %v303_v33  ;;  %v313_v43 = vld [vmem:[%s9046_s21 + $0xea] sm:$0xff]  ;;  %v311_v45 = vld [vmem:[%s9046_s21 + $0xd2] sm:$0xff]  ;;  %v312_v46 = vld [vmem:[%s9046_s21 + $0xe2] sm:$0xff] }
  0x30   : > { %v317_v49 = vld [vmem:[%s9046_s21 + $0x112] sm:$0xff]  ;;  %v318_v50 = vld [vmem:[%s9046_s21 + $0x122] sm:$0xff]  ;;  %v316_v52 = vld [vmem:[%s9046_s21 + $0x10a] sm:$0xff] }
  0x31   : > { %v315_v51 = vld [vmem:[%s9046_s21 + $0x102] sm:$0xff]  ;;  %v322_v56 = vld [vmem:[%s9046_s21 + $0x14a] sm:$0xff]  ;;  %v320_v58 = vld [vmem:[%s9046_s21 + $0x132] sm:$0xff] }
  0x32   : > { %7150 = vrot.lane.b32.xlu1 %v7149_v41, %s8988_s22  ;;  %v7254_v41 = vpack.i.bf16 %v310_v38, %v309_v37  ;;  %v321_v55 = vld [vmem:[%s9046_s21 + $0x142] sm:$0xff]  ;;  %v319_v57 = vld [vmem:[%s9046_s21 + $0x12a] sm:$0xff]  ;;  %v326_v62 = vld [vmem:[%s9046_s21 + $0x172] sm:$0xff] }
  0x33   : > { %7145 = vrot.lane.b32.xlu0 %v7144_v42, %s8988_s22  ;;  %v7249_v42 = vpack.i.bf16 %v308_v40, %v307_v39  ;;  %v325_v61 = vld [vmem:[%s9046_s21 + $0x16a] sm:$0xff]  ;;  %v323_v63 = vld [vmem:[%s9046_s21 + $0x152] sm:$0xff]  ;;  %v324_v0 = vld [vmem:[%s9046_s21 + $0x162] sm:$0xff] }
  0x34   : > { %v329_v3 = vld [vmem:[%s9046_s21 + $0x192] sm:$0xff]  ;;  %v330_v4 = vld [vmem:[%s9046_s21 + $0x1a2] sm:$0xff]  ;;  %v328_v6 = vld [vmem:[%s9046_s21 + $0x18a] sm:$0xff] }
  0x35   : > { %v327_v5 = vld [vmem:[%s9046_s21 + $0x182] sm:$0xff]  ;;  %v334_v10 = vld [vmem:[%s9046_s21 + $0x1ca] sm:$0xff]  ;;  %v338_v16 = vld [vmem:[%s9046_s21 + $0x1f2] sm:$0xff] }
  0x36   : > { %7160 = vrot.lane.b32.xlu1 %v7159_v47, %s8988_s22  ;;  %v7264_v47 = vpack.i.bf16 %v314_v44, %v313_v43  ;;  %v333_v9 = vld [vmem:[%s9046_s21 + $0x1c2] sm:$0xff]  ;;  %v337_v15 = vld [vmem:[%s9046_s21 + $0x1ea] sm:$0xff]  ;;  %v344_v25 = vld [vmem:[%s9046_s21 + $0x13] sm:$0xff] }
  0x37   : > { %7155 = vrot.lane.b32.xlu0 %v7154_v48, %s8988_s22  ;;  %v7259_v48 = vpack.i.bf16 %v312_v46, %v311_v45  ;;  %v7314_v13 = vpack.i.bf16 %v334_v10, %v333_v9  ;;  %v7324_v19 = vpack.i.bf16 %v338_v16, %v337_v15  ;;  %v339_v21 = vld [vmem:[%s9046_s21 + $0x202] sm:$0xff]  ;;  %v340_v22 = vld [vmem:[%s9046_s21 + $0x20a] sm:$0xff]  ;;  %v347_v34 = vld [vmem:[%s9046_s21 + $0x33] sm:$0xff] }
  0x38   : > { %v345_v26 = vld [vmem:[%s9046_s21 + $0x23] sm:$0xff]  ;;  %v343_v28 = vld [vmem:[%s9046_s21 + $0xb] sm:$0xff]  ;;  %v353_v38 = vld [vmem:[%s9046_s21 + $0x73] sm:$0xff] }
  0x39   : > { %v342_v27 = vld [vmem:[%s9046_s21 + $0x3] sm:$0xff]  ;;  %v349_v32 = vld [vmem:[%s9046_s21 + $0x4b] sm:$0xff]  ;;  %v350_v39 = vld [vmem:[%s9046_s21 + $0x53] sm:$0xff] }
  0x3a   : > { %7170 = vrot.lane.b32.xlu1 %v7169_v53, %s8988_s22  ;;  %v7274_v53 = vpack.i.bf16 %v318_v50, %v317_v49  ;;  %v348_v31 = vld [vmem:[%s9046_s21 + $0x43] sm:$0xff]  ;;  %v346_v33 = vld [vmem:[%s9046_s21 + $0x2b] sm:$0xff]  ;;  %v356_v43 = vld [vmem:[%s9046_s21 + $0x93] sm:$0xff] }
  0x3b   : > { %7165 = vrot.lane.b32.xlu0 %v7164_v54, %s8988_s22  ;;  %v7269_v54 = vpack.i.bf16 %v316_v52, %v315_v51  ;;  %v352_v37 = vld [vmem:[%s9046_s21 + $0x6b] sm:$0xff]  ;;  %v351_v40 = vld [vmem:[%s9046_s21 + $0x63] sm:$0xff] }
  0x3c   : > { %v357_v44 = vld [vmem:[%s9046_s21 + $0xa3] sm:$0xff]  ;;  %v355_v46 = vld [vmem:[%s9046_s21 + $0x8b] sm:$0xff] }
  0x3d   : > { %v354_v45 = vld [vmem:[%s9046_s21 + $0x83] sm:$0xff]  ;;  %v361_v50 = vld [vmem:[%s9046_s21 + $0xcb] sm:$0xff] }
  0x3e   : > { %7180 = vrot.lane.b32.xlu1 %v7179_v59, %s8988_s22  ;;  %v7284_v59 = vpack.i.bf16 %v322_v56, %v321_v55  ;;  %v360_v49 = vld [vmem:[%s9046_s21 + $0xc3] sm:$0xff]  ;;  %v358_v52 = vld [vmem:[%s9046_s21 + $0xab] sm:$0xff] }
  0x3f   : > { %7175 = vrot.lane.b32.xlu0 %v7174_v60, %s8988_s22  ;;  %v7279_v60 = vpack.i.bf16 %v320_v58, %v319_v57  ;;  %v7379_v55 = vpack.i.bf16 %v361_v50, %v360_v49  ;;  %v364_v57 = vld [vmem:[%s9046_s21 + $0xeb] sm:$0xff]  ;;  %v365_v58 = vld [vmem:[%s9046_s21 + $0xf3] sm:$0xff]  ;;  %v372_v9 = vld [vmem:[%s9046_s21 + $0x143] sm:$0xff] }
  0x40   : > { %v373_v10 = vld [vmem:[%s9046_s21 + $0x14b] sm:$0xff]  ;;  %v390_v50 = vld [vmem:[%s9046_s21 + $0x203] sm:$0xff] }
  0x41   : > { %v7409_v15 = vpack.i.bf16 %v373_v10, %v372_v9  ;;  %v196_v9 = vld [vmem:[%s9046_s21 + $0x48] sm:$0xff]  ;;  %v197_v10 = vld [vmem:[%s9046_s21 + $0x50] sm:$0xff] }
  0x42   : > { %7190 = vrot.lane.b32.xlu1 %v7189_v1, %s8988_s22  ;;  %v7294_v1 = vpack.i.bf16 %v326_v62, %v325_v61  ;;  %v363_v61 = vld [vmem:[%s9046_s21 + $0xe3] sm:$0xff] }
  0x43   : > { %7185 = vrot.lane.b32.xlu0 %v7184_v2, %s8988_s22  ;;  %v7289_v2 = vpack.i.bf16 %v324_v0, %v323_v63  ;;  %v7389_v63 = vpack.i.bf16 %v365_v58, %v364_v57  ;;  %v194_v58 = vld [vmem:[%s9046_s21 + $0x30] sm:$0xff] }
  0x46   : > { %7200 = vrot.lane.b32.xlu1 %v7199_v7, %s8988_s22  ;;  %v7304_v7 = vpack.i.bf16 %v330_v4, %v329_v3  ;;  %v366_v4 = vld [vmem:[%s9046_s21 + $0x103] sm:$0xff] }
  0x47   : > { %7195 = vrot.lane.b32.xlu0 %v7194_v8, %s8988_s22  ;;  %v7299_v8 = vpack.i.bf16 %v328_v6, %v327_v5  ;;  %v367_v5 = vld [vmem:[%s9046_s21 + $0x10b] sm:$0xff] }
  0x4a   : > { %1159 = vrot.lane.b32.xlu1 %v290_v11, %s8988_s22  ;;  %v331_v11 = vld [vmem:[%s9046_s21 + $0x1aa] sm:$0xff] }
  0x4b   : > { %7205 = vrot.lane.b32.xlu0 %v7204_v12, %s8988_s22  ;;  %v332_v12 = vld [vmem:[%s9046_s21 + $0x1b2] sm:$0xff]  ;;  %s9004_s22 = smov 104  }
  0x4c   : > { %v7309_v14 = vpack.i.bf16 %v332_v12, %v331_v11  ;;  %v370_v12 = vld [vmem:[%s9046_s21 + $0x12b] sm:$0xff] }
  0x4e   : > { %7215 = vrot.lane.b32.xlu1 %v7214_v17, %s8989_s23  ;;  %v335_v17 = vld [vmem:[%s9046_s21 + $0x1d2] sm:$0xff] }
  0x4f   : > { %7210 = vrot.lane.b32.xlu0 %v7209_v18, %s8989_s23  ;;  %v336_v18 = vld [vmem:[%s9046_s21 + $0x1e2] sm:$0xff] }
  0x50   : > { %v7319_v20 = vpack.i.bf16 %v336_v18, %v335_v17  ;;  %v376_v17 = vld [vmem:[%s9046_s21 + $0x16b] sm:$0xff]  ;;  %v377_v18 = vld [vmem:[%s9046_s21 + $0x173] sm:$0xff] }
  0x52   : > { %7225 = vrot.lane.b32.xlu1 %v7224_v23, %s8989_s23  ;;  %v341_v23 = vld [vmem:[%s9046_s21 + $0x212] sm:$0xff] }
  0x53   : > { %7220 = vrot.lane.b32.xlu0 %v7219_v24, %s8989_s23  ;;  %v7329_v24 = vpack.i.bf16 %v340_v22, %v339_v21  ;;  %v375_v21 = vld [vmem:[%s9046_s21 + $0x163] sm:$0xff] }
  0x56   : > { %7235 = vrot.lane.b32.xlu1 %v7234_v29, %s8989_s23  ;;  %v7339_v29 = vpack.i.bf16 %v345_v26, %v344_v25  ;;  %v380_v25 = vld [vmem:[%s9046_s21 + $0x193] sm:$0xff]  ;;  %v381_v26 = vld [vmem:[%s9046_s21 + $0x1a3] sm:$0xff] }
  0x57   : > { %7230 = vrot.lane.b32.xlu0 %v7229_v30, %s8989_s23  ;;  %v7334_v30 = vpack.i.bf16 %v343_v28, %v342_v27  ;;  %v378_v28 = vld [vmem:[%s9046_s21 + $0x183] sm:$0xff] }
  0x5a   : > { %7245 = vrot.lane.b32.xlu1 %v7244_v35, %s8989_s23  ;;  %v7349_v35 = vpack.i.bf16 %v349_v32, %v348_v31  ;;  %v7429_v31 = vpack.i.bf16 %v381_v26, %v380_v25  ;;  %v9347_v26 = vld [vmem:[%s9046_s21 + $0xc0] sm:$0xff] }
  0x5b   : > { %7240 = vrot.lane.b32.xlu0 %v7239_v36, %s8989_s23  ;;  %v7344_v36 = vpack.i.bf16 %v347_v34, %v346_v33  ;;  %v384_v33 = vld [vmem:[%s9046_s21 + $0x1c3] sm:$0xff]  ;;  %v385_v34 = vld [vmem:[%s9046_s21 + $0x1cb] sm:$0xff] }
  0x5e   : > { %7255 = vrot.lane.b32.xlu1 %v7254_v41, %s8989_s23  ;;  %v7359_v41 = vpack.i.bf16 %v353_v38, %v352_v37  ;;  %v383_v37 = vld [vmem:[%s9046_s21 + $0x1b3] sm:$0xff] }
  0x5f   : > { %7250 = vrot.lane.b32.xlu0 %v7249_v42, %s8989_s23  ;;  %v7354_v42 = vpack.i.bf16 %v351_v40, %v350_v39  ;;  %v7439_v39 = vpack.i.bf16 %v385_v34, %v384_v33 }
  0x62   : > { %7265 = vrot.lane.b32.xlu1 %v7264_v47, %s8989_s23  ;;  %v7369_v47 = vpack.i.bf16 %v357_v44, %v356_v43  ;;  %v386_v44 = vld [vmem:[%s9046_s21 + $0x1d3] sm:$0xff] }
  0x63   : > { %7260 = vrot.lane.b32.xlu0 %v7259_v48, %s8989_s23  ;;  %v7364_v48 = vpack.i.bf16 %v355_v46, %v354_v45  ;;  %v387_v45 = vld [vmem:[%s9046_s21 + $0x1e3] sm:$0xff] }
  0x66   : > { %7275 = vrot.lane.b32.xlu1 %v7274_v53, %s8989_s23  ;;  %v359_v53 = vld [vmem:[%s9046_s21 + $0xb3] sm:$0xff] }
  0x67   : > { %7270 = vrot.lane.b32.xlu0 %v7269_v54, %s8989_s23  ;;  %v7374_v56 = vpack.i.bf16 %v359_v53, %v358_v52  ;;  %v391_v52 = vld [vmem:[%s9046_s21 + $0x20b] sm:$0xff] }
  0x6a   : > { %7285 = vrot.lane.b32.xlu1 %v7284_v59, %s8989_s23 }
  0x6b   : > { %7280 = vrot.lane.b32.xlu0 %v7279_v60, %s8989_s23  ;;  %v362_v60 = vld [vmem:[%s9046_s21 + $0xd3] sm:$0xff] }
  0x6c   : > { %v7384_v0 = vpack.i.bf16 %v363_v61, %v362_v60  ;;  %v195_v60 = vld [vmem:[%s9046_s21 + $0x40] sm:$0xff] }
  0x6e   : > { %7295 = vrot.lane.b32.xlu1 %v7294_v1, %s8989_s23  ;;  %v368_v1 = vld [vmem:[%s9046_s21 + $0x113] sm:$0xff] }
  0x6f   : > { %7290 = vrot.lane.b32.xlu0 %v7289_v2, %s8989_s23  ;;  %v369_v2 = vld [vmem:[%s9046_s21 + $0x123] sm:$0xff] }
  0x72   : > { %7305 = vrot.lane.b32.xlu1 %v7304_v7, %s8989_s23  ;;  %v7399_v7 = vpack.i.bf16 %v369_v2, %v368_v1  ;;  %v7464_v1 = vpack.i.bf16 %v195_v60, %v194_v58 }
  0x73   : > { %7300 = vrot.lane.b32.xlu0 %v7299_v8, %s8989_s23  ;;  %v7394_v8 = vpack.i.bf16 %v367_v5, %v366_v4  ;;  %v199_v5 = vld [vmem:[%s9046_s21 + $0x68] sm:$0xff] }
  0x76   : > { %7315 = vrot.lane.b32.xlu1 %v7314_v13, %s8989_s23  ;;  %v371_v13 = vld [vmem:[%s9046_s21 + $0x133] sm:$0xff] }
  0x77   : > { %7310 = vrot.lane.b32.xlu0 %v7309_v14, %s8989_s23  ;;  %v7404_v16 = vpack.i.bf16 %v371_v13, %v370_v12  ;;  %v7469_v13 = vpack.i.bf16 %v197_v10, %v196_v9  ;;  %v9425_v9 = vld [vmem:[%s9046_s21 + $0x168] sm:$0xff]  ;;  %v9428_v10 = vld [vmem:[%s9046_s21 + $0x170] sm:$0xff] }
  0x7a   : > { %7325 = vrot.lane.b32.xlu1 %v7324_v19, %s8989_s23 }
  0x7b   : > { %7320 = vrot.lane.b32.xlu0 %v7319_v20, %s8989_s23  ;;  %v374_v20 = vld [vmem:[%s9046_s21 + $0x153] sm:$0xff] }
  0x7e   : > { %1363 = vrot.lane.b32.xlu1 %v341_v23, %s8989_s23  ;;  %v7419_v23 = vpack.i.bf16 %v377_v18, %v376_v17  ;;  %v202_v17 = vld [vmem:[%s9046_s21 + $0x88] sm:$0xff] }
  0x7f   : > { %7330 = vrot.lane.b32.xlu0 %v7329_v24, %s8989_s23  ;;  %v7414_v24 = vpack.i.bf16 %v375_v21, %v374_v20  ;;  %v200_v20 = vld [vmem:[%s9046_s21 + $0x70] sm:$0xff]  ;;  %v201_v21 = vld [vmem:[%s9046_s21 + $0x80] sm:$0xff]  ;;  %s9005_s23 = smov 120  }
  0x82   : > { %7340 = vrot.lane.b32.xlu1 %v7339_v29, %s8990_s24  ;;  %v379_v29 = vld [vmem:[%s9046_s21 + $0x18b] sm:$0xff] }
  0x83   : > { %7335 = vrot.lane.b32.xlu0 %v7334_v30, %s8990_s24  ;;  %v7424_v32 = vpack.i.bf16 %v379_v29, %v378_v28  ;;  %v9350_v28 = vld [vmem:[%s9046_s21 + $0xb0] sm:$0xff] }
  0x84   : > { %v7494_v33 = vpack.i.bf16 %v9347_v26, %v9350_v28 }
  0x86   : > { %7350 = vrot.lane.b32.xlu1 %v7349_v35, %s8990_s24 }
  0x87   : > { %7345 = vrot.lane.b32.xlu0 %v7344_v36, %s8990_s24  ;;  %v382_v36 = vld [vmem:[%s9046_s21 + $0x1ab] sm:$0xff] }
  0x88   : > { %v7434_v40 = vpack.i.bf16 %v383_v37, %v382_v36  ;;  %v9369_v37 = vld [vmem:[%s9046_s21 + $0xe8] sm:$0xff] }
  0x8a   : > { %7360 = vrot.lane.b32.xlu1 %v7359_v41, %s8990_s24  ;;  %v388_v41 = vld [vmem:[%s9046_s21 + $0x1eb] sm:$0xff] }
  0x8b   : > { %7355 = vrot.lane.b32.xlu0 %v7354_v42, %s8990_s24  ;;  %v389_v42 = vld [vmem:[%s9046_s21 + $0x1f3] sm:$0xff] }
  0x8c   : > { %v9227_v51 = vpop.permute.xlu1 %7095 }
  0x8d   : > { %14288 = vst [vmem:[#allocation4_spill] sm:$0xff] %v9227_v51  ;;  %v9231_v54 = vpop.permute.xlu0 %7085  ;;  %v9499_v51 = vld [vmem:[%s9046_s21 + $0x228] sm:$0xff] }
  0x8e   : > { %14289 = vst [vmem:[#allocation5_spill] sm:$0xff] %v9231_v54  ;;  %7370 = vrot.lane.b32.xlu1 %v7369_v47, %s8990_s24  ;;  %v7449_v47 = vpack.i.bf16 %v389_v42, %v388_v41  ;;  %v9377_v41 = vld [vmem:[%s9046_s21 + $0xc8] sm:$0xff]  ;;  %v9380_v42 = vld [vmem:[%s9046_s21 + $0xd0] sm:$0xff]  ;;  %v9496_v54 = vld [vmem:[%s9046_s21 + $0x220] sm:$0xff] }
  0x8f   : > { %7365 = vrot.lane.b32.xlu0 %v7364_v48, %s8990_s24  ;;  %v7444_v48 = vpack.i.bf16 %v387_v45, %v386_v44  ;;  %v7499_v45 = vpack.i.bf16 %v9380_v42, %v9377_v41 }
  0x90   : > { %v9237_v59 = vpop.permute.xlu1 %7100 }
  0x91   : > { %14290 = vst [vmem:[#allocation6_spill] sm:$0xff] %v9237_v59  ;;  %v9241_v62 = vpop.permute.xlu0 %7090 }
  0x92   : > { %14291 = vst [vmem:[#allocation7_spill] sm:$0xff] %v9241_v62  ;;  %7380 = vrot.lane.b32.xlu1 %v7379_v55, %s8990_s24  ;;  %v392_v55 = vld [vmem:[%s9046_s21 + $0x213] sm:$0xff] }
  0x93   : > { %7375 = vrot.lane.b32.xlu0 %v7374_v56, %s8990_s24  ;;  %v7454_v56 = vpack.i.bf16 %v391_v52, %v390_v50  ;;  %v9392_v50 = vld [vmem:[%s9046_s21 + $0x108] sm:$0xff] }
  0x94   : > { %v9247_v3 = vpop.permute.xlu1 %7110 }
  0x95   : > { %14292 = vst [vmem:[#allocation8_spill] sm:$0xff] %v9247_v3  ;;  %v9251_v6 = vpop.permute.xlu0 %7105 }
  0x96   : > { %14293 = vst [vmem:[#allocation9_spill] sm:$0xff] %v9251_v6  ;;  %7390 = vrot.lane.b32.xlu1 %v7389_v63, %s8990_s24  ;;  %v193_v63 = vld [vmem:[%s9046_s21 + $0x28] sm:$0xff] }
  0x97   : > { %7385 = vrot.lane.b32.xlu0 %v7384_v0, %s8990_s24  ;;  %v192_v0 = vld [vmem:[%s9046_s21 + $0x20] sm:$0xff] }
  0x98   : > { %v9257_v11 = vpop.permute.xlu1 %7120  ;;  %v7459_v2 = vpack.i.bf16 %v193_v63, %v192_v0  ;;  %v9408_v63 = vld [vmem:[%s9046_s21 + $0x120] sm:$0xff] }
  0x99   : > { %14294 = vst [vmem:[#allocation10_spill] sm:$0xff] %v9257_v11  ;;  %v9261_v14 = vpop.permute.xlu0 %7115  ;;  %v9411_v0 = vld [vmem:[%s9046_s21 + $0x140] sm:$0xff] }
  0x9a   : > { %14295 = vst [vmem:[#allocation11_spill] sm:$0xff] %v9261_v14  ;;  %7400 = vrot.lane.b32.xlu1 %v7399_v7, %s8990_s24  ;;  %v198_v7 = vld [vmem:[%s9046_s21 + $0x60] sm:$0xff] }
  0x9b   : > { %7395 = vrot.lane.b32.xlu0 %v7394_v8, %s8990_s24  ;;  %v7474_v12 = vpack.i.bf16 %v199_v5, %v198_v7  ;;  %v9422_v7 = vld [vmem:[%s9046_s21 + $0x148] sm:$0xff] }
  0x9c   : > { %v9267_v19 = vpop.permute.xlu1 %7130 }
  0x9d   : > { %v9271_v22 = vpop.permute.xlu0 %7125  ;;  %v7133_v14 = vunpack.i.h.bf16 %v9267_v19 }
  0x9e   : > { %7410 = vrot.lane.b32.xlu1 %v7409_v15, %s8990_s24 }
  0x9f   : > { %7405 = vrot.lane.b32.xlu0 %v7404_v16, %s8990_s24  ;;  %v203_v16 = vld [vmem:[%s9046_s21 + $0x90] sm:$0xff] }
  0xa0   : > { %v9277_v27 = vpop.permute.xlu1 %7140 }
  0xa1   : > { %v9281_v30 = vpop.permute.xlu0 %7135 }
  0xa2   : > { %7420 = vrot.lane.b32.xlu1 %v7419_v23, %s8990_s24  ;;  %v7484_v23 = vpack.i.bf16 %v203_v16, %v202_v17  ;;  %v7123_v17 = vunpack.i.h.bf16 %v9257_v11  ;;  %v9486_v11 = vld [vmem:[%s9046_s21 + $0x1e0] sm:$0xff] }
  0xa3   : > { %7415 = vrot.lane.b32.xlu0 %v7414_v24, %s8990_s24  ;;  %v7479_v24 = vpack.i.bf16 %v201_v21, %v200_v20  ;;  %v9440_v20 = vld [vmem:[%s9046_s21 + $0x190] sm:$0xff]  ;;  %v9443_v21 = vld [vmem:[%s9046_s21 + $0x180] sm:$0xff] }
  0xa4   : > { %v9287_v35 = vpop.permute.xlu1 %7150  ;;  %14309 = vst [vmem:[#allocation25_spill] sm:$0xff] %v9440_v20 }
  0xa5   : > { %14296 = vst [vmem:[#allocation12_spill] sm:$0xff] %v9287_v35  ;;  %v9291_v38 = vpop.permute.xlu0 %7145 }
  0xa6   : > { %7430 = vrot.lane.b32.xlu1 %v7429_v31, %s8990_s24  ;;  %v9355_v31 = vld [vmem:[%s9046_s21 + $0xa0] sm:$0xff] }
  0xa7   : > { %7425 = vrot.lane.b32.xlu0 %v7424_v32, %s8990_s24  ;;  %v9358_v32 = vld [vmem:[%s9046_s21 + $0xa8] sm:$0xff] }
  0xa8   : > { %v9297_v43 = vpop.permute.xlu1 %7160  ;;  %v7489_v34 = vpack.i.bf16 %v9358_v32, %v9355_v31 }
  0xa9   : > { %v9301_v46 = vpop.permute.xlu0 %7155 }
  0xaa   : > { %7440 = vrot.lane.b32.xlu1 %v7439_v39, %s8990_s24  ;;  %v9372_v39 = vld [vmem:[%s9046_s21 + $0xe0] sm:$0xff] }
  0xab   : > { %7435 = vrot.lane.b32.xlu0 %v7434_v40, %s8990_s24  ;;  %v7504_v44 = vpack.i.bf16 %v9369_v37, %v9372_v39 }
  0xac   : > { %v9305_v49 = vpop.permute.xlu1 %7170 }
  0xad   : > { %v9309_v53 = vpop.permute.xlu0 %7165 }
  0xae   : > { %7450 = vrot.lane.b32.xlu1 %v7449_v47, %s8990_s24 }
  0xaf   : > { %7445 = vrot.lane.b32.xlu0 %v7444_v48, %s8990_s24  ;;  %v215_v48 = vld [vmem:[%s9046_s21 + $0x110] sm:$0xff] }
  0xb0   : > { %v9314_v57 = vpop.permute.xlu1 %7180  ;;  %v7514_v58 = vpack.i.bf16 %v215_v48, %v9392_v50 }
  0xb1   : > { %v9318_v61 = vpop.permute.xlu0 %7175 }
  0xb2   : > { %1567 = vrot.lane.b32.xlu1 %v392_v55, %s8990_s24  ;;  %v9397_v55 = vld [vmem:[%s9046_s21 + $0xf0] sm:$0xff] }
  0xb3   : > { %7455 = vrot.lane.b32.xlu0 %v7454_v56, %s8990_s24  ;;  %v9400_v56 = vld [vmem:[%s9046_s21 + $0x100] sm:$0xff] }
  0xb4   : > { %v9324_v4 = vpop.permute.xlu1 %7190  ;;  %v7509_v60 = vpack.i.bf16 %v9400_v56, %v9397_v55 }
  0xb5   : > { %14297 = vst [vmem:[#allocation13_spill] sm:$0xff] %v9324_v4  ;;  %v9328_v8 = vpop.permute.xlu0 %7185 }
  0xb6   : > { %14298 = vst [vmem:[#allocation14_spill] sm:$0xff] %v9328_v8  ;;  %7465 = vrot.lane.b32.xlu1 %v7464_v1, %s8991_s25  ;;  %v9414_v1 = vld [vmem:[%s9046_s21 + $0x128] sm:$0xff]  ;;  %v7173_v8 = vunpack.i.h.bf16 %v9305_v49 }
  0xb7   : > { %7460 = vrot.lane.b32.xlu0 %v7459_v2, %s8991_s25  ;;  %v9417_v2 = vld [vmem:[%s9046_s21 + $0x130] sm:$0xff]  ;;  %v7519_v48 = vpack.i.bf16 %v9414_v1, %v9408_v63 }
  0xb8   : > { %v9334_v15 = vpop.permute.xlu1 %7200 }
  0xb9   : > { %14299 = vst [vmem:[#allocation15_spill] sm:$0xff] %v9334_v15  ;;  %v9338_v18 = vpop.permute.xlu0 %7195  ;;  %v7137_v15 = vunpack.i.l.bf16 %v9281_v30 }
  0xba   : > { %14300 = vst [vmem:[#allocation16_spill] sm:$0xff] %v9338_v18  ;;  %7475 = vrot.lane.b32.xlu1 %v7474_v12, %s8991_s25  ;;  %v9431_v12 = vld [vmem:[%s9046_s21 + $0x150] sm:$0xff]  ;;  %v7127_v18 = vunpack.i.l.bf16 %v9271_v22 }
  0xbb   : > { %7470 = vrot.lane.b32.xlu0 %v7469_v13, %s8991_s25  ;;  %v9434_v13 = vld [vmem:[%s9046_s21 + $0x160] sm:$0xff] }
  0xbc   : > { %v9344_v25 = vpop.permute.xlu1 %1159 }
  0xbd   : > { %14301 = vst [vmem:[#allocation17_spill] sm:$0xff] %v9344_v25  ;;  %v9352_v29 = vpop.permute.xlu0 %7205  ;;  %v9507_v25 = vld [vmem:[%s9046_s21 + $0x208] sm:$0xff] }
  0xbe   : > { %14302 = vst [vmem:[#allocation18_spill] sm:$0xff] %v9352_v29  ;;  %7485 = vrot.lane.b32.xlu1 %v7484_v23, %s8991_s25  ;;  %v9446_v23 = vld [vmem:[%s9046_s21 + $0x188] sm:$0xff]  ;;  %v7128_v29 = vunpack.i.h.bf16 %v9271_v22 }
  0xbf   : > { %7480 = vrot.lane.b32.xlu0 %v7479_v24, %s8991_s25  ;;  %14310 = vst [vmem:[#allocation26_spill] sm:$0xff] %v9446_v23  ;;  %v7524_v24 = vpack.i.bf16 %v9411_v0, %v9417_v2  ;;  %v7544_v62 = vpack.i.bf16 %v9440_v20, %v9446_v23  ;;  %v9541_v23 = vld [vmem:[%s9046_s21 + $0x31] sm:$0xff] }
  0xc0   : > { %v9366_v36 = vpop.permute.xlu1 %7215 }
  0xc1   : > { %14303 = vst [vmem:[#allocation19_spill] sm:$0xff] %v9366_v36  ;;  %v9374_v40 = vpop.permute.xlu0 %7210  ;;  %v9504_v36 = vld [vmem:[%s9046_s21 + $0x210] sm:$0xff] }
  0xc2   : > { %14304 = vst [vmem:[#allocation20_spill] sm:$0xff] %v9374_v40  ;;  %7495 = vrot.lane.b32.xlu1 %v7494_v33, %s8991_s25  ;;  %v9452_v33 = vld [vmem:[%s9046_s21 + $0x1a0] sm:$0xff]  ;;  %v7529_v40 = vpack.i.bf16 %v9431_v12, %v9422_v7 }
  0xc3   : > { %7490 = vrot.lane.b32.xlu0 %v7489_v34, %s8991_s25  ;;  %v9455_v34 = vld [vmem:[%s9046_s21 + $0x1c0] sm:$0xff] }
  0xc4   : > { %v9388_v47 = vpop.permute.xlu1 %7225 }
  0xc5   : > { %14305 = vst [vmem:[#allocation21_spill] sm:$0xff] %v9388_v47  ;;  %v9394_v52 = vpop.permute.xlu0 %7220 }
  0xc6   : > { %14306 = vst [vmem:[#allocation22_spill] sm:$0xff] %v9394_v52  ;;  %7505 = vrot.lane.b32.xlu1 %v7504_v44, %s8991_s25  ;;  %v9458_v44 = vld [vmem:[%s9046_s21 + $0x1c8] sm:$0xff]  ;;  %v9474_v52 = vld [vmem:[%s9046_s21 + $0x1d0] sm:$0xff] }
  0xc7   : > { %7500 = vrot.lane.b32.xlu0 %v7499_v45, %s8991_s25  ;;  %v9461_v45 = vld [vmem:[%s9046_s21 + $0x1a8] sm:$0xff] }
  0xc8   : > { %v9419_v5 = vpop.permute.xlu1 %7235 }
  0xc9   : > { %14307 = vst [vmem:[#allocation23_spill] sm:$0xff] %v9419_v5  ;;  %v9436_v16 = vpop.permute.xlu0 %7230  ;;  %v9471_v5 = vld [vmem:[%s9046_s21 + $0x1e8] sm:$0xff] }
  0xca   : > { %14308 = vst [vmem:[#allocation24_spill] sm:$0xff] %v9436_v16  ;;  %7515 = vrot.lane.b32.xlu1 %v7514_v58, %s8991_s25  ;;  %v7132_v58 = vunpack.i.l.bf16 %v9267_v19  ;;  %v9468_v16 = vld [vmem:[%s9046_s21 + $0x1b0] sm:$0xff]  ;;  %v4084_v19 = vsel %vm4068_vm0, %v9355_v31, %v7123_v17  ;;  %v9522_v17 = vld [vmem:[%s9046_s21 + $0x200] sm:$0xff] }
  0xcb   : > { %7510 = vrot.lane.b32.xlu0 %v7509_v60, %s8991_s25  ;;  %v7534_v60 = vpack.i.bf16 %v9425_v9, %v9434_v13  ;;  %v9519_v31 = vld [vmem:[%s9046_s21 + $0x1f0] sm:$0xff] }
  0xcc   : > { %v9476_v47 = vpop.permute.xlu1 %7245  ;;  %v4087_v59 = vsel %vm4068_vm0, %v9347_v26, %v7132_v58  ;;  %v9544_v26 = vld [vmem:[%s9046_s21 + $0x41] sm:$0xff]  ;;  %v7138_v58 = vunpack.i.h.bf16 %v9281_v30 }
  0xcd   : > { %14311 = vst [vmem:[#allocation27_spill] sm:$0xff] %v9476_v47  ;;  %v7248_v6 = vunpack.i.h.bf16 %v9476_v47  ;;  %v9489_v3 = vpop.permute.xlu0 %7240 }
  0xce   : > { %14312 = vst [vmem:[#allocation28_spill] sm:$0xff] %v9489_v3  ;;  %7525 = vrot.lane.b32.xlu1 %v7524_v24, %s8991_s25  ;;  %v7142_v3 = vunpack.i.l.bf16 %v9277_v27 }
  0xcf   : > { %v9525_v24 = vsel %vm4120_vm1, %v4084_v19, %v7248_v6  ;;  %7520 = vrot.lane.b32.xlu0 %v7519_v48, %s8991_s25  ;;  %v4088_v6 = vsel %vm4068_vm0, %v9377_v41, %v7133_v14  ;;  %v7143_v48 = vunpack.i.h.bf16 %v9277_v27  ;;  %v4085_v14 = vsel %vm4068_vm0, %v9358_v32, %v7127_v18 }
  0xd0   : > { %14313 = vst [vmem:[#allocation29_spill] sm:$0xff] %v9525_v24  ;;  %v7256_v22 = vpop.permute.xlu1 %7255  ;;  %v4086_v27 = vsel %vm4068_vm0, %v9350_v28, %v7128_v29  ;;  %v4091_v30 = vsel %vm4068_vm0, %v9369_v37, %v7142_v3  ;;  %v9571_v29 = vld [vmem:[%s9046_s21 + $0x21] sm:$0xff]  ;;  %v9577_v37 = vld [vmem:[%s9046_s21 + $0x29] sm:$0xff] }
  0xd1   : > { %v7258_v19 = vunpack.i.h.bf16 %v7256_v22  ;;  %v7257_v24 = vunpack.i.l.bf16 %v7256_v22  ;;  %v7251_v47 = vpop.permute.xlu0 %7250  ;;  %v4092_v32 = vsel %vm4068_vm0, %v9397_v55, %v7143_v48 }
  0xd2   : > { %v7253_v20 = vunpack.i.h.bf16 %v7251_v47  ;;  %v7252_v4 = vunpack.i.l.bf16 %v7251_v47  ;;  %7535 = vrot.lane.b32.xlu1 %v7534_v60, %s8991_s25 }
  0xd3   : > { %v9554_v41 = vsel %vm4120_vm1, %v4087_v59, %v7257_v24  ;;  %v9557_v22 = vsel %vm4120_vm1, %v4088_v6, %v7258_v19  ;;  %7530 = vrot.lane.b32.xlu0 %v7529_v40, %s8991_s25  ;;  %v7153_v40 = vunpack.i.h.bf16 %v9287_v35  ;;  %v4089_v6 = vsel %vm4068_vm0, %v9380_v42, %v7137_v15 }
  0xd4   : > { %v9563_v47 = vsel %vm4120_vm1, %v4085_v14, %v7252_v4  ;;  %v9566_v18 = vsel %vm4120_vm1, %v4086_v27, %v7253_v20  ;;  %v7266_v28 = vpop.permute.xlu1 %7265  ;;  %v9580_v4 = vld [vmem:[%s9046_s21 + $0x61] sm:$0xff]  ;;  %v9583_v20 = vld [vmem:[%s9046_s21 + $0x69] sm:$0xff]  ;;  %v4090_v19 = vsel %vm4068_vm0, %v9372_v39, %v7138_v58  ;;  %v7148_v14 = vunpack.i.h.bf16 %v9291_v38 }
  0xd5   : > { %v7268_v60 = vunpack.i.h.bf16 %v7266_v28  ;;  %v7267_v24 = vunpack.i.l.bf16 %v7266_v28  ;;  %v7261_v3 = vpop.permute.xlu0 %7260  ;;  %v7147_v27 = vunpack.i.l.bf16 %v9291_v38  ;;  %v14314_v15 = vpack.i.bf16 %v9443_v21, %v9428_v10 }
  0xd6   : > { %v7263_v55 = vunpack.i.h.bf16 %v7261_v3  ;;  %v7262_v48 = vunpack.i.l.bf16 %v7261_v3  ;;  %7545 = vrot.lane.b32.xlu1 %v7544_v62, %s8991_s25  ;;  %v7162_v3 = vunpack.i.l.bf16 %v9297_v43  ;;  %v14316_v38 = vpack.i.bf16 %v9455_v34, %v9468_v16 }
  0xd7   : > { %v9593_v28 = vsel %vm4120_vm1, %v4091_v30, %v7267_v24  ;;  %v9596_v59 = vsel %vm4120_vm1, %v4092_v32, %v7268_v60  ;;  %7540 = vrot.lane.b32.xlu0 %v14314_v15, %s8991_s25  ;;  %v9615_v30 = vld [vmem:[%s9046_s21 + $0x49] sm:$0xff]  ;;  %v9618_v32 = vld [vmem:[%s9046_s21 + $0x51] sm:$0xff]  ;;  %v4096_v60 = vsel %vm4068_vm0, %v9408_v63, %v7153_v40  ;;  %v7163_v24 = vunpack.i.h.bf16 %v9297_v43 }
  0xd8   : > { %v9603_v39 = vsel %vm4120_vm1, %v4089_v6, %v7262_v48  ;;  %v9606_v62 = vsel %vm4120_vm1, %v4090_v19, %v7263_v55  ;;  %v9608_v42 = vpop.permute.xlu1 %7275  ;;  %v7158_v55 = vunpack.i.h.bf16 %v9301_v46  ;;  %v7157_v48 = vunpack.i.l.bf16 %v9301_v46 }
  0xd9   : > { %14315 = vst [vmem:[#allocation30_spill] sm:$0xff] %v9608_v42  ;;  %v7278_v6 = vunpack.i.h.bf16 %v9608_v42  ;;  %v7271_v19 = vpop.permute.xlu0 %7270  ;;  %v4093_v63 = vsel %vm4068_vm0, %v9400_v56, %v7147_v27  ;;  %v4094_v43 = vsel %vm4068_vm0, %v9392_v50, %v7148_v14  ;;  %v14317_v46 = vpack.i.bf16 %v9461_v45, %v9452_v33 }
  0xda   : > { %v7273_v15 = vunpack.i.h.bf16 %v7271_v19  ;;  %v7272_v58 = vunpack.i.l.bf16 %v7271_v19  ;;  %7555 = vrot.lane.b32.xlu1 %v14316_v38, %s8991_s25  ;;  %v7172_v38 = vunpack.i.l.bf16 %v9305_v49  ;;  %v4099_v27 = vsel %vm4068_vm0, %v9411_v0, %v7162_v3 }
  0xdb   : > { %v9636_v40 = vsel %vm4120_vm1, %v4096_v60, %v7278_v6  ;;  %7550 = vrot.lane.b32.xlu0 %v14317_v46, %s8991_s25  ;;  %v4100_v60 = vsel %vm4068_vm0, %v9422_v7, %v7163_v24  ;;  %v4097_v42 = vsel %vm4068_vm0, %v9414_v1, %v7157_v48  ;;  %v4098_v49 = vsel %vm4068_vm0, %v9417_v2, %v7158_v55 }
  0xdc   : > { %v9647_v56 = vsel %vm4120_vm1, %v4093_v63, %v7272_v58  ;;  %v9650_v50 = vsel %vm4120_vm1, %v4094_v43, %v7273_v15  ;;  %v7286_v14 = vpop.permute.xlu1 %7285  ;;  %v14318_v15 = vpack.i.bf16 %v9471_v5, %v9486_v11  ;;  %v7168_v0 = vunpack.i.h.bf16 %v9309_v53 }
  0xdd   : > { %v7288_v6 = vunpack.i.h.bf16 %v7286_v14  ;;  %v7287_v46 = vunpack.i.l.bf16 %v7286_v14  ;;  %v7281_v19 = vpop.permute.xlu0 %7280  ;;  %v7167_v7 = vunpack.i.l.bf16 %v9309_v53  ;;  %v14319_v1 = vpack.i.bf16 %v9474_v52, %v9458_v44 }
  0xde   : > { %v7283_v58 = vunpack.i.h.bf16 %v7281_v19  ;;  %v7282_v63 = vunpack.i.l.bf16 %v7281_v19  ;;  %7565 = vrot.lane.b32.xlu1 %v14318_v15, %s8991_s25  ;;  %v4103_v2 = vsel %vm4068_vm0, %v9425_v9, %v7172_v38  ;;  %v4104_v55 = vsel %vm4068_vm0, %v9428_v10, %v7173_v8  ;;  %v14322_v15 = vld [vmem:[#allocation13_spill] sm:$0xff] }
  0xdf   : > { %v9667_v24 = vsel %vm4120_vm1, %v4099_v27, %v7287_v46  ;;  %v9670_v3 = vsel %vm4120_vm1, %v4100_v60, %v7288_v6  ;;  %7560 = vrot.lane.b32.xlu0 %v14319_v1, %s8991_s25  ;;  %v7183_v19 = vunpack.i.h.bf16 %v9314_v57  ;;  %v7182_v14 = vunpack.i.l.bf16 %v9314_v57 }
  0xe0   : > { %v9681_v48 = vsel %vm4120_vm1, %v4097_v42, %v7282_v63  ;;  %v9684_v53 = vsel %vm4120_vm1, %v4098_v49, %v7283_v58  ;;  %v7296_v43 = vpop.permute.xlu1 %7295  ;;  %v7178_v9 = vunpack.i.h.bf16 %v9318_v61  ;;  %v7177_v38 = vunpack.i.l.bf16 %v9318_v61  ;;  %v6096_v63 = vld [vmem:[%s9046_s21 + $0x230] sm:$0xff] }
  0xe1   : > { %v7298_v27 = vunpack.i.h.bf16 %v7296_v43  ;;  %v7297_v60 = vunpack.i.l.bf16 %v7296_v43  ;;  %v7291_v6 = vpop.permute.xlu0 %7290  ;;  %v14320_v42 = vpack.i.bf16 %v9504_v36, %v9507_v25  ;;  %v4101_v46 = vsel %vm4068_vm0, %v9431_v12, %v7167_v7  ;;  %v14323_v7 = vld [vmem:[#allocation25_spill] sm:$0xff] }
  0xe2   : > { %v7293_v8 = vunpack.i.h.bf16 %v7291_v6  ;;  %v7292_v10 = vunpack.i.l.bf16 %v7291_v6  ;;  %v4102_v57 = vsel %vm4068_vm0, %v9434_v13, %v7168_v0  ;;  %v14321_v61 = vpack.i.bf16 %v9522_v17, %v9519_v31 }
  0xe3   : > { %7575 = vrot.lane.b32.xlu1 %v14320_v42, %s8991_s25  ;;  %v9699_v49 = vsel %vm4120_vm1, %v4103_v2, %v7297_v60  ;;  %v9702_v58 = vsel %vm4120_vm1, %v4104_v55, %v7298_v27  ;;  %v7193_v1 = vunpack.i.h.bf16 %v14322_v15  ;;  %v7192_v43 = vunpack.i.l.bf16 %v14322_v15 }
  0xe4   : > { %7570 = vrot.lane.b32.xlu0 %v14321_v61, %s8991_s25  ;;  %v9712_v12 = vsel %vm4120_vm1, %v4101_v46, %v7292_v10  ;;  %v9715_v13 = vsel %vm4120_vm1, %v4102_v57, %v7293_v8  ;;  %v7306_v0 = vpop.permute.xlu1 %7305  ;;  %v4107_v2 = vsel %vm4068_vm0, %v14323_v7, %v7182_v14  ;;  %v4108_v55 = vsel %vm4068_vm0, %v9452_v33, %v7183_v19  ;;  %v14324_v61 = vld [vmem:[#allocation26_spill] sm:$0xff] }
  0xe5   : > { %v7308_v27 = vunpack.i.h.bf16 %v7306_v0  ;;  %v7307_v60 = vunpack.i.l.bf16 %v7306_v0  ;;  %v7301_v6 = vpop.permute.xlu0 %7300  ;;  %v4105_v42 = vsel %vm4068_vm0, %v9443_v21, %v7177_v38  ;;  %v4106_v10 = vsel %vm4068_vm0, %v14324_v61, %v7178_v9  ;;  %v14325_v57 = vld [vmem:[#allocation14_spill] sm:$0xff] }
  0xe6   : > { %v7303_v46 = vunpack.i.h.bf16 %v7301_v6  ;;  %v7302_v8 = vunpack.i.l.bf16 %v7301_v6  ;;  %v7188_v15 = vunpack.i.h.bf16 %v14325_v57  ;;  %v7187_v14 = vunpack.i.l.bf16 %v14325_v57  ;;  %v6108_v61 = vld [vmem:[%s9046_s21 + $0x91] sm:$0xff]  ;;  %v14328_v57 = vld [vmem:[#allocation16_spill] sm:$0xff] }
  0xe7   : > { %1771 = vrot.lane.b32.xlu1 %v6096_v63, %s8991_s25  ;;  %v9729_v33 = vsel %vm4120_vm1, %v4107_v2, %v7307_v60  ;;  %v9732_v19 = vsel %vm4120_vm1, %v4108_v55, %v7308_v27  ;;  %v14326_v21 = vpack.i.bf16 %v9499_v51, %v9496_v54  ;;  %v4111_v9 = vsel %vm4068_vm0, %v9455_v34, %v7192_v43  ;;  %v6107_v2 = vld [vmem:[%s9046_s21 + $0x89] sm:$0xff]  ;;  %v14327_v55 = vld [vmem:[#allocation15_spill] sm:$0xff]  ;;  %v6105_v34 = vld [vmem:[%s9046_s21 + $0x71] sm:$0xff] }
  0xe8   : > { %v4112_v38 = vsel %vm4068_vm0, %v9458_v44, %v7193_v1  ;;  %v9743_v63 = vsel %vm4120_vm1, %v4105_v42, %v7302_v8  ;;  %v9746_v0 = vsel %vm4120_vm1, %v4106_v10, %v7303_v46  ;;  %v7316_v7 = vpop.permute.xlu1 %7315  ;;  %v7203_v27 = vunpack.i.h.bf16 %v14327_v55  ;;  %v6106_v43 = vld [vmem:[%s9046_s21 + $0x81] sm:$0xff] }
  0xe9   : > { %7580 = vrot.lane.b32.xlu0 %v14326_v21, %s8991_s25  ;;  %v7202_v60 = vunpack.i.l.bf16 %v14327_v55  ;;  %v7318_v51 = vunpack.i.h.bf16 %v7316_v7  ;;  %v7317_v54 = vunpack.i.l.bf16 %v7316_v7  ;;  %v7311_v6 = vpop.permute.xlu0 %7310  ;;  %v7198_v44 = vunpack.i.h.bf16 %v14328_v57 }
  0xea   : > { %v7197_v1 = vunpack.i.l.bf16 %v14328_v57  ;;  %v7313_v42 = vunpack.i.h.bf16 %v7311_v6  ;;  %v7312_v8 = vunpack.i.l.bf16 %v7311_v6  ;;  %v14329_v10 = vpack.i.bf16 %v9544_v26, %v9541_v23  ;;  %v6112_v57 = vld [vmem:[%s9046_s21 + $0xc1] sm:$0xff] }
  0xeb   : > { %v4109_v46 = vsel %vm4068_vm0, %v9461_v45, %v7187_v14  ;;  %v4110_v21 = vsel %vm4068_vm0, %v9468_v16, %v7188_v15  ;;  %v9765_v7 = vsel %vm4120_vm1, %v4111_v9, %v7317_v54  ;;  %v9768_v55 = vsel %vm4120_vm1, %v4112_v38, %v7318_v51 }
  0xec   : > { %7590 = vrot.lane.b32.xlu1 %v14329_v10, %s8992_s26  ;;  %v14330_v6 = vpack.i.bf16 %v9577_v37, %v9571_v29  ;;  %v9775_v23 = vsel %vm4120_vm1, %v4109_v46, %v7312_v8  ;;  %v9778_v26 = vsel %vm4120_vm1, %v4110_v21, %v7313_v42  ;;  %v7326_v45 = vpop.permute.xlu1 %7325  ;;  %v7609_v14 = vpack.i.bf16 %v6108_v61, %v6107_v2  ;;  %v6109_v8 = vld [vmem:[%s9046_s21 + $0xa1] sm:$0xff]  ;;  %v6110_v10 = vld [vmem:[%s9046_s21 + $0xa9] sm:$0xff] }
  0xed   : > { %v7604_v16 = vpack.i.bf16 %v6106_v43, %v6105_v34  ;;  %v4115_v15 = vsel %vm4068_vm0, %v9471_v5, %v7202_v60  ;;  %v4116_v9 = vsel %vm4068_vm0, %v9519_v31, %v7203_v27  ;;  %v7328_v38 = vunpack.i.h.bf16 %v7326_v45  ;;  %v7321_v37 = vpop.permute.xlu0 %7320  ;;  %v14332_v60 = vld [vmem:[#allocation18_spill] sm:$0xff] }
  0xee   : > { %7585 = vrot.lane.b32.xlu0 %v14330_v6, %s8992_s26  ;;  %v7327_v29 = vunpack.i.l.bf16 %v7326_v45  ;;  %v4113_v51 = vsel %vm4068_vm0, %v9474_v52, %v7197_v1  ;;  %v4114_v54 = vsel %vm4068_vm0, %v9486_v11, %v7198_v44  ;;  %v7323_v2 = vunpack.i.h.bf16 %v7321_v37  ;;  %v6111_v43 = vld [vmem:[%s9046_s21 + $0xb1] sm:$0xff] }
  0xef   : > { %v7322_v61 = vunpack.i.l.bf16 %v7321_v37  ;;  %v14331_v5 = vpack.i.bf16 %v9583_v20, %v9580_v4  ;;  %v7208_v31 = vunpack.i.h.bf16 %v14332_v60  ;;  %v7207_v27 = vunpack.i.l.bf16 %v14332_v60  ;;  %v14334_v44 = vld [vmem:[#allocation17_spill] sm:$0xff] }
  0xf0   : > { %v9795_v34 = vsel %vm4120_vm1, %v4115_v15, %v7327_v29  ;;  %v9798_v52 = vsel %vm4120_vm1, %v4116_v9, %v7328_v38  ;;  %v14333_v11 = vpack.i.bf16 %v9618_v32, %v9615_v30  ;;  %v4119_v4 = vsel %vm4068_vm0, %v9504_v36, %v14334_v44  ;;  %v1364_v42 = vpop.permute.xlu1 %1363  ;;  %v6115_v9 = vld [vmem:[%s9046_s21 + $0xe1] sm:$0xff]  ;;  %v6116_v38 = vld [vmem:[%s9046_s21 + $0xe9] sm:$0xff]  ;;  %v6117_v60 = vld [vmem:[%s9046_s21 + $0xf1] sm:$0xff] }
  0xf1   : > { %7600 = vrot.lane.b32.xlu1 %v14331_v5, %s8992_s26  ;;  %v9810_v20 = vsel %vm4120_vm1, %v4113_v51, %v7322_v61  ;;  %v9813_v1 = vsel %vm4120_vm1, %v4114_v54, %v7323_v2  ;;  %v9818_v30 = vsel %vm4120_vm1, %v4119_v4, %v1364_v42  ;;  %v7331_v32 = vpop.permute.xlu0 %7330  ;;  %v7619_v36 = vpack.i.bf16 %v6112_v57, %v6111_v43  ;;  %v6114_v51 = vld [vmem:[%s9046_s21 + $0xd1] sm:$0xff]  ;;  %v6119_v2 = vld [vmem:[%s9046_s21 + $0x109] sm:$0xff]  ;;  %v6124_v44 = vld [vmem:[%s9046_s21 + $0x141] sm:$0xff] }
  0xf2   : > { %7595 = vrot.lane.b32.xlu0 %v14333_v11, %s8992_s26  ;;  %v7333_v46 = vunpack.i.h.bf16 %v7331_v32  ;;  %v7332_v21 = vunpack.i.l.bf16 %v7331_v32  ;;  %v4117_v6 = vsel %vm4068_vm0, %v9522_v17, %v7207_v27  ;;  %v4118_v45 = vsel %vm4068_vm0, %v9507_v25, %v7208_v31  ;;  %v6113_v17 = vld [vmem:[%s9046_s21 + $0xc9] sm:$0xff]  ;;  %v6120_v61 = vld [vmem:[%s9046_s21 + $0x111] sm:$0xff]  ;;  %v6118_v31 = vld [vmem:[%s9046_s21 + $0x101] sm:$0xff] }
  0xf3   : > { %v7614_v15 = vpack.i.bf16 %v6110_v10, %v6109_v8  ;;  %v7624_v54 = vpack.i.bf16 %v6114_v51, %v6113_v17  ;;  %v7639_v11 = vpack.i.bf16 %v6120_v61, %v6119_v2  ;;  %v7634_v43 = vpack.i.bf16 %v6118_v31, %v6117_v60  ;;  %v6123_v57 = vld [vmem:[%s9046_s21 + $0x131] sm:$0xff]  ;;  %v6121_v42 = vld [vmem:[%s9046_s21 + $0x121] sm:$0xff]  ;;  %v6122_v8 = vld [vmem:[%s9046_s21 + $0x129] sm:$0xff] }
  0xf4   : > { %v9829_v29 = vsel %vm4120_vm1, %v4117_v6, %v7332_v21  ;;  %v9834_v37 = vpop.permute.xlu1 %7340  ;;  %v7649_v32 = vpack.i.bf16 %v6124_v44, %v6123_v57  ;;  %v6127_v21 = vld [vmem:[%s9046_s21 + $0x161] sm:$0xff]  ;;  %v14343_v51 = vld [vmem:[#allocation29_spill] sm:$0xff] }
  0xf5   : > { %7610 = vrot.lane.b32.xlu1 %v7609_v14, %s8992_s26  ;;  %v9832_v14 = vsel %vm4120_vm1, %v4118_v45, %v7333_v46  ;;  %14335 = vst [vmem:[#allocation13_spill] sm:$0xff] %v9834_v37  ;;  %v9838_v25 = vpop.permute.xlu0 %7335  ;;  %v7644_v46 = vpack.i.bf16 %v6122_v8, %v6121_v42  ;;  %v6125_v45 = vld [vmem:[%s9046_s21 + $0x149] sm:$0xff]  ;;  %v6132_v61 = vld [vmem:[%s9046_s21 + $0x191] sm:$0xff]  ;;  %v14243_v37 = vmov 0.0|0.0  }
  0xf6   : > { %7605 = vrot.lane.b32.xlu0 %v7604_v16, %s8992_s26  ;;  %14336 = vst [vmem:[#allocation25_spill] sm:$0xff] %v9838_v25  ;;  %v7629_v16 = vpack.i.bf16 %v6116_v38, %v6115_v9  ;;  %v6131_v2 = vld [vmem:[%s9046_s21 + $0x189] sm:$0xff]  ;;  %v6129_v31 = vld [vmem:[%s9046_s21 + $0x171] sm:$0xff]  ;;  %7016 = vmatprep.subr.bf16.mxu0 %v14243_v37 }
  0xf7   : > { %7040 = vmatprep.subr.bf16.mxu1 %v14243_v37 }
  0xf8   : > { %v9844_v5 = vpop.permute.xlu1 %7350 }
  0xf9   : > { %7620 = vrot.lane.b32.xlu1 %v7619_v36, %s8992_s26  ;;  %14337 = vst [vmem:[#allocation26_spill] sm:$0xff] %v9844_v5  ;;  %v9848_v27 = vpop.permute.xlu0 %7345  ;;  %v6128_v36 = vld [vmem:[%s9046_s21 + $0x169] sm:$0xff] }
  0xfa   : > { %7615 = vrot.lane.b32.xlu0 %v7614_v15, %s8992_s26  ;;  %14338 = vst [vmem:[#allocation14_spill] sm:$0xff] %v9848_v27  ;;  %v6126_v15 = vld [vmem:[%s9046_s21 + $0x151] sm:$0xff]  ;;  %v7659_v17 = vpack.i.bf16 %v6128_v36, %v6127_v21 }
  0xfc   : > { %v9854_v4 = vpop.permute.xlu1 %7360 }
  0xfd   : > { %7630 = vrot.lane.b32.xlu1 %v7629_v16, %s8992_s26  ;;  %14339 = vst [vmem:[#allocation15_spill] sm:$0xff] %v9854_v4  ;;  %v9858_v10 = vpop.permute.xlu0 %7355 }
  0xfe   : > { %7625 = vrot.lane.b32.xlu0 %v7624_v54, %s8992_s26  ;;  %14340 = vst [vmem:[#allocation16_spill] sm:$0xff] %v9858_v10  ;;  %v7654_v54 = vpack.i.bf16 %v6126_v15, %v6125_v45  ;;  %v6135_v45 = vld [vmem:[%s9046_s21 + $0x1b1] sm:$0xff]  ;;  %v6136_v15 = vld [vmem:[%s9046_s21 + $0x1c1] sm:$0xff] }
 0x100   : > { %v9864_v6 = vpop.permute.xlu1 %7370 }
 0x101   : > { %7640 = vrot.lane.b32.xlu1 %v7639_v11, %s8992_s26  ;;  %14341 = vst [vmem:[#allocation18_spill] sm:$0xff] %v9864_v6  ;;  %v7373_v9 = vunpack.i.h.bf16 %v9864_v6  ;;  %v9869_v38 = vpop.permute.xlu0 %7365  ;;  %v6130_v11 = vld [vmem:[%s9046_s21 + $0x181] sm:$0xff] }
 0x102   : > { %7635 = vrot.lane.b32.xlu0 %v7634_v43, %s8992_s26  ;;  %14342 = vst [vmem:[#allocation17_spill] sm:$0xff] %v9869_v38  ;;  %v7664_v36 = vpack.i.bf16 %v6130_v11, %v6129_v31 }
 0x103   : > { %v9874_v16 = vsel %vm4172_vm2, %v14343_v51, %v7373_v9  ;;  %v6133_v51 = vld [vmem:[%s9046_s21 + $0x1a1] sm:$0xff] }
 0x104   : > { %v7381_v60 = vpop.permute.xlu1 %7380 }
 0x105   : > { %7650 = vrot.lane.b32.xlu1 %v7649_v32, %s8992_s26  ;;  %v7383_v43 = vunpack.i.h.bf16 %v7381_v60  ;;  %v7382_v57 = vunpack.i.l.bf16 %v7381_v60  ;;  %v7376_v44 = vpop.permute.xlu0 %7375  ;;  %v7669_v32 = vpack.i.bf16 %v6132_v61, %v6131_v2  ;;  %v6134_v2 = vld [vmem:[%s9046_s21 + $0x1a9] sm:$0xff] }
 0x106   : > { %7645 = vrot.lane.b32.xlu0 %v7644_v46, %s8992_s26  ;;  %v7378_v42 = vunpack.i.h.bf16 %v7376_v44  ;;  %v7377_v8 = vunpack.i.l.bf16 %v7376_v44  ;;  %v6140_v44 = vld [vmem:[%s9046_s21 + $0x1e9] sm:$0xff] }
 0x107   : > { %v9884_v46 = vsel %vm4172_vm2, %v9554_v41, %v7382_v57  ;;  %v9888_v21 = vsel %vm4172_vm2, %v9557_v22, %v7383_v43  ;;  %v7674_v43 = vpack.i.bf16 %v6134_v2, %v6133_v51  ;;  %v6139_v57 = vld [vmem:[%s9046_s21 + $0x1e1] sm:$0xff]  ;;  %v6143_v2 = vld [vmem:[%s9046_s21 + $0x209] sm:$0xff] }
 0x108   : > { %v9895_v9 = vsel %vm4172_vm2, %v9563_v47, %v7377_v8  ;;  %v7391_v41 = vpop.permute.xlu1 %7390  ;;  %v7679_v47 = vpack.i.bf16 %v6136_v15, %v6135_v45  ;;  %v7689_v51 = vpack.i.bf16 %v6140_v44, %v6139_v57 }
 0x109   : > { %7660 = vrot.lane.b32.xlu1 %v7659_v17, %s8992_s26  ;;  %v9899_v17 = vsel %vm4172_vm2, %v9566_v18, %v7378_v42  ;;  %v7393_v22 = vunpack.i.h.bf16 %v7391_v41  ;;  %v7392_v61 = vunpack.i.l.bf16 %v7391_v41 }
 0x10a   : > { %7655 = vrot.lane.b32.xlu0 %v7654_v54, %s8992_s26  ;;  %v7386_v54 = vpop.permute.xlu0 %7385 }
 0x10b   : > { %v7388_v60 = vunpack.i.h.bf16 %v7386_v54  ;;  %v7387_v31 = vunpack.i.l.bf16 %v7386_v54  ;;  %v9906_v11 = vsel %vm4172_vm2, %v9593_v28, %v7392_v61  ;;  %v9910_v18 = vsel %vm4172_vm2, %v9596_v59, %v7393_v22  ;;  %v6138_v59 = vld [vmem:[%s9046_s21 + $0x1d1] sm:$0xff] }
 0x10c   : > { %v9923_v28 = vpop.permute.xlu1 %7400  ;;  %v6144_v22 = vld [vmem:[%s9046_s21 + $0x211] sm:$0xff] }
 0x10d   : > { %7670 = vrot.lane.b32.xlu1 %v7669_v32, %s8992_s26  ;;  %v9917_v42 = vsel %vm4172_vm2, %v9603_v39, %v7387_v31  ;;  %v9921_v8 = vsel %vm4172_vm2, %v9606_v62, %v7388_v60  ;;  %14344 = vst [vmem:[#allocation29_spill] sm:$0xff] %v9923_v28  ;;  %v6137_v32 = vld [vmem:[%s9046_s21 + $0x1c9] sm:$0xff]  ;;  %v6141_v31 = vld [vmem:[%s9046_s21 + $0x1f1] sm:$0xff] }
 0x10e   : > { %7665 = vrot.lane.b32.xlu0 %v7664_v36, %s8992_s26  ;;  %v7403_v36 = vunpack.i.h.bf16 %v9923_v28  ;;  %v7396_v45 = vpop.permute.xlu0 %7395  ;;  %v7684_v62 = vpack.i.bf16 %v6138_v59, %v6137_v32  ;;  %v7699_v59 = vpack.i.bf16 %v6144_v22, %v6143_v2 }
 0x10f   : > { %v7398_v15 = vunpack.i.h.bf16 %v7396_v45  ;;  %v7397_v41 = vunpack.i.l.bf16 %v7396_v45 }
 0x110   : > { %v9931_v39 = vsel %vm4172_vm2, %v9636_v40, %v7403_v36  ;;  %v7411_v60 = vpop.permute.xlu1 %7410 }
 0x111   : > { %7680 = vrot.lane.b32.xlu1 %v7679_v47, %s8992_s26  ;;  %v9938_v61 = vsel %vm4172_vm2, %v9647_v56, %v7397_v41  ;;  %v9942_v54 = vsel %vm4172_vm2, %v9650_v50, %v7398_v15  ;;  %v6142_v47 = vld [vmem:[%s9046_s21 + $0x201] sm:$0xff]  ;;  %v7413_v40 = vunpack.i.h.bf16 %v7411_v60  ;;  %v7412_v57 = vunpack.i.l.bf16 %v7411_v60 }
 0x112   : > { %7675 = vrot.lane.b32.xlu0 %v7674_v43, %s8992_s26  ;;  %v7406_v44 = vpop.permute.xlu0 %7405  ;;  %v7694_v36 = vpack.i.bf16 %v6142_v47, %v6141_v31  ;;  %v6145_v41 = vld [vmem:[%s9046_s21 + $0x221] sm:$0xff]  ;;  %v6147_v31 = vld [vmem:[%s9046_s21 + $0x231] sm:$0xff] }
 0x113   : > { %v7408_v43 = vunpack.i.h.bf16 %v7406_v44  ;;  %v7407_v32 = vunpack.i.l.bf16 %v7406_v44  ;;  %v9949_v56 = vsel %vm4172_vm2, %v9667_v24, %v7412_v57  ;;  %v9953_v50 = vsel %vm4172_vm2, %v9670_v3, %v7413_v40  ;;  %v6150_v40 = vld [vmem:[%s9046_s21 + $0x32] sm:$0xff]  ;;  %v6151_v57 = vld [vmem:[%s9046_s21 + $0x42] sm:$0xff] }
 0x114   : > { %v7421_v24 = vpop.permute.xlu1 %7420 }
 0x115   : > { %7690 = vrot.lane.b32.xlu1 %v7689_v51, %s8992_s26  ;;  %v9958_v45 = vsel %vm4172_vm2, %v9681_v48, %v7407_v32  ;;  %v9962_v15 = vsel %vm4172_vm2, %v9684_v53, %v7408_v43  ;;  %v6146_v51 = vld [vmem:[%s9046_s21 + $0x229] sm:$0xff]  ;;  %v7423_v2 = vunpack.i.h.bf16 %v7421_v24  ;;  %v7422_v3 = vunpack.i.l.bf16 %v7421_v24 }
 0x116   : > { %7685 = vrot.lane.b32.xlu0 %v7684_v62, %s8992_s26  ;;  %v7416_v62 = vpop.permute.xlu0 %7415  ;;  %v7704_v47 = vpack.i.bf16 %v6146_v51, %v6145_v41  ;;  %v6148_v32 = vld [vmem:[%s9046_s21 + $0x22] sm:$0xff] }
 0x117   : > { %v7418_v22 = vunpack.i.h.bf16 %v7416_v62  ;;  %v7417_v60 = vunpack.i.l.bf16 %v7416_v62  ;;  %v9969_v48 = vsel %vm4172_vm2, %v9699_v49, %v7422_v3  ;;  %v9973_v53 = vsel %vm4172_vm2, %v9702_v58, %v7423_v2  ;;  %v6149_v58 = vld [vmem:[%s9046_s21 + $0x2a] sm:$0xff]  ;;  %v6154_v62 = vld [vmem:[%s9046_s21 + $0x62] sm:$0xff] }
 0x118   : > { %v7431_v49 = vpop.permute.xlu1 %7430  ;;  %v7709_v3 = vpack.i.bf16 %v6149_v58, %v6148_v32 }
 0x119   : > { %7700 = vrot.lane.b32.xlu1 %v7699_v59, %s8992_s26  ;;  %v9981_v44 = vsel %vm4172_vm2, %v9712_v12, %v7417_v60  ;;  %v9985_v43 = vsel %vm4172_vm2, %v9715_v13, %v7418_v22  ;;  %v7433_v59 = vunpack.i.h.bf16 %v7431_v49  ;;  %v7714_v12 = vpack.i.bf16 %v6151_v57, %v6150_v40  ;;  %v6155_v22 = vld [vmem:[%s9046_s21 + $0x6a] sm:$0xff]  ;;  %v6153_v57 = vld [vmem:[%s9046_s21 + $0x52] sm:$0xff] }
 0x11a   : > { %7695 = vrot.lane.b32.xlu0 %v7694_v36, %s8992_s26  ;;  %v7432_v36 = vunpack.i.l.bf16 %v7431_v49  ;;  %v7426_v24 = vpop.permute.xlu0 %7425  ;;  %v6152_v40 = vld [vmem:[%s9046_s21 + $0x4a] sm:$0xff] }
 0x11b   : > { %v7428_v41 = vunpack.i.h.bf16 %v7426_v24  ;;  %v7427_v51 = vunpack.i.l.bf16 %v7426_v24  ;;  %v9996_v13 = vsel %vm4172_vm2, %v9732_v19, %v7433_v59  ;;  %v6158_v24 = vld [vmem:[%s9046_s21 + $0x8a] sm:$0xff] }
 0x11c   : > { %v9992_v2 = vsel %vm4172_vm2, %v9729_v33, %v7432_v36  ;;  %v7441_v33 = vpop.permute.xlu1 %7440  ;;  %v7719_v36 = vpack.i.bf16 %v6153_v57, %v6152_v40 }
 0x11d   : > { %1975 = vrot.lane.b32.xlu1 %v6147_v31, %s8992_s26  ;;  %v10003_v60 = vsel %vm4172_vm2, %v9743_v63, %v7427_v51  ;;  %v10007_v31 = vsel %vm4172_vm2, %v9746_v0, %v7428_v41  ;;  %v7443_v19 = vunpack.i.h.bf16 %v7441_v33  ;;  %v7442_v49 = vunpack.i.l.bf16 %v7441_v33  ;;  %v6159_v41 = vld [vmem:[%s9046_s21 + $0x92] sm:$0xff] }
 0x11e   : > { %7705 = vrot.lane.b32.xlu0 %v7704_v47, %s8992_s26  ;;  %v7436_v47 = vpop.permute.xlu0 %7435  ;;  %v7724_v63 = vpack.i.bf16 %v6155_v22, %v6154_v62  ;;  %v6156_v62 = vld [vmem:[%s9046_s21 + $0x72] sm:$0xff]  ;;  %v6157_v22 = vld [vmem:[%s9046_s21 + $0x82] sm:$0xff] }
 0x11f   : > { %v7438_v32 = vunpack.i.h.bf16 %v7436_v47  ;;  %v7437_v58 = vunpack.i.l.bf16 %v7436_v47  ;;  %v10014_v0 = vsel %vm4172_vm2, %v9765_v7, %v7442_v49  ;;  %v10018_v59 = vsel %vm4172_vm2, %v9768_v55, %v7443_v19  ;;  %v6162_v47 = vld [vmem:[%s9046_s21 + $0xb2] sm:$0xff] }
 0x120   : > { %v7451_v7 = vpop.permute.xlu1 %7450  ;;  %v7729_v49 = vpack.i.bf16 %v6157_v22, %v6156_v62  ;;  %v6166_v22 = vld [vmem:[%s9046_s21 + $0xe2] sm:$0xff] }
 0x121   : > { %7715 = vrot.lane.b32.xlu1 %v7714_v12, %s8993_s27  ;;  %v10025_v51 = vsel %vm4172_vm2, %v9775_v23, %v7437_v58  ;;  %v10029_v12 = vsel %vm4172_vm2, %v9778_v26, %v7438_v32  ;;  %v7453_v55 = vunpack.i.h.bf16 %v7451_v7  ;;  %v7452_v33 = vunpack.i.l.bf16 %v7451_v7  ;;  %v6163_v32 = vld [vmem:[%s9046_s21 + $0xc2] sm:$0xff] }
 0x122   : > { %7710 = vrot.lane.b32.xlu0 %v7709_v3, %s8993_s27  ;;  %v7446_v3 = vpop.permute.xlu0 %7445  ;;  %v7734_v23 = vpack.i.bf16 %v6159_v41, %v6158_v24  ;;  %v6160_v24 = vld [vmem:[%s9046_s21 + $0xa2] sm:$0xff] }
 0x123   : > { %v7448_v40 = vunpack.i.h.bf16 %v7446_v3  ;;  %v7447_v57 = vunpack.i.l.bf16 %v7446_v3  ;;  %v10036_v19 = vsel %vm4172_vm2, %v9795_v34, %v7452_v33  ;;  %v10040_v26 = vsel %vm4172_vm2, %v9798_v52, %v7453_v55  ;;  %v6161_v52 = vld [vmem:[%s9046_s21 + $0xaa] sm:$0xff] }
 0x124   : > { %v1568_v34 = vpop.permute.xlu1 %1567  ;;  %v6167_v55 = vld [vmem:[%s9046_s21 + $0xea] sm:$0xff] }
 0x125   : > { %7725 = vrot.lane.b32.xlu1 %v7724_v63, %s8993_s27  ;;  %v10047_v58 = vsel %vm4172_vm2, %v9810_v20, %v7447_v57  ;;  %v10051_v63 = vsel %vm4172_vm2, %v9813_v1, %v7448_v40  ;;  %v7744_v20 = vpack.i.bf16 %v6163_v32, %v6162_v47  ;;  %v7739_v1 = vpack.i.bf16 %v6161_v52, %v6160_v24  ;;  %v6164_v40 = vld [vmem:[%s9046_s21 + $0xca] sm:$0xff]  ;;  %v6165_v57 = vld [vmem:[%s9046_s21 + $0xd2] sm:$0xff]  ;;  %v6169_v24 = vld [vmem:[%s9046_s21 + $0x102] sm:$0xff] }
 0x126   : > { %7720 = vrot.lane.b32.xlu0 %v7719_v36, %s8993_s27  ;;  %v10057_v36 = vsel %vm4172_vm2, %v9818_v30, %v1568_v34  ;;  %v7456_v41 = vpop.permute.xlu0 %7455  ;;  %v6170_v47 = vld [vmem:[%s9046_s21 + $0x10a] sm:$0xff]  ;;  %v6171_v32 = vld [vmem:[%s9046_s21 + $0x112] sm:$0xff] }
 0x127   : > { %v7458_v7 = vunpack.i.h.bf16 %v7456_v41  ;;  %v7457_v62 = vunpack.i.l.bf16 %v7456_v41  ;;  %v6168_v34 = vld [vmem:[%s9046_s21 + $0xf2] sm:$0xff]  ;;  %v7764_v41 = vpack.i.bf16 %v6171_v32, %v6170_v47  ;;  %v6178_v47 = vld [vmem:[%s9046_s21 + $0x162] sm:$0xff] }
 0x128   : > { %v10071_v3 = vpop.permute.xlu1 %7465 }
 0x129   : > { %7735 = vrot.lane.b32.xlu1 %v7734_v23, %s8993_s27  ;;  %v10065_v33 = vsel %vm4172_vm2, %v9829_v29, %v7457_v62  ;;  %v10069_v30 = vsel %vm4172_vm2, %v9832_v14, %v7458_v7  ;;  %14345 = vst [vmem:[#allocation31_spill] sm:$0xff] %v10071_v3  ;;  %v7749_v29 = vpack.i.bf16 %v6165_v57, %v6164_v40  ;;  %v6174_v62 = vld [vmem:[%s9046_s21 + $0x132] sm:$0xff] }
 0x12a   : > { %7730 = vrot.lane.b32.xlu0 %v7729_v49, %s8993_s27  ;;  %v10075_v23 = vpop.permute.xlu0 %7460  ;;  %v7754_v49 = vpack.i.bf16 %v6167_v55, %v6166_v22  ;;  %v7759_v7 = vpack.i.bf16 %v6169_v24, %v6168_v34  ;;  %v6172_v22 = vld [vmem:[%s9046_s21 + $0x122] sm:$0xff]  ;;  %v6173_v55 = vld [vmem:[%s9046_s21 + $0x12a] sm:$0xff]  ;;  %v6177_v24 = vld [vmem:[%s9046_s21 + $0x152] sm:$0xff] }
 0x12b   : > { %14346 = vst [vmem:[#allocation32_spill] sm:$0xff] %v10075_v23  ;;  %v6176_v34 = vld [vmem:[%s9046_s21 + $0x14a] sm:$0xff] }
 0x12c   : > { %v10081_v14 = vpop.permute.xlu1 %7475 }
 0x12d   : > { %7745 = vrot.lane.b32.xlu1 %v7744_v20, %s8993_s27  ;;  %14347 = vst [vmem:[#allocation33_spill] sm:$0xff] %v10081_v14  ;;  %v6175_v20 = vld [vmem:[%s9046_s21 + $0x142] sm:$0xff] }
 0x12e   : > { %7740 = vrot.lane.b32.xlu0 %v7739_v1, %s8993_s27  ;;  %v10085_v52 = vpop.permute.xlu0 %7470  ;;  %v7774_v57 = vpack.i.bf16 %v6175_v20, %v6174_v62  ;;  %v7779_v62 = vpack.i.bf16 %v6177_v24, %v6176_v34  ;;  %v6182_v20 = vld [vmem:[%s9046_s21 + $0x18a] sm:$0xff]  ;;  %v6186_v24 = vld [vmem:[%s9046_s21 + $0x1b2] sm:$0xff] }
 0x12f   : > { %14348 = vst [vmem:[#allocation34_spill] sm:$0xff] %v10085_v52 }
 0x130   : > { %v10091_v1 = vpop.permute.xlu1 %7485 }
 0x131   : > { %7755 = vrot.lane.b32.xlu1 %v7754_v49, %s8993_s27  ;;  %14349 = vst [vmem:[#allocation35_spill] sm:$0xff] %v10091_v1  ;;  %v7769_v49 = vpack.i.bf16 %v6173_v55, %v6172_v22  ;;  %v6183_v22 = vld [vmem:[%s9046_s21 + $0x192] sm:$0xff] }
 0x132   : > { %7750 = vrot.lane.b32.xlu0 %v7749_v29, %s8993_s27  ;;  %v10095_v40 = vpop.permute.xlu0 %7480  ;;  %v6179_v29 = vld [vmem:[%s9046_s21 + $0x16a] sm:$0xff] }
 0x133   : > { %14350 = vst [vmem:[#allocation36_spill] sm:$0xff] %v10095_v40  ;;  %v6180_v40 = vld [vmem:[%s9046_s21 + $0x172] sm:$0xff] }
 0x134   : > { %v10101_v32 = vpop.permute.xlu1 %7495 }
 0x135   : > { %7765 = vrot.lane.b32.xlu1 %v7764_v41, %s8993_s27  ;;  %14351 = vst [vmem:[#allocation37_spill] sm:$0xff] %v10101_v32  ;;  %v7498_v1 = vunpack.i.h.bf16 %v10101_v32  ;;  %v7784_v41 = vpack.i.bf16 %v6179_v29, %v6178_v47  ;;  %v6181_v32 = vld [vmem:[%s9046_s21 + $0x182] sm:$0xff] }
 0x136   : > { %7760 = vrot.lane.b32.xlu0 %v7759_v7, %s8993_s27  ;;  %v10106_v52 = vpop.permute.xlu0 %7490  ;;  %v7789_v34 = vpack.i.bf16 %v6181_v32, %v6180_v40 }
 0x137   : > { %14352 = vst [vmem:[#allocation38_spill] sm:$0xff] %v10106_v52  ;;  %v10111_v7 = vsel %vm4224_vm3, %v9874_v16, %v7498_v1  ;;  %v7794_v16 = vpack.i.bf16 %v6183_v22, %v6182_v20  ;;  %v6185_v20 = vld [vmem:[%s9046_s21 + $0x1aa] sm:$0xff] }
 0x138   : > { %v7506_v55 = vpop.permute.xlu1 %7505 }
 0x139   : > { %7775 = vrot.lane.b32.xlu1 %v7774_v57, %s8993_s27  ;;  %v7508_v14 = vunpack.i.h.bf16 %v7506_v55  ;;  %v7507_v52 = vunpack.i.l.bf16 %v7506_v55  ;;  %v6187_v55 = vld [vmem:[%s9046_s21 + $0x1c2] sm:$0xff] }
 0x13a   : > { %7770 = vrot.lane.b32.xlu0 %v7769_v49, %s8993_s27  ;;  %v7501_v57 = vpop.permute.xlu0 %7500 }
 0x13b   : > { %v7503_v47 = vunpack.i.h.bf16 %v7501_v57  ;;  %v7502_v29 = vunpack.i.l.bf16 %v7501_v57  ;;  %v10121_v1 = vsel %vm4224_vm3, %v9884_v46, %v7507_v52  ;;  %v10125_v49 = vsel %vm4224_vm3, %v9888_v21, %v7508_v14  ;;  %v6184_v52 = vld [vmem:[%s9046_s21 + $0x1a2] sm:$0xff] }
 0x13c   : > { %v7516_v46 = vpop.permute.xlu1 %7515  ;;  %v7799_v57 = vpack.i.bf16 %v6185_v20, %v6184_v52 }
 0x13d   : > { %7785 = vrot.lane.b32.xlu1 %v7784_v41, %s8993_s27  ;;  %v10132_v23 = vsel %vm4224_vm3, %v9895_v9, %v7502_v29  ;;  %v10136_v41 = vsel %vm4224_vm3, %v9899_v17, %v7503_v47  ;;  %v7518_v21 = vunpack.i.h.bf16 %v7516_v46  ;;  %v7517_v14 = vunpack.i.l.bf16 %v7516_v46  ;;  %v6190_v47 = vld [vmem:[%s9046_s21 + $0x1e2] sm:$0xff]  ;;  %v6191_v29 = vld [vmem:[%s9046_s21 + $0x1ea] sm:$0xff] }
 0x13e   : > { %7780 = vrot.lane.b32.xlu0 %v7779_v62, %s8993_s27  ;;  %v7511_v40 = vpop.permute.xlu0 %7510  ;;  %v7804_v9 = vpack.i.bf16 %v6187_v55, %v6186_v24  ;;  %v6188_v24 = vld [vmem:[%s9046_s21 + $0x1ca] sm:$0xff] }
 0x13f   : > { %v7513_v32 = vunpack.i.h.bf16 %v7511_v40  ;;  %v7512_v62 = vunpack.i.l.bf16 %v7511_v40  ;;  %v10143_v22 = vsel %vm4224_vm3, %v9906_v11, %v7517_v14  ;;  %v10147_v17 = vsel %vm4224_vm3, %v9910_v18, %v7518_v21  ;;  %v6189_v18 = vld [vmem:[%s9046_s21 + $0x1d2] sm:$0xff]  ;;  %v6194_v14 = vld [vmem:[%s9046_s21 + $0x20a] sm:$0xff] }
 0x140   : > { %v10160_v11 = vpop.permute.xlu1 %7525  ;;  %v7814_v21 = vpack.i.bf16 %v6191_v29, %v6190_v47  ;;  %v6195_v40 = vld [vmem:[%s9046_s21 + $0x212] sm:$0xff]  ;;  %v6193_v47 = vld [vmem:[%s9046_s21 + $0x202] sm:$0xff] }
 0x141   : > { %7795 = vrot.lane.b32.xlu1 %v7794_v16, %s8993_s27  ;;  %v10154_v46 = vsel %vm4224_vm3, %v9917_v42, %v7512_v62  ;;  %v10158_v16 = vsel %vm4224_vm3, %v9921_v8, %v7513_v32  ;;  %14353 = vst [vmem:[#allocation39_spill] sm:$0xff] %v10160_v11  ;;  %v7809_v8 = vpack.i.bf16 %v6189_v18, %v6188_v24 }
 0x142   : > { %7790 = vrot.lane.b32.xlu0 %v7789_v34, %s8993_s27  ;;  %v7528_v34 = vunpack.i.h.bf16 %v10160_v11  ;;  %v7521_v55 = vpop.permute.xlu0 %7520  ;;  %v7824_v18 = vpack.i.bf16 %v6195_v40, %v6194_v14  ;;  %v6196_v14 = vld [vmem:[%s9046_s21 + $0x222] sm:$0xff]  ;;  %v6197_v40 = vld [vmem:[%s9046_s21 + $0x22a] sm:$0xff] }
 0x143   : > { %v7523_v52 = vunpack.i.h.bf16 %v7521_v55  ;;  %v7522_v20 = vunpack.i.l.bf16 %v7521_v55 }
 0x144   : > { %v10168_v42 = vsel %vm4224_vm3, %v9931_v39, %v7528_v34  ;;  %v7536_v55 = vpop.permute.xlu1 %7535 }
 0x145   : > { %7805 = vrot.lane.b32.xlu1 %v7804_v9, %s8993_s27  ;;  %v10175_v32 = vsel %vm4224_vm3, %v9938_v61, %v7522_v20  ;;  %v10179_v62 = vsel %vm4224_vm3, %v9942_v54, %v7523_v52  ;;  %v6192_v9 = vld [vmem:[%s9046_s21 + $0x1f2] sm:$0xff]  ;;  %v7538_v39 = vunpack.i.h.bf16 %v7536_v55  ;;  %v7537_v29 = vunpack.i.l.bf16 %v7536_v55 }
 0x146   : > { %7800 = vrot.lane.b32.xlu0 %v7799_v57, %s8993_s27  ;;  %v7531_v34 = vpop.permute.xlu0 %7530  ;;  %v7819_v52 = vpack.i.bf16 %v6193_v47, %v6192_v9  ;;  %v6198_v47 = vld [vmem:[%s9046_s21 + $0x232] sm:$0xff] }
 0x147   : > { %v7533_v57 = vunpack.i.h.bf16 %v7531_v34  ;;  %v7532_v24 = vunpack.i.l.bf16 %v7531_v34  ;;  %v10186_v61 = vsel %vm4224_vm3, %v9949_v56, %v7537_v29  ;;  %v10190_v54 = vsel %vm4224_vm3, %v9953_v50, %v7538_v39  ;;  %v6201_v34 = vld [vmem:[%s9046_s21 + $0x33] sm:$0xff] }
 0x148   : > { %v7546_v56 = vpop.permute.xlu1 %7545  ;;  %v7829_v29 = vpack.i.bf16 %v6197_v40, %v6196_v14 }
 0x149   : > { %7815 = vrot.lane.b32.xlu1 %v7814_v21, %s8993_s27  ;;  %v10195_v20 = vsel %vm4224_vm3, %v9958_v45, %v7532_v24  ;;  %v10199_v21 = vsel %vm4224_vm3, %v9962_v15, %v7533_v57  ;;  %v7548_v55 = vunpack.i.h.bf16 %v7546_v56  ;;  %v7547_v50 = vunpack.i.l.bf16 %v7546_v56  ;;  %v6202_v57 = vld [vmem:[%s9046_s21 + $0x43] sm:$0xff] }
 0x14a   : > { %7810 = vrot.lane.b32.xlu0 %v7809_v8, %s8993_s27  ;;  %v7541_v8 = vpop.permute.xlu0 %7540  ;;  %v6199_v56 = vld [vmem:[%s9046_s21 + $0x23] sm:$0xff] }
 0x14b   : > { %v7543_v39 = vunpack.i.h.bf16 %v7541_v8  ;;  %v7542_v9 = vunpack.i.l.bf16 %v7541_v8  ;;  %v10206_v45 = vsel %vm4224_vm3, %v9969_v48, %v7547_v50  ;;  %v10210_v15 = vsel %vm4224_vm3, %v9973_v53, %v7548_v55  ;;  %v6200_v53 = vld [vmem:[%s9046_s21 + $0x2b] sm:$0xff] }
 0x14c   : > { %v7556_v48 = vpop.permute.xlu1 %7555 }
 0x14d   : > { %7825 = vrot.lane.b32.xlu1 %v7824_v18, %s8993_s27  ;;  %v10218_v24 = vsel %vm4224_vm3, %v9981_v44, %v7542_v9  ;;  %v10222_v18 = vsel %vm4224_vm3, %v9985_v43, %v7543_v39  ;;  %v7558_v55 = vunpack.i.h.bf16 %v7556_v48  ;;  %v7839_v44 = vpack.i.bf16 %v6202_v57, %v6201_v34  ;;  %v6205_v9 = vld [vmem:[%s9046_s21 + $0x63] sm:$0xff]  ;;  %v6203_v34 = vld [vmem:[%s9046_s21 + $0x4b] sm:$0xff]  ;;  %v6204_v57 = vld [vmem:[%s9046_s21 + $0x53] sm:$0xff] }
 0x14e   : > { %7820 = vrot.lane.b32.xlu0 %v7819_v52, %s8993_s27  ;;  %v7557_v52 = vunpack.i.l.bf16 %v7556_v48  ;;  %v7551_v14 = vpop.permute.xlu0 %7550  ;;  %v7834_v39 = vpack.i.bf16 %v6200_v53, %v6199_v56  ;;  %v6206_v48 = vld [vmem:[%s9046_s21 + $0x6b] sm:$0xff] }
 0x14f   : > { %v7553_v40 = vunpack.i.h.bf16 %v7551_v14  ;;  %v7552_v50 = vunpack.i.l.bf16 %v7551_v14  ;;  %v10233_v43 = vsel %vm4224_vm3, %v9996_v13, %v7558_v55  ;;  %v7844_v14 = vpack.i.bf16 %v6204_v57, %v6203_v34 }
 0x150   : > { %v10229_v8 = vsel %vm4224_vm3, %v9992_v2, %v7557_v52  ;;  %v7566_v2 = vpop.permute.xlu1 %7565 }
 0x151   : > { %2179 = vrot.lane.b32.xlu1 %v6198_v47, %s8993_s27  ;;  %v10240_v11 = vsel %vm4224_vm3, %v10003_v60, %v7552_v50  ;;  %v10244_v47 = vsel %vm4224_vm3, %v10007_v31, %v7553_v40  ;;  %v7568_v13 = vunpack.i.h.bf16 %v7566_v2  ;;  %v7567_v55 = vunpack.i.l.bf16 %v7566_v2  ;;  %v6209_v40 = vld [vmem:[%s9046_s21 + $0x8b] sm:$0xff]  ;;  %v6210_v50 = vld [vmem:[%s9046_s21 + $0x93] sm:$0xff] }
 0x152   : > { %7830 = vrot.lane.b32.xlu0 %v7829_v29, %s8993_s27  ;;  %v7561_v29 = vpop.permute.xlu0 %7560  ;;  %v7849_v60 = vpack.i.bf16 %v6206_v48, %v6205_v9  ;;  %v6207_v9 = vld [vmem:[%s9046_s21 + $0x73] sm:$0xff]  ;;  %v6208_v48 = vld [vmem:[%s9046_s21 + $0x83] sm:$0xff] }
 0x153   : > { %v7563_v56 = vunpack.i.h.bf16 %v7561_v29  ;;  %v7562_v53 = vunpack.i.l.bf16 %v7561_v29  ;;  %v10251_v31 = vsel %vm4224_vm3, %v10014_v0, %v7567_v55  ;;  %v10255_v52 = vsel %vm4224_vm3, %v10018_v59, %v7568_v13 }
 0x154   : > { %v7854_v29 = vpack.i.bf16 %v6208_v48, %v6207_v9 }
 0x155   : > { %7840 = vrot.lane.b32.xlu1 %v7839_v44, %s8994_s28  ;;  %v10262_v2 = vsel %vm4224_vm3, %v10025_v51, %v7562_v53  ;;  %v10266_v44 = vsel %vm4224_vm3, %v10029_v12, %v7563_v56  ;;  %v7576_v0 = vpop.permute.xlu1 %7575  ;;  %v7859_v51 = vpack.i.bf16 %v6210_v50, %v6209_v40  ;;  %v6213_v56 = vld [vmem:[%s9046_s21 + $0xb3] sm:$0xff]  ;;  %v6214_v53 = vld [vmem:[%s9046_s21 + $0xc3] sm:$0xff] }
 0x156   : > { %7835 = vrot.lane.b32.xlu0 %v7834_v39, %s8994_s28  ;;  %v7578_v59 = vunpack.i.h.bf16 %v7576_v0  ;;  %v7577_v13 = vunpack.i.l.bf16 %v7576_v0  ;;  %v7571_v39 = vpop.permute.xlu0 %7570  ;;  %v6211_v40 = vld [vmem:[%s9046_s21 + $0xa3] sm:$0xff] }
 0x157   : > { %v7573_v34 = vunpack.i.h.bf16 %v7571_v39  ;;  %v7572_v57 = vunpack.i.l.bf16 %v7571_v39 }
 0x158   : > { %v10273_v55 = vsel %vm4224_vm3, %v10036_v19, %v7577_v13  ;;  %v10277_v12 = vsel %vm4224_vm3, %v10040_v26, %v7578_v59  ;;  %v6212_v26 = vld [vmem:[%s9046_s21 + $0xab] sm:$0xff]  ;;  %v6217_v59 = vld [vmem:[%s9046_s21 + $0xe3] sm:$0xff] }
 0x159   : > { %7850 = vrot.lane.b32.xlu1 %v7849_v60, %s8994_s28  ;;  %v10284_v0 = vsel %vm4224_vm3, %v10047_v58, %v7572_v57  ;;  %v10288_v60 = vsel %vm4224_vm3, %v10051_v63, %v7573_v34  ;;  %v1772_v19 = vpop.permute.xlu1 %1771  ;;  %v7869_v58 = vpack.i.bf16 %v6214_v53, %v6213_v56  ;;  %v7864_v63 = vpack.i.bf16 %v6212_v26, %v6211_v40  ;;  %v6218_v13 = vld [vmem:[%s9046_s21 + $0xeb] sm:$0xff]  ;;  %v6219_v40 = vld [vmem:[%s9046_s21 + $0xf3] sm:$0xff]  ;;  %v6220_v26 = vld [vmem:[%s9046_s21 + $0x103] sm:$0xff] }
 0x15a   : > { %7845 = vrot.lane.b32.xlu0 %v7844_v14, %s8994_s28  ;;  %v10294_v14 = vsel %vm4224_vm3, %v10057_v36, %v1772_v19  ;;  %v6215_v57 = vld [vmem:[%s9046_s21 + $0xcb] sm:$0xff]  ;;  %v6222_v19 = vld [vmem:[%s9046_s21 + $0x113] sm:$0xff] }
 0x15b   : > { %v7581_v50 = vpop.permute.xlu0 %7580  ;;  %v6221_v53 = vld [vmem:[%s9046_s21 + $0x10b] sm:$0xff] }
 0x15c   : > { %v7583_v9 = vunpack.i.h.bf16 %v7581_v50  ;;  %v7582_v48 = vunpack.i.l.bf16 %v7581_v50 }
 0x15d   : > { %7860 = vrot.lane.b32.xlu1 %v7859_v51, %s8994_s28  ;;  %v6216_v51 = vld [vmem:[%s9046_s21 + $0xd3] sm:$0xff] }
 0x15e   : > { %7855 = vrot.lane.b32.xlu0 %v7854_v29, %s8994_s28  ;;  %v10302_v39 = vsel %vm4224_vm3, %v10065_v33, %v7582_v48  ;;  %v10306_v36 = vsel %vm4224_vm3, %v10069_v30, %v7583_v9  ;;  %v10308_v34 = vpop.permute.xlu1 %7590  ;;  %v7879_v29 = vpack.i.bf16 %v6218_v13, %v6217_v59  ;;  %v7874_v33 = vpack.i.bf16 %v6216_v51, %v6215_v57  ;;  %v6223_v13 = vld [vmem:[%s9046_s21 + $0x123] sm:$0xff]  ;;  %v6224_v57 = vld [vmem:[%s9046_s21 + $0x12b] sm:$0xff] }
 0x15f   : > { %14354 = vst [vmem:[#allocation40_spill] sm:$0xff] %v10308_v34  ;;  %v7889_v9 = vpack.i.bf16 %v6222_v19, %v6221_v53  ;;  %v7884_v48 = vpack.i.bf16 %v6220_v26, %v6219_v40  ;;  %v6229_v53 = vld [vmem:[%s9046_s21 + $0x163] sm:$0xff]  ;;  %v6227_v40 = vld [vmem:[%s9046_s21 + $0x14b] sm:$0xff]  ;;  %v6228_v26 = vld [vmem:[%s9046_s21 + $0x153] sm:$0xff] }
 0x160   : > { %v10312_v56 = vpop.permute.xlu0 %7585 }
 0x161   : > { %14355 = vst [vmem:[#allocation41_spill] sm:$0xff] %v10312_v56  ;;  %7870 = vrot.lane.b32.xlu1 %v7869_v58, %s8994_s28  ;;  %v6225_v58 = vld [vmem:[%s9046_s21 + $0x133] sm:$0xff] }
 0x162   : > { %7865 = vrot.lane.b32.xlu0 %v7864_v63, %s8994_s28  ;;  %v6226_v63 = vld [vmem:[%s9046_s21 + $0x143] sm:$0xff] }
 0x163   : > { %v10318_v30 = vpop.permute.xlu1 %7600 }
 0x164   : > { %14356 = vst [vmem:[#allocation42_spill] sm:$0xff] %v10318_v30  ;;  %v10322_v50 = vpop.permute.xlu0 %7595 }
 0x165   : > { %14357 = vst [vmem:[#allocation43_spill] sm:$0xff] %v10322_v50  ;;  %7880 = vrot.lane.b32.xlu1 %v7879_v29, %s8994_s28  ;;  %v7899_v50 = vpack.i.bf16 %v6226_v63, %v6225_v58  ;;  %v7894_v29 = vpack.i.bf16 %v6224_v57, %v6223_v13  ;;  %v7904_v58 = vpack.i.bf16 %v6228_v26, %v6227_v40  ;;  %v6233_v63 = vld [vmem:[%s9046_s21 + $0x18b] sm:$0xff]  ;;  %v6234_v13 = vld [vmem:[%s9046_s21 + $0x193] sm:$0xff] }
 0x166   : > { %7875 = vrot.lane.b32.xlu0 %v7874_v33, %s8994_s28  ;;  %v6230_v33 = vld [vmem:[%s9046_s21 + $0x16b] sm:$0xff]  ;;  %v6237_v26 = vld [vmem:[%s9046_s21 + $0x1b3] sm:$0xff] }
 0x167   : > { %v10328_v59 = vpop.permute.xlu1 %7610 }
 0x168   : > { %14358 = vst [vmem:[#allocation44_spill] sm:$0xff] %v10328_v59  ;;  %v10332_v51 = vpop.permute.xlu0 %7605 }
 0x169   : > { %14359 = vst [vmem:[#allocation45_spill] sm:$0xff] %v10332_v51  ;;  %7890 = vrot.lane.b32.xlu1 %v7889_v9, %s8994_s28  ;;  %v7909_v9 = vpack.i.bf16 %v6230_v33, %v6229_v53  ;;  %v6231_v51 = vld [vmem:[%s9046_s21 + $0x173] sm:$0xff] }
 0x16a   : > { %7885 = vrot.lane.b32.xlu0 %v7884_v48, %s8994_s28 }
 0x16b   : > { %v10338_v19 = vpop.permute.xlu1 %7620 }
 0x16c   : > { %14360 = vst [vmem:[#allocation46_spill] sm:$0xff] %v10338_v19  ;;  %v7623_v59 = vunpack.i.h.bf16 %v10338_v19  ;;  %v10343_v30 = vpop.permute.xlu0 %7615  ;;  %v6232_v19 = vld [vmem:[%s9046_s21 + $0x183] sm:$0xff] }
 0x16d   : > { %14361 = vst [vmem:[#allocation47_spill] sm:$0xff] %v10343_v30  ;;  %7900 = vrot.lane.b32.xlu1 %v7899_v50, %s8994_s28  ;;  %v7914_v40 = vpack.i.bf16 %v6232_v19, %v6231_v51 }
 0x16e   : > { %v10348_v48 = vsel %vm4276_vm4, %v10111_v7, %v7623_v59  ;;  %7895 = vrot.lane.b32.xlu0 %v7894_v29, %s8994_s28  ;;  %v7919_v7 = vpack.i.bf16 %v6234_v13, %v6233_v63  ;;  %v6236_v63 = vld [vmem:[%s9046_s21 + $0x1ab] sm:$0xff] }
 0x16f   : > { %v7631_v57 = vpop.permute.xlu1 %7630 }
 0x170   : > { %v7633_v56 = vunpack.i.h.bf16 %v7631_v57  ;;  %v7632_v30 = vunpack.i.l.bf16 %v7631_v57  ;;  %v7626_v50 = vpop.permute.xlu0 %7625  ;;  %v6238_v57 = vld [vmem:[%s9046_s21 + $0x1c3] sm:$0xff] }
 0x171   : > { %v7628_v53 = vunpack.i.h.bf16 %v7626_v50  ;;  %v7627_v33 = vunpack.i.l.bf16 %v7626_v50  ;;  %7910 = vrot.lane.b32.xlu1 %v7909_v9, %s8994_s28 }
 0x172   : > { %v10358_v59 = vsel %vm4276_vm4, %v10121_v1, %v7632_v30  ;;  %v10362_v29 = vsel %vm4276_vm4, %v10125_v49, %v7633_v56  ;;  %7905 = vrot.lane.b32.xlu0 %v7904_v58, %s8994_s28  ;;  %v6235_v30 = vld [vmem:[%s9046_s21 + $0x1a3] sm:$0xff] }
 0x173   : > { %v10369_v34 = vsel %vm4276_vm4, %v10132_v23, %v7627_v33  ;;  %v10373_v9 = vsel %vm4276_vm4, %v10136_v41, %v7628_v53  ;;  %v7641_v1 = vpop.permute.xlu1 %7640  ;;  %v7929_v23 = vpack.i.bf16 %v6238_v57, %v6237_v26  ;;  %v7924_v50 = vpack.i.bf16 %v6236_v63, %v6235_v30  ;;  %v6241_v53 = vld [vmem:[%s9046_s21 + $0x1e3] sm:$0xff]  ;;  %v6242_v33 = vld [vmem:[%s9046_s21 + $0x1eb] sm:$0xff] }
 0x174   : > { %v7643_v49 = vunpack.i.h.bf16 %v7641_v1  ;;  %v7642_v56 = vunpack.i.l.bf16 %v7641_v1  ;;  %v7636_v51 = vpop.permute.xlu0 %7635  ;;  %v6239_v26 = vld [vmem:[%s9046_s21 + $0x1cb] sm:$0xff] }
 0x175   : > { %v7638_v19 = vunpack.i.h.bf16 %v7636_v51  ;;  %v7637_v58 = vunpack.i.l.bf16 %v7636_v51  ;;  %7920 = vrot.lane.b32.xlu1 %v7919_v7, %s8994_s28  ;;  %v6246_v51 = vld [vmem:[%s9046_s21 + $0x213] sm:$0xff] }
 0x176   : > { %v10380_v13 = vsel %vm4276_vm4, %v10143_v22, %v7642_v56  ;;  %v10384_v41 = vsel %vm4276_vm4, %v10147_v17, %v7643_v49  ;;  %7915 = vrot.lane.b32.xlu0 %v7914_v40, %s8994_s28  ;;  %v6240_v17 = vld [vmem:[%s9046_s21 + $0x1d3] sm:$0xff]  ;;  %v7939_v49 = vpack.i.bf16 %v6242_v33, %v6241_v53  ;;  %v6245_v56 = vld [vmem:[%s9046_s21 + $0x20b] sm:$0xff]  ;;  %v6244_v53 = vld [vmem:[%s9046_s21 + $0x203] sm:$0xff] }
 0x177   : > { %v10391_v1 = vsel %vm4276_vm4, %v10154_v46, %v7637_v58  ;;  %v10395_v7 = vsel %vm4276_vm4, %v10158_v16, %v7638_v19  ;;  %v10397_v22 = vpop.permute.xlu1 %7650  ;;  %v7934_v16 = vpack.i.bf16 %v6240_v17, %v6239_v26  ;;  %v7949_v17 = vpack.i.bf16 %v6246_v51, %v6245_v56  ;;  %v6247_v56 = vld [vmem:[%s9046_s21 + $0x223] sm:$0xff]  ;;  %v6248_v51 = vld [vmem:[%s9046_s21 + $0x22b] sm:$0xff] }
 0x178   : > { %14362 = vst [vmem:[#allocation48_spill] sm:$0xff] %v10397_v22  ;;  %v7653_v40 = vunpack.i.h.bf16 %v10397_v22  ;;  %v7646_v57 = vpop.permute.xlu0 %7645 }
 0x179   : > { %v7648_v30 = vunpack.i.h.bf16 %v7646_v57  ;;  %v7647_v63 = vunpack.i.l.bf16 %v7646_v57  ;;  %7930 = vrot.lane.b32.xlu1 %v7929_v23, %s8994_s28  ;;  %v6243_v23 = vld [vmem:[%s9046_s21 + $0x1f3] sm:$0xff] }
 0x17a   : > { %v10405_v46 = vsel %vm4276_vm4, %v10168_v42, %v7653_v40  ;;  %7925 = vrot.lane.b32.xlu0 %v7924_v50, %s8994_s28 }
 0x17b   : > { %v10412_v19 = vsel %vm4276_vm4, %v10175_v32, %v7647_v63  ;;  %v10416_v58 = vsel %vm4276_vm4, %v10179_v62, %v7648_v30  ;;  %v7661_v57 = vpop.permute.xlu1 %7660  ;;  %v7944_v30 = vpack.i.bf16 %v6244_v53, %v6243_v23  ;;  %v6249_v53 = vld [vmem:[%s9046_s21 + $0x233] sm:$0xff] }
 0x17c   : > { %v7663_v42 = vunpack.i.h.bf16 %v7661_v57  ;;  %v7662_v33 = vunpack.i.l.bf16 %v7661_v57  ;;  %v7656_v40 = vpop.permute.xlu0 %7655 }
 0x17d   : > { %v7658_v50 = vunpack.i.h.bf16 %v7656_v40  ;;  %v7657_v26 = vunpack.i.l.bf16 %v7656_v40  ;;  %7940 = vrot.lane.b32.xlu1 %v7939_v49, %s8994_s28  ;;  %v6252_v40 = vld [vmem:[%s9046_s21 + $0x50] sm:$0xff] }
 0x17e   : > { %v10423_v32 = vsel %vm4276_vm4, %v10186_v61, %v7662_v33  ;;  %v10427_v62 = vsel %vm4276_vm4, %v10190_v54, %v7663_v42  ;;  %7935 = vrot.lane.b32.xlu0 %v7934_v16, %s8994_s28  ;;  %v7954_v33 = vpack.i.bf16 %v6248_v51, %v6247_v56 }
 0x17f   : > { %v10432_v63 = vsel %vm4276_vm4, %v10195_v20, %v7657_v26  ;;  %v10436_v49 = vsel %vm4276_vm4, %v10199_v21, %v7658_v50  ;;  %v7671_v61 = vpop.permute.xlu1 %7670  ;;  %v6253_v50 = vld [vmem:[%s9046_s21 + $0x60] sm:$0xff] }
 0x180   : > { %v7673_v57 = vunpack.i.h.bf16 %v7671_v61  ;;  %v7672_v54 = vunpack.i.l.bf16 %v7671_v61  ;;  %v7666_v16 = vpop.permute.xlu0 %7665  ;;  %v6250_v61 = vld [vmem:[%s9046_s21 + $0x40] sm:$0xff] }
 0x181   : > { %v7668_v42 = vunpack.i.h.bf16 %v7666_v16  ;;  %v7667_v23 = vunpack.i.l.bf16 %v7666_v16  ;;  %7950 = vrot.lane.b32.xlu1 %v7949_v17, %s8994_s28 }
 0x182   : > { %v10443_v20 = vsel %vm4276_vm4, %v10206_v45, %v7672_v54  ;;  %v10447_v21 = vsel %vm4276_vm4, %v10210_v15, %v7673_v57  ;;  %7945 = vrot.lane.b32.xlu0 %v7944_v30, %s8994_s28  ;;  %v6251_v15 = vld [vmem:[%s9046_s21 + $0x48] sm:$0xff] }
 0x183   : > { %v10455_v26 = vsel %vm4276_vm4, %v10218_v24, %v7667_v23  ;;  %v10459_v17 = vsel %vm4276_vm4, %v10222_v18, %v7668_v42  ;;  %v7681_v45 = vpop.permute.xlu1 %7680  ;;  %v7964_v24 = vpack.i.bf16 %v6253_v50, %v6252_v40  ;;  %v7959_v42 = vpack.i.bf16 %v6251_v15, %v6250_v61  ;;  %v6256_v23 = vld [vmem:[%s9046_s21 + $0x80] sm:$0xff]  ;;  %v6254_v40 = vld [vmem:[%s9046_s21 + $0x68] sm:$0xff]  ;;  %v6255_v50 = vld [vmem:[%s9046_s21 + $0x70] sm:$0xff] }
 0x184   : > { %v7683_v57 = vunpack.i.h.bf16 %v7681_v45  ;;  %v7682_v30 = vunpack.i.l.bf16 %v7681_v45  ;;  %v7676_v56 = vpop.permute.xlu0 %7675  ;;  %v6257_v45 = vld [vmem:[%s9046_s21 + $0x88] sm:$0xff] }
 0x185   : > { %v7678_v51 = vunpack.i.h.bf16 %v7676_v56  ;;  %v7677_v54 = vunpack.i.l.bf16 %v7676_v56  ;;  %2383 = vrot.lane.b32.xlu1 %v6249_v53, %s8994_s28  ;;  %v7969_v56 = vpack.i.bf16 %v6255_v50, %v6254_v40 }
 0x186   : > { %v10466_v16 = vsel %vm4276_vm4, %v10229_v8, %v7682_v30  ;;  %v10470_v18 = vsel %vm4276_vm4, %v10233_v43, %v7683_v57  ;;  %7955 = vrot.lane.b32.xlu0 %v7954_v33, %s8994_s28 }
 0x187   : > { %v10477_v22 = vsel %vm4276_vm4, %v10240_v11, %v7677_v54  ;;  %v10481_v53 = vsel %vm4276_vm4, %v10244_v47, %v7678_v51  ;;  %v7691_v8 = vpop.permute.xlu1 %7690  ;;  %v7974_v11 = vpack.i.bf16 %v6257_v45, %v6256_v23  ;;  %v6260_v51 = vld [vmem:[%s9046_s21 + $0xa8] sm:$0xff]  ;;  %v6261_v54 = vld [vmem:[%s9046_s21 + $0xb0] sm:$0xff]  ;;  %v6259_v45 = vld [vmem:[%s9046_s21 + $0xa0] sm:$0xff] }
 0x188   : > { %v7693_v43 = vunpack.i.h.bf16 %v7691_v8  ;;  %v7692_v57 = vunpack.i.l.bf16 %v7691_v8  ;;  %v7686_v33 = vpop.permute.xlu0 %7685  ;;  %v6258_v23 = vld [vmem:[%s9046_s21 + $0x90] sm:$0xff] }
 0x189   : > { %v7688_v61 = vunpack.i.h.bf16 %v7686_v33  ;;  %v7687_v15 = vunpack.i.l.bf16 %v7686_v33  ;;  %7965 = vrot.lane.b32.xlu1 %v7964_v24, %s8995_s29  ;;  %v7979_v33 = vpack.i.bf16 %v6259_v45, %v6258_v23 }
 0x18a   : > { %v10488_v47 = vsel %vm4276_vm4, %v10251_v31, %v7692_v57  ;;  %v10492_v30 = vsel %vm4276_vm4, %v10255_v52, %v7693_v43  ;;  %7960 = vrot.lane.b32.xlu0 %v7959_v42, %s8995_s29 }
 0x18b   : > { %v10499_v8 = vsel %vm4276_vm4, %v10262_v2, %v7687_v15  ;;  %v10503_v24 = vsel %vm4276_vm4, %v10266_v44, %v7688_v61  ;;  %v7701_v31 = vpop.permute.xlu1 %7700  ;;  %v7984_v2 = vpack.i.bf16 %v6261_v54, %v6260_v51  ;;  %v6264_v61 = vld [vmem:[%s9046_s21 + $0xd0] sm:$0xff]  ;;  %v6265_v15 = vld [vmem:[%s9046_s21 + $0xe0] sm:$0xff] }
 0x18c   : > { %v7703_v52 = vunpack.i.h.bf16 %v7701_v31  ;;  %v7702_v43 = vunpack.i.l.bf16 %v7701_v31  ;;  %v7696_v42 = vpop.permute.xlu0 %7695  ;;  %v6262_v51 = vld [vmem:[%s9046_s21 + $0xc0] sm:$0xff] }
 0x18d   : > { %v7698_v40 = vunpack.i.h.bf16 %v7696_v42  ;;  %v7697_v50 = vunpack.i.l.bf16 %v7696_v42  ;;  %7975 = vrot.lane.b32.xlu1 %v7974_v11, %s8995_s29 }
 0x18e   : > { %v10510_v57 = vsel %vm4276_vm4, %v10273_v55, %v7702_v43  ;;  %v10514_v44 = vsel %vm4276_vm4, %v10277_v12, %v7703_v52  ;;  %7970 = vrot.lane.b32.xlu0 %v7969_v56, %s8995_s29  ;;  %v6263_v12 = vld [vmem:[%s9046_s21 + $0xc8] sm:$0xff]  ;;  %v6268_v52 = vld [vmem:[%s9046_s21 + $0x100] sm:$0xff] }
 0x18f   : > { %v10521_v31 = vsel %vm4276_vm4, %v10284_v0, %v7697_v50  ;;  %v10525_v11 = vsel %vm4276_vm4, %v10288_v60, %v7698_v40  ;;  %v1976_v55 = vpop.permute.xlu1 %1975  ;;  %v7994_v0 = vpack.i.bf16 %v6265_v15, %v6264_v61  ;;  %v7989_v60 = vpack.i.bf16 %v6263_v12, %v6262_v51  ;;  %v6269_v43 = vld [vmem:[%s9046_s21 + $0x108] sm:$0xff]  ;;  %v6270_v51 = vld [vmem:[%s9046_s21 + $0x110] sm:$0xff]  ;;  %v6271_v12 = vld [vmem:[%s9046_s21 + $0x120] sm:$0xff] }
 0x190   : > { %v10531_v56 = vsel %vm4276_vm4, %v10294_v14, %v1976_v55  ;;  %v7706_v54 = vpop.permute.xlu0 %7705  ;;  %v6266_v50 = vld [vmem:[%s9046_s21 + $0xe8] sm:$0xff]  ;;  %v6273_v55 = vld [vmem:[%s9046_s21 + $0x130] sm:$0xff] }
 0x191   : > { %v7708_v23 = vunpack.i.h.bf16 %v7706_v54  ;;  %v7707_v45 = vunpack.i.l.bf16 %v7706_v54  ;;  %7985 = vrot.lane.b32.xlu1 %v7984_v2, %s8995_s29  ;;  %v6267_v2 = vld [vmem:[%s9046_s21 + $0xf0] sm:$0xff]  ;;  %v6272_v15 = vld [vmem:[%s9046_s21 + $0x128] sm:$0xff] }
 0x192   : > { %7980 = vrot.lane.b32.xlu0 %v7979_v33, %s8995_s29  ;;  %v8004_v33 = vpack.i.bf16 %v6269_v43, %v6268_v52  ;;  %v6274_v43 = vld [vmem:[%s9046_s21 + $0x140] sm:$0xff] }
 0x193   : > { %v10539_v42 = vsel %vm4276_vm4, %v10302_v39, %v7707_v45  ;;  %v10543_v14 = vsel %vm4276_vm4, %v10306_v36, %v7708_v23  ;;  %v10545_v40 = vpop.permute.xlu1 %7715  ;;  %v7999_v39 = vpack.i.bf16 %v6267_v2, %v6266_v50  ;;  %v8014_v23 = vpack.i.bf16 %v6273_v55, %v6272_v15  ;;  %v6275_v50 = vld [vmem:[%s9046_s21 + $0x148] sm:$0xff]  ;;  %v6280_v15 = vld [vmem:[%s9046_s21 + $0x180] sm:$0xff] }
 0x194   : > { %14363 = vst [vmem:[#allocation49_spill] sm:$0xff] %v10545_v40  ;;  %v10549_v61 = vpop.permute.xlu0 %7710  ;;  %v8009_v45 = vpack.i.bf16 %v6271_v12, %v6270_v51  ;;  %v6278_v51 = vld [vmem:[%s9046_s21 + $0x168] sm:$0xff]  ;;  %v6279_v12 = vld [vmem:[%s9046_s21 + $0x170] sm:$0xff] }
 0x195   : > { %14364 = vst [vmem:[#allocation50_spill] sm:$0xff] %v10549_v61  ;;  %7995 = vrot.lane.b32.xlu1 %v7994_v0, %s8995_s29  ;;  %v6276_v0 = vld [vmem:[%s9046_s21 + $0x150] sm:$0xff] }
 0x196   : > { %7990 = vrot.lane.b32.xlu0 %v7989_v60, %s8995_s29  ;;  %v6277_v60 = vld [vmem:[%s9046_s21 + $0x160] sm:$0xff] }
 0x197   : > { %v10555_v36 = vpop.permute.xlu1 %7725 }
 0x198   : > { %14365 = vst [vmem:[#allocation51_spill] sm:$0xff] %v10555_v36  ;;  %v10559_v54 = vpop.permute.xlu0 %7720 }
 0x199   : > { %14366 = vst [vmem:[#allocation52_spill] sm:$0xff] %v10559_v54  ;;  %8005 = vrot.lane.b32.xlu1 %v8004_v33, %s8995_s29  ;;  %v8024_v54 = vpack.i.bf16 %v6277_v60, %v6276_v0  ;;  %v8019_v33 = vpack.i.bf16 %v6275_v50, %v6274_v43  ;;  %v8029_v0 = vpack.i.bf16 %v6279_v12, %v6278_v51  ;;  %v6284_v60 = vld [vmem:[%s9046_s21 + $0x1a8] sm:$0xff]  ;;  %v6285_v43 = vld [vmem:[%s9046_s21 + $0x1b0] sm:$0xff] }
 0x19a   : > { %8000 = vrot.lane.b32.xlu0 %v7999_v39, %s8995_s29  ;;  %v6281_v39 = vld [vmem:[%s9046_s21 + $0x188] sm:$0xff]  ;;  %v6288_v12 = vld [vmem:[%s9046_s21 + $0x1d0] sm:$0xff] }
 0x19b   : > { %v10565_v52 = vpop.permute.xlu1 %7735 }
 0x19c   : > { %14367 = vst [vmem:[#allocation53_spill] sm:$0xff] %v10565_v52  ;;  %v10569_v2 = vpop.permute.xlu0 %7730 }
 0x19d   : > { %14368 = vst [vmem:[#allocation54_spill] sm:$0xff] %v10569_v2  ;;  %8015 = vrot.lane.b32.xlu1 %v8014_v23, %s8995_s29  ;;  %v8034_v23 = vpack.i.bf16 %v6281_v39, %v6280_v15  ;;  %v6282_v2 = vld [vmem:[%s9046_s21 + $0x190] sm:$0xff] }
 0x19e   : > { %8010 = vrot.lane.b32.xlu0 %v8009_v45, %s8995_s29 }
 0x19f   : > { %v10575_v55 = vpop.permute.xlu1 %7745 }
 0x1a0   : > { %14369 = vst [vmem:[#allocation55_spill] sm:$0xff] %v10575_v55  ;;  %v7748_v52 = vunpack.i.h.bf16 %v10575_v55  ;;  %v10580_v36 = vpop.permute.xlu0 %7740  ;;  %v6283_v55 = vld [vmem:[%s9046_s21 + $0x1a0] sm:$0xff] }
 0x1a1   : > { %14370 = vst [vmem:[#allocation56_spill] sm:$0xff] %v10580_v36  ;;  %8025 = vrot.lane.b32.xlu1 %v8024_v54, %s8995_s29  ;;  %v8039_v51 = vpack.i.bf16 %v6283_v55, %v6282_v2 }
 0x1a2   : > { %v10585_v45 = vsel %vm4328_vm5, %v10348_v48, %v7748_v52  ;;  %8020 = vrot.lane.b32.xlu0 %v8019_v33, %s8995_s29  ;;  %v8044_v48 = vpack.i.bf16 %v6285_v43, %v6284_v60  ;;  %v6287_v60 = vld [vmem:[%s9046_s21 + $0x1c8] sm:$0xff] }
 0x1a3   : > { %v7756_v50 = vpop.permute.xlu1 %7755 }
 0x1a4   : > { %v7758_v61 = vunpack.i.h.bf16 %v7756_v50  ;;  %v7757_v36 = vunpack.i.l.bf16 %v7756_v50  ;;  %v7751_v54 = vpop.permute.xlu0 %7750  ;;  %v6289_v50 = vld [vmem:[%s9046_s21 + $0x1e0] sm:$0xff] }
 0x1a5   : > { %v7753_v15 = vunpack.i.h.bf16 %v7751_v54  ;;  %v7752_v39 = vunpack.i.l.bf16 %v7751_v54  ;;  %8035 = vrot.lane.b32.xlu1 %v8034_v23, %s8995_s29 }
 0x1a6   : > { %v10595_v52 = vsel %vm4328_vm5, %v10358_v59, %v7757_v36  ;;  %v10599_v33 = vsel %vm4328_vm5, %v10362_v29, %v7758_v61  ;;  %8030 = vrot.lane.b32.xlu0 %v8029_v0, %s8995_s29  ;;  %v6286_v36 = vld [vmem:[%s9046_s21 + $0x1c0] sm:$0xff] }
 0x1a7   : > { %v10606_v40 = vsel %vm4328_vm5, %v10369_v34, %v7752_v39  ;;  %v10610_v23 = vsel %vm4328_vm5, %v10373_v9, %v7753_v15  ;;  %v7766_v59 = vpop.permute.xlu1 %7765  ;;  %v8054_v34 = vpack.i.bf16 %v6289_v50, %v6288_v12  ;;  %v8049_v54 = vpack.i.bf16 %v6287_v60, %v6286_v36  ;;  %v6292_v15 = vld [vmem:[%s9046_s21 + $0x200] sm:$0xff]  ;;  %v6293_v39 = vld [vmem:[%s9046_s21 + $0x208] sm:$0xff] }
 0x1a8   : > { %v7768_v29 = vunpack.i.h.bf16 %v7766_v59  ;;  %v7767_v61 = vunpack.i.l.bf16 %v7766_v59  ;;  %v7761_v2 = vpop.permute.xlu0 %7760  ;;  %v6290_v12 = vld [vmem:[%s9046_s21 + $0x1e8] sm:$0xff] }
 0x1a9   : > { %v7763_v55 = vunpack.i.h.bf16 %v7761_v2  ;;  %v7762_v0 = vunpack.i.l.bf16 %v7761_v2  ;;  %8045 = vrot.lane.b32.xlu1 %v8044_v48, %s8995_s29  ;;  %v6297_v2 = vld [vmem:[%s9046_s21 + $0x230] sm:$0xff] }
 0x1aa   : > { %v10617_v43 = vsel %vm4328_vm5, %v10380_v13, %v7767_v61  ;;  %v10621_v9 = vsel %vm4328_vm5, %v10384_v41, %v7768_v29  ;;  %8040 = vrot.lane.b32.xlu0 %v8039_v51, %s8995_s29  ;;  %v6291_v41 = vld [vmem:[%s9046_s21 + $0x1f0] sm:$0xff]  ;;  %v8064_v29 = vpack.i.bf16 %v6293_v39, %v6292_v15  ;;  %v6296_v61 = vld [vmem:[%s9046_s21 + $0x228] sm:$0xff]  ;;  %v6295_v15 = vld [vmem:[%s9046_s21 + $0x220] sm:$0xff] }
 0x1ab   : > { %v10628_v59 = vsel %vm4328_vm5, %v10391_v1, %v7762_v0  ;;  %v10632_v48 = vsel %vm4328_vm5, %v10395_v7, %v7763_v55  ;;  %v10634_v13 = vpop.permute.xlu1 %7775  ;;  %v8059_v7 = vpack.i.bf16 %v6291_v41, %v6290_v12  ;;  %v8074_v41 = vpack.i.bf16 %v6297_v2, %v6296_v61  ;;  %v6298_v61 = vld [vmem:[%s9046_s21 + $0x240] sm:$0xff]  ;;  %v6299_v2 = vld [vmem:[%s9046_s21 + $0x248] sm:$0xff] }
 0x1ac   : > { %14371 = vst [vmem:[#allocation57_spill] sm:$0xff] %v10634_v13  ;;  %v7778_v51 = vunpack.i.h.bf16 %v10634_v13  ;;  %v7771_v50 = vpop.permute.xlu0 %7770 }
 0x1ad   : > { %v7773_v36 = vunpack.i.h.bf16 %v7771_v50  ;;  %v7772_v60 = vunpack.i.l.bf16 %v7771_v50  ;;  %8055 = vrot.lane.b32.xlu1 %v8054_v34, %s8995_s29  ;;  %v6294_v34 = vld [vmem:[%s9046_s21 + $0x210] sm:$0xff] }
 0x1ae   : > { %v10642_v1 = vsel %vm4328_vm5, %v10405_v46, %v7778_v51  ;;  %8050 = vrot.lane.b32.xlu0 %v8049_v54, %s8995_s29 }
 0x1af   : > { %v10649_v55 = vsel %vm4328_vm5, %v10412_v19, %v7772_v60  ;;  %v10653_v0 = vsel %vm4328_vm5, %v10416_v58, %v7773_v36  ;;  %v7786_v50 = vpop.permute.xlu1 %7785  ;;  %v8069_v36 = vpack.i.bf16 %v6295_v15, %v6294_v34  ;;  %v6300_v15 = vld [vmem:[%s9046_s21 + $0x250] sm:$0xff] }
 0x1b0   : > { %v7788_v46 = vunpack.i.h.bf16 %v7786_v50  ;;  %v7787_v39 = vunpack.i.l.bf16 %v7786_v50  ;;  %v7781_v51 = vpop.permute.xlu0 %7780 }
 0x1b1   : > { %v7783_v54 = vunpack.i.h.bf16 %v7781_v51  ;;  %v7782_v12 = vunpack.i.l.bf16 %v7781_v51  ;;  %8065 = vrot.lane.b32.xlu1 %v8064_v29, %s8995_s29  ;;  %v6303_v51 = vld [vmem:[%s9046_s21 + $0x51] sm:$0xff] }
 0x1b2   : > { %v10660_v19 = vsel %vm4328_vm5, %v10423_v32, %v7787_v39  ;;  %v10664_v58 = vsel %vm4328_vm5, %v10427_v62, %v7788_v46  ;;  %8060 = vrot.lane.b32.xlu0 %v8059_v7, %s8995_s29  ;;  %v8079_v39 = vpack.i.bf16 %v6299_v2, %v6298_v61 }
 0x1b3   : > { %v10669_v60 = vsel %vm4328_vm5, %v10432_v63, %v7782_v12  ;;  %v10673_v29 = vsel %vm4328_vm5, %v10436_v49, %v7783_v54  ;;  %v7796_v32 = vpop.permute.xlu1 %7795  ;;  %v6304_v54 = vld [vmem:[%s9046_s21 + $0x61] sm:$0xff] }
 0x1b4   : > { %v7798_v50 = vunpack.i.h.bf16 %v7796_v32  ;;  %v7797_v62 = vunpack.i.l.bf16 %v7796_v32  ;;  %v7791_v7 = vpop.permute.xlu0 %7790  ;;  %v6301_v32 = vld [vmem:[%s9046_s21 + $0x41] sm:$0xff] }
 0x1b5   : > { %v7793_v46 = vunpack.i.h.bf16 %v7791_v7  ;;  %v7792_v34 = vunpack.i.l.bf16 %v7791_v7  ;;  %8075 = vrot.lane.b32.xlu1 %v8074_v41, %s8995_s29 }
 0x1b6   : > { %v10680_v63 = vsel %vm4328_vm5, %v10443_v20, %v7797_v62  ;;  %v10684_v49 = vsel %vm4328_vm5, %v10447_v21, %v7798_v50  ;;  %8070 = vrot.lane.b32.xlu0 %v8069_v36, %s8995_s29  ;;  %v6302_v21 = vld [vmem:[%s9046_s21 + $0x49] sm:$0xff] }
 0x1b7   : > { %v10692_v12 = vsel %vm4328_vm5, %v10455_v26, %v7792_v34  ;;  %v10696_v41 = vsel %vm4328_vm5, %v10459_v17, %v7793_v46  ;;  %v7806_v20 = vpop.permute.xlu1 %7805  ;;  %v8089_v26 = vpack.i.bf16 %v6304_v54, %v6303_v51  ;;  %v8084_v46 = vpack.i.bf16 %v6302_v21, %v6301_v32  ;;  %v6307_v34 = vld [vmem:[%s9046_s21 + $0x81] sm:$0xff]  ;;  %v6305_v51 = vld [vmem:[%s9046_s21 + $0x69] sm:$0xff]  ;;  %v6306_v54 = vld [vmem:[%s9046_s21 + $0x71] sm:$0xff] }
 0x1b8   : > { %v7808_v50 = vunpack.i.h.bf16 %v7806_v20  ;;  %v7807_v36 = vunpack.i.l.bf16 %v7806_v20  ;;  %v7801_v61 = vpop.permute.xlu0 %7800  ;;  %v6308_v20 = vld [vmem:[%s9046_s21 + $0x89] sm:$0xff] }
 0x1b9   : > { %v7803_v2 = vunpack.i.h.bf16 %v7801_v61  ;;  %v7802_v62 = vunpack.i.l.bf16 %v7801_v61  ;;  %2587 = vrot.lane.b32.xlu1 %v6300_v15, %s8995_s29  ;;  %v8094_v61 = vpack.i.bf16 %v6306_v54, %v6305_v51 }
 0x1ba   : > { %v10703_v7 = vsel %vm4328_vm5, %v10466_v16, %v7807_v36  ;;  %v10707_v17 = vsel %vm4328_vm5, %v10470_v18, %v7808_v50  ;;  %8080 = vrot.lane.b32.xlu0 %v8079_v39, %s8995_s29 }
 0x1bb   : > { %v10714_v13 = vsel %vm4328_vm5, %v10477_v22, %v7802_v62  ;;  %v10718_v15 = vsel %vm4328_vm5, %v10481_v53, %v7803_v2  ;;  %v7816_v16 = vpop.permute.xlu1 %7815  ;;  %v8099_v22 = vpack.i.bf16 %v6308_v20, %v6307_v34  ;;  %v6311_v2 = vld [vmem:[%s9046_s21 + $0xa9] sm:$0xff]  ;;  %v6312_v62 = vld [vmem:[%s9046_s21 + $0xb1] sm:$0xff]  ;;  %v6310_v20 = vld [vmem:[%s9046_s21 + $0xa1] sm:$0xff] }
 0x1bc   : > { %v7818_v18 = vunpack.i.h.bf16 %v7816_v16  ;;  %v7817_v50 = vunpack.i.l.bf16 %v7816_v16  ;;  %v7811_v39 = vpop.permute.xlu0 %7810  ;;  %v6309_v34 = vld [vmem:[%s9046_s21 + $0x91] sm:$0xff] }
 0x1bd   : > { %v7813_v32 = vunpack.i.h.bf16 %v7811_v39  ;;  %v7812_v21 = vunpack.i.l.bf16 %v7811_v39  ;;  %8090 = vrot.lane.b32.xlu1 %v8089_v26, %s8996_s30  ;;  %v8104_v39 = vpack.i.bf16 %v6310_v20, %v6309_v34 }
 0x1be   : > { %v10725_v53 = vsel %vm4328_vm5, %v10488_v47, %v7817_v50  ;;  %v10729_v36 = vsel %vm4328_vm5, %v10492_v30, %v7818_v18  ;;  %8085 = vrot.lane.b32.xlu0 %v8084_v46, %s8996_s30 }
 0x1bf   : > { %v10736_v16 = vsel %vm4328_vm5, %v10499_v8, %v7812_v21  ;;  %v10740_v26 = vsel %vm4328_vm5, %v10503_v24, %v7813_v32  ;;  %v7826_v47 = vpop.permute.xlu1 %7825  ;;  %v8109_v8 = vpack.i.bf16 %v6312_v62, %v6311_v2  ;;  %v6315_v32 = vld [vmem:[%s9046_s21 + $0xd1] sm:$0xff]  ;;  %v6316_v21 = vld [vmem:[%s9046_s21 + $0xe1] sm:$0xff] }
 0x1c0   : > { %v7828_v30 = vunpack.i.h.bf16 %v7826_v47  ;;  %v7827_v18 = vunpack.i.l.bf16 %v7826_v47  ;;  %v7821_v46 = vpop.permute.xlu0 %7820  ;;  %v6313_v2 = vld [vmem:[%s9046_s21 + $0xc1] sm:$0xff] }
 0x1c1   : > { %v7823_v51 = vunpack.i.h.bf16 %v7821_v46  ;;  %v7822_v54 = vunpack.i.l.bf16 %v7821_v46  ;;  %8100 = vrot.lane.b32.xlu1 %v8099_v22, %s8996_s30 }
 0x1c2   : > { %v10747_v50 = vsel %vm4328_vm5, %v10510_v57, %v7827_v18  ;;  %v10751_v24 = vsel %vm4328_vm5, %v10514_v44, %v7828_v30  ;;  %8095 = vrot.lane.b32.xlu0 %v8094_v61, %s8996_s30  ;;  %v6314_v44 = vld [vmem:[%s9046_s21 + $0xc9] sm:$0xff]  ;;  %v6319_v30 = vld [vmem:[%s9046_s21 + $0x101] sm:$0xff] }
 0x1c3   : > { %v10758_v47 = vsel %vm4328_vm5, %v10521_v31, %v7822_v54  ;;  %v10762_v22 = vsel %vm4328_vm5, %v10525_v11, %v7823_v51  ;;  %v2180_v57 = vpop.permute.xlu1 %2179  ;;  %v8119_v31 = vpack.i.bf16 %v6316_v21, %v6315_v32  ;;  %v8114_v11 = vpack.i.bf16 %v6314_v44, %v6313_v2  ;;  %v6320_v18 = vld [vmem:[%s9046_s21 + $0x109] sm:$0xff]  ;;  %v6321_v2 = vld [vmem:[%s9046_s21 + $0x111] sm:$0xff]  ;;  %v6322_v44 = vld [vmem:[%s9046_s21 + $0x121] sm:$0xff] }
 0x1c4   : > { %v10768_v61 = vsel %vm4328_vm5, %v10531_v56, %v2180_v57  ;;  %v7831_v62 = vpop.permute.xlu0 %7830  ;;  %v6317_v54 = vld [vmem:[%s9046_s21 + $0xe9] sm:$0xff]  ;;  %v6324_v57 = vld [vmem:[%s9046_s21 + $0x131] sm:$0xff] }
 0x1c5   : > { %v7833_v34 = vunpack.i.h.bf16 %v7831_v62  ;;  %v7832_v20 = vunpack.i.l.bf16 %v7831_v62  ;;  %8110 = vrot.lane.b32.xlu1 %v8109_v8, %s8996_s30  ;;  %v6318_v8 = vld [vmem:[%s9046_s21 + $0xf1] sm:$0xff]  ;;  %v6323_v21 = vld [vmem:[%s9046_s21 + $0x129] sm:$0xff] }
 0x1c6   : > { %8105 = vrot.lane.b32.xlu0 %v8104_v39, %s8996_s30  ;;  %v8129_v39 = vpack.i.bf16 %v6320_v18, %v6319_v30  ;;  %v6325_v18 = vld [vmem:[%s9046_s21 + $0x141] sm:$0xff] }
 0x1c7   : > { %v10776_v46 = vsel %vm4328_vm5, %v10539_v42, %v7832_v20  ;;  %v10780_v56 = vsel %vm4328_vm5, %v10543_v14, %v7833_v34  ;;  %v10782_v51 = vpop.permute.xlu1 %7840  ;;  %v8124_v42 = vpack.i.bf16 %v6318_v8, %v6317_v54  ;;  %v8139_v34 = vpack.i.bf16 %v6324_v57, %v6323_v21  ;;  %v6326_v54 = vld [vmem:[%s9046_s21 + $0x149] sm:$0xff]  ;;  %v6331_v21 = vld [vmem:[%s9046_s21 + $0x181] sm:$0xff] }
 0x1c8   : > { %14372 = vst [vmem:[#allocation58_spill] sm:$0xff] %v10782_v51  ;;  %v10786_v32 = vpop.permute.xlu0 %7835  ;;  %v8134_v20 = vpack.i.bf16 %v6322_v44, %v6321_v2  ;;  %v6329_v2 = vld [vmem:[%s9046_s21 + $0x169] sm:$0xff]  ;;  %v6330_v44 = vld [vmem:[%s9046_s21 + $0x171] sm:$0xff] }
 0x1c9   : > { %14373 = vst [vmem:[#allocation59_spill] sm:$0xff] %v10786_v32  ;;  %8120 = vrot.lane.b32.xlu1 %v8119_v31, %s8996_s30  ;;  %v6327_v31 = vld [vmem:[%s9046_s21 + $0x151] sm:$0xff] }
 0x1ca   : > { %8115 = vrot.lane.b32.xlu0 %v8114_v11, %s8996_s30  ;;  %v6328_v11 = vld [vmem:[%s9046_s21 + $0x161] sm:$0xff] }
 0x1cb   : > { %v10792_v14 = vpop.permute.xlu1 %7850 }
 0x1cc   : > { %14374 = vst [vmem:[#allocation60_spill] sm:$0xff] %v10792_v14  ;;  %v10796_v62 = vpop.permute.xlu0 %7845 }
 0x1cd   : > { %14375 = vst [vmem:[#allocation61_spill] sm:$0xff] %v10796_v62  ;;  %8130 = vrot.lane.b32.xlu1 %v8129_v39, %s8996_s30  ;;  %v8149_v62 = vpack.i.bf16 %v6328_v11, %v6327_v31  ;;  %v8144_v39 = vpack.i.bf16 %v6326_v54, %v6325_v18  ;;  %v8154_v31 = vpack.i.bf16 %v6330_v44, %v6329_v2  ;;  %v6335_v11 = vld [vmem:[%s9046_s21 + $0x1a9] sm:$0xff]  ;;  %v6336_v18 = vld [vmem:[%s9046_s21 + $0x1b1] sm:$0xff] }
 0x1ce   : > { %8125 = vrot.lane.b32.xlu0 %v8124_v42, %s8996_s30  ;;  %v6332_v42 = vld [vmem:[%s9046_s21 + $0x189] sm:$0xff]  ;;  %v6339_v44 = vld [vmem:[%s9046_s21 + $0x1d1] sm:$0xff] }
 0x1cf   : > { %v10802_v30 = vpop.permute.xlu1 %7860 }
 0x1d0   : > { %14376 = vst [vmem:[#allocation62_spill] sm:$0xff] %v10802_v30  ;;  %v10806_v8 = vpop.permute.xlu0 %7855 }
 0x1d1   : > { %14377 = vst [vmem:[#allocation63_spill] sm:$0xff] %v10806_v8  ;;  %8140 = vrot.lane.b32.xlu1 %v8139_v34, %s8996_s30  ;;  %v8159_v34 = vpack.i.bf16 %v6332_v42, %v6331_v21  ;;  %v6333_v8 = vld [vmem:[%s9046_s21 + $0x191] sm:$0xff] }
 0x1d2   : > { %8135 = vrot.lane.b32.xlu0 %v8134_v20, %s8996_s30 }
 0x1d3   : > { %v10812_v57 = vpop.permute.xlu1 %7870 }
 0x1d4   : > { %14378 = vst [vmem:[#allocation64_spill] sm:$0xff] %v10812_v57  ;;  %v7873_v30 = vunpack.i.h.bf16 %v10812_v57  ;;  %v10817_v14 = vpop.permute.xlu0 %7865  ;;  %v6334_v57 = vld [vmem:[%s9046_s21 + $0x1a1] sm:$0xff] }
 0x1d5   : > { %14379 = vst [vmem:[#allocation65_spill] sm:$0xff] %v10817_v14  ;;  %8150 = vrot.lane.b32.xlu1 %v8149_v62, %s8996_s30  ;;  %v8164_v2 = vpack.i.bf16 %v6334_v57, %v6333_v8 }
 0x1d6   : > { %v10822_v20 = vsel %vm4380_vm6, %v10585_v45, %v7873_v30  ;;  %8145 = vrot.lane.b32.xlu0 %v8144_v39, %s8996_s30  ;;  %v8169_v45 = vpack.i.bf16 %v6336_v18, %v6335_v11  ;;  %v6338_v11 = vld [vmem:[%s9046_s21 + $0x1c9] sm:$0xff] }
 0x1d7   : > { %v7881_v54 = vpop.permute.xlu1 %7880 }
 0x1d8   : > { %v7883_v32 = vunpack.i.h.bf16 %v7881_v54  ;;  %v7882_v14 = vunpack.i.l.bf16 %v7881_v54  ;;  %v7876_v62 = vpop.permute.xlu0 %7875  ;;  %v6340_v54 = vld [vmem:[%s9046_s21 + $0x1e1] sm:$0xff] }
 0x1d9   : > { %v7878_v21 = vunpack.i.h.bf16 %v7876_v62  ;;  %v7877_v42 = vunpack.i.l.bf16 %v7876_v62  ;;  %8160 = vrot.lane.b32.xlu1 %v8159_v34, %s8996_s30 }
 0x1da   : > { %v10832_v30 = vsel %vm4380_vm6, %v10595_v52, %v7882_v14  ;;  %v10836_v39 = vsel %vm4380_vm6, %v10599_v33, %v7883_v32  ;;  %8155 = vrot.lane.b32.xlu0 %v8154_v31, %s8996_s30  ;;  %v6337_v14 = vld [vmem:[%s9046_s21 + $0x1c1] sm:$0xff] }
 0x1db   : > { %v10843_v51 = vsel %vm4380_vm6, %v10606_v40, %v7877_v42  ;;  %v10847_v34 = vsel %vm4380_vm6, %v10610_v23, %v7878_v21  ;;  %v7891_v52 = vpop.permute.xlu1 %7890  ;;  %v8179_v40 = vpack.i.bf16 %v6340_v54, %v6339_v44  ;;  %v8174_v62 = vpack.i.bf16 %v6338_v11, %v6337_v14  ;;  %v6343_v21 = vld [vmem:[%s9046_s21 + $0x201] sm:$0xff]  ;;  %v6344_v42 = vld [vmem:[%s9046_s21 + $0x209] sm:$0xff] }
 0x1dc   : > { %v7893_v33 = vunpack.i.h.bf16 %v7891_v52  ;;  %v7892_v32 = vunpack.i.l.bf16 %v7891_v52  ;;  %v7886_v8 = vpop.permute.xlu0 %7885  ;;  %v6341_v44 = vld [vmem:[%s9046_s21 + $0x1e9] sm:$0xff] }
 0x1dd   : > { %v7888_v57 = vunpack.i.h.bf16 %v7886_v8  ;;  %v7887_v31 = vunpack.i.l.bf16 %v7886_v8  ;;  %8170 = vrot.lane.b32.xlu1 %v8169_v45, %s8996_s30  ;;  %v6348_v8 = vld [vmem:[%s9046_s21 + $0x231] sm:$0xff] }
 0x1de   : > { %v10854_v18 = vsel %vm4380_vm6, %v10617_v43, %v7892_v32  ;;  %v10858_v23 = vsel %vm4380_vm6, %v10621_v9, %v7893_v33  ;;  %8165 = vrot.lane.b32.xlu0 %v8164_v2, %s8996_s30  ;;  %v6342_v9 = vld [vmem:[%s9046_s21 + $0x1f1] sm:$0xff]  ;;  %v8189_v33 = vpack.i.bf16 %v6344_v42, %v6343_v21  ;;  %v6347_v32 = vld [vmem:[%s9046_s21 + $0x229] sm:$0xff]  ;;  %v6346_v21 = vld [vmem:[%s9046_s21 + $0x221] sm:$0xff] }
 0x1df   : > { %v10865_v52 = vsel %vm4380_vm6, %v10628_v59, %v7887_v31  ;;  %v10869_v45 = vsel %vm4380_vm6, %v10632_v48, %v7888_v57  ;;  %v10871_v43 = vpop.permute.xlu1 %7900  ;;  %v8184_v48 = vpack.i.bf16 %v6342_v9, %v6341_v44  ;;  %v8199_v9 = vpack.i.bf16 %v6348_v8, %v6347_v32  ;;  %v6349_v32 = vld [vmem:[%s9046_s21 + $0x241] sm:$0xff]  ;;  %v6350_v8 = vld [vmem:[%s9046_s21 + $0x249] sm:$0xff] }
 0x1e0   : > { %14380 = vst [vmem:[#allocation66_spill] sm:$0xff] %v10871_v43  ;;  %v7903_v2 = vunpack.i.h.bf16 %v10871_v43  ;;  %v7896_v54 = vpop.permute.xlu0 %7895 }
 0x1e1   : > { %v7898_v14 = vunpack.i.h.bf16 %v7896_v54  ;;  %v7897_v11 = vunpack.i.l.bf16 %v7896_v54  ;;  %8180 = vrot.lane.b32.xlu1 %v8179_v40, %s8996_s30  ;;  %v6345_v40 = vld [vmem:[%s9046_s21 + $0x211] sm:$0xff] }
 0x1e2   : > { %v10879_v59 = vsel %vm4380_vm6, %v10642_v1, %v7903_v2  ;;  %8175 = vrot.lane.b32.xlu0 %v8174_v62, %s8996_s30 }
 0x1e3   : > { %v10886_v57 = vsel %vm4380_vm6, %v10649_v55, %v7897_v11  ;;  %v10890_v31 = vsel %vm4380_vm6, %v10653_v0, %v7898_v14  ;;  %v7911_v54 = vpop.permute.xlu1 %7910  ;;  %v8194_v14 = vpack.i.bf16 %v6346_v21, %v6345_v40  ;;  %v6351_v21 = vld [vmem:[%s9046_s21 + $0x251] sm:$0xff] }
 0x1e4   : > { %v7913_v1 = vunpack.i.h.bf16 %v7911_v54  ;;  %v7912_v42 = vunpack.i.l.bf16 %v7911_v54  ;;  %v7906_v2 = vpop.permute.xlu0 %7905 }
 0x1e5   : > { %v7908_v62 = vunpack.i.h.bf16 %v7906_v2  ;;  %v7907_v44 = vunpack.i.l.bf16 %v7906_v2  ;;  %8190 = vrot.lane.b32.xlu1 %v8189_v33, %s8996_s30  ;;  %v6354_v2 = vld [vmem:[%s9046_s21 + $0x52] sm:$0xff] }
 0x1e6   : > { %v10897_v55 = vsel %vm4380_vm6, %v10660_v19, %v7912_v42  ;;  %v10901_v0 = vsel %vm4380_vm6, %v10664_v58, %v7913_v1  ;;  %8185 = vrot.lane.b32.xlu0 %v8184_v48, %s8996_s30  ;;  %v8204_v42 = vpack.i.bf16 %v6350_v8, %v6349_v32 }
 0x1e7   : > { %v10906_v11 = vsel %vm4380_vm6, %v10669_v60, %v7907_v44  ;;  %v10910_v33 = vsel %vm4380_vm6, %v10673_v29, %v7908_v62  ;;  %v7921_v19 = vpop.permute.xlu1 %7920  ;;  %v10927_v62 = vld [vmem:[%s9046_s21 + $0x62] sm:$0xff] }
 0x1e8   : > { %v7923_v54 = vunpack.i.h.bf16 %v7921_v19  ;;  %v7922_v58 = vunpack.i.l.bf16 %v7921_v19  ;;  %v7916_v48 = vpop.permute.xlu0 %7915  ;;  %v6353_v19 = vld [vmem:[%s9046_s21 + $0x4a] sm:$0xff] }
 0x1e9   : > { %v7918_v1 = vunpack.i.h.bf16 %v7916_v48  ;;  %v7917_v40 = vunpack.i.l.bf16 %v7916_v48  ;;  %8200 = vrot.lane.b32.xlu1 %v8199_v9, %s8996_s30 }
 0x1ea   : > { %v10917_v60 = vsel %vm4380_vm6, %v10680_v63, %v7922_v58  ;;  %v10921_v29 = vsel %vm4380_vm6, %v10684_v49, %v7923_v54  ;;  %8195 = vrot.lane.b32.xlu0 %v8194_v14, %s8996_s30  ;;  %v6352_v49 = vld [vmem:[%s9046_s21 + $0x42] sm:$0xff] }
 0x1eb   : > { %v10931_v44 = vsel %vm4380_vm6, %v10692_v12, %v7917_v40  ;;  %v10935_v63 = vsel %vm4380_vm6, %v10696_v41, %v7918_v1  ;;  %v7931_v9 = vpop.permute.xlu1 %7930  ;;  %v8214_v12 = vpack.i.bf16 %v10927_v62, %v6354_v2  ;;  %v8209_v1 = vpack.i.bf16 %v6353_v19, %v6352_v49  ;;  %v10951_v40 = vld [vmem:[%s9046_s21 + $0x82] sm:$0xff] }
 0x1ec   : > { %v7933_v54 = vunpack.i.h.bf16 %v7931_v9  ;;  %v7932_v14 = vunpack.i.l.bf16 %v7931_v9  ;;  %v7926_v32 = vpop.permute.xlu0 %7925  ;;  %v10954_v9 = vld [vmem:[%s9046_s21 + $0x8a] sm:$0xff] }
 0x1ed   : > { %v7928_v8 = vunpack.i.h.bf16 %v7926_v32  ;;  %v7927_v58 = vunpack.i.l.bf16 %v7926_v32  ;;  %2791 = vrot.lane.b32.xlu1 %v6351_v21, %s8996_s30 }
 0x1ee   : > { %v10943_v48 = vsel %vm4380_vm6, %v10703_v7, %v7932_v14  ;;  %v10947_v41 = vsel %vm4380_vm6, %v10707_v17, %v7933_v54  ;;  %8205 = vrot.lane.b32.xlu0 %v8204_v42, %s8996_s30  ;;  %v10965_v17 = vld [vmem:[%s9046_s21 + $0x6a] sm:$0xff]  ;;  %v10968_v54 = vld [vmem:[%s9046_s21 + $0x72] sm:$0xff] }
 0x1ef   : > { %v10958_v21 = vsel %vm4380_vm6, %v10714_v13, %v7927_v58  ;;  %v10962_v2 = vsel %vm4380_vm6, %v10718_v15, %v7928_v8  ;;  %v7941_v7 = vpop.permute.xlu1 %7940  ;;  %v8224_v13 = vpack.i.bf16 %v10954_v9, %v10951_v40  ;;  %v8219_v58 = vpack.i.bf16 %v10968_v54, %v10965_v17 }
 0x1f0   : > { %v7943_v42 = vunpack.i.h.bf16 %v7941_v7  ;;  %v7942_v49 = vunpack.i.l.bf16 %v7941_v7  ;;  %v7936_v19 = vpop.permute.xlu0 %7935  ;;  %v10985_v7 = vld [vmem:[%s9046_s21 + $0xaa] sm:$0xff] }
 0x1f1   : > { %v7938_v14 = vunpack.i.h.bf16 %v7936_v19  ;;  %v7937_v32 = vunpack.i.l.bf16 %v7936_v19  ;;  %8215 = vrot.lane.b32.xlu1 %v8214_v12, %s8997_s5  ;;  %14381 = vst [vmem:[#allocation67_spill] sm:$0xff] %v10985_v7  ;;  %v6363_v19 = vld [vmem:[%s9046_s21 + $0xb2] sm:$0xff] }
 0x1f2   : > { %v10975_v15 = vsel %vm4380_vm6, %v10725_v53, %v7942_v49  ;;  %v10979_v8 = vsel %vm4380_vm6, %v10729_v36, %v7943_v42  ;;  %8210 = vrot.lane.b32.xlu0 %v8209_v1, %s8997_s5  ;;  %v10997_v42 = vld [vmem:[%s9046_s21 + $0x92] sm:$0xff]  ;;  %v11000_v1 = vld [vmem:[%s9046_s21 + $0xa2] sm:$0xff] }
 0x1f3   : > { %v10990_v12 = vsel %vm4380_vm6, %v10736_v16, %v7937_v32  ;;  %v10994_v53 = vsel %vm4380_vm6, %v10740_v26, %v7938_v14  ;;  %v7951_v36 = vpop.permute.xlu1 %7950  ;;  %14382 = vst [vmem:[#allocation68_spill] sm:$0xff] %v11000_v1  ;;  %v8234_v16 = vpack.i.bf16 %v6363_v19, %v10985_v7  ;;  %v8229_v32 = vpack.i.bf16 %v11000_v1, %v10997_v42 }
 0x1f4   : > { %v7953_v49 = vunpack.i.h.bf16 %v7951_v36  ;;  %v7952_v43 = vunpack.i.l.bf16 %v7951_v36  ;;  %v7946_v3 = vpop.permute.xlu0 %7945  ;;  %v6366_v36 = vld [vmem:[%s9046_s21 + $0xd2] sm:$0xff] }
 0x1f5   : > { %v7948_v28 = vunpack.i.h.bf16 %v7946_v3  ;;  %v7947_v38 = vunpack.i.l.bf16 %v7946_v3  ;;  %8225 = vrot.lane.b32.xlu1 %v8224_v13, %s8997_s5  ;;  %v6367_v3 = vld [vmem:[%s9046_s21 + $0xe2] sm:$0xff] }
 0x1f6   : > { %v11006_v26 = vsel %vm4380_vm6, %v10747_v50, %v7952_v43  ;;  %v11010_v14 = vsel %vm4380_vm6, %v10751_v24, %v7953_v49  ;;  %8220 = vrot.lane.b32.xlu0 %v8219_v58, %s8997_s5  ;;  %v11026_v24 = vld [vmem:[%s9046_s21 + $0xc2] sm:$0xff]  ;;  %v6365_v58 = vld [vmem:[%s9046_s21 + $0xca] sm:$0xff] }
 0x1f7   : > { %v11019_v13 = vsel %vm4380_vm6, %v10758_v47, %v7947_v38  ;;  %v11023_v50 = vsel %vm4380_vm6, %v10762_v22, %v7948_v28  ;;  %v2384_v43 = vpop.permute.xlu1 %2383  ;;  %14383 = vst [vmem:[#allocation69_spill] sm:$0xff] %v11026_v24  ;;  %v8244_v38 = vpack.i.bf16 %v6367_v3, %v6366_v36  ;;  %v8239_v28 = vpack.i.bf16 %v6365_v58, %v11026_v24  ;;  %v6370_v47 = vld [vmem:[%s9046_s21 + $0x102] sm:$0xff]  ;;  %v6371_v22 = vld [vmem:[%s9046_s21 + $0x10a] sm:$0xff]  ;;  %v6369_v3 = vld [vmem:[%s9046_s21 + $0xf2] sm:$0xff] }
 0x1f8   : > { %v11031_v19 = vsel %vm4380_vm6, %v10768_v61, %v2384_v43  ;;  %v7956_v49 = vpop.permute.xlu0 %7955  ;;  %v6368_v36 = vld [vmem:[%s9046_s21 + $0xea] sm:$0xff]  ;;  %v8254_v58 = vpack.i.bf16 %v6371_v22, %v6370_v47  ;;  %v6379_v47 = vld [vmem:[%s9046_s21 + $0x162] sm:$0xff] }
 0x1f9   : > { %v7958_v6 = vunpack.i.h.bf16 %v7956_v49  ;;  %v7957_v10 = vunpack.i.l.bf16 %v7956_v49  ;;  %8235 = vrot.lane.b32.xlu1 %v8234_v16, %s8997_s5  ;;  %v6375_v49 = vld [vmem:[%s9046_s21 + $0x132] sm:$0xff] }
 0x1fa   : > { %8230 = vrot.lane.b32.xlu0 %v8229_v32, %s8997_s5 }
 0x1fb   : > { %v11040_v61 = vsel %vm4380_vm6, %v10776_v46, %v7957_v10  ;;  %v11044_v43 = vsel %vm4380_vm6, %v10780_v56, %v7958_v6  ;;  %v11046_v16 = vpop.permute.xlu1 %7965  ;;  %v8249_v10 = vpack.i.bf16 %v6369_v3, %v6368_v36  ;;  %v6374_v46 = vld [vmem:[%s9046_s21 + $0x12a] sm:$0xff]  ;;  %v6372_v56 = vld [vmem:[%s9046_s21 + $0x112] sm:$0xff]  ;;  %v6376_v36 = vld [vmem:[%s9046_s21 + $0x142] sm:$0xff] }
 0x1fc   : > { %14384 = vst [vmem:[#allocation70_spill] sm:$0xff] %v11046_v16  ;;  %v11050_v32 = vpop.permute.xlu0 %7960  ;;  %v6373_v16 = vld [vmem:[%s9046_s21 + $0x122] sm:$0xff]  ;;  %v6377_v3 = vld [vmem:[%s9046_s21 + $0x14a] sm:$0xff] }
 0x1fd   : > { %14385 = vst [vmem:[#allocation71_spill] sm:$0xff] %v11050_v32  ;;  %8245 = vrot.lane.b32.xlu1 %v8244_v38, %s8997_s5  ;;  %v8264_v32 = vpack.i.bf16 %v6375_v49, %v6374_v46  ;;  %v8259_v38 = vpack.i.bf16 %v6373_v16, %v6372_v56  ;;  %v6382_v46 = vld [vmem:[%s9046_s21 + $0x182] sm:$0xff]  ;;  %v6380_v49 = vld [vmem:[%s9046_s21 + $0x16a] sm:$0xff]  ;;  %v6381_v56 = vld [vmem:[%s9046_s21 + $0x172] sm:$0xff] }
 0x1fe   : > { %8240 = vrot.lane.b32.xlu0 %v8239_v28, %s8997_s5  ;;  %v6378_v28 = vld [vmem:[%s9046_s21 + $0x152] sm:$0xff] }
 0x1ff   : > { %v11056_v6 = vpop.permute.xlu1 %7975 }
 0x200   : > { %14386 = vst [vmem:[#allocation72_spill] sm:$0xff] %v11056_v6  ;;  %v11060_v4 = vpop.permute.xlu0 %7970 }
 0x201   : > { %14387 = vst [vmem:[#allocation73_spill] sm:$0xff] %v11060_v4  ;;  %8255 = vrot.lane.b32.xlu1 %v8254_v58, %s8997_s5  ;;  %v8274_v4 = vpack.i.bf16 %v6379_v47, %v6378_v28  ;;  %v8269_v58 = vpack.i.bf16 %v6377_v3, %v6376_v36  ;;  %v8279_v28 = vpack.i.bf16 %v6381_v56, %v6380_v49  ;;  %v6386_v47 = vld [vmem:[%s9046_s21 + $0x1aa] sm:$0xff]  ;;  %v6387_v36 = vld [vmem:[%s9046_s21 + $0x1b2] sm:$0xff] }
 0x202   : > { %8250 = vrot.lane.b32.xlu0 %v8249_v10, %s8997_s5  ;;  %v6383_v10 = vld [vmem:[%s9046_s21 + $0x18a] sm:$0xff]  ;;  %v6390_v56 = vld [vmem:[%s9046_s21 + $0x1d2] sm:$0xff] }
 0x203   : > { %v11066_v22 = vpop.permute.xlu1 %7985 }
 0x204   : > { %14388 = vst [vmem:[#allocation74_spill] sm:$0xff] %v11066_v22  ;;  %v11070_v6 = vpop.permute.xlu0 %7980 }
 0x205   : > { %14389 = vst [vmem:[#allocation75_spill] sm:$0xff] %v11070_v6  ;;  %8265 = vrot.lane.b32.xlu1 %v8264_v32, %s8997_s5  ;;  %v8284_v32 = vpack.i.bf16 %v6383_v10, %v6382_v46  ;;  %v6384_v6 = vld [vmem:[%s9046_s21 + $0x192] sm:$0xff] }
 0x206   : > { %8260 = vrot.lane.b32.xlu0 %v8259_v38, %s8997_s5 }
 0x207   : > { %v11076_v16 = vpop.permute.xlu1 %7995 }
 0x208   : > { %14390 = vst [vmem:[#allocation76_spill] sm:$0xff] %v11076_v16  ;;  %v7998_v22 = vunpack.i.h.bf16 %v11076_v16  ;;  %v11081_v27 = vpop.permute.xlu0 %7990  ;;  %v6385_v16 = vld [vmem:[%s9046_s21 + $0x1a2] sm:$0xff] }
 0x209   : > { %14391 = vst [vmem:[#allocation77_spill] sm:$0xff] %v11081_v27  ;;  %8275 = vrot.lane.b32.xlu1 %v8274_v4, %s8997_s5  ;;  %v8289_v49 = vpack.i.bf16 %v6385_v16, %v6384_v6 }
 0x20a   : > { %v11086_v38 = vsel %vm4432_vm7, %v10822_v20, %v7998_v22  ;;  %8270 = vrot.lane.b32.xlu0 %v8269_v58, %s8997_s5  ;;  %v8294_v20 = vpack.i.bf16 %v6387_v36, %v6386_v47  ;;  %v6389_v47 = vld [vmem:[%s9046_s21 + $0x1ca] sm:$0xff] }
 0x20b   : > { %v8006_v3 = vpop.permute.xlu1 %8005 }
 0x20c   : > { %v8008_v5 = vunpack.i.h.bf16 %v8006_v3  ;;  %v8007_v27 = vunpack.i.l.bf16 %v8006_v3  ;;  %v8001_v4 = vpop.permute.xlu0 %8000  ;;  %v6391_v3 = vld [vmem:[%s9046_s21 + $0x1e2] sm:$0xff] }
 0x20d   : > { %v8003_v46 = vunpack.i.h.bf16 %v8001_v4  ;;  %v8002_v10 = vunpack.i.l.bf16 %v8001_v4  ;;  %8285 = vrot.lane.b32.xlu1 %v8284_v32, %s8997_s5 }
 0x20e   : > { %v11096_v22 = vsel %vm4432_vm7, %v10832_v30, %v8007_v27  ;;  %v11100_v58 = vsel %vm4432_vm7, %v10836_v39, %v8008_v5  ;;  %8280 = vrot.lane.b32.xlu0 %v8279_v28, %s8997_s5  ;;  %v6388_v30 = vld [vmem:[%s9046_s21 + $0x1c2] sm:$0xff] }
 0x20f   : > { %v11107_v25 = vsel %vm4432_vm7, %v10843_v51, %v8002_v10  ;;  %v11111_v32 = vsel %vm4432_vm7, %v10847_v34, %v8003_v46  ;;  %v8016_v27 = vpop.permute.xlu1 %8015  ;;  %v8304_v51 = vpack.i.bf16 %v6391_v3, %v6390_v56  ;;  %v8299_v4 = vpack.i.bf16 %v6389_v47, %v6388_v30  ;;  %v6394_v46 = vld [vmem:[%s9046_s21 + $0x202] sm:$0xff]  ;;  %v6395_v10 = vld [vmem:[%s9046_s21 + $0x20a] sm:$0xff] }
 0x210   : > { %v8018_v5 = vunpack.i.h.bf16 %v8016_v27  ;;  %v8017_v39 = vunpack.i.l.bf16 %v8016_v27  ;;  %v8011_v6 = vpop.permute.xlu0 %8010  ;;  %v6392_v56 = vld [vmem:[%s9046_s21 + $0x1ea] sm:$0xff] }
 0x211   : > { %v8013_v16 = vunpack.i.h.bf16 %v8011_v6  ;;  %v8012_v28 = vunpack.i.l.bf16 %v8011_v6  ;;  %8295 = vrot.lane.b32.xlu1 %v8294_v20, %s8997_s5  ;;  %v6399_v6 = vld [vmem:[%s9046_s21 + $0x232] sm:$0xff] }
 0x212   : > { %v11118_v36 = vsel %vm4432_vm7, %v10854_v18, %v8017_v39  ;;  %v11122_v34 = vsel %vm4432_vm7, %v10858_v23, %v8018_v5  ;;  %8290 = vrot.lane.b32.xlu0 %v8289_v49, %s8997_s5  ;;  %v6393_v23 = vld [vmem:[%s9046_s21 + $0x1f2] sm:$0xff]  ;;  %v8314_v5 = vpack.i.bf16 %v6395_v10, %v6394_v46  ;;  %v6398_v39 = vld [vmem:[%s9046_s21 + $0x22a] sm:$0xff]  ;;  %v6397_v46 = vld [vmem:[%s9046_s21 + $0x222] sm:$0xff] }
 0x213   : > { %v11129_v27 = vsel %vm4432_vm7, %v10865_v52, %v8012_v28  ;;  %v11133_v20 = vsel %vm4432_vm7, %v10869_v45, %v8013_v16  ;;  %v11135_v18 = vpop.permute.xlu1 %8025  ;;  %v8309_v45 = vpack.i.bf16 %v6393_v23, %v6392_v56  ;;  %v8324_v23 = vpack.i.bf16 %v6399_v6, %v6398_v39  ;;  %v6400_v39 = vld [vmem:[%s9046_s21 + $0x242] sm:$0xff]  ;;  %v6401_v6 = vld [vmem:[%s9046_s21 + $0x24a] sm:$0xff] }
 0x214   : > { %14392 = vst [vmem:[#allocation78_spill] sm:$0xff] %v11135_v18  ;;  %v8028_v49 = vunpack.i.h.bf16 %v11135_v18  ;;  %v8021_v3 = vpop.permute.xlu0 %8020 }
 0x215   : > { %v8023_v30 = vunpack.i.h.bf16 %v8021_v3  ;;  %v8022_v47 = vunpack.i.l.bf16 %v8021_v3  ;;  %8305 = vrot.lane.b32.xlu1 %v8304_v51, %s8997_s5  ;;  %v6396_v51 = vld [vmem:[%s9046_s21 + $0x212] sm:$0xff] }
 0x216   : > { %v11143_v52 = vsel %vm4432_vm7, %v10879_v59, %v8028_v49  ;;  %8300 = vrot.lane.b32.xlu0 %v8299_v4, %s8997_s5 }
 0x217   : > { %v11150_v16 = vsel %vm4432_vm7, %v10886_v57, %v8022_v47  ;;  %v11154_v28 = vsel %vm4432_vm7, %v10890_v31, %v8023_v30  ;;  %v8036_v3 = vpop.permute.xlu1 %8035  ;;  %v8319_v30 = vpack.i.bf16 %v6397_v46, %v6396_v51  ;;  %v6402_v46 = vld [vmem:[%s9046_s21 + $0x252] sm:$0xff] }
 0x218   : > { %v8038_v59 = vunpack.i.h.bf16 %v8036_v3  ;;  %v8037_v10 = vunpack.i.l.bf16 %v8036_v3  ;;  %v8031_v49 = vpop.permute.xlu0 %8030 }
 0x219   : > { %v8033_v4 = vunpack.i.h.bf16 %v8031_v49  ;;  %v8032_v56 = vunpack.i.l.bf16 %v8031_v49  ;;  %8315 = vrot.lane.b32.xlu1 %v8314_v5, %s8997_s5  ;;  %v6405_v49 = vld [vmem:[%s9046_s21 + $0x53] sm:$0xff] }
 0x21a   : > { %v11161_v57 = vsel %vm4432_vm7, %v10897_v55, %v8037_v10  ;;  %v11165_v31 = vsel %vm4432_vm7, %v10901_v0, %v8038_v59  ;;  %8310 = vrot.lane.b32.xlu0 %v8309_v45, %s8997_s5  ;;  %v8329_v10 = vpack.i.bf16 %v6401_v6, %v6400_v39 }
 0x21b   : > { %v11170_v47 = vsel %vm4432_vm7, %v10906_v11, %v8032_v56  ;;  %v11174_v5 = vsel %vm4432_vm7, %v10910_v33, %v8033_v4  ;;  %v8046_v55 = vpop.permute.xlu1 %8045  ;;  %v11191_v4 = vld [vmem:[%s9046_s21 + $0x63] sm:$0xff] }
 0x21c   : > { %v8048_v3 = vunpack.i.h.bf16 %v8046_v55  ;;  %v8047_v0 = vunpack.i.l.bf16 %v8046_v55  ;;  %v8041_v45 = vpop.permute.xlu0 %8040  ;;  %v6404_v55 = vld [vmem:[%s9046_s21 + $0x4b] sm:$0xff] }
 0x21d   : > { %v8043_v59 = vunpack.i.h.bf16 %v8041_v45  ;;  %v8042_v51 = vunpack.i.l.bf16 %v8041_v45  ;;  %8325 = vrot.lane.b32.xlu1 %v8324_v23, %s8997_s5  ;;  %v11206_v45 = vld [vmem:[%s9046_s21 + $0x83] sm:$0xff] }
 0x21e   : > { %v11181_v11 = vsel %vm4432_vm7, %v10917_v60, %v8047_v0  ;;  %v11185_v33 = vsel %vm4432_vm7, %v10921_v29, %v8048_v3  ;;  %8320 = vrot.lane.b32.xlu0 %v8319_v30, %s8997_s5  ;;  %v6403_v29 = vld [vmem:[%s9046_s21 + $0x43] sm:$0xff] }
 0x21f   : > { %v11195_v56 = vsel %vm4432_vm7, %v10931_v44, %v8042_v51  ;;  %v11199_v60 = vsel %vm4432_vm7, %v10935_v63, %v8043_v59  ;;  %v8056_v23 = vpop.permute.xlu1 %8055  ;;  %v8339_v44 = vpack.i.bf16 %v11191_v4, %v6405_v49  ;;  %v8334_v51 = vpack.i.bf16 %v6404_v55, %v6403_v29  ;;  %v4849_v49 = vld [vmem:[%s14161_s1 + $0x8] sm:$0xff]  ;;  %v11238_v55 = vld [vmem:[%s9046_s21 + $0x73] sm:$0xff] }
 0x220   : > { %v8058_v3 = vunpack.i.h.bf16 %v8056_v23  ;;  %v8057_v30 = vunpack.i.l.bf16 %v8056_v23  ;;  %v8051_v0 = vpop.permute.xlu0 %8050  ;;  %v11218_v23 = vld [vmem:[%s9046_s21 + $0x8b] sm:$0xff] }
 0x221   : > { %v8053_v39 = vunpack.i.h.bf16 %v8051_v0  ;;  %v8052_v6 = vunpack.i.l.bf16 %v8051_v0  ;;  %2995 = vrot.lane.b32.xlu1 %v6402_v46, %s8997_s5  ;;  %14393 = vst [vmem:[#allocation79_spill] sm:$0xff] %v11218_v23  ;;  %v4848_v46 = vld [vmem:[%s14161_s1] sm:$0xff]  ;;  %v11235_v29 = vld [vmem:[%s9046_s21 + $0x6b] sm:$0xff] }
 0x222   : > { %v11210_v63 = vsel %vm4432_vm7, %v10943_v48, %v8057_v30  ;;  %v11214_v59 = vsel %vm4432_vm7, %v10947_v41, %v8058_v3  ;;  %8330 = vrot.lane.b32.xlu0 %v8329_v10, %s8997_s5  ;;  %v7017_v3 = vpack.c.bf16 %v4849_v49, %v4848_v46 }
 0x223   : > { %v11228_v48 = vsel %vm4432_vm7, %v10958_v21, %v8052_v6  ;;  %v11232_v41 = vsel %vm4432_vm7, %v10962_v2, %v8053_v39  ;;  %v8066_v10 = vpop.permute.xlu1 %8065  ;;  %v8349_v2 = vpack.i.bf16 %v11218_v23, %v11206_v45  ;;  %v11246_v39 = vld [vmem:[%s9046_s21 + $0xab] sm:$0xff]  ;;  %v14397_v23 = vmov 0.0|0.0  }
 0x224   : > { %v8068_v30 = vunpack.i.h.bf16 %v8066_v10  ;;  %v8067_v0 = vunpack.i.l.bf16 %v8066_v10  ;;  %v8061_v18 = vpop.permute.xlu0 %8060  ;;  %14394 = vst [vmem:[#allocation80_spill] sm:$0xff] %v11246_v39  ;;  %7018 = vmatpush3.bf16.msra.mxu0 %v7017_v3  ;;  %v4850_v10 = vld [vmem:[%s14161_s1 + $0x10] sm:$0xff]  ;;  %7048 = vmatpush3.bf16.msra.mxu1 %v7017_v3 }
 0x225   : > { %v8063_v21 = vunpack.i.h.bf16 %v8061_v18  ;;  %v8062_v6 = vunpack.i.l.bf16 %v8061_v18  ;;  %8340 = vrot.lane.b32.xlu1 %v8339_v44, %s8999_s10  ;;  %v8344_v18 = vpack.i.bf16 %v11238_v55, %v11235_v29  ;;  %v11260_v44 = vld [vmem:[%s9046_s21 + $0xb3] sm:$0xff]  ;;  %7019 = vmatprep.subr.bf16.mxu0 %v14243_v37  ;;  %v11281_v37 = vld [vmem:[%s9046_s21 + $0xa3] sm:$0xff] }
 0x226   : > { %v11250_v46 = vsel %vm4432_vm7, %v10975_v15, %v8067_v0  ;;  %v11254_v49 = vsel %vm4432_vm7, %v10979_v8, %v8068_v30  ;;  %8335 = vrot.lane.b32.xlu0 %v8334_v51, %s8999_s10  ;;  %14396 = vst [vmem:[#allocation82_spill] sm:$0xff] %v11260_v44  ;;  %v4851_v15 = vld [vmem:[%s14161_s1 + $0x18] sm:$0xff]  ;;  %7041 = vmatprep.subr.bf16.mxu1 %v14397_v23 }
 0x227   : > { %14395 = vst [vmem:[#allocation81_spill] sm:$0xff] %v11254_v49  ;;  %v11271_v8 = vsel %vm4432_vm7, %v10990_v12, %v8062_v6  ;;  %v11275_v51 = vsel %vm4432_vm7, %v10994_v53, %v8063_v21  ;;  %v8076_v30 = vpop.permute.xlu1 %8075  ;;  %v11278_v0 = vld [vmem:[%s9046_s21 + $0x93] sm:$0xff]  ;;  %v7020_v24 = vpack.c.bf16 %v4851_v15, %v4850_v10  ;;  %v8359_v53 = vpack.i.bf16 %v11260_v44, %v11246_v39  ;;  %v4852_v10 = vld [vmem:[%s14161_s1 + $0x20] sm:$0xff]  ;;  %v11323_v15 = vld [vmem:[%s9046_s21 + $0xcb] sm:$0xff] }
 0x228   : > { %v8078_v35 = vunpack.i.h.bf16 %v8076_v30  ;;  %v8077_v7 = vunpack.i.l.bf16 %v8076_v30  ;;  %v8071_v1 = vpop.permute.xlu0 %8070  ;;  %v11288_v21 = vld [vmem:[%s9046_s21 + $0xd3] sm:$0xff]  ;;  %14401 = vst [vmem:[#allocation86_spill] sm:$0xff] %v11323_v15 }
 0x229   : > { %v8073_v49 = vunpack.i.h.bf16 %v8071_v1  ;;  %v8072_v12 = vunpack.i.l.bf16 %v8071_v1  ;;  %8350 = vrot.lane.b32.xlu1 %v8349_v2, %s8999_s10  ;;  %14398 = vst [vmem:[#allocation83_spill] sm:$0xff] %v11288_v21  ;;  %7021 = vmatpush3.bf16.msra.mxu0 %v7020_v24  ;;  %v8354_v1 = vpack.i.bf16 %v11281_v37, %v11278_v0  ;;  %v11302_v2 = vld [vmem:[%s9046_s21 + $0xe3] sm:$0xff] }
 0x22a   : > { %v11292_v3 = vsel %vm4432_vm7, %v11006_v26, %v8077_v7  ;;  %v11296_v6 = vsel %vm4432_vm7, %v11010_v14, %v8078_v35  ;;  %8345 = vrot.lane.b32.xlu0 %v8344_v18, %s8999_s10  ;;  %14399 = vst [vmem:[#allocation84_spill] sm:$0xff] %v11302_v2  ;;  %7022 = vmatprep.subr.bf16.mxu0 %v14397_v23  ;;  %v4853_v7 = vld [vmem:[%s14161_s1 + $0x28] sm:$0xff] }
 0x22b   : > { %v11313_v35 = vsel %vm4432_vm7, %v11019_v13, %v8072_v12  ;;  %v11317_v26 = vsel %vm4432_vm7, %v11023_v50, %v8073_v49  ;;  %v2588_v14 = vpop.permute.xlu1 %2587  ;;  %v11320_v18 = vld [vmem:[%s9046_s21 + $0xc3] sm:$0xff]  ;;  %v7023_v30 = vpack.c.bf16 %v4853_v7, %v4852_v10  ;;  %7049 = vmatpush3.bf16.msra.mxu1 %v7020_v24  ;;  %v8369_v49 = vpack.i.bf16 %v11302_v2, %v11288_v21  ;;  %v11361_v2 = vld [vmem:[%s9046_s21 + $0xf3] sm:$0xff] }
 0x22c   : > { %14400 = vst [vmem:[#allocation85_spill] sm:$0xff] %v11320_v18  ;;  %v11327_v44 = vsel %vm4432_vm7, %v11031_v19, %v2588_v14  ;;  %v8081_v39 = vpop.permute.xlu0 %8080  ;;  %7042 = vmatprep.subr.bf16.mxu1 %v14397_v23  ;;  %v11334_v12 = vld [vmem:[%s9046_s21 + $0x103] sm:$0xff]  ;;  %v8364_v24 = vpack.i.bf16 %v11323_v15, %v11320_v18  ;;  %v6422_v19 = vld [vmem:[%s9046_s21 + $0x10b] sm:$0xff]  ;;  %14406 = vst [vmem:[#allocation91_spill] sm:$0xff] %v11361_v2 }
 0x22d   : > { %v8083_v13 = vunpack.i.h.bf16 %v8081_v39  ;;  %v8082_v50 = vunpack.i.l.bf16 %v8081_v39  ;;  %8360 = vrot.lane.b32.xlu1 %v8359_v53, %s8999_s10  ;;  %14402 = vst [vmem:[#allocation87_spill] sm:$0xff] %v11334_v12  ;;  %7024 = vmatpush3.bf16.msra.mxu0 %v7023_v30  ;;  %v4854_v39 = vld [vmem:[%s14161_s1 + $0x30] sm:$0xff]  ;;  %v4855_v53 = vld [vmem:[%s14161_s1 + $0x38] sm:$0xff] }
 0x22e   : > { %8355 = vrot.lane.b32.xlu0 %v8354_v1, %s8999_s10  ;;  %7025 = vmatprep.subr.bf16.mxu0 %v14397_v23  ;;  %v11358_v14 = vld [vmem:[%s9046_s21 + $0xeb] sm:$0xff]  ;;  %v7026_v21 = vpack.c.bf16 %v4855_v53, %v4854_v39  ;;  %v6423_v39 = vld [vmem:[%s9046_s21 + $0x113] sm:$0xff]  ;;  %v6424_v53 = vld [vmem:[%s9046_s21 + $0x123] sm:$0xff] }
 0x22f   : > { %v11349_v10 = vsel %vm4432_vm7, %v11040_v61, %v8082_v50  ;;  %v11353_v1 = vsel %vm4432_vm7, %v11044_v43, %v8083_v13  ;;  %v11355_v7 = vpop.permute.xlu1 %8090  ;;  %14405 = vst [vmem:[#allocation90_spill] sm:$0xff] %v11358_v14  ;;  %7050 = vmatpush3.bf16.msra.mxu1 %v7023_v30  ;;  %v8379_v61 = vpack.i.bf16 %v6422_v19, %v11334_v12  ;;  %v6425_v43 = vld [vmem:[%s9046_s21 + $0x12b] sm:$0xff]  ;;  %v6426_v50 = vld [vmem:[%s9046_s21 + $0x133] sm:$0xff]  ;;  %v4856_v30 = vld [vmem:[%s14161_s1 + $0x40] sm:$0xff] }
 0x230   : > { %14403 = vst [vmem:[#allocation88_spill] sm:$0xff] %v11353_v1  ;;  %14404 = vst [vmem:[#allocation89_spill] sm:$0xff] %v11355_v7  ;;  %v11363_v15 = vpop.permute.xlu0 %8085  ;;  %7043 = vmatprep.subr.bf16.mxu1 %v14397_v23  ;;  %v8374_v13 = vpack.i.bf16 %v11361_v2, %v11358_v14  ;;  %v8389_v7 = vpack.i.bf16 %v6426_v50, %v6425_v43  ;;  %v6429_v12 = vld [vmem:[%s9046_s21 + $0x153] sm:$0xff]  ;;  %v8384_v2 = vpack.i.bf16 %v6424_v53, %v6423_v39  ;;  %v6427_v43 = vld [vmem:[%s9046_s21 + $0x143] sm:$0xff] }
 0x231   : > { %14407 = vst [vmem:[#allocation92_spill] sm:$0xff] %v11363_v15  ;;  %8370 = vrot.lane.b32.xlu1 %v8369_v49, %s8999_s10  ;;  %7027 = vmatpush3.bf16.msra.mxu0 %v7026_v21  ;;  %v4857_v49 = vld [vmem:[%s14161_s1 + $0x48] sm:$0xff]  ;;  %v11436_v18 = vld [vmem:[%s9046_s21 + $0x193] sm:$0xff] }
 0x232   : > { %8365 = vrot.lane.b32.xlu0 %v8364_v24, %s8999_s10  ;;  %7028 = vmatprep.subr.bf16.mxu0 %v14397_v23  ;;  %v7029_v24 = vpack.c.bf16 %v4857_v49, %v4856_v30  ;;  %v4859_v30 = vld [vmem:[%s14161_s1 + $0x58] sm:$0xff]  ;;  %v6428_v50 = vld [vmem:[%s9046_s21 + $0x14b] sm:$0xff]  ;;  %v11407_v53 = vld [vmem:[%s9046_s21 + $0x183] sm:$0xff]  ;;  %14417 = vst [vmem:[#allocation102_spill] sm:$0xff] %v11436_v18 }
 0x233   : > { %v11380_v19 = vpop.permute.xlu1 %8100  ;;  %7051 = vmatpush3.bf16.msra.mxu1 %v7026_v21  ;;  %v4858_v21 = vld [vmem:[%s14161_s1 + $0x50] sm:$0xff]  ;;  %14412 = vst [vmem:[#allocation97_spill] sm:$0xff] %v11407_v53  ;;  %v6455_v14 = vld [vmem:[%s9046_s21 + $0x68] sm:$0xff] }
 0x234   : > { %14408 = vst [vmem:[#allocation93_spill] sm:$0xff] %v11380_v19  ;;  %v11384_v15 = vpop.permute.xlu0 %8095  ;;  %7044 = vmatprep.subr.bf16.mxu1 %v14397_v23  ;;  %v6430_v19 = vld [vmem:[%s9046_s21 + $0x163] sm:$0xff]  ;;  %v7032_v49 = vpack.c.bf16 %v4859_v30, %v4858_v21 }
 0x235   : > { %14409 = vst [vmem:[#allocation94_spill] sm:$0xff] %v11384_v15  ;;  %8380 = vrot.lane.b32.xlu1 %v8379_v61, %s8999_s10  ;;  %7030 = vmatpush3.bf16.msra.mxu0 %v7029_v24  ;;  %v8399_v39 = vpack.i.bf16 %v6430_v19, %v6429_v12  ;;  %v8394_v15 = vpack.i.bf16 %v6428_v50, %v6427_v43  ;;  %v4861_v12 = vld [vmem:[%s14161_s1 + $0x68] sm:$0xff] }
 0x236   : > { %8375 = vrot.lane.b32.xlu0 %v8374_v13, %s8999_s10  ;;  %7031 = vmatprep.subr.bf16.mxu0 %v14397_v23  ;;  %v6431_v19 = vld [vmem:[%s9046_s21 + $0x16b] sm:$0xff] }
 0x237   : > { %v11398_v61 = vpop.permute.xlu1 %8110  ;;  %7052 = vmatpush3.bf16.msra.mxu1 %v7029_v24  ;;  %v4860_v24 = vld [vmem:[%s14161_s1 + $0x60] sm:$0xff] }
 0x238   : > { %14410 = vst [vmem:[#allocation95_spill] sm:$0xff] %v11398_v61  ;;  %v11402_v13 = vpop.permute.xlu0 %8105  ;;  %7045 = vmatprep.subr.bf16.mxu1 %v14397_v23  ;;  %v11411_v61 = vld [vmem:[%s9046_s21 + $0x18b] sm:$0xff]  ;;  %v7035_v21 = vpack.c.bf16 %v4861_v12, %v4860_v24  ;;  %v6436_v12 = vld [vmem:[%s9046_s21 + $0x1a3] sm:$0xff] }
 0x239   : > { %14411 = vst [vmem:[#allocation96_spill] sm:$0xff] %v11402_v13  ;;  %8390 = vrot.lane.b32.xlu1 %v8389_v7, %s8999_s10  ;;  %7033 = vmatpush3.bf16.msra.mxu0 %v7032_v49  ;;  %14413 = vst [vmem:[#allocation98_spill] sm:$0xff] %v11411_v61  ;;  %v8409_v50 = vpack.i.bf16 %v11411_v61, %v11407_v53  ;;  %v6454_v13 = vld [vmem:[%s9046_s21 + $0x60] sm:$0xff] }
 0x23a   : > { %8385 = vrot.lane.b32.xlu0 %v8384_v2, %s8999_s10  ;;  %7034 = vmatprep.subr.bf16.mxu0 %v14397_v23  ;;  %v11424_v2 = vld [vmem:[%s9046_s21 + $0x173] sm:$0xff] }
 0x23b   : > { %v11420_v7 = vpop.permute.xlu1 %8120  ;;  %14415 = vst [vmem:[#allocation100_spill] sm:$0xff] %v11424_v2  ;;  %7053 = vmatpush3.bf16.msra.mxu1 %v7032_v49  ;;  %v8404_v24 = vpack.i.bf16 %v11424_v2, %v6431_v19  ;;  %v8419_v2 = vpack.i.bf16 %v6455_v14, %v6454_v13 }
 0x23c   : > { %14414 = vst [vmem:[#allocation99_spill] sm:$0xff] %v11420_v7  ;;  %v8123_v30 = vunpack.i.h.bf16 %v11420_v7  ;;  %v11427_v43 = vpop.permute.xlu0 %8115  ;;  %7046 = vmatprep.subr.bf16.mxu1 %v14397_v23 }
 0x23d   : > { %14416 = vst [vmem:[#allocation101_spill] sm:$0xff] %v11427_v43  ;;  %8400 = vrot.lane.b32.xlu1 %v8399_v39, %s8999_s10  ;;  %7036 = vmatpush3.bf16.msra.mxu0 %v7035_v21  ;;  %v4862_v39 = vld [vmem:[%s14161_s1 + $0x70] sm:$0xff]  ;;  %v4863_v43 = vld [vmem:[%s14161_s1 + $0x78] sm:$0xff] }
 0x23e   : > { %v11440_v49 = vsel %vm4484_vm8, %v11086_v38, %v8123_v30  ;;  %8395 = vrot.lane.b32.xlu0 %v8394_v15, %s8999_s10  ;;  %7037 = vmatprep.subr.bf16.mxu0 %v14397_v23  ;;  %v7038_v61 = vpack.c.bf16 %v4863_v43, %v4862_v39  ;;  %v6506_v43 = vld [vmem:[%s9046_s21 + $0x69] sm:$0xff] }
 0x23f   : > { %14418 = vst [vmem:[#allocation103_spill] sm:$0xff] %v11440_v49  ;;  %v8131_v7 = vpop.permute.xlu1 %8130  ;;  %7054 = vmatpush3.bf16.msra.mxu1 %v7035_v21  ;;  %v8414_v49 = vpack.i.bf16 %v6436_v12, %v11436_v18  ;;  %v8965_v18 = vld [vmem:[%s9046_s21 + $0x70] sm:$0xff] }
 0x240   : > { %v8133_v38 = vunpack.i.h.bf16 %v8131_v7  ;;  %v8132_v30 = vunpack.i.l.bf16 %v8131_v7  ;;  %v8126_v15 = vpop.permute.xlu0 %8125  ;;  %7047 = vmatprep.subr.bf16.mxu1 %v14397_v23  ;;  %v6505_v7 = vld [vmem:[%s9046_s21 + $0x61] sm:$0xff] }
 0x241   : > { %v8128_v19 = vunpack.i.h.bf16 %v8126_v15  ;;  %v8127_v53 = vunpack.i.l.bf16 %v8126_v15  ;;  %8410 = vrot.lane.b32.xlu1 %v8409_v50, %s8999_s10  ;;  %7039 = vmatpush3.bf16.msra.mxu0 %v7038_v61  ;;  %v8424_v39 = vpack.i.bf16 %v6506_v43, %v6505_v7 }
 0x242   : > { %v11457_v1 = vsel %vm4484_vm8, %v11096_v22, %v8132_v30  ;;  %v11461_v21 = vsel %vm4484_vm8, %v11100_v58, %v8133_v38  ;;  %8405 = vrot.lane.b32.xlu0 %v8404_v24, %s8999_s10  ;;  %v14270_v22 = vmov 0.0   ;;  %v6456_v38 = vld [vmem:[%s9046_s21 + $0x70] sm:$0xff]  ;;  %v6457_v30 = vld [vmem:[%s9046_s21 + $0x80] sm:$0xff] }
 0x243   : > { %v11466_v23 = vsel %vm4484_vm8, %v11107_v25, %v8127_v53  ;;  %v11470_v14 = vsel %vm4484_vm8, %v11111_v32, %v8128_v19  ;;  %v8141_v13 = vpop.permute.xlu1 %8140  ;;  %6863 = vmatprep.mubr.msk.f32.mxu0 %vm9000_vm9, %v14270_v22  ;;  %7055 = vmatpush3.bf16.msra.mxu1 %v7038_v61  ;;  %v8429_v53 = vpack.i.bf16 %v10965_v17, %v10927_v62 }
 0x244   : > { %v8143_v58 = vunpack.i.h.bf16 %v8141_v13  ;;  %v8142_v50 = vunpack.i.l.bf16 %v8141_v13  ;;  %v8136_v24 = vpop.permute.xlu0 %8135  ;;  %6941 = vmatprep.mubr.msk.f32.mxu1 %vm9000_vm9, %v14270_v22  ;;  %v8439_v19 = vpack.i.bf16 %v6457_v30, %v6456_v38  ;;  %v6459_v38 = vld [vmem:[%s9046_s21 + $0x90] sm:$0xff]  ;;  %v14420_v30 = vld [vmem:[#allocation4_spill] sm:$0xff] }
 0x245   : > { %v8138_v25 = vunpack.i.h.bf16 %v8136_v24  ;;  %v8137_v32 = vunpack.i.l.bf16 %v8136_v24  ;;  %8420 = vrot.lane.b32.xlu1 %v8419_v2, %s9002_s19 }
 0x246   : > { %v11483_v12 = vsel %vm4484_vm8, %v11118_v36, %v8142_v50  ;;  %v11487_v61 = vsel %vm4484_vm8, %v11122_v34, %v8143_v58  ;;  %8415 = vrot.lane.b32.xlu0 %v8414_v49, %s8999_s10  ;;  %v6507_v58 = vld [vmem:[%s9046_s21 + $0x71] sm:$0xff] }
 0x247   : > { %v11494_v15 = vsel %vm4484_vm8, %v11129_v27, %v8137_v32  ;;  %v11498_v62 = vsel %vm4484_vm8, %v11133_v20, %v8138_v25  ;;  %v11500_v17 = vpop.permute.xlu1 %8150  ;;  %v8434_v20 = vpack.i.bf16 %v11235_v29, %v11191_v4 }
 0x248   : > { %14419 = vst [vmem:[#allocation104_spill] sm:$0xff] %v11500_v17  ;;  %v8153_v36 = vunpack.i.h.bf16 %v11500_v17  ;;  %v8146_v34 = vpop.permute.xlu0 %8145  ;;  %v8964_v17 = vld [vmem:[%s9046_s21 + $0x68] sm:$0xff] }
 0x249   : > { %v8148_v2 = vunpack.i.h.bf16 %v8146_v34  ;;  %v8147_v49 = vunpack.i.l.bf16 %v8146_v34  ;;  %8430 = vrot.lane.b32.xlu1 %v8429_v53, %s9003_s20 }
 0x24a   : > { %v11506_v27 = vsel %vm4484_vm8, %v11143_v52, %v8153_v36  ;;  %8425 = vrot.lane.b32.xlu0 %v8424_v39, %s9004_s22  ;;  %v6508_v52 = vld [vmem:[%s9046_s21 + $0x81] sm:$0xff]  ;;  %v7097_v36 = vunpack.i.l.bf16 %v14420_v30 }
 0x24b   : > { %v11513_v13 = vsel %vm4484_vm8, %v11150_v16, %v8147_v49  ;;  %v11517_v7 = vsel %vm4484_vm8, %v11154_v28, %v8148_v2  ;;  %v8161_v43 = vpop.permute.xlu1 %8160  ;;  %v8449_v16 = vpack.i.bf16 %v10951_v40, %v10968_v54  ;;  %v8444_v29 = vpack.i.bf16 %v6508_v52, %v6507_v58  ;;  %v6458_v39 = vld [vmem:[%s9046_s21 + $0x88] sm:$0xff] }
 0x24c   : > { %v8163_v50 = vunpack.i.h.bf16 %v8161_v43  ;;  %v8162_v24 = vunpack.i.l.bf16 %v8161_v43  ;;  %v8156_v25 = vpop.permute.xlu0 %8155  ;;  %v14421_v43 = vld [vmem:[#allocation5_spill] sm:$0xff] }
 0x24d   : > { %v8158_v32 = vunpack.i.h.bf16 %v8156_v25  ;;  %v8157_v53 = vunpack.i.l.bf16 %v8156_v25  ;;  %8440 = vrot.lane.b32.xlu1 %v8439_v19, %s9002_s19  ;;  %v7087_v58 = vunpack.i.l.bf16 %v14421_v43 }
 0x24e   : > { %v11526_v4 = vsel %vm4484_vm8, %v11161_v57, %v8162_v24  ;;  %v11530_v28 = vsel %vm4484_vm8, %v11165_v31, %v8163_v50  ;;  %8435 = vrot.lane.b32.xlu0 %v8434_v20, %s9005_s23  ;;  %v7098_v57 = vunpack.i.h.bf16 %v14420_v30  ;;  %v8454_v50 = vpack.i.bf16 %v11206_v45, %v11238_v55  ;;  %v8959_v24 = vld [vmem:[%s9046_s21 + $0x28] sm:$0xff]  ;;  %v14422_v30 = vld [vmem:[#allocation6_spill] sm:$0xff] }
 0x24f   : > { %v11538_v34 = vsel %vm4484_vm8, %v11170_v47, %v8157_v53  ;;  %v11542_v40 = vsel %vm4484_vm8, %v11174_v5, %v8158_v32  ;;  %v8171_v54 = vpop.permute.xlu1 %8170  ;;  %v8459_v47 = vpack.i.bf16 %v6459_v38, %v6458_v39  ;;  %v11560_v25 = vsel %vm4068_vm0, %v8959_v24, %v7097_v36  ;;  %v189_v53 = vld [vmem:[%s9046_s21] sm:$0xff]  ;;  %v6510_v39 = vld [vmem:[%s9046_s21 + $0x91] sm:$0xff]  ;;  %v190_v55 = vld [vmem:[%s9046_s21 + $0x8] sm:$0xff] }
 0x250   : > { %v8173_v31 = vunpack.i.h.bf16 %v8171_v54  ;;  %v8172_v2 = vunpack.i.l.bf16 %v8171_v54  ;;  %v8166_v49 = vpop.permute.xlu0 %8165  ;;  %v7088_v32 = vunpack.i.h.bf16 %v14421_v43  ;;  %v8960_v38 = vld [vmem:[%s9046_s21 + $0x30] sm:$0xff]  ;;  %v7102_v36 = vunpack.i.l.bf16 %v14422_v30 }
 0x251   : > { %v8168_v19 = vunpack.i.h.bf16 %v8166_v49  ;;  %v8167_v20 = vunpack.i.l.bf16 %v8166_v49  ;;  %8450 = vrot.lane.b32.xlu1 %v8449_v16, %s9003_s20  ;;  %v11576_v45 = vsel %vm4068_vm0, %v8960_v38, %v7098_v57  ;;  %v11585_v57 = vsel %vm4068_vm0, %v189_v53, %v7087_v58  ;;  %v8961_v38 = vld [vmem:[%s9046_s21 + $0x40] sm:$0xff] }
 0x252   : > { %v11549_v5 = vsel %vm4484_vm8, %v11181_v11, %v8172_v2  ;;  %v11553_v52 = vsel %vm4484_vm8, %v11185_v33, %v8173_v31  ;;  %8445 = vrot.lane.b32.xlu0 %v8444_v29, %s9004_s22  ;;  %v6509_v29 = vld [vmem:[%s9046_s21 + $0x89] sm:$0xff]  ;;  %v7103_v2 = vunpack.i.h.bf16 %v14422_v30 }
 0x253   : > { %v11566_v11 = vsel %vm4484_vm8, %v11195_v56, %v8167_v20  ;;  %v11570_v33 = vsel %vm4484_vm8, %v11199_v60, %v8168_v19  ;;  %v8181_v16 = vpop.permute.xlu1 %8180  ;;  %v8469_v19 = vpack.i.bf16 %v10997_v42, %v10954_v9  ;;  %v8464_v24 = vpack.i.bf16 %v6510_v39, %v6509_v29  ;;  %v14423_v42 = vld [vmem:[#allocation7_spill] sm:$0xff]  ;;  %v191_v39 = vld [vmem:[%s9046_s21 + $0x10] sm:$0xff] }
 0x254   : > { %v8183_v54 = vunpack.i.h.bf16 %v8181_v16  ;;  %v8182_v31 = vunpack.i.l.bf16 %v8181_v16  ;;  %v8176_v56 = vpop.permute.xlu0 %8175  ;;  %v6461_v16 = vld [vmem:[%s9046_s21 + $0xa8] sm:$0xff]  ;;  %v11599_v9 = vsel %vm4068_vm0, %v190_v55, %v7088_v32  ;;  %v7092_v58 = vunpack.i.l.bf16 %v14423_v42 }
 0x255   : > { %v8178_v49 = vunpack.i.h.bf16 %v8176_v56  ;;  %v8177_v60 = vunpack.i.l.bf16 %v8176_v56  ;;  %8460 = vrot.lane.b32.xlu1 %v8459_v47, %s9002_s19  ;;  %v6460_v47 = vld [vmem:[%s9046_s21 + $0xa0] sm:$0xff]  ;;  %v7093_v29 = vunpack.i.h.bf16 %v14423_v42  ;;  %v14426_v42 = vld [vmem:[#allocation81_spill] sm:$0xff] }
 0x256   : > { %v11589_v20 = vsel %vm4484_vm8, %v11210_v63, %v8182_v31  ;;  %v11593_v43 = vsel %vm4484_vm8, %v11214_v59, %v8183_v54  ;;  %8455 = vrot.lane.b32.xlu0 %v8454_v50, %s9005_s23  ;;  %v11612_v50 = vsel %vm4068_vm0, %v8961_v38, %v7102_v36  ;;  %v8962_v54 = vld [vmem:[%s9046_s21 + $0x48] sm:$0xff]  ;;  %v8479_v56 = vpack.i.bf16 %v6461_v16, %v6460_v47 }
 0x257   : > { %v11604_v53 = vsel %vm4484_vm8, %v11228_v48, %v8177_v60  ;;  %v11608_v63 = vsel %vm4484_vm8, %v11232_v41, %v8178_v49  ;;  %v8191_v59 = vpop.permute.xlu1 %8190  ;;  %v11618_v48 = vsel %vm4068_vm0, %v8962_v54, %v7103_v2  ;;  %v14424_v36 = vld [vmem:[#allocation8_spill] sm:$0xff]  ;;  %v14428_v2 = vld [vmem:[#allocation79_spill] sm:$0xff] }
 0x258   : > { %v8193_v32 = vunpack.i.h.bf16 %v8191_v59  ;;  %v8192_v55 = vunpack.i.l.bf16 %v8191_v59  ;;  %v8186_v30 = vpop.permute.xlu0 %8185  ;;  %v7112_v49 = vunpack.i.l.bf16 %v14424_v36  ;;  %v8474_v38 = vpack.i.bf16 %v11278_v0, %v14428_v2  ;;  %v14433_v2 = vld [vmem:[#allocation67_spill] sm:$0xff] }
 0x259   : > { %v8188_v31 = vunpack.i.h.bf16 %v8186_v30  ;;  %v8187_v41 = vunpack.i.l.bf16 %v8186_v30  ;;  %8470 = vrot.lane.b32.xlu1 %v8469_v19, %s9003_s20  ;;  %v11634_v30 = vsel %vm4068_vm0, %v191_v39, %v7092_v58  ;;  %v7113_v19 = vunpack.i.h.bf16 %v14424_v36  ;;  %v14431_v58 = vld [vmem:[#allocation9_spill] sm:$0xff] }
 0x25a   : > { %v11624_v60 = vsel %vm4484_vm8, %v11250_v46, %v8192_v55  ;;  %v11628_v59 = vsel %vm4484_vm8, %v14426_v42, %v8193_v32  ;;  %8465 = vrot.lane.b32.xlu0 %v8464_v24, %s9004_s22  ;;  %v6511_v32 = vld [vmem:[%s9046_s21 + $0xa1] sm:$0xff]  ;;  %v6512_v24 = vld [vmem:[%s9046_s21 + $0xa9] sm:$0xff]  ;;  %v7108_v39 = vunpack.i.h.bf16 %v14431_v58  ;;  %v7107_v36 = vunpack.i.l.bf16 %v14431_v58 }
 0x25b   : > { %14425 = vst [vmem:[#allocation4_spill] sm:$0xff] %v11624_v60  ;;  %14427 = vst [vmem:[#allocation5_spill] sm:$0xff] %v11628_v59  ;;  %v11639_v47 = vsel %vm4484_vm8, %v11271_v8, %v8187_v41  ;;  %v11643_v46 = vsel %vm4484_vm8, %v11275_v51, %v8188_v31  ;;  %v8201_v16 = vpop.permute.xlu1 %8200  ;;  %v8963_v55 = vld [vmem:[%s9046_s21 + $0x20] sm:$0xff]  ;;  %v8484_v58 = vpack.i.bf16 %v6512_v24, %v6511_v32  ;;  %v6566_v59 = vld [vmem:[%s9046_s21 + $0xca] sm:$0xff] }
 0x25c   : > { %14429 = vst [vmem:[#allocation6_spill] sm:$0xff] %v11639_v47  ;;  %14430 = vst [vmem:[#allocation7_spill] sm:$0xff] %v11643_v46  ;;  %v11649_v0 = vsel %vm4068_vm0, %v8963_v55, %v7093_v29  ;;  %v8203_v54 = vunpack.i.h.bf16 %v8201_v16  ;;  %v8202_v8 = vunpack.i.l.bf16 %v8201_v16  ;;  %v8196_v41 = vpop.permute.xlu0 %8195  ;;  %v14432_v31 = vld [vmem:[#allocation68_spill] sm:$0xff]  ;;  %v11658_v29 = vsel %vm4068_vm0, %v8964_v17, %v7112_v49  ;;  %v14436_v17 = vld [vmem:[#allocation10_spill] sm:$0xff] }
 0x25d   : > { %v8198_v42 = vunpack.i.h.bf16 %v8196_v41  ;;  %v8197_v51 = vunpack.i.l.bf16 %v8196_v41  ;;  %8480 = vrot.lane.b32.xlu1 %v8479_v56, %s9002_s19  ;;  %v8489_v22 = vpack.i.bf16 %v14433_v2, %v14432_v31  ;;  %v6462_v41 = vld [vmem:[%s9046_s21 + $0xb0] sm:$0xff]  ;;  %v6463_v56 = vld [vmem:[%s9046_s21 + $0xc0] sm:$0xff]  ;;  %v11673_v31 = vsel %vm4068_vm0, %v8965_v18, %v7113_v19 }
 0x25e   : > { %v11662_v55 = vsel %vm4484_vm8, %v11292_v3, %v8202_v8  ;;  %v11666_v16 = vsel %vm4484_vm8, %v11296_v6, %v8203_v54  ;;  %8475 = vrot.lane.b32.xlu0 %v8474_v38, %s9005_s23  ;;  %v7122_v49 = vunpack.i.l.bf16 %v14436_v17  ;;  %v14439_v38 = vld [vmem:[#allocation11_spill] sm:$0xff]  ;;  %v14440_v8 = vld [vmem:[#allocation12_spill] sm:$0xff]  ;;  %v6567_v60 = vld [vmem:[%s9046_s21 + $0xd2] sm:$0xff] }
 0x25f   : > { %14434 = vst [vmem:[#allocation8_spill] sm:$0xff] %v11662_v55  ;;  %14435 = vst [vmem:[#allocation81_spill] sm:$0xff] %v11666_v16  ;;  %v11678_v3 = vsel %vm4484_vm8, %v11313_v35, %v8197_v51  ;;  %v11682_v6 = vsel %vm4484_vm8, %v11317_v26, %v8198_v42  ;;  %v2792_v54 = vpop.permute.xlu1 %2791  ;;  %v7118_v32 = vunpack.i.h.bf16 %v14439_v38  ;;  %v7117_v24 = vunpack.i.l.bf16 %v14439_v38  ;;  %v14442_v35 = vld [vmem:[#allocation19_spill] sm:$0xff]  ;;  %v8966_v42 = vld [vmem:[%s9046_s21 + $0x50] sm:$0xff] }
 0x260   : > { %14437 = vst [vmem:[#allocation79_spill] sm:$0xff] %v11678_v3  ;;  %14438 = vst [vmem:[#allocation9_spill] sm:$0xff] %v11682_v6  ;;  %v7152_v2 = vunpack.i.l.bf16 %v14440_v8  ;;  %v11689_v18 = vsel %vm4484_vm8, %v11327_v44, %v2792_v54  ;;  %v8206_v19 = vpop.permute.xlu0 %8205  ;;  %v7217_v51 = vunpack.i.l.bf16 %v14442_v35  ;;  %v8499_v26 = vpack.i.bf16 %v6463_v56, %v6462_v41  ;;  %v14443_v6 = vld [vmem:[#allocation20_spill] sm:$0xff]  ;;  %v8968_v16 = vld [vmem:[%s9046_s21 + $0x90] sm:$0xff] }
 0x261   : > { %14441 = vst [vmem:[#allocation68_spill] sm:$0xff] %v11689_v18  ;;  %v8208_v17 = vunpack.i.h.bf16 %v8206_v19  ;;  %v8207_v3 = vunpack.i.l.bf16 %v8206_v19  ;;  %8490 = vrot.lane.b32.xlu1 %v8489_v22, %s9003_s20  ;;  %v4077_v38 = vsel %vm4068_vm0, %v8966_v42, %v7107_v36  ;;  %v7218_v8 = vunpack.i.h.bf16 %v14442_v35  ;;  %v14444_v54 = vld [vmem:[#allocation80_spill] sm:$0xff]  ;;  %v6513_v42 = vld [vmem:[%s9046_s21 + $0xb1] sm:$0xff] }
 0x262   : > { %v7212_v44 = vunpack.i.l.bf16 %v14443_v6  ;;  %8485 = vrot.lane.b32.xlu0 %v8484_v58, %s9004_s22  ;;  %v8494_v18 = vpack.i.bf16 %v14444_v54, %v11281_v37  ;;  %v8967_v19 = vld [vmem:[%s9046_s21 + $0x60] sm:$0xff]  ;;  %v4083_v41 = vsel %vm4068_vm0, %v8968_v16, %v7122_v49  ;;  %v7213_v16 = vunpack.i.h.bf16 %v14443_v6 }
 0x263   : > { %v4078_v22 = vsel %vm4068_vm0, %v8967_v19, %v7108_v39  ;;  %v11706_v36 = vsel %vm4484_vm8, %v11349_v10, %v8207_v3  ;;  %v14446_v56 = vld [vmem:[#allocation88_spill] sm:$0xff]  ;;  %v11712_v58 = vpop.permute.xlu1 %8215  ;;  %v14449_v10 = vld [vmem:[#allocation21_spill] sm:$0xff]  ;;  %v4124_v6 = vsel %vm4120_vm1, %v11649_v0, %v7218_v8  ;;  %v14456_v8 = vld [vmem:[#allocation27_spill] sm:$0xff] }
 0x264   : > { %14445 = vst [vmem:[#allocation67_spill] sm:$0xff] %v11706_v36  ;;  %v11710_v35 = vsel %vm4484_vm8, %v14446_v56, %v8208_v17  ;;  %14448 = vst [vmem:[#allocation11_spill] sm:$0xff] %v11712_v58  ;;  %v6514_v37 = vld [vmem:[%s9046_s21 + $0xc1] sm:$0xff]  ;;  %v7227_v49 = vunpack.i.l.bf16 %v14449_v10  ;;  %v11722_v3 = vpop.permute.xlu0 %8210  ;;  %v8971_v17 = vld [vmem:[%s9046_s21 + $0x110] sm:$0xff]  ;;  %v4123_v58 = vsel %vm4120_vm1, %v11634_v30, %v7217_v51 }
 0x265   : > { %14447 = vst [vmem:[#allocation10_spill] sm:$0xff] %v11710_v35  ;;  %v8969_v54 = vld [vmem:[%s9046_s21 + $0x80] sm:$0xff]  ;;  %v8970_v39 = vld [vmem:[%s9046_s21 + $0x88] sm:$0xff]  ;;  %14450 = vst [vmem:[#allocation12_spill] sm:$0xff] %v11722_v3  ;;  %v4095_v56 = vsel %vm4068_vm0, %v8971_v17, %v7152_v2  ;;  %v7228_v35 = vunpack.i.h.bf16 %v14449_v10  ;;  %8500 = vrot.lane.b32.xlu1 %v8499_v26, %s9002_s19  ;;  %v8504_v2 = vpack.i.bf16 %v6514_v37, %v6513_v42 }
 0x266   : > { %v4081_v55 = vsel %vm4068_vm0, %v8969_v54, %v7117_v24  ;;  %v4082_v19 = vsel %vm4068_vm0, %v8970_v39, %v7118_v32  ;;  %v8972_v24 = vld [vmem:[%s9046_s21 + $0xb2] sm:$0xff]  ;;  %v14451_v32 = vld [vmem:[#allocation69_spill] sm:$0xff]  ;;  %v4121_v39 = vsel %vm4120_vm1, %v11585_v57, %v7212_v44  ;;  %8495 = vrot.lane.b32.xlu0 %v8494_v18, %s9005_s23  ;;  %v14453_v10 = vld [vmem:[#allocation23_spill] sm:$0xff]  ;;  %v4122_v57 = vsel %vm4120_vm1, %v11599_v9, %v7213_v16 }
 0x267   : > { %v8509_v54 = vpack.i.bf16 %v14451_v32, %v8972_v24  ;;  %v14452_v3 = vld [vmem:[#allocation22_spill] sm:$0xff]  ;;  %v6464_v17 = vld [vmem:[%s9046_s21 + $0xc8] sm:$0xff]  ;;  %v7238_v26 = vunpack.i.h.bf16 %v14453_v10  ;;  %v7237_v46 = vunpack.i.l.bf16 %v14453_v10  ;;  %v11744_v47 = vpop.permute.xlu1 %8225  ;;  %v4127_v0 = vsel %vm4120_vm1, %v11612_v50, %v7227_v49 }
 0x268   : > { %v7222_v36 = vunpack.i.l.bf16 %v14452_v3  ;;  %v6465_v30 = vld [vmem:[%s9046_s21 + $0xd0] sm:$0xff]  ;;  %v7223_v51 = vunpack.i.h.bf16 %v14452_v3  ;;  %v14454_v24 = vld [vmem:[#allocation24_spill] sm:$0xff]  ;;  %14455 = vst [vmem:[#allocation19_spill] sm:$0xff] %v11744_v47  ;;  %v7247_v44 = vunpack.i.l.bf16 %v14456_v8  ;;  %v11752_v42 = vpop.permute.xlu0 %8220  ;;  %v4128_v37 = vsel %vm4120_vm1, %v11618_v48, %v7228_v35 }
 0x269   : > { %v7232_v32 = vunpack.i.l.bf16 %v14454_v24  ;;  %v7233_v18 = vunpack.i.h.bf16 %v14454_v24  ;;  %14457 = vst [vmem:[#allocation20_spill] sm:$0xff] %v11752_v42  ;;  %v14458_v3 = vld [vmem:[#allocation28_spill] sm:$0xff]  ;;  %8510 = vrot.lane.b32.xlu1 %v8509_v54, %s9003_s20  ;;  %v8519_v9 = vpack.i.bf16 %v6465_v30, %v6464_v17  ;;  %v14459_v16 = vld [vmem:[#allocation30_spill] sm:$0xff]  ;;  %v14460_v24 = vld [vmem:[#allocation13_spill] sm:$0xff]  ;;  %v4131_v54 = vsel %vm4120_vm1, %v11658_v29, %v7237_v46 }
 0x26a   : > { %v7243_v10 = vunpack.i.h.bf16 %v14458_v3  ;;  %v7242_v47 = vunpack.i.l.bf16 %v14458_v3  ;;  %v4125_v50 = vsel %vm4120_vm1, %v11560_v25, %v7222_v36  ;;  %v7277_v49 = vunpack.i.l.bf16 %v14459_v16  ;;  %8505 = vrot.lane.b32.xlu0 %v8504_v2, %s9004_s22  ;;  %v14461_v42 = vld [vmem:[#allocation82_spill] sm:$0xff]  ;;  %v14462_v48 = vld [vmem:[#allocation85_spill] sm:$0xff] }
 0x26b   : > { %v7342_v8 = vunpack.i.l.bf16 %v14460_v24  ;;  %v8514_v35 = vpack.i.bf16 %v14462_v48, %v14461_v42  ;;  %v4126_v3 = vsel %vm4120_vm1, %v11576_v45, %v7223_v51  ;;  %v4132_v25 = vsel %vm4120_vm1, %v11673_v31, %v7238_v26  ;;  %v11775_v17 = vpop.permute.xlu1 %8235  ;;  %v6515_v30 = vld [vmem:[%s9046_s21 + $0xc9] sm:$0xff]  ;;  %v6516_v2 = vld [vmem:[%s9046_s21 + $0xd1] sm:$0xff] }
 0x26c   : > { %v4129_v36 = vsel %vm4120_vm1, %v4077_v38, %v7232_v32  ;;  %14463 = vst [vmem:[#allocation80_spill] sm:$0xff] %v11775_v17  ;;  %v4130_v42 = vsel %vm4120_vm1, %v4078_v22, %v7233_v18  ;;  %v11781_v16 = vsel %vm4120_vm1, %v4083_v41, %v7247_v44  ;;  %v7343_v45 = vunpack.i.h.bf16 %v14460_v24  ;;  %v14464_v51 = vld [vmem:[#allocation25_spill] sm:$0xff]  ;;  %v11785_v29 = vpop.permute.xlu0 %8230  ;;  %v14465_v18 = vld [vmem:[#allocation26_spill] sm:$0xff] }
 0x26d   : > { %v7337_v46 = vunpack.i.l.bf16 %v14464_v51  ;;  %v11788_v31 = vsel %vm4120_vm1, %v4081_v55, %v7242_v47  ;;  %v11791_v38 = vsel %vm4120_vm1, %v4082_v19, %v7243_v10  ;;  %v7338_v26 = vunpack.i.h.bf16 %v14464_v51  ;;  %8520 = vrot.lane.b32.xlu1 %v8519_v9, %s9002_s19  ;;  %v6466_v55 = vld [vmem:[%s9046_s21 + $0xe0] sm:$0xff]  ;;  %v6467_v24 = vld [vmem:[%s9046_s21 + $0xe8] sm:$0xff]  ;;  %v14466_v10 = vld [vmem:[#allocation14_spill] sm:$0xff] }
 0x26e   : > { %v8529_v22 = vpack.i.bf16 %v6567_v60, %v6566_v59  ;;  %v11796_v41 = vsel %vm4120_vm1, %v4095_v56, %v7277_v49  ;;  %v11799_v32 = vsel %vm4172_vm2, %v4123_v58, %v7342_v8  ;;  %v7352_v44 = vunpack.i.l.bf16 %v14465_v18  ;;  %8515 = vrot.lane.b32.xlu0 %v8514_v35, %s9005_s23  ;;  %v14467_v60 = vld [vmem:[#allocation15_spill] sm:$0xff]  ;;  %v14470_v51 = vld [vmem:[#allocation16_spill] sm:$0xff] }
 0x26f   : > { %v8524_v47 = vpack.i.bf16 %v6516_v2, %v6515_v30  ;;  %v7353_v19 = vunpack.i.h.bf16 %v14465_v18  ;;  %v7348_v48 = vunpack.i.h.bf16 %v14466_v10  ;;  %v7347_v9 = vunpack.i.l.bf16 %v14466_v10  ;;  %v11809_v56 = vpop.permute.xlu1 %8245 }
 0x270   : > { %v7362_v59 = vunpack.i.l.bf16 %v14467_v60  ;;  %14468 = vst [vmem:[#allocation88_spill] sm:$0xff] %v11809_v56  ;;  %v11812_v58 = vsel %vm4172_vm2, %v4124_v6, %v7343_v45  ;;  %v11815_v49 = vsel %vm4172_vm2, %v4121_v39, %v7337_v46  ;;  %v7363_v8 = vunpack.i.h.bf16 %v14467_v60  ;;  %v11819_v30 = vpop.permute.xlu0 %8240  ;;  %v14471_v46 = vld [vmem:[#allocation103_spill] sm:$0xff] }
 0x271   : > { %v8248_v35 = vunpack.i.h.bf16 %v11809_v56  ;;  %14469 = vst [vmem:[#allocation21_spill] sm:$0xff] %v11819_v30  ;;  %v11822_v2 = vsel %vm4172_vm2, %v4122_v57, %v7338_v26  ;;  %v7357_v18 = vunpack.i.l.bf16 %v14470_v51  ;;  %8530 = vrot.lane.b32.xlu1 %v8529_v22, %s9003_s20  ;;  %v8539_v6 = vpack.i.bf16 %v6467_v24, %v6466_v55  ;;  %v14472_v57 = vld [vmem:[#allocation86_spill] sm:$0xff]  ;;  %v14473_v26 = vld [vmem:[#allocation83_spill] sm:$0xff]  ;;  %v6568_v56 = vld [vmem:[%s9046_s21 + $0xe2] sm:$0xff] }
 0x272   : > { %v11827_v39 = vsel %vm4172_vm2, %v4127_v0, %v7352_v44  ;;  %v7358_v45 = vunpack.i.h.bf16 %v14470_v51  ;;  %8525 = vrot.lane.b32.xlu0 %v8524_v47, %s9004_s22  ;;  %v8534_v60 = vpack.i.bf16 %v14473_v26, %v14472_v57  ;;  %v6569_v30 = vld [vmem:[%s9046_s21 + $0xea] sm:$0xff]  ;;  %v11840_v17 = vsel %vm4172_vm2, %v4128_v37, %v7353_v19  ;;  %v6517_v24 = vld [vmem:[%s9046_s21 + $0xe1] sm:$0xff]  ;;  %v14474_v51 = vld [vmem:[#allocation18_spill] sm:$0xff] }
 0x273   : > { %v11832_v10 = vsel %vm4536_vm10, %v14471_v46, %v8248_v35  ;;  %v11843_v22 = vsel %vm4172_vm2, %v4125_v50, %v7347_v9  ;;  %v11846_v0 = vsel %vm4172_vm2, %v4126_v3, %v7348_v48  ;;  %v11849_v44 = vsel %vm4172_vm2, %v4131_v54, %v7362_v59  ;;  %v8256_v55 = vpop.permute.xlu1 %8255  ;;  %v6518_v47 = vld [vmem:[%s9046_s21 + $0xe9] sm:$0xff] }
 0x274   : > { %v11854_v35 = vsel %vm4172_vm2, %v4132_v25, %v7363_v8  ;;  %v7372_v37 = vunpack.i.l.bf16 %v14474_v51  ;;  %v8258_v19 = vunpack.i.h.bf16 %v8256_v55  ;;  %v8257_v46 = vunpack.i.l.bf16 %v8256_v55  ;;  %v8251_v50 = vpop.permute.xlu0 %8250  ;;  %v6480_v57 = vld [vmem:[%s9046_s21 + $0x170] sm:$0xff]  ;;  %v14480_v51 = vld [vmem:[#allocation31_spill] sm:$0xff] }
 0x275   : > { %v11858_v9 = vsel %vm4172_vm2, %v4129_v36, %v7357_v18  ;;  %v8253_v3 = vunpack.i.h.bf16 %v8251_v50  ;;  %v8252_v48 = vunpack.i.l.bf16 %v8251_v50  ;;  %8540 = vrot.lane.b32.xlu1 %v8539_v6, %s9002_s19  ;;  %v8549_v54 = vpack.i.bf16 %v6569_v30, %v6568_v56  ;;  %v6468_v18 = vld [vmem:[%s9046_s21 + $0xf0] sm:$0xff] }
 0x276   : > { %v11862_v59 = vsel %vm4172_vm2, %v4130_v42, %v7358_v45  ;;  %v11866_v25 = vsel %vm4536_vm10, %v11457_v1, %v8257_v46  ;;  %v11870_v8 = vsel %vm4536_vm10, %v11461_v21, %v8258_v19  ;;  %8535 = vrot.lane.b32.xlu0 %v8534_v60, %s9005_s23  ;;  %v8544_v36 = vpack.i.bf16 %v6518_v47, %v6517_v24  ;;  %v14477_v26 = vld [vmem:[#allocation17_spill] sm:$0xff] }
 0x277   : > { %14475 = vst [vmem:[#allocation69_spill] sm:$0xff] %v11866_v25  ;;  %14476 = vst [vmem:[#allocation22_spill] sm:$0xff] %v11870_v8  ;;  %v7368_v55 = vunpack.i.h.bf16 %v14477_v26  ;;  %v7367_v56 = vunpack.i.l.bf16 %v14477_v26  ;;  %v11879_v42 = vsel %vm4536_vm10, %v11466_v23, %v8252_v48  ;;  %v11883_v1 = vsel %vm4536_vm10, %v11470_v14, %v8253_v3  ;;  %v8266_v30 = vpop.permute.xlu1 %8265  ;;  %v14479_v6 = vld [vmem:[#allocation29_spill] sm:$0xff]  ;;  %v14483_v3 = vld [vmem:[#allocation84_spill] sm:$0xff] }
 0x278   : > { %14478 = vst [vmem:[#allocation23_spill] sm:$0xff] %v11883_v1  ;;  %v11887_v21 = vsel %vm4172_vm2, %v11781_v16, %v7372_v37  ;;  %v7402_v45 = vunpack.i.l.bf16 %v14479_v6  ;;  %v8268_v60 = vunpack.i.h.bf16 %v8266_v30  ;;  %v8267_v24 = vunpack.i.l.bf16 %v8266_v30  ;;  %v8261_v47 = vpop.permute.xlu0 %8260  ;;  %v14484_v48 = vld [vmem:[#allocation90_spill] sm:$0xff] }
 0x279   : > { %v7467_v19 = vunpack.i.l.bf16 %v14480_v51  ;;  %v8263_v23 = vunpack.i.h.bf16 %v8261_v47  ;;  %v8262_v46 = vunpack.i.l.bf16 %v8261_v47  ;;  %8550 = vrot.lane.b32.xlu1 %v8549_v54, %s9003_s20  ;;  %v8559_v14 = vpack.i.bf16 %v6468_v18, %v6480_v57  ;;  %v6570_v30 = vld [vmem:[%s9046_s21 + $0xf2] sm:$0xff]  ;;  %v14485_v18 = vld [vmem:[#allocation32_spill] sm:$0xff] }
 0x27a   : > { %v7468_v50 = vunpack.i.h.bf16 %v14480_v51  ;;  %v11895_v16 = vsel %vm4536_vm10, %v11483_v12, %v8267_v24  ;;  %v11899_v37 = vsel %vm4536_vm10, %v11487_v61, %v8268_v60  ;;  %8545 = vrot.lane.b32.xlu0 %v8544_v36, %s9004_s22  ;;  %v8554_v26 = vpack.i.bf16 %v14484_v48, %v14483_v3  ;;  %v6582_v6 = vld [vmem:[%s9046_s21 + $0x172] sm:$0xff] }
 0x27b   : > { %14481 = vst [vmem:[#allocation24_spill] sm:$0xff] %v11895_v16  ;;  %14482 = vst [vmem:[#allocation27_spill] sm:$0xff] %v11899_v37  ;;  %v11908_v54 = vsel %vm4172_vm2, %v11788_v31, %v7367_v56  ;;  %v7462_v57 = vunpack.i.l.bf16 %v14485_v18  ;;  %v11913_v12 = vsel %vm4536_vm10, %v11494_v15, %v8262_v46  ;;  %v11917_v61 = vsel %vm4536_vm10, %v11498_v62, %v8263_v23  ;;  %v11919_v36 = vpop.permute.xlu1 %8275  ;;  %v6519_v60 = vld [vmem:[%s9046_s21 + $0xf1] sm:$0xff]  ;;  %v14555_v37 = vld [vmem:[#allocation59_spill] sm:$0xff] }
 0x27c   : > { %14486 = vst [vmem:[#allocation28_spill] sm:$0xff] %v11913_v12  ;;  %14487 = vst [vmem:[#allocation30_spill] sm:$0xff] %v11917_v61  ;;  %v6531_v24 = vld [vmem:[%s9046_s21 + $0x171] sm:$0xff]  ;;  %v11925_v47 = vsel %vm4172_vm2, %v11791_v38, %v7368_v55  ;;  %v11929_v31 = vsel %vm4172_vm2, %v11796_v41, %v7402_v45  ;;  %v7463_v15 = vunpack.i.h.bf16 %v14485_v18  ;;  %v8278_v56 = vunpack.i.h.bf16 %v11919_v36  ;;  %v8271_v62 = vpop.permute.xlu0 %8270  ;;  %v14561_v61 = vld [vmem:[#allocation64_spill] sm:$0xff] }
 0x27d   : > { %v11935_v51 = vsel %vm4224_vm3, %v11799_v32, %v7467_v19  ;;  %v8273_v23 = vunpack.i.h.bf16 %v8271_v62  ;;  %v8272_v46 = vunpack.i.l.bf16 %v8271_v62  ;;  %8560 = vrot.lane.b32.xlu1 %v8559_v14, %s9002_s19  ;;  %v8569_v38 = vpack.i.bf16 %v6570_v30, %v6582_v6  ;;  %v14488_v41 = vld [vmem:[#allocation33_spill] sm:$0xff]  ;;  %v6469_v32 = vld [vmem:[%s9046_s21 + $0x100] sm:$0xff]  ;;  %v14491_v30 = vld [vmem:[#allocation34_spill] sm:$0xff] }
 0x27e   : > { %v11940_v55 = vsel %vm4224_vm3, %v11812_v58, %v7468_v50  ;;  %v7477_v45 = vunpack.i.l.bf16 %v14488_v41  ;;  %v11945_v3 = vsel %vm4536_vm10, %v11506_v27, %v8278_v56  ;;  %8555 = vrot.lane.b32.xlu0 %v8554_v26, %s9005_s23  ;;  %v8564_v48 = vpack.i.bf16 %v6519_v60, %v6531_v24  ;;  %v6481_v19 = vld [vmem:[%s9046_s21 + $0x180] sm:$0xff]  ;;  %v14582_v25 = vld [vmem:[#allocation94_spill] sm:$0xff] }
 0x27f   : > { %v11952_v18 = vsel %vm4224_vm3, %v11815_v49, %v7462_v57  ;;  %v7478_v14 = vunpack.i.h.bf16 %v14488_v41  ;;  %v11957_v58 = vsel %vm4536_vm10, %v11513_v13, %v8272_v46  ;;  %v11961_v50 = vsel %vm4536_vm10, %v11517_v7, %v8273_v23  ;;  %v8286_v27 = vpop.permute.xlu1 %8285  ;;  %v14494_v23 = vld [vmem:[#allocation100_spill] sm:$0xff]  ;;  %v14495_v46 = vld [vmem:[#allocation91_spill] sm:$0xff] }
 0x280   : > { %14489 = vst [vmem:[#allocation13_spill] sm:$0xff] %v11957_v58  ;;  %14490 = vst [vmem:[#allocation82_spill] sm:$0xff] %v11961_v50  ;;  %v11965_v26 = vsel %vm4224_vm3, %v11822_v2, %v7463_v15  ;;  %v7472_v49 = vunpack.i.l.bf16 %v14491_v30  ;;  %v8288_v6 = vunpack.i.h.bf16 %v8286_v27  ;;  %v8287_v57 = vunpack.i.l.bf16 %v8286_v27  ;;  %v8281_v60 = vpop.permute.xlu0 %8280  ;;  %v6571_v27 = vld [vmem:[%s9046_s21 + $0x102] sm:$0xff] }
 0x281   : > { %v7473_v24 = vunpack.i.h.bf16 %v14491_v30  ;;  %v8283_v13 = vunpack.i.h.bf16 %v8281_v60  ;;  %v8282_v56 = vunpack.i.l.bf16 %v8281_v60  ;;  %8570 = vrot.lane.b32.xlu1 %v8569_v38, %s9003_s20  ;;  %v8579_v7 = vpack.i.bf16 %v6469_v32, %v6481_v19  ;;  %v6583_v38 = vld [vmem:[%s9046_s21 + $0x182] sm:$0xff] }
 0x282   : > { %v11972_v62 = vsel %vm4224_vm3, %v11827_v39, %v7477_v45  ;;  %v11976_v2 = vsel %vm4536_vm10, %v11526_v4, %v8287_v57  ;;  %v11980_v15 = vsel %vm4536_vm10, %v11530_v28, %v8288_v6  ;;  %8565 = vrot.lane.b32.xlu0 %v8564_v48, %s9004_s22  ;;  %v8574_v41 = vpack.i.bf16 %v14495_v46, %v14494_v23  ;;  %v14496_v39 = vld [vmem:[#allocation35_spill] sm:$0xff]  ;;  %v14498_v23 = vld [vmem:[#allocation36_spill] sm:$0xff] }
 0x283   : > { %14492 = vst [vmem:[#allocation85_spill] sm:$0xff] %v11976_v2  ;;  %14493 = vst [vmem:[#allocation25_spill] sm:$0xff] %v11980_v15  ;;  %v11989_v32 = vsel %vm4224_vm3, %v11840_v17, %v7478_v14  ;;  %v7487_v45 = vunpack.i.l.bf16 %v14496_v39  ;;  %v11994_v4 = vsel %vm4536_vm10, %v11538_v34, %v8282_v56  ;;  %v11998_v28 = vsel %vm4536_vm10, %v11542_v40, %v8283_v13  ;;  %v8296_v48 = vpop.permute.xlu1 %8295  ;;  %v6520_v19 = vld [vmem:[%s9046_s21 + $0x101] sm:$0xff] }
 0x284   : > { %14497 = vst [vmem:[#allocation26_spill] sm:$0xff] %v11998_v28  ;;  %v6532_v30 = vld [vmem:[%s9046_s21 + $0x181] sm:$0xff]  ;;  %v12004_v6 = vsel %vm4224_vm3, %v11843_v22, %v7472_v49  ;;  %v7488_v17 = vunpack.i.h.bf16 %v14496_v39  ;;  %v8298_v14 = vunpack.i.h.bf16 %v8296_v48  ;;  %v8297_v57 = vunpack.i.l.bf16 %v8296_v48  ;;  %v8291_v60 = vpop.permute.xlu0 %8290  ;;  %v6489_v28 = vld [vmem:[%s9046_s21 + $0x1d0] sm:$0xff] }
 0x285   : > { %v12009_v34 = vsel %vm4224_vm3, %v11846_v0, %v7473_v24  ;;  %v8293_v40 = vunpack.i.h.bf16 %v8291_v60  ;;  %v8292_v13 = vunpack.i.l.bf16 %v8291_v60  ;;  %8580 = vrot.lane.b32.xlu1 %v8579_v7, %s9002_s19  ;;  %v8589_v56 = vpack.i.bf16 %v6571_v27, %v6583_v38  ;;  %v6470_v0 = vld [vmem:[%s9046_s21 + $0x108] sm:$0xff] }
 0x286   : > { %v7482_v46 = vunpack.i.l.bf16 %v14498_v23  ;;  %v12015_v22 = vsel %vm4536_vm10, %v11549_v5, %v8297_v57  ;;  %v12019_v49 = vsel %vm4536_vm10, %v11553_v52, %v8298_v14  ;;  %8575 = vrot.lane.b32.xlu0 %v8574_v41, %s9005_s23  ;;  %v8584_v39 = vpack.i.bf16 %v6520_v19, %v6532_v30  ;;  %v6482_v24 = vld [vmem:[%s9046_s21 + $0x188] sm:$0xff]  ;;  %v14504_v14 = vld [vmem:[#allocation38_spill] sm:$0xff] }
 0x287   : > { %14499 = vst [vmem:[#allocation14_spill] sm:$0xff] %v12015_v22  ;;  %14500 = vst [vmem:[#allocation15_spill] sm:$0xff] %v12019_v49  ;;  %v12026_v48 = vsel %vm4224_vm3, %v11849_v44, %v7487_v45  ;;  %v7483_v7 = vunpack.i.h.bf16 %v14498_v23  ;;  %v12031_v27 = vsel %vm4536_vm10, %v11566_v11, %v8292_v13  ;;  %v12035_v5 = vsel %vm4536_vm10, %v11570_v33, %v8293_v40  ;;  %v8306_v52 = vpop.permute.xlu1 %8305  ;;  %v14503_v38 = vld [vmem:[#allocation37_spill] sm:$0xff]  ;;  %v14508_v23 = vld [vmem:[#allocation87_spill] sm:$0xff] }
 0x288   : > { %14501 = vst [vmem:[#allocation16_spill] sm:$0xff] %v12031_v27  ;;  %14502 = vst [vmem:[#allocation103_spill] sm:$0xff] %v12035_v5  ;;  %v12039_v41 = vsel %vm4224_vm3, %v11854_v35, %v7488_v17  ;;  %v7497_v44 = vunpack.i.l.bf16 %v14503_v38  ;;  %v8308_v45 = vunpack.i.h.bf16 %v8306_v52  ;;  %v8307_v19 = vunpack.i.l.bf16 %v8306_v52  ;;  %v8301_v30 = vpop.permute.xlu0 %8300  ;;  %v14507_v13 = vld [vmem:[#allocation97_spill] sm:$0xff]  ;;  %v14548_v50 = vld [vmem:[#allocation52_spill] sm:$0xff] }
 0x289   : > { %v7492_v57 = vunpack.i.l.bf16 %v14504_v14  ;;  %v8303_v11 = vunpack.i.h.bf16 %v8301_v30  ;;  %v8302_v60 = vunpack.i.l.bf16 %v8301_v30  ;;  %8590 = vrot.lane.b32.xlu1 %v8589_v56, %s9003_s20  ;;  %v8599_v33 = vpack.i.bf16 %v6470_v0, %v6482_v24  ;;  %v6572_v38 = vld [vmem:[%s9046_s21 + $0x10a] sm:$0xff] }
 0x28a   : > { %v12046_v40 = vsel %vm4224_vm3, %v11858_v9, %v7482_v46  ;;  %v12050_v35 = vsel %vm4536_vm10, %v11589_v20, %v8307_v19  ;;  %v12054_v17 = vsel %vm4536_vm10, %v11593_v43, %v8308_v45  ;;  %8585 = vrot.lane.b32.xlu0 %v8584_v39, %s9004_s22  ;;  %v8594_v52 = vpack.i.bf16 %v14508_v23, %v14507_v13  ;;  %v6584_v56 = vld [vmem:[%s9046_s21 + $0x18a] sm:$0xff]  ;;  %v14512_v13 = vld [vmem:[#allocation40_spill] sm:$0xff] }
 0x28b   : > { %14505 = vst [vmem:[#allocation86_spill] sm:$0xff] %v12050_v35  ;;  %14506 = vst [vmem:[#allocation83_spill] sm:$0xff] %v12054_v17  ;;  %v12063_v0 = vsel %vm4224_vm3, %v11862_v59, %v7483_v7  ;;  %v7493_v9 = vunpack.i.h.bf16 %v14504_v14  ;;  %v12068_v20 = vsel %vm4536_vm10, %v11604_v53, %v8302_v60  ;;  %v12072_v43 = vsel %vm4536_vm10, %v11608_v63, %v8303_v11  ;;  %v8316_v46 = vpop.permute.xlu1 %8315  ;;  %v6521_v39 = vld [vmem:[%s9046_s21 + $0x109] sm:$0xff]  ;;  %v14511_v59 = vld [vmem:[#allocation39_spill] sm:$0xff] }
 0x28c   : > { %14509 = vst [vmem:[#allocation18_spill] sm:$0xff] %v12068_v20  ;;  %14510 = vst [vmem:[#allocation17_spill] sm:$0xff] %v12072_v43  ;;  %v6533_v24 = vld [vmem:[%s9046_s21 + $0x189] sm:$0xff]  ;;  %v12078_v45 = vsel %vm4224_vm3, %v11887_v21, %v7497_v44  ;;  %v7527_v7 = vunpack.i.l.bf16 %v14511_v59  ;;  %v8318_v19 = vunpack.i.h.bf16 %v8316_v46  ;;  %v8317_v30 = vunpack.i.l.bf16 %v8316_v46  ;;  %v8311_v14 = vpop.permute.xlu0 %8310  ;;  %v14520_v43 = vld [vmem:[#allocation7_spill] sm:$0xff] }
 0x28d   : > { %v12083_v53 = vsel %vm4224_vm3, %v11908_v54, %v7492_v57  ;;  %v8313_v63 = vunpack.i.h.bf16 %v8311_v14  ;;  %v8312_v11 = vunpack.i.l.bf16 %v8311_v14  ;;  %8600 = vrot.lane.b32.xlu1 %v8599_v33, %s9002_s19  ;;  %v8609_v60 = vpack.i.bf16 %v6572_v38, %v6584_v56  ;;  %v14513_v17 = vld [vmem:[#allocation4_spill] sm:$0xff]  ;;  %v14515_v44 = vld [vmem:[#allocation5_spill] sm:$0xff]  ;;  %v14518_v38 = vld [vmem:[#allocation6_spill] sm:$0xff] }
 0x28e   : > { %v7592_v23 = vunpack.i.l.bf16 %v14512_v13  ;;  %v12089_v21 = vsel %vm4536_vm10, %v14513_v17, %v8317_v30  ;;  %v12093_v59 = vsel %vm4536_vm10, %v14515_v44, %v8318_v19  ;;  %8595 = vrot.lane.b32.xlu0 %v8594_v52, %s9005_s23  ;;  %v8604_v46 = vpack.i.bf16 %v6521_v39, %v6533_v24  ;;  %v6471_v54 = vld [vmem:[%s9046_s21 + $0x110] sm:$0xff]  ;;  %v6473_v49 = vld [vmem:[%s9046_s21 + $0x128] sm:$0xff] }
 0x28f   : > { %14514 = vst [vmem:[#allocation29_spill] sm:$0xff] %v12089_v21  ;;  %14516 = vst [vmem:[#allocation31_spill] sm:$0xff] %v12093_v59  ;;  %v6483_v57 = vld [vmem:[%s9046_s21 + $0x190] sm:$0xff]  ;;  %v7593_v14 = vunpack.i.h.bf16 %v14512_v13  ;;  %v12102_v56 = vsel %vm4536_vm10, %v14518_v38, %v8312_v11  ;;  %v12106_v17 = vsel %vm4536_vm10, %v14520_v43, %v8313_v63  ;;  %v8326_v19 = vpop.permute.xlu1 %8325  ;;  %v12110_v52 = vsel %vm4224_vm3, %v11925_v47, %v7493_v9  ;;  %v14522_v9 = vld [vmem:[#allocation8_spill] sm:$0xff] }
 0x290   : > { %v14517_v35 = vld [vmem:[#allocation41_spill] sm:$0xff]  ;;  %14519 = vst [vmem:[#allocation84_spill] sm:$0xff] %v12102_v56  ;;  %14521 = vst [vmem:[#allocation90_spill] sm:$0xff] %v12106_v17  ;;  %v12114_v39 = vsel %vm4224_vm3, %v11929_v31, %v7527_v7  ;;  %v8328_v24 = vunpack.i.h.bf16 %v8326_v19  ;;  %v8327_v30 = vunpack.i.l.bf16 %v8326_v19  ;;  %v8321_v11 = vpop.permute.xlu0 %8320  ;;  %v8619_v63 = vpack.i.bf16 %v6471_v54, %v6483_v57  ;;  %v14526_v19 = vld [vmem:[#allocation98_spill] sm:$0xff] }
 0x291   : > { %v7587_v33 = vunpack.i.l.bf16 %v14517_v35  ;;  %v7588_v13 = vunpack.i.h.bf16 %v14517_v35  ;;  %v8323_v44 = vunpack.i.h.bf16 %v8321_v11  ;;  %v8322_v43 = vunpack.i.l.bf16 %v8321_v11  ;;  %8610 = vrot.lane.b32.xlu1 %v8609_v60, %s9003_s20  ;;  %v14524_v7 = vld [vmem:[#allocation81_spill] sm:$0xff]  ;;  %v6573_v60 = vld [vmem:[%s9046_s21 + $0x112] sm:$0xff] }
 0x292   : > { %v12120_v47 = vsel %vm4276_vm4, %v11935_v51, %v7592_v23  ;;  %v12124_v31 = vsel %vm4536_vm10, %v14522_v9, %v8327_v30  ;;  %v12128_v38 = vsel %vm4536_vm10, %v14524_v7, %v8328_v24  ;;  %8605 = vrot.lane.b32.xlu0 %v8604_v46, %s9004_s22  ;;  %v8973_v35 = vld [vmem:[%s9046_s21 + $0x10b] sm:$0xff]  ;;  %v12137_v54 = vsel %vm4276_vm4, %v11940_v55, %v7593_v14  ;;  %v14527_v23 = vld [vmem:[#allocation79_spill] sm:$0xff] }
 0x293   : > { %14523 = vst [vmem:[#allocation32_spill] sm:$0xff] %v12124_v31  ;;  %14525 = vst [vmem:[#allocation33_spill] sm:$0xff] %v12128_v38  ;;  %v8614_v11 = vpack.i.bf16 %v8973_v35, %v14526_v19  ;;  %v6585_v59 = vld [vmem:[%s9046_s21 + $0x192] sm:$0xff]  ;;  %v12141_v51 = vsel %vm4276_vm4, %v11952_v18, %v7587_v33  ;;  %v12145_v57 = vsel %vm4536_vm10, %v14527_v23, %v8322_v43  ;;  %v14529_v24 = vld [vmem:[#allocation9_spill] sm:$0xff]  ;;  %v2996_v30 = vpop.permute.xlu1 %2995  ;;  %v7722_v20 = vunpack.i.l.bf16 %v14548_v50 }
 0x294   : > { %14528 = vst [vmem:[#allocation34_spill] sm:$0xff] %v12145_v57  ;;  %v12149_v46 = vsel %vm4536_vm10, %v14529_v24, %v8323_v44  ;;  %v6522_v9 = vld [vmem:[%s9046_s21 + $0x111] sm:$0xff]  ;;  %v14532_v14 = vld [vmem:[#allocation43_spill] sm:$0xff]  ;;  %v14533_v33 = vld [vmem:[#allocation68_spill] sm:$0xff]  ;;  %v8331_v43 = vpop.permute.xlu0 %8330  ;;  %v8629_v31 = vpack.i.bf16 %v6573_v60, %v6585_v59  ;;  %v7872_v27 = vunpack.i.l.bf16 %v14561_v61 }
 0x295   : > { %14530 = vst [vmem:[#allocation100_spill] sm:$0xff] %v12149_v46  ;;  %v6534_v7 = vld [vmem:[%s9046_s21 + $0x191] sm:$0xff]  ;;  %v7597_v18 = vunpack.i.l.bf16 %v14532_v14  ;;  %v12158_v38 = vsel %vm4536_vm10, %v14533_v33, %v2996_v30  ;;  %v7598_v23 = vunpack.i.h.bf16 %v14532_v14  ;;  %v8333_v44 = vunpack.i.h.bf16 %v8331_v43  ;;  %8620 = vrot.lane.b32.xlu1 %v8619_v63, %s9002_s19  ;;  %v14535_v57 = vld [vmem:[#allocation44_spill] sm:$0xff] }
 0x296   : > { %v14531_v35 = vld [vmem:[#allocation42_spill] sm:$0xff]  ;;  %14534 = vst [vmem:[#allocation91_spill] sm:$0xff] %v12158_v38  ;;  %v8332_v24 = vunpack.i.l.bf16 %v8331_v43  ;;  %v4278_v46 = vsel %vm4276_vm4, %v11965_v26, %v7588_v13  ;;  %v7613_v21 = vunpack.i.h.bf16 %v14535_v57  ;;  %8615 = vrot.lane.b32.xlu0 %v8614_v11, %s9005_s23  ;;  %v8624_v17 = vpack.i.bf16 %v6522_v9, %v6534_v7  ;;  %v6472_v30 = vld [vmem:[%s9046_s21 + $0x120] sm:$0xff]  ;;  %v14536_v38 = vld [vmem:[#allocation45_spill] sm:$0xff] }
 0x297   : > { %v7603_v19 = vunpack.i.h.bf16 %v14531_v35  ;;  %v7602_v55 = vunpack.i.l.bf16 %v14531_v35  ;;  %v7612_v35 = vunpack.i.l.bf16 %v14535_v57  ;;  %v6484_v33 = vld [vmem:[%s9046_s21 + $0x1a0] sm:$0xff]  ;;  %v7608_v56 = vunpack.i.h.bf16 %v14536_v38  ;;  %v14539_v59 = vld [vmem:[#allocation10_spill] sm:$0xff]  ;;  %v12179_v13 = vpop.permute.xlu1 %8340 }
 0x298   : > { %v7607_v14 = vunpack.i.l.bf16 %v14536_v38  ;;  %v14537_v43 = vld [vmem:[#allocation67_spill] sm:$0xff]  ;;  %v12177_v26 = vsel %vm4536_vm10, %v14539_v59, %v8333_v44  ;;  %v4281_v38 = vsel %vm4276_vm4, %v12004_v6, %v7597_v18  ;;  %v14541_v57 = vld [vmem:[#allocation46_spill] sm:$0xff]  ;;  %v12188_v7 = vpop.permute.xlu0 %8335  ;;  %v4282_v44 = vsel %vm4276_vm4, %v12009_v34, %v7598_v23 }
 0x299   : > { %v12173_v63 = vsel %vm4536_vm10, %v14537_v43, %v8332_v24  ;;  %14540 = vst [vmem:[#allocation36_spill] sm:$0xff] %v12177_v26  ;;  %v4283_v11 = vsel %vm4276_vm4, %v11972_v62, %v7602_v55  ;;  %v4284_v60 = vsel %vm4276_vm4, %v11989_v32, %v7603_v19  ;;  %v7622_v9 = vunpack.i.l.bf16 %v14541_v57  ;;  %v14542_v24 = vld [vmem:[#allocation47_spill] sm:$0xff]  ;;  %8630 = vrot.lane.b32.xlu1 %v8629_v31, %s9003_s20  ;;  %v14543_v19 = vld [vmem:[#allocation48_spill] sm:$0xff]  ;;  %v14544_v18 = vld [vmem:[#allocation102_spill] sm:$0xff] }
 0x29a   : > { %14538 = vst [vmem:[#allocation35_spill] sm:$0xff] %v12173_v63  ;;  %v7618_v43 = vunpack.i.h.bf16 %v14542_v24  ;;  %v7617_v59 = vunpack.i.l.bf16 %v14542_v24  ;;  %v8639_v62 = vpack.i.bf16 %v6472_v30, %v6484_v33  ;;  %v4287_v32 = vsel %vm4276_vm4, %v12026_v48, %v7612_v35  ;;  %8625 = vrot.lane.b32.xlu0 %v8624_v17, %s9004_s22  ;;  %v8974_v34 = vld [vmem:[%s9046_s21 + $0x113] sm:$0xff]  ;;  %v6574_v57 = vld [vmem:[%s9046_s21 + $0x122] sm:$0xff]  ;;  %v14545_v33 = vld [vmem:[#allocation49_spill] sm:$0xff] }
 0x29b   : > { %v4288_v6 = vsel %vm4276_vm4, %v12039_v41, %v7613_v21  ;;  %v7652_v55 = vunpack.i.l.bf16 %v14543_v19  ;;  %v8634_v23 = vpack.i.bf16 %v8974_v34, %v14544_v18  ;;  %v6586_v24 = vld [vmem:[%s9046_s21 + $0x1a2] sm:$0xff]  ;;  %v4285_v31 = vsel %vm4276_vm4, %v12046_v40, %v7607_v14  ;;  %v12211_v41 = vpop.permute.xlu1 %8350  ;;  %v14546_v34 = vld [vmem:[#allocation50_spill] sm:$0xff]  ;;  %v14547_v14 = vld [vmem:[#allocation51_spill] sm:$0xff] }
 0x29c   : > { %v4286_v30 = vsel %vm4276_vm4, %v12063_v0, %v7608_v56  ;;  %v7718_v48 = vunpack.i.h.bf16 %v14545_v33  ;;  %v7717_v35 = vunpack.i.l.bf16 %v14545_v33  ;;  %v6523_v21 = vld [vmem:[%s9046_s21 + $0x121] sm:$0xff]  ;;  %v4291_v17 = vsel %vm4276_vm4, %v12078_v45, %v7622_v9  ;;  %v12220_v0 = vpop.permute.xlu0 %8345  ;;  %v6474_v5 = vld [vmem:[%s9046_s21 + $0x130] sm:$0xff] }
 0x29d   : > { %v6535_v19 = vld [vmem:[%s9046_s21 + $0x1a1] sm:$0xff]  ;;  %v7713_v18 = vunpack.i.h.bf16 %v14546_v34  ;;  %v7712_v40 = vunpack.i.l.bf16 %v14546_v34  ;;  %v7727_v26 = vunpack.i.l.bf16 %v14547_v14  ;;  %v4289_v56 = vsel %vm4276_vm4, %v12083_v53, %v7617_v59  ;;  %8640 = vrot.lane.b32.xlu1 %v8639_v62, %s9002_s19  ;;  %v14549_v59 = vld [vmem:[#allocation53_spill] sm:$0xff] }
 0x29e   : > { %v4290_v33 = vsel %vm4276_vm4, %v12110_v52, %v7618_v43  ;;  %v7728_v63 = vunpack.i.h.bf16 %v14547_v14  ;;  %v8649_v45 = vpack.i.bf16 %v6574_v57, %v6586_v24  ;;  %v4303_v9 = vsel %vm4276_vm4, %v12114_v39, %v7652_v55  ;;  %8635 = vrot.lane.b32.xlu0 %v8634_v23, %s9005_s23  ;;  %v6485_v53 = vld [vmem:[%s9046_s21 + $0x1a8] sm:$0xff] }
 0x29f   : > { %v7723_v34 = vunpack.i.h.bf16 %v14548_v50  ;;  %v8644_v58 = vpack.i.bf16 %v6523_v21, %v6535_v19  ;;  %v4331_v52 = vsel %vm4328_vm5, %v12120_v47, %v7717_v35  ;;  %v4332_v43 = vsel %vm4328_vm5, %v12137_v54, %v7718_v48  ;;  %v12241_v39 = vpop.permute.xlu1 %8360  ;;  %v14550_v47 = vld [vmem:[#allocation54_spill] sm:$0xff]  ;;  %v14551_v21 = vld [vmem:[#allocation55_spill] sm:$0xff]  ;;  %v8976_v14 = vld [vmem:[%s9046_s21 + $0x1a3] sm:$0xff] }
 0x2a0   : > { %v7738_v62 = vunpack.i.h.bf16 %v14549_v59  ;;  %v7737_v57 = vunpack.i.l.bf16 %v14549_v59  ;;  %v4329_v50 = vsel %vm4328_vm5, %v12141_v51, %v7712_v40  ;;  %v4330_v55 = vsel %vm4328_vm5, %v4278_v46, %v7713_v18  ;;  %v12248_v54 = vpop.permute.xlu0 %8355  ;;  %v8975_v40 = vld [vmem:[%s9046_s21 + $0x123] sm:$0xff] }
 0x2a1   : > { %v4335_v23 = vsel %vm4328_vm5, %v4283_v11, %v7727_v26  ;;  %v7732_v24 = vunpack.i.l.bf16 %v14550_v47  ;;  %v4336_v48 = vsel %vm4328_vm5, %v4284_v60, %v7728_v63  ;;  %v7733_v35 = vunpack.i.h.bf16 %v14550_v47  ;;  %8650 = vrot.lane.b32.xlu1 %v8649_v45, %s9003_s20  ;;  %v14552_v11 = vld [vmem:[#allocation56_spill] sm:$0xff]  ;;  %v6575_v60 = vld [vmem:[%s9046_s21 + $0x12a] sm:$0xff] }
 0x2a2   : > { %v7747_v19 = vunpack.i.l.bf16 %v14551_v21  ;;  %v8659_v51 = vpack.i.bf16 %v6473_v49, %v6485_v53  ;;  %v4333_v46 = vsel %vm4328_vm5, %v4281_v38, %v7722_v20  ;;  %v4334_v26 = vsel %vm4328_vm5, %v4282_v44, %v7723_v34  ;;  %8645 = vrot.lane.b32.xlu0 %v8644_v58, %s9004_s22  ;;  %v6587_v59 = vld [vmem:[%s9046_s21 + $0x1aa] sm:$0xff]  ;;  %v14554_v34 = vld [vmem:[#allocation58_spill] sm:$0xff] }
 0x2a3   : > { %v7742_v18 = vunpack.i.l.bf16 %v14552_v11  ;;  %v8654_v63 = vpack.i.bf16 %v8975_v40, %v8976_v14  ;;  %v4339_v47 = vsel %vm4328_vm5, %v4287_v32, %v7737_v57  ;;  %v4340_v45 = vsel %vm4328_vm5, %v4288_v6, %v7738_v62  ;;  %v14553_v53 = vld [vmem:[#allocation57_spill] sm:$0xff]  ;;  %v12266_v20 = vpop.permute.xlu1 %8370 }
 0x2a4   : > { %v7743_v49 = vunpack.i.h.bf16 %v14552_v11  ;;  %v7777_v21 = vunpack.i.l.bf16 %v14553_v53  ;;  %v6524_v38 = vld [vmem:[%s9046_s21 + $0x129] sm:$0xff]  ;;  %v4337_v58 = vsel %vm4328_vm5, %v4285_v31, %v7732_v24  ;;  %v7843_v40 = vunpack.i.h.bf16 %v14554_v34  ;;  %v12274_v57 = vpop.permute.xlu0 %8365 }
 0x2a5   : > { %v6536_v44 = vld [vmem:[%s9046_s21 + $0x1a9] sm:$0xff]  ;;  %v7842_v14 = vunpack.i.l.bf16 %v14554_v34  ;;  %v7837_v32 = vunpack.i.l.bf16 %v14555_v37  ;;  %v4338_v6 = vsel %vm4328_vm5, %v4286_v30, %v7733_v35  ;;  %v4343_v62 = vsel %vm4328_vm5, %v4291_v17, %v7747_v19  ;;  %8660 = vrot.lane.b32.xlu1 %v8659_v51, %s9002_s19 }
 0x2a6   : > { %v7838_v11 = vunpack.i.h.bf16 %v14555_v37  ;;  %v8669_v31 = vpack.i.bf16 %v6575_v60, %v6587_v59  ;;  %v4341_v24 = vsel %vm4328_vm5, %v4289_v56, %v7742_v18  ;;  %v14556_v53 = vld [vmem:[#allocation60_spill] sm:$0xff]  ;;  %8655 = vrot.lane.b32.xlu0 %v8654_v63, %s9005_s23  ;;  %v8664_v16 = vpack.i.bf16 %v6524_v38, %v6536_v44  ;;  %v6486_v30 = vld [vmem:[%s9046_s21 + $0x1b0] sm:$0xff] }
 0x2a7   : > { %v7853_v22 = vunpack.i.h.bf16 %v14556_v53  ;;  %v7852_v34 = vunpack.i.l.bf16 %v14556_v53  ;;  %v4342_v17 = vsel %vm4328_vm5, %v4290_v33, %v7743_v49  ;;  %v4355_v35 = vsel %vm4328_vm5, %v4303_v9, %v7777_v21  ;;  %v14557_v37 = vld [vmem:[#allocation61_spill] sm:$0xff]  ;;  %v12290_v60 = vpop.permute.xlu1 %8380  ;;  %v14559_v33 = vld [vmem:[#allocation62_spill] sm:$0xff]  ;;  %v14560_v53 = vld [vmem:[#allocation63_spill] sm:$0xff] }
 0x2a8   : > { %v7848_v19 = vunpack.i.h.bf16 %v14557_v37  ;;  %v7847_v51 = vunpack.i.l.bf16 %v14557_v37  ;;  %14558 = vst [vmem:[#allocation37_spill] sm:$0xff] %v12290_v60  ;;  %v6626_v56 = vld [vmem:[%s9046_s21 + $0x12b] sm:$0xff]  ;;  %v4383_v59 = vsel %vm4380_vm6, %v4331_v52, %v7842_v14  ;;  %v4384_v63 = vsel %vm4380_vm6, %v4332_v43, %v7843_v40  ;;  %v12300_v9 = vpop.permute.xlu0 %8375 }
 0x2a9   : > { %v12294_v18 = vld [vmem:[%s9046_s21 + $0x1ab] sm:$0xff]  ;;  %v4381_v38 = vsel %vm4380_vm6, %v4329_v50, %v7837_v32  ;;  %v7862_v49 = vunpack.i.l.bf16 %v14559_v33  ;;  %v4382_v21 = vsel %vm4380_vm6, %v4330_v55, %v7838_v11  ;;  %v7863_v44 = vunpack.i.h.bf16 %v14559_v33  ;;  %8670 = vrot.lane.b32.xlu1 %v8669_v31, %s9003_s20 }
 0x2aa   : > { %v7857_v37 = vunpack.i.l.bf16 %v14560_v53  ;;  %v8679_v52 = vpack.i.bf16 %v6474_v5, %v6486_v30  ;;  %v4387_v14 = vsel %vm4380_vm6, %v4335_v23, %v7852_v34  ;;  %v4388_v43 = vsel %vm4380_vm6, %v4336_v48, %v7853_v22  ;;  %8665 = vrot.lane.b32.xlu0 %v8664_v16, %s9004_s22  ;;  %v6576_v55 = vld [vmem:[%s9046_s21 + $0x132] sm:$0xff]  ;;  %v14562_v31 = vld [vmem:[#allocation65_spill] sm:$0xff] }
 0x2ab   : > { %v7858_v50 = vunpack.i.h.bf16 %v14560_v53  ;;  %v8674_v40 = vpack.i.bf16 %v6626_v56, %v12294_v18  ;;  %v6588_v32 = vld [vmem:[%s9046_s21 + $0x1b2] sm:$0xff]  ;;  %v4385_v11 = vsel %vm4380_vm6, %v4333_v46, %v7847_v51  ;;  %v4386_v33 = vsel %vm4380_vm6, %v4334_v26, %v7848_v19  ;;  %v12317_v30 = vpop.permute.xlu1 %8390 }
 0x2ac   : > { %v7867_v5 = vunpack.i.l.bf16 %v14562_v31  ;;  %14563 = vst [vmem:[#allocation38_spill] sm:$0xff] %v12317_v30  ;;  %v6525_v23 = vld [vmem:[%s9046_s21 + $0x131] sm:$0xff]  ;;  %v4391_v48 = vsel %vm4380_vm6, %v4339_v47, %v7862_v49  ;;  %v7868_v16 = vunpack.i.h.bf16 %v14562_v31  ;;  %v12325_v51 = vpop.permute.xlu0 %8385  ;;  %v4392_v61 = vsel %vm4380_vm6, %v4340_v45, %v7863_v44  ;;  %v14567_v31 = vld [vmem:[#allocation71_spill] sm:$0xff] }
 0x2ad   : > { %v6537_v22 = vld [vmem:[%s9046_s21 + $0x1b1] sm:$0xff]  ;;  %14566 = vst [vmem:[#allocation97_spill] sm:$0xff] %v12325_v51  ;;  %v4389_v26 = vsel %vm4380_vm6, %v4337_v58, %v7857_v37  ;;  %8680 = vrot.lane.b32.xlu1 %v8679_v52, %s9002_s19  ;;  %v8689_v47 = vpack.i.bf16 %v6576_v55, %v6588_v32  ;;  %v4390_v49 = vsel %vm4380_vm6, %v4338_v6, %v7858_v50  ;;  %v7963_v30 = vunpack.i.h.bf16 %v14567_v31  ;;  %v6475_v51 = vld [vmem:[%s9046_s21 + $0x140] sm:$0xff] }
 0x2ae   : > { %v14564_v34 = vld [vmem:[#allocation66_spill] sm:$0xff]  ;;  %8675 = vrot.lane.b32.xlu0 %v8674_v40, %s9005_s23  ;;  %v8684_v12 = vpack.i.bf16 %v6525_v23, %v6537_v22  ;;  %v6487_v45 = vld [vmem:[%s9046_s21 + $0x1c0] sm:$0xff]  ;;  %v4395_v58 = vsel %vm4380_vm6, %v4343_v62, %v7872_v27  ;;  %v4393_v44 = vsel %vm4380_vm6, %v4341_v24, %v7867_v5  ;;  %v4394_v32 = vsel %vm4380_vm6, %v4342_v17, %v7868_v16  ;;  %v14569_v27 = vld [vmem:[#allocation73_spill] sm:$0xff] }
 0x2af   : > { %v7902_v56 = vunpack.i.l.bf16 %v14564_v34  ;;  %v14565_v53 = vld [vmem:[#allocation70_spill] sm:$0xff]  ;;  %v7962_v34 = vunpack.i.l.bf16 %v14567_v31  ;;  %v14568_v37 = vld [vmem:[#allocation72_spill] sm:$0xff]  ;;  %v12341_v55 = vpop.permute.xlu1 %8400  ;;  %v7972_v62 = vunpack.i.l.bf16 %v14569_v27  ;;  %v7973_v22 = vunpack.i.h.bf16 %v14569_v27 }
 0x2b0   : > { %v7967_v46 = vunpack.i.l.bf16 %v14565_v53  ;;  %v7968_v19 = vunpack.i.h.bf16 %v14565_v53  ;;  %v7978_v53 = vunpack.i.h.bf16 %v14568_v37  ;;  %v7977_v52 = vunpack.i.l.bf16 %v14568_v37  ;;  %v6627_v6 = vld [vmem:[%s9046_s21 + $0x133] sm:$0xff]  ;;  %v12351_v24 = vpop.permute.xlu0 %8395 }
 0x2b1   : > { %v12345_v50 = vld [vmem:[%s9046_s21 + $0x1b3] sm:$0xff]  ;;  %v4407_v40 = vsel %vm4380_vm6, %v4355_v35, %v7902_v56  ;;  %14570 = vst [vmem:[#allocation87_spill] sm:$0xff] %v12351_v24  ;;  %8690 = vrot.lane.b32.xlu1 %v8689_v47, %s9003_s20  ;;  %v8699_v17 = vpack.i.bf16 %v6475_v51, %v6487_v45  ;;  %v4433_v16 = vsel %vm4432_vm7, %v4381_v38, %v7962_v34  ;;  %v14574_v45 = vld [vmem:[#allocation76_spill] sm:$0xff] }
 0x2b2   : > { %v4435_v23 = vsel %vm4432_vm7, %v4383_v59, %v7967_v46  ;;  %v4436_v5 = vsel %vm4432_vm7, %v4384_v63, %v7968_v19  ;;  %v14571_v31 = vld [vmem:[#allocation74_spill] sm:$0xff]  ;;  %v4434_v35 = vsel %vm4432_vm7, %v4382_v21, %v7963_v30  ;;  %8685 = vrot.lane.b32.xlu0 %v8684_v12, %s9004_s22  ;;  %v8694_v56 = vpack.i.bf16 %v6627_v6, %v12345_v50  ;;  %v6577_v63 = vld [vmem:[%s9046_s21 + $0x142] sm:$0xff]  ;;  %v14572_v47 = vld [vmem:[#allocation75_spill] sm:$0xff] }
 0x2b3   : > { %v7987_v37 = vunpack.i.l.bf16 %v14571_v31  ;;  %v7988_v59 = vunpack.i.h.bf16 %v14571_v31  ;;  %v6589_v46 = vld [vmem:[%s9046_s21 + $0x1c2] sm:$0xff]  ;;  %v12365_v19 = vsel %vm4432_vm7, %v4387_v14, %v7977_v52  ;;  %v12368_v27 = vsel %vm4432_vm7, %v4388_v43, %v7978_v53  ;;  %v12372_v34 = vpop.permute.xlu1 %8410  ;;  %v14575_v14 = vld [vmem:[#allocation77_spill] sm:$0xff]  ;;  %v14576_v24 = vld [vmem:[#allocation78_spill] sm:$0xff] }
 0x2b4   : > { %v7983_v51 = vunpack.i.h.bf16 %v14572_v47  ;;  %v7982_v38 = vunpack.i.l.bf16 %v14572_v47  ;;  %14573 = vst [vmem:[#allocation39_spill] sm:$0xff] %v12372_v34  ;;  %v6526_v21 = vld [vmem:[%s9046_s21 + $0x141] sm:$0xff]  ;;  %v12377_v12 = vsel %vm4432_vm7, %v4385_v11, %v7972_v62  ;;  %v7997_v6 = vunpack.i.l.bf16 %v14574_v45  ;;  %v12382_v53 = vpop.permute.xlu0 %8405  ;;  %v14577_v45 = vld [vmem:[#allocation89_spill] sm:$0xff] }
 0x2b5   : > { %v6538_v30 = vld [vmem:[%s9046_s21 + $0x1c1] sm:$0xff]  ;;  %v7993_v52 = vunpack.i.h.bf16 %v14575_v14  ;;  %v7992_v43 = vunpack.i.l.bf16 %v14575_v14  ;;  %v12385_v31 = vsel %vm4432_vm7, %v4386_v33, %v7973_v22  ;;  %v12388_v47 = vsel %vm4432_vm7, %v4391_v48, %v7987_v37  ;;  %8700 = vrot.lane.b32.xlu1 %v8699_v17, %s9002_s19  ;;  %v6477_v60 = vld [vmem:[%s9046_s21 + $0x150] sm:$0xff] }
 0x2b6   : > { %v8027_v15 = vunpack.i.l.bf16 %v14576_v24  ;;  %v8709_v11 = vpack.i.bf16 %v6577_v63, %v6589_v46  ;;  %v12393_v62 = vsel %vm4432_vm7, %v4392_v61, %v7988_v59  ;;  %v8093_v8 = vunpack.i.h.bf16 %v14577_v45  ;;  %8695 = vrot.lane.b32.xlu0 %v8694_v56, %s9005_s23  ;;  %v6628_v33 = vld [vmem:[%s9046_s21 + $0x143] sm:$0xff] }
 0x2b7   : > { %v8092_v14 = vunpack.i.l.bf16 %v14577_v45  ;;  %v8704_v2 = vpack.i.bf16 %v6526_v21, %v6538_v30  ;;  %v12400_v22 = vld [vmem:[%s9046_s21 + $0x1c3] sm:$0xff]  ;;  %v12403_v48 = vsel %vm4432_vm7, %v4389_v26, %v7982_v38  ;;  %v12406_v24 = vsel %vm4432_vm7, %v4390_v49, %v7983_v51  ;;  %v12410_v59 = vpop.permute.xlu1 %8420 }
 0x2b8   : > { %v14578_v37 = vld [vmem:[#allocation92_spill] sm:$0xff]  ;;  %v12413_v63 = vsel %vm4432_vm7, %v4395_v58, %v7997_v6  ;;  %v12416_v56 = vsel %vm4432_vm7, %v4393_v44, %v7992_v43  ;;  %v12419_v26 = vsel %vm4432_vm7, %v4394_v32, %v7993_v52  ;;  %v12422_v51 = vpop.permute.xlu0 %8415  ;;  %v12425_v38 = vsel %vm4432_vm7, %v4407_v40, %v8027_v15 }
 0x2b9   : > { %v8088_v17 = vunpack.i.h.bf16 %v14578_v37  ;;  %v8087_v61 = vunpack.i.l.bf16 %v14578_v37  ;;  %v14579_v46 = vld [vmem:[#allocation12_spill] sm:$0xff]  ;;  %14580 = vst [vmem:[#allocation40_spill] sm:$0xff] %v12422_v51  ;;  %v8337_v21 = vunpack.i.l.bf16 %v12188_v7  ;;  %8710 = vrot.lane.b32.xlu1 %v8709_v11, %s9003_s20  ;;  %v8719_v58 = vpack.i.bf16 %v6628_v33, %v12400_v22  ;;  %v14581_v11 = vld [vmem:[#allocation93_spill] sm:$0xff] }
 0x2ba   : > { %v8212_v49 = vunpack.i.l.bf16 %v14579_v46  ;;  %v12431_v44 = vsel %vm4484_vm8, %v4435_v23, %v8092_v14  ;;  %v12434_v32 = vsel %vm4484_vm8, %v4436_v5, %v8093_v8  ;;  %v8422_v30 = vunpack.i.l.bf16 %v12410_v59  ;;  %8705 = vrot.lane.b32.xlu0 %v8704_v2, %s9004_s22  ;;  %v6527_v40 = vld [vmem:[%s9046_s21 + $0x149] sm:$0xff] }
 0x2bb   : > { %v8714_v15 = vpack.i.bf16 %v12345_v50, %v12294_v18  ;;  %v6539_v6 = vld [vmem:[%s9046_s21 + $0x1c9] sm:$0xff]  ;;  %v4485_v52 = vsel %vm4484_vm8, %v4433_v16, %v8087_v61  ;;  %v4486_v43 = vsel %vm4484_vm8, %v4434_v35, %v8088_v17  ;;  %v12445_v8 = vpop.permute.xlu1 %8430  ;;  %v8102_v2 = vunpack.i.l.bf16 %v14581_v11 }
 0x2bc   : > { %v6476_v5 = vld [vmem:[%s9046_s21 + $0x148] sm:$0xff]  ;;  %v8213_v14 = vunpack.i.h.bf16 %v14579_v46  ;;  %v4537_v18 = vsel %vm4536_vm10, %v4485_v52, %v8212_v49  ;;  %v8426_v50 = vpop.permute.xlu0 %8425  ;;  %v8338_v16 = vunpack.i.h.bf16 %v12188_v7  ;;  %v8729_v37 = vpack.i.bf16 %v6527_v40, %v6539_v6 }
 0x2bd   : > { %v6488_v45 = vld [vmem:[%s9046_s21 + $0x1c8] sm:$0xff]  ;;  %v4589_v35 = vsel %vm4588_vm11, %v4537_v18, %v8337_v21  ;;  %v8427_v33 = vunpack.i.l.bf16 %v8426_v50  ;;  %8720 = vrot.lane.b32.xlu1 %v8719_v58, %s9005_s23  ;;  %v8423_v23 = vunpack.i.h.bf16 %v12410_v59  ;;  %v8432_v49 = vunpack.i.l.bf16 %v12445_v8  ;;  %v14583_v59 = vld [vmem:[#allocation11_spill] sm:$0xff] }
 0x2be   : > { %v6629_v17 = vld [vmem:[%s9046_s21 + $0x14b] sm:$0xff]  ;;  %v4641_v46 = vsel %vm4640_vm12, %v4589_v35, %v8422_v30  ;;  %8715 = vrot.lane.b32.xlu0 %v8714_v15, %s8999_s10  ;;  %v8724_v52 = vpack.i.bf16 %v6476_v5, %v6488_v45  ;;  %v8428_v58 = vunpack.i.h.bf16 %v8426_v50  ;;  %v8217_v18 = vunpack.i.l.bf16 %v14583_v59 }
 0x2bf   : > { %v12457_v61 = vld [vmem:[%s9046_s21 + $0x1cb] sm:$0xff]  ;;  %v12466_v40 = vpop.permute.xlu1 %8440  ;;  %v4693_v6 = vsel %vm4692_vm13, %v4641_v46, %v8427_v33  ;;  %v4538_v30 = vsel %vm4536_vm10, %v4486_v43, %v8213_v14  ;;  %v8342_v5 = vunpack.i.l.bf16 %v12179_v13  ;;  %v8433_v43 = vunpack.i.h.bf16 %v12445_v8 }
 0x2c0   : > { %v6578_v51 = vld [vmem:[%s9046_s21 + $0x14a] sm:$0xff]  ;;  %v8436_v35 = vpop.permute.xlu0 %8435  ;;  %v8739_v15 = vpack.i.bf16 %v6629_v17, %v12457_v61  ;;  %v4590_v45 = vsel %vm4588_vm11, %v4538_v30, %v8338_v16  ;;  %v8442_v14 = vunpack.i.l.bf16 %v12466_v40  ;;  %v4745_v17 = vsel %vm4744_vm14, %v4693_v6, %v8432_v49 }
 0x2c1   : > { %v6590_v7 = vld [vmem:[%s9046_s21 + $0x1ca] sm:$0xff]  ;;  %v8437_v50 = vunpack.i.l.bf16 %v8436_v35  ;;  %8730 = vrot.lane.b32.xlu1 %v8729_v37, %s9004_s22  ;;  %v4642_v34 = vsel %vm4640_vm12, %v4590_v45, %v8423_v23  ;;  %v8097_v16 = vunpack.i.l.bf16 %v14582_v25  ;;  %v8438_v30 = vunpack.i.h.bf16 %v8436_v35 }
 0x2c2   : > { %v8734_v21 = vpack.i.bf16 %v6578_v51, %v6590_v7  ;;  %v6528_v33 = vld [vmem:[%s9046_s21 + $0x151] sm:$0xff]  ;;  %8725 = vrot.lane.b32.xlu0 %v8724_v52, %s9002_s19  ;;  %v4694_v37 = vsel %vm4692_vm13, %v4642_v34, %v8428_v58  ;;  %v12491_v23 = vsel %vm4484_vm8, %v12365_v19, %v8102_v2  ;;  %v8218_v8 = vunpack.i.h.bf16 %v14583_v59 }
 0x2c3   : > { %v6540_v46 = vld [vmem:[%s9046_s21 + $0x1d1] sm:$0xff]  ;;  %v12485_v1 = vpop.permute.xlu1 %8450  ;;  %v4797_v51 = vsel %vm4796_vm15, %v4745_v17, %v8437_v50  ;;  %v4539_v49 = vsel %vm4536_vm10, %v12431_v44, %v8217_v18  ;;  %v8343_v6 = vunpack.i.h.bf16 %v12179_v13  ;;  %v14584_v34 = vmov 0.0  }
 0x2c4   : > { %v8446_v52 = vpop.permute.xlu0 %8445  ;;  %6864 = vmatmul.mubr.f32.vlgmr.msra.gmra.mrb[0].mxu0 %v4797_v51  ;;  %v8749_v7 = vpack.i.bf16 %v6528_v33, %v6540_v46  ;;  %v4591_v35 = vsel %vm4588_vm11, %v4539_v49, %v8342_v5  ;;  %v8744_v19 = vpack.i.bf16 %v6477_v60, %v6489_v28  ;;  %v8443_v2 = vunpack.i.h.bf16 %v12466_v40  ;;  %v6579_v13 = vld [vmem:[%s9046_s21 + $0x152] sm:$0xff] }
 0x2c5   : > { %v8447_v45 = vunpack.i.l.bf16 %v8446_v52  ;;  %8740 = vrot.lane.b32.xlu1 %v8739_v15, %s9005_s23  ;;  %6866 = vmatprep.mubr.msk.f32.mxu0 %vm9000_vm9, %v14584_v34  ;;  %v4643_v58 = vsel %vm4640_vm12, %v4591_v35, %v8442_v14  ;;  %v8452_v44 = vunpack.i.l.bf16 %v12485_v1  ;;  %v4746_v59 = vsel %vm4744_vm14, %v4694_v37, %v8433_v43  ;;  %v6591_v18 = vld [vmem:[%s9046_s21 + $0x1d2] sm:$0xff] }
 0x2c6   : > { %8735 = vrot.lane.b32.xlu0 %v8734_v21, %s9003_s20  ;;  %v14585_v5 = vunpack.i.h.bf16 %v14581_v11  ;;  %v8448_v50 = vunpack.i.h.bf16 %v8446_v52  ;;  %v4798_v60 = vsel %vm4796_vm15, %v4746_v59, %v8438_v30  ;;  %v4489_v21 = vsel %vm4484_vm8, %v12377_v12, %v8097_v16  ;;  %v14586_v11 = vld [vmem:[#allocation20_spill] sm:$0xff]  ;;  %v12539_v49 = vld [vmem:[%s9046_s21 + $0x1d3] sm:$0xff] }
 0x2c7   : > { %v12514_v28 = vpop.permute.xlu1 %8460  ;;  %v4695_v40 = vsel %vm4692_vm13, %v4643_v58, %v8447_v45  ;;  %v4540_v33 = vsel %vm4536_vm10, %v12434_v32, %v8218_v8  ;;  %v8222_v46 = vunpack.i.l.bf16 %v14586_v11  ;;  %v8347_v17 = vunpack.i.l.bf16 %v12220_v0  ;;  %v6478_v32 = vld [vmem:[%s9046_s21 + $0x160] sm:$0xff] }
 0x2c8   : > { %v12512_v15 = vsel %vm4484_vm8, %v12368_v27, %v14585_v5  ;;  %v8456_v43 = vpop.permute.xlu0 %8455  ;;  %6867 = vmatmul.mubr.f32.gmra.mrb[2].mxu0 %v4798_v60  ;;  %v8759_v27 = vpack.i.bf16 %v12457_v61, %v12400_v22  ;;  %v4592_v14 = vsel %vm4588_vm11, %v4540_v33, %v8343_v6  ;;  %v8754_v12 = vpack.i.bf16 %v6579_v13, %v6591_v18  ;;  %v6490_v16 = vld [vmem:[%s9046_s21 + $0x1e0] sm:$0xff]  ;;  %v6630_v61 = vld [vmem:[%s9046_s21 + $0x153] sm:$0xff] }
 0x2c9   : > { %v8457_v30 = vunpack.i.l.bf16 %v8456_v43  ;;  %8750 = vrot.lane.b32.xlu1 %v8749_v7, %s9004_s22  ;;  %6869 = vmatprep.mubr.msk.f32.mxu0 %vm9000_vm9, %v14584_v34  ;;  %v4644_v51 = vsel %vm4640_vm12, %v4592_v14, %v8443_v2  ;;  %v8453_v37 = vunpack.i.h.bf16 %v12485_v1  ;;  %v8462_v8 = vunpack.i.l.bf16 %v12514_v28  ;;  %v6592_v60 = vld [vmem:[%s9046_s21 + $0x1e2] sm:$0xff] }
 0x2ca   : > { %8745 = vrot.lane.b32.xlu0 %v8744_v19, %s9002_s19  ;;  %v4747_v22 = vsel %vm4744_vm14, %v4695_v40, %v8452_v44  ;;  %v14587_v52 = vunpack.i.h.bf16 %v14582_v25  ;;  %v8458_v6 = vunpack.i.h.bf16 %v8456_v43  ;;  %v4696_v45 = vsel %vm4692_vm13, %v4644_v51, %v8448_v50  ;;  %v14588_v19 = vld [vmem:[#allocation95_spill] sm:$0xff]  ;;  %v6580_v50 = vld [vmem:[%s9046_s21 + $0x162] sm:$0xff] }
 0x2cb   : > { %v12545_v35 = vpop.permute.xlu1 %8470  ;;  %v4799_v1 = vsel %vm4796_vm15, %v4747_v22, %v8457_v30  ;;  %v8113_v2 = vunpack.i.h.bf16 %v14588_v19  ;;  %v8223_v58 = vunpack.i.h.bf16 %v14586_v11  ;;  %v4541_v44 = vsel %vm4536_vm10, %v4489_v21, %v8222_v46  ;;  %v6529_v11 = vld [vmem:[%s9046_s21 + $0x161] sm:$0xff] }
 0x2cc   : > { %v4490_v7 = vsel %vm4484_vm8, %v12385_v31, %v14587_v52  ;;  %v8466_v59 = vpop.permute.xlu0 %8465  ;;  %6870 = vmatmul.mubr.f32.gmra.mrb[4].mxu0 %v4799_v1  ;;  %v8769_v25 = vpack.i.bf16 %v6478_v32, %v6490_v16  ;;  %v8348_v31 = vunpack.i.h.bf16 %v12220_v0  ;;  %v4593_v13 = vsel %vm4588_vm11, %v4541_v44, %v8347_v17  ;;  %v6541_v46 = vld [vmem:[%s9046_s21 + $0x1e1] sm:$0xff] }
 0x2cd   : > { %v8467_v18 = vunpack.i.l.bf16 %v8466_v59  ;;  %8760 = vrot.lane.b32.xlu1 %v8759_v27, %s8999_s10  ;;  %6872 = vmatprep.mubr.msk.f32.mxu0 %vm9000_vm9, %v14584_v34  ;;  %v8764_v5 = vpack.i.bf16 %v6630_v61, %v12539_v49  ;;  %v8463_v40 = vunpack.i.h.bf16 %v12514_v28  ;;  %v4645_v21 = vsel %vm4640_vm12, %v4593_v13, %v8462_v8  ;;  %v14589_v30 = vld [vmem:[#allocation96_spill] sm:$0xff]  ;;  %v14590_v16 = vld [vmem:[#allocation19_spill] sm:$0xff] }
 0x2ce   : > { %v8472_v33 = vunpack.i.l.bf16 %v12545_v35  ;;  %8755 = vrot.lane.b32.xlu0 %v8754_v12, %s9003_s20  ;;  %v4748_v0 = vsel %vm4744_vm14, %v4696_v45, %v8453_v37  ;;  %v8112_v43 = vunpack.i.l.bf16 %v14588_v19  ;;  %v8468_v27 = vunpack.i.h.bf16 %v8466_v59  ;;  %v6479_v1 = vld [vmem:[%s9046_s21 + $0x168] sm:$0xff] }
 0x2cf   : > { %v12568_v14 = vpop.permute.xlu1 %8480  ;;  %v4800_v17 = vsel %vm4796_vm15, %v4748_v0, %v8458_v6  ;;  %v4697_v28 = vsel %vm4692_vm13, %v4645_v21, %v8467_v18  ;;  %v8108_v32 = vunpack.i.h.bf16 %v14589_v30  ;;  %v8227_v51 = vunpack.i.l.bf16 %v14590_v16  ;;  %v6491_v45 = vld [vmem:[%s9046_s21 + $0x1e8] sm:$0xff] }
 0x2d0   : > { %v4542_v12 = vsel %vm4536_vm10, %v4490_v7, %v8223_v58  ;;  %v8476_v37 = vpop.permute.xlu0 %8475  ;;  %6873 = vmatmul.mubr.f32.gmra.mrb[6].mxu0 %v4800_v17  ;;  %v8779_v8 = vpack.i.bf16 %v6580_v50, %v6592_v60  ;;  %v8352_v22 = vunpack.i.l.bf16 %v12211_v41  ;;  %v8774_v6 = vpack.i.bf16 %v6529_v11, %v6541_v46  ;;  %v12589_v13 = vld [vmem:[%s9046_s21 + $0x1e3] sm:$0xff] }
 0x2d1   : > { %v4594_v61 = vsel %vm4588_vm11, %v4542_v12, %v8348_v31  ;;  %v8477_v52 = vunpack.i.l.bf16 %v8476_v37  ;;  %8770 = vrot.lane.b32.xlu1 %v8769_v25, %s9002_s19  ;;  %6875 = vmatprep.mubr.msk.f32.mxu0 %vm9000_vm9, %v14584_v34  ;;  %v8473_v58 = vunpack.i.h.bf16 %v12545_v35  ;;  %v8482_v44 = vunpack.i.l.bf16 %v12568_v14  ;;  %v6631_v31 = vld [vmem:[%s9046_s21 + $0x163] sm:$0xff] }
 0x2d2   : > { %v4646_v7 = vsel %vm4640_vm12, %v4594_v61, %v8463_v40  ;;  %8765 = vrot.lane.b32.xlu0 %v8764_v5, %s9005_s23  ;;  %v4749_v59 = vsel %vm4744_vm14, %v4697_v28, %v8472_v33  ;;  %v8107_v25 = vunpack.i.l.bf16 %v14589_v30  ;;  %v8478_v18 = vunpack.i.h.bf16 %v8476_v37  ;;  %v6542_v12 = vld [vmem:[%s9046_s21 + $0x1e9] sm:$0xff] }
 0x2d3   : > { %v12592_v50 = vpop.permute.xlu1 %8490  ;;  %v4801_v60 = vsel %vm4796_vm15, %v4749_v59, %v8477_v52  ;;  %v4698_v35 = vsel %vm4692_vm13, %v4646_v7, %v8468_v27  ;;  %v12598_v40 = vsel %vm4484_vm8, %v12388_v47, %v8112_v43  ;;  %v8228_v5 = vunpack.i.h.bf16 %v14590_v16  ;;  %v6581_v43 = vld [vmem:[%s9046_s21 + $0x16a] sm:$0xff] }
 0x2d4   : > { %v4543_v21 = vsel %vm4536_vm10, %v12491_v23, %v8227_v51  ;;  %v8486_v33 = vpop.permute.xlu0 %8485  ;;  %6876 = vmatmul.mubr.f32.gmra.mrb[8].mxu0 %v4801_v60  ;;  %v8789_v0 = vpack.i.bf16 %v6479_v1, %v6491_v45  ;;  %v8353_v11 = vunpack.i.h.bf16 %v12211_v41  ;;  %v8784_v47 = vpack.i.bf16 %v6631_v31, %v12589_v13  ;;  %v6593_v27 = vld [vmem:[%s9046_s21 + $0x1ea] sm:$0xff] }
 0x2d5   : > { %v4595_v46 = vsel %vm4588_vm11, %v4543_v21, %v8352_v22  ;;  %v8487_v17 = vunpack.i.l.bf16 %v8486_v33  ;;  %8780 = vrot.lane.b32.xlu1 %v8779_v8, %s9003_s20  ;;  %6878 = vmatprep.mubr.msk.f32.mxu0 %vm9000_vm9, %v14584_v34  ;;  %v8483_v23 = vunpack.i.h.bf16 %v12568_v14  ;;  %v8492_v16 = vunpack.i.l.bf16 %v12592_v50  ;;  %v6530_v51 = vld [vmem:[%s9046_s21 + $0x169] sm:$0xff]  ;;  %v14591_v21 = vld [vmem:[#allocation99_spill] sm:$0xff] }
 0x2d6   : > { %v4647_v28 = vsel %vm4640_vm12, %v4595_v46, %v8482_v44  ;;  %8775 = vrot.lane.b32.xlu0 %v8774_v6, %s9004_s22  ;;  %v4750_v41 = vsel %vm4744_vm14, %v4698_v35, %v8473_v58  ;;  %v12622_v37 = vsel %vm4484_vm8, %v12393_v62, %v8113_v2  ;;  %v8488_v8 = vunpack.i.h.bf16 %v8486_v33  ;;  %v12640_v44 = vld [vmem:[%s9046_s21 + $0x1eb] sm:$0xff] }
 0x2d7   : > { %v12624_v22 = vpop.permute.xlu1 %8500  ;;  %v4802_v14 = vsel %vm4796_vm15, %v4750_v41, %v8478_v18  ;;  %v4699_v61 = vsel %vm4692_vm13, %v4647_v28, %v8487_v17  ;;  %v4493_v52 = vsel %vm4484_vm8, %v12403_v48, %v8107_v25  ;;  %v4544_v6 = vsel %vm4536_vm10, %v12512_v15, %v8228_v5  ;;  %v6632_v48 = vld [vmem:[%s9046_s21 + $0x16b] sm:$0xff]  ;;  %v6493_v41 = vld [vmem:[%s9046_s21 + $0x200] sm:$0xff] }
 0x2d8   : > { %v8232_v19 = vunpack.i.l.bf16 %v11785_v29  ;;  %v8496_v1 = vpop.permute.xlu0 %8495  ;;  %6879 = vmatmul.mubr.f32.gmra.mrb[10].mxu0 %v4802_v14  ;;  %v8799_v62 = vpack.i.bf16 %v6581_v43, %v6593_v27  ;;  %v4596_v2 = vsel %vm4588_vm11, %v4544_v6, %v8353_v11  ;;  %v8357_v45 = vunpack.i.l.bf16 %v12248_v54  ;;  %v6544_v43 = vld [vmem:[%s9046_s21 + $0x201] sm:$0xff] }
 0x2d9   : > { %v8497_v7 = vunpack.i.l.bf16 %v8496_v1  ;;  %8790 = vrot.lane.b32.xlu1 %v8789_v0, %s9002_s19  ;;  %6881 = vmatprep.mubr.msk.f32.mxu0 %vm9000_vm9, %v14584_v34  ;;  %v8794_v58 = vpack.i.bf16 %v6530_v51, %v6542_v12  ;;  %v4648_v15 = vsel %vm4640_vm12, %v4596_v2, %v8483_v23  ;;  %v8493_v59 = vunpack.i.h.bf16 %v12592_v50  ;;  %v14592_v51 = vld [vmem:[#allocation101_spill] sm:$0xff] }
 0x2da   : > { %v8502_v31 = vunpack.i.l.bf16 %v12624_v22  ;;  %8785 = vrot.lane.b32.xlu0 %v8784_v47, %s9005_s23  ;;  %v4751_v25 = vsel %vm4744_vm14, %v4699_v61, %v8492_v16  ;;  %v4494_v18 = vsel %vm4484_vm8, %v12406_v24, %v8108_v32  ;;  %v8498_v60 = vunpack.i.h.bf16 %v8496_v1  ;;  %v6543_v47 = vld [vmem:[%s9046_s21 + $0x1f1] sm:$0xff]  ;;  %v14593_v61 = vld [vmem:[#allocation80_spill] sm:$0xff] }
 0x2db   : > { %v12651_v35 = vpop.permute.xlu1 %8510  ;;  %v4803_v5 = vsel %vm4796_vm15, %v4751_v25, %v8497_v7  ;;  %v4700_v50 = vsel %vm4692_vm13, %v4648_v15, %v8488_v8  ;;  %v8122_v33 = vunpack.i.l.bf16 %v14591_v21  ;;  %v8233_v0 = vunpack.i.h.bf16 %v11785_v29  ;;  %v6492_v16 = vld [vmem:[%s9046_s21 + $0x1f0] sm:$0xff] }
 0x2dc   : > { %v4545_v11 = vsel %vm4536_vm10, %v4493_v52, %v8232_v19  ;;  %v8506_v46 = vpop.permute.xlu0 %8505  ;;  %6882 = vmatmul.mubr.f32.gmra.mrb[12].mxu0 %v4803_v5  ;;  %v8809_v24 = vpack.i.bf16 %v6632_v48, %v12640_v44  ;;  %v8358_v30 = vunpack.i.h.bf16 %v12248_v54  ;;  %v8804_v29 = vpack.i.bf16 %v12589_v13, %v12539_v49  ;;  %v12692_v48 = vld [vmem:[%s9046_s21 + $0x203] sm:$0xff] }
 0x2dd   : > { %v4597_v32 = vsel %vm4588_vm11, %v4545_v11, %v8357_v45  ;;  %v8507_v17 = vunpack.i.l.bf16 %v8506_v46  ;;  %8800 = vrot.lane.b32.xlu1 %v8799_v62, %s9003_s20  ;;  %6884 = vmatprep.mubr.msk.f32.mxu0 %vm9000_vm9, %v14584_v34  ;;  %v8503_v27 = vunpack.i.h.bf16 %v12624_v22  ;;  %v8512_v28 = vunpack.i.l.bf16 %v12651_v35 }
 0x2de   : > { %v4649_v23 = vsel %vm4640_vm12, %v4597_v32, %v8502_v31  ;;  %8795 = vrot.lane.b32.xlu0 %v8794_v58, %s9004_s22  ;;  %v4752_v54 = vsel %vm4744_vm14, %v4700_v50, %v8493_v59  ;;  %v8118_v12 = vunpack.i.h.bf16 %v14592_v51  ;;  %v8508_v8 = vunpack.i.h.bf16 %v8506_v46  ;;  %v12689_v58 = vld [vmem:[%s9046_s21 + $0x1f3] sm:$0xff] }
 0x2df   : > { %v12676_v14 = vpop.permute.xlu1 %8520  ;;  %v4804_v49 = vsel %vm4796_vm15, %v4752_v54, %v8498_v60  ;;  %v4701_v13 = vsel %vm4692_vm13, %v4649_v23, %v8507_v17  ;;  %v8117_v22 = vunpack.i.l.bf16 %v14592_v51  ;;  %v8237_v52 = vunpack.i.l.bf16 %v14593_v61  ;;  %v6595_v60 = vld [vmem:[%s9046_s21 + $0x202] sm:$0xff] }
 0x2e0   : > { %v4546_v6 = vsel %vm4536_vm10, %v4494_v18, %v8233_v0  ;;  %v8516_v19 = vpop.permute.xlu0 %8515  ;;  %6885 = vmatmul.mubr.f32.gmra.mrb[14].mxu0 %v4804_v49  ;;  %v8819_v1 = vpack.i.bf16 %v6544_v43, %v6543_v47  ;;  %v8362_v62 = vunpack.i.l.bf16 %v12241_v39  ;;  %v8814_v7 = vpack.i.bf16 %v6493_v41, %v6492_v16  ;;  %v6594_v18 = vld [vmem:[%s9046_s21 + $0x1f2] sm:$0xff]  ;;  %v14594_v51 = vld [vmem:[#allocation104_spill] sm:$0xff]  ;;  %v14595_v49 = vld [vmem:[#allocation21_spill] sm:$0xff] }
 0x2e1   : > { %v4598_v2 = vsel %vm4588_vm11, %v4546_v6, %v8358_v30  ;;  %v8517_v45 = vunpack.i.l.bf16 %v8516_v19  ;;  %8810 = vrot.lane.b32.xlu1 %v8809_v24, %s9005_s23  ;;  %6887 = vmatprep.mubr.msk.f32.mxu0 %vm9000_vm9, %v14584_v34  ;;  %v8513_v59 = vunpack.i.h.bf16 %v12651_v35  ;;  %v8522_v31 = vunpack.i.l.bf16 %v12676_v14  ;;  %v6495_v47 = vld [vmem:[%s9046_s21 + $0x210] sm:$0xff] }
 0x2e2   : > { %v4650_v15 = vsel %vm4640_vm12, %v4598_v2, %v8503_v27  ;;  %8805 = vrot.lane.b32.xlu0 %v8804_v29, %s8999_s10  ;;  %v4753_v25 = vsel %vm4744_vm14, %v4701_v13, %v8512_v28  ;;  %v12703_v5 = vsel %vm4484_vm8, %v12413_v63, %v8122_v33  ;;  %v8518_v50 = vunpack.i.h.bf16 %v8516_v19  ;;  %v6494_v29 = vld [vmem:[%s9046_s21 + $0x208] sm:$0xff]  ;;  %v6597_v19 = vld [vmem:[%s9046_s21 + $0x212] sm:$0xff] }
 0x2e3   : > { %v12705_v21 = vpop.permute.xlu1 %8530  ;;  %v4805_v0 = vsel %vm4796_vm15, %v4753_v25, %v8517_v45  ;;  %v4702_v35 = vsel %vm4692_vm13, %v4650_v15, %v8508_v8  ;;  %v4497_v11 = vsel %vm4484_vm8, %v12416_v56, %v8117_v22  ;;  %v8238_v46 = vunpack.i.h.bf16 %v14593_v61  ;;  %v6596_v6 = vld [vmem:[%s9046_s21 + $0x20a] sm:$0xff] }
 0x2e4   : > { %v4547_v24 = vsel %vm4536_vm10, %v12598_v40, %v8237_v52  ;;  %v8526_v30 = vpop.permute.xlu0 %8525  ;;  %6888 = vmatmul.mubr.f32.gmra.mrb[16].mxu0 %v4805_v0  ;;  %v8829_v63 = vpack.i.bf16 %v12692_v48, %v12689_v58  ;;  %v8363_v33 = vunpack.i.h.bf16 %v12241_v39  ;;  %v8824_v56 = vpack.i.bf16 %v6595_v60, %v6594_v18  ;;  %v6546_v15 = vld [vmem:[%s9046_s21 + $0x211] sm:$0xff]  ;;  %v14596_v18 = vld [vmem:[#allocation88_spill] sm:$0xff] }
 0x2e5   : > { %v4599_v32 = vsel %vm4588_vm11, %v4547_v24, %v8362_v62  ;;  %v8527_v17 = vunpack.i.l.bf16 %v8526_v30  ;;  %8820 = vrot.lane.b32.xlu1 %v8819_v1, %s9004_s22  ;;  %6890 = vmatprep.mubr.msk.f32.mxu0 %vm9000_vm9, %v14584_v34  ;;  %v8523_v40 = vunpack.i.h.bf16 %v12676_v14  ;;  %v8532_v27 = vunpack.i.l.bf16 %v12705_v21 }
 0x2e6   : > { %v4651_v43 = vsel %vm4640_vm12, %v4599_v32, %v8522_v31  ;;  %8815 = vrot.lane.b32.xlu0 %v8814_v7, %s9002_s19  ;;  %v4754_v39 = vsel %vm4744_vm14, %v4702_v35, %v8513_v59  ;;  %v4498_v23 = vsel %vm4484_vm8, %v12419_v26, %v8118_v12  ;;  %v8528_v28 = vunpack.i.h.bf16 %v8526_v30  ;;  %v6545_v7 = vld [vmem:[%s9046_s21 + $0x209] sm:$0xff]  ;;  %v12771_v32 = vld [vmem:[%s9046_s21 + $0x213] sm:$0xff] }
 0x2e7   : > { %v12730_v54 = vpop.permute.xlu1 %8540  ;;  %v4806_v16 = vsel %vm4796_vm15, %v4754_v39, %v8518_v50  ;;  %v4703_v41 = vsel %vm4692_vm13, %v4651_v43, %v8527_v17  ;;  %v8152_v8 = vunpack.i.l.bf16 %v14594_v51  ;;  %v4548_v14 = vsel %vm4536_vm10, %v12622_v37, %v8238_v46  ;;  %v12763_v46 = vld [vmem:[%s9046_s21 + $0x20b] sm:$0xff] }
 0x2e8   : > { %v8242_v13 = vunpack.i.l.bf16 %v14595_v49  ;;  %v8536_v22 = vpop.permute.xlu0 %8535  ;;  %6891 = vmatmul.mubr.f32.gmra.mrb[18].mxu0 %v4806_v16  ;;  %v8839_v26 = vpack.i.bf16 %v6495_v47, %v6494_v29  ;;  %v4600_v12 = vsel %vm4588_vm11, %v4548_v14, %v8363_v33  ;;  %v8367_v61 = vunpack.i.l.bf16 %v12274_v57 }
 0x2e9   : > { %v8537_v52 = vunpack.i.l.bf16 %v8536_v22  ;;  %8830 = vrot.lane.b32.xlu1 %v8829_v63, %s9005_s23  ;;  %6893 = vmatprep.mubr.msk.f32.mxu0 %vm9000_vm9, %v14584_v34  ;;  %v8834_v37 = vpack.i.bf16 %v12689_v58, %v12640_v44  ;;  %v4652_v1 = vsel %vm4640_vm12, %v4600_v12, %v8523_v40  ;;  %v8533_v62 = vunpack.i.h.bf16 %v12705_v21 }
 0x2ea   : > { %v8542_v2 = vunpack.i.l.bf16 %v12730_v54  ;;  %8825 = vrot.lane.b32.xlu0 %v8824_v56, %s9003_s20  ;;  %v4755_v45 = vsel %vm4744_vm14, %v4703_v41, %v8532_v27  ;;  %v8243_v59 = vunpack.i.h.bf16 %v14595_v49  ;;  %v8538_v31 = vunpack.i.h.bf16 %v8536_v22  ;;  %v6547_v41 = vld [vmem:[%s9046_s21 + $0x221] sm:$0xff] }
 0x2eb   : > { %v12755_v25 = vpop.permute.xlu1 %8550  ;;  %v4807_v44 = vsel %vm4796_vm15, %v4755_v45, %v8537_v52  ;;  %v4704_v58 = vsel %vm4692_vm13, %v4652_v1, %v8528_v28  ;;  %v8247_v60 = vunpack.i.l.bf16 %v14596_v18  ;;  %v4549_v50 = vsel %vm4536_vm10, %v4497_v11, %v8242_v13  ;;  %v6496_v22 = vld [vmem:[%s9046_s21 + $0x220] sm:$0xff]  ;;  %v6599_v18 = vld [vmem:[%s9046_s21 + $0x22a] sm:$0xff] }
 0x2ec   : > { %v8368_v21 = vunpack.i.h.bf16 %v12274_v57  ;;  %v8546_v0 = vpop.permute.xlu0 %8545  ;;  %6894 = vmatmul.mubr.f32.gmra.mrb[20].mxu0 %v4807_v44  ;;  %v8849_v35 = vpack.i.bf16 %v6597_v19, %v6596_v6  ;;  %v4601_v24 = vsel %vm4588_vm11, %v4549_v50, %v8367_v61  ;;  %v8543_v30 = vunpack.i.h.bf16 %v12730_v54  ;;  %v12818_v44 = vld [vmem:[%s9046_s21 + $0x22b] sm:$0xff] }
 0x2ed   : > { %v8547_v63 = vunpack.i.l.bf16 %v8546_v0  ;;  %8840 = vrot.lane.b32.xlu1 %v8839_v26, %s9002_s19  ;;  %6896 = vmatprep.mubr.msk.f32.mxu0 %vm9000_vm9, %v14584_v34  ;;  %v8844_v33 = vpack.i.bf16 %v6546_v15, %v6545_v7  ;;  %v4653_v57 = vsel %vm4640_vm12, %v4601_v24, %v8542_v2  ;;  %v8552_v11 = vunpack.i.l.bf16 %v12755_v25  ;;  %v6497_v26 = vld [vmem:[%s9046_s21 + $0x228] sm:$0xff] }
 0x2ee   : > { %v8548_v17 = vunpack.i.h.bf16 %v8546_v0  ;;  %8835 = vrot.lane.b32.xlu0 %v8834_v37, %s8999_s10  ;;  %v4756_v56 = vsel %vm4744_vm14, %v4704_v58, %v8533_v62  ;;  %v4550_v29 = vsel %vm4536_vm10, %v4498_v23, %v8243_v59  ;;  %v8859_v27 = vpack.i.bf16 %v12763_v46, %v12692_v48  ;;  %v6598_v58 = vld [vmem:[%s9046_s21 + $0x222] sm:$0xff] }
 0x2ef   : > { %v8561_v47 = vpop.permute.xlu1 %8560  ;;  %v4808_v40 = vsel %vm4796_vm15, %v4756_v56, %v8538_v31  ;;  %v4705_v43 = vsel %vm4692_vm13, %v4653_v57, %v8547_v63  ;;  %v8277_v39 = vunpack.i.l.bf16 %v11919_v36  ;;  %v8372_v28 = vunpack.i.l.bf16 %v12266_v20  ;;  %v6548_v36 = vld [vmem:[%s9046_s21 + $0x229] sm:$0xff] }
 0x2f0   : > { %v4602_v54 = vsel %vm4588_vm11, %v4550_v29, %v8368_v21  ;;  %v8556_v16 = vpop.permute.xlu0 %8555  ;;  %6897 = vmatmul.mubr.f32.gmra.mrb[22].mxu0 %v4808_v40  ;;  %v8854_v23 = vpack.i.bf16 %v12771_v32, %v12763_v46  ;;  %v8402_v14 = vunpack.i.l.bf16 %v12341_v55  ;;  %v8553_v13 = vunpack.i.h.bf16 %v12755_v25  ;;  %v12810_v31 = vld [vmem:[%s9046_s21 + $0x223] sm:$0xff] }
 0x2f1   : > { %v4654_v49 = vsel %vm4640_vm12, %v4602_v54, %v8543_v30  ;;  %v8557_v48 = vunpack.i.l.bf16 %v8556_v16  ;;  %8850 = vrot.lane.b32.xlu1 %v8849_v35, %s9003_s20  ;;  %6899 = vmatprep.mubr.msk.f32.mxu0 %vm9000_vm9, %v14584_v34  ;;  %v8563_v12 = vunpack.i.h.bf16 %v8561_v47  ;;  %v8562_v61 = vunpack.i.l.bf16 %v8561_v47  ;;  %v6498_v47 = vld [vmem:[%s9046_s21 + $0x230] sm:$0xff]  ;;  %v6499_v40 = vld [vmem:[%s9046_s21 + $0x240] sm:$0xff] }
 0x2f2   : > { %8845 = vrot.lane.b32.xlu0 %v8844_v33, %s9004_s22  ;;  %v4757_v52 = vsel %vm4744_vm14, %v4705_v43, %v8552_v11  ;;  %v4706_v37 = vsel %vm4692_vm13, %v4654_v49, %v8548_v17  ;;  %v4511_v6 = vsel %vm4484_vm8, %v12425_v38, %v8152_v8  ;;  %v4551_v19 = vsel %vm4536_vm10, %v12703_v5, %v8247_v60 }
 0x2f3   : > { %v8558_v1 = vunpack.i.h.bf16 %v8556_v16  ;;  %v8571_v62 = vpop.permute.xlu1 %8570  ;;  %v4809_v2 = vsel %vm4796_vm15, %v4757_v52, %v8557_v48  ;;  %v4563_v45 = vsel %vm4536_vm10, %v4511_v6, %v8277_v39  ;;  %v4603_v7 = vsel %vm4588_vm11, %v4551_v19, %v8372_v28 }
 0x2f4   : > { %v8566_v15 = vpop.permute.xlu0 %8565  ;;  %6900 = vmatmul.mubr.f32.gmra.mrb[24].mxu0 %v4809_v2  ;;  %v8869_v51 = vpack.i.bf16 %v6548_v36, %v6547_v41  ;;  %v8864_v59 = vpack.i.bf16 %v6497_v26, %v6496_v22  ;;  %v4615_v38 = vsel %vm4588_vm11, %v4563_v45, %v8402_v14  ;;  %v4758_v25 = vsel %vm4744_vm14, %v4706_v37, %v8553_v13  ;;  %v6600_v14 = vld [vmem:[%s9046_s21 + $0x232] sm:$0xff]  ;;  %v6601_v22 = vld [vmem:[%s9046_s21 + $0x242] sm:$0xff] }
 0x2f5   : > { %v8568_v5 = vunpack.i.h.bf16 %v8566_v15  ;;  %v8567_v8 = vunpack.i.l.bf16 %v8566_v15  ;;  %8860 = vrot.lane.b32.xlu1 %v8859_v27, %s8999_s10  ;;  %6902 = vmatprep.mubr.msk.f32.mxu0 %vm9000_vm9, %v14584_v34  ;;  %v4655_v60 = vsel %vm4640_vm12, %v4603_v7, %v8563_v12  ;;  %v4667_v50 = vsel %vm4640_vm12, %v4615_v38, %v8562_v61  ;;  %v6549_v26 = vld [vmem:[%s9046_s21 + $0x231] sm:$0xff]  ;;  %v6550_v12 = vld [vmem:[%s9046_s21 + $0x241] sm:$0xff] }
 0x2f6   : > { %v8573_v21 = vunpack.i.h.bf16 %v8571_v62  ;;  %v8572_v0 = vunpack.i.l.bf16 %v8571_v62  ;;  %8855 = vrot.lane.b32.xlu0 %v8854_v23, %s9005_s23  ;;  %v4810_v46 = vsel %vm4796_vm15, %v4758_v25, %v8558_v1  ;;  %v8879_v33 = vpack.i.bf16 %v12818_v44, %v12810_v31 }
 0x2f7   : > { %v8581_v35 = vpop.permute.xlu1 %8580  ;;  %v4707_v24 = vsel %vm4692_vm13, %v4655_v60, %v8568_v5  ;;  %v4719_v30 = vsel %vm4692_vm13, %v4667_v50, %v8567_v8  ;;  %v8874_v57 = vpack.i.bf16 %v6599_v18, %v6598_v58  ;;  %v8373_v11 = vunpack.i.h.bf16 %v12266_v20 }
 0x2f8   : > { %v8576_v63 = vpop.permute.xlu0 %8575  ;;  %6903 = vmatmul.mubr.f32.gmra.mrb[26].mxu0 %v4810_v46  ;;  %v8403_v17 = vunpack.i.h.bf16 %v12341_v55  ;;  %v8583_v43 = vunpack.i.h.bf16 %v8581_v35  ;;  %v8582_v27 = vunpack.i.l.bf16 %v8581_v35  ;;  %v4759_v39 = vsel %vm4744_vm14, %v4707_v24, %v8573_v21 }
 0x2f9   : > { %v8578_v56 = vunpack.i.h.bf16 %v8576_v63  ;;  %v8577_v29 = vunpack.i.l.bf16 %v8576_v63  ;;  %8870 = vrot.lane.b32.xlu1 %v8869_v51, %s9004_s22  ;;  %6905 = vmatprep.mubr.msk.f32.mxu0 %vm9000_vm9, %v14584_v34  ;;  %v4771_v20 = vsel %vm4744_vm14, %v4719_v30, %v8572_v0  ;;  %v8889_v23 = vpack.i.bf16 %v6499_v40, %v6498_v47  ;;  %v6450_v51 = vld [vmem:[%s9046_s21 + $0x233] sm:$0xff]  ;;  %v6551_v0 = vld [vmem:[%s9046_s21 + $0x249] sm:$0xff] }
 0x2fa   : > { %8865 = vrot.lane.b32.xlu0 %v8864_v59, %s9002_s19  ;;  %v8884_v41 = vpack.i.bf16 %v12810_v31, %v12771_v32  ;;  %v4604_v49 = vsel %vm4588_vm11, %v11832_v10, %v8373_v11  ;;  %v4616_v13 = vsel %vm4588_vm11, %v11945_v3, %v8403_v17  ;;  %v8899_v1 = vpack.i.bf16 %v6601_v22, %v6600_v14  ;;  %v12867_v59 = vld [vmem:[%s9046_s21 + $0x243] sm:$0xff]  ;;  %v6552_v63 = vld [vmem:[%s9046_s21 + $0x251] sm:$0xff] }
 0x2fb   : > { %v8591_v55 = vpop.permute.xlu1 %8590  ;;  %v4811_v28 = vsel %vm4796_vm15, %v4759_v39, %v8578_v56  ;;  %v4823_v54 = vsel %vm4796_vm15, %v4771_v20, %v8577_v29  ;;  %v4656_v61 = vsel %vm4640_vm12, %v4604_v49, %v8583_v43  ;;  %v4668_v32 = vsel %vm4640_vm12, %v4616_v13, %v8582_v27  ;;  %v12895_v27 = vld [vmem:[%s9046_s21 + $0x24b] sm:$0xff] }
 0x2fc   : > { %v8586_v16 = vpop.permute.xlu0 %8585  ;;  %6906 = vmatmul.mubr.f32.gmra.mrb[28].mxu0 %v4811_v28  ;;  %6942 = vmatmul.mubr.f32.vlgmr.msra.gmra.mrb[0].mxu1 %v4823_v54  ;;  %v8593_v52 = vunpack.i.h.bf16 %v8591_v55  ;;  %v8592_v10 = vunpack.i.l.bf16 %v8591_v55  ;;  %v8894_v62 = vpack.i.bf16 %v6550_v12, %v6549_v26  ;;  %v8377_v2 = vunpack.i.l.bf16 %v12300_v9  ;;  %v12901_v54 = vld [vmem:[%s9046_s21 + $0x253] sm:$0xff] }
 0x2fd   : > { %v8588_v48 = vunpack.i.h.bf16 %v8586_v16  ;;  %v8587_v36 = vunpack.i.l.bf16 %v8586_v16  ;;  %8880 = vrot.lane.b32.xlu1 %v8879_v33, %s9005_s23  ;;  %6908 = vmatprep.mubr.msk.f32.mxu0 %vm9000_vm9, %v14584_v34  ;;  %v8407_v45 = vunpack.i.l.bf16 %v12382_v53  ;;  %v8909_v50 = vpack.i.bf16 %v6450_v51, %v12818_v44  ;;  %v6500_v33 = vld [vmem:[%s9046_s21 + $0x248] sm:$0xff]  ;;  %v6501_v44 = vld [vmem:[%s9046_s21 + $0x250] sm:$0xff]  ;;  %v14597_v12 = vld [vmem:[#allocation23_spill] sm:$0xff] }
 0x2fe   : > { %8875 = vrot.lane.b32.xlu0 %v8874_v57, %s9003_s20  ;;  %6944 = vmatprep.mubr.msk.f32.mxu1 %vm9000_vm9, %v14584_v34  ;;  %v8904_v21 = vpack.i.bf16 %v12867_v59, %v6450_v51  ;;  %v4605_v35 = vsel %vm4588_vm11, %v11879_v42, %v8377_v2  ;;  %v8919_v40 = vpack.i.bf16 %v6552_v63, %v6551_v0  ;;  %v8378_v39 = vunpack.i.h.bf16 %v12300_v9  ;;  %v6602_v16 = vld [vmem:[%s9046_s21 + $0x24a] sm:$0xff]  ;;  %v6553_v0 = vld [vmem:[%s9046_s21 + $0x261] sm:$0xff] }
 0x2ff   : > { %v8601_v3 = vpop.permute.xlu1 %8600  ;;  %v4708_v37 = vsel %vm4692_vm13, %v4656_v61, %v8588_v48  ;;  %v4720_v6 = vsel %vm4692_vm13, %v4668_v32, %v8587_v36  ;;  %v4617_v46 = vsel %vm4588_vm11, %v11994_v4, %v8407_v45  ;;  %v8914_v43 = vpack.i.bf16 %v6501_v44, %v6500_v33  ;;  %v14598_v32 = vld [vmem:[#allocation26_spill] sm:$0xff] }
 0x300   : > { %v8596_v19 = vpop.permute.xlu0 %8595  ;;  %v8603_v31 = vunpack.i.h.bf16 %v8601_v3  ;;  %v8602_v38 = vunpack.i.l.bf16 %v8601_v3  ;;  %v4760_v5 = vsel %vm4744_vm14, %v4708_v37, %v8593_v52  ;;  %v4772_v8 = vsel %vm4744_vm14, %v4720_v6, %v8592_v10  ;;  %v6502_v37 = vld [vmem:[%s9046_s21 + $0x260] sm:$0xff]  ;;  %v6503_v6 = vld [vmem:[%s9046_s21 + $0x268] sm:$0xff] }
 0x301   : > { %v8598_v7 = vunpack.i.h.bf16 %v8596_v19  ;;  %v8597_v15 = vunpack.i.l.bf16 %v8596_v19  ;;  %8890 = vrot.lane.b32.xlu1 %v8889_v23, %s9002_s19  ;;  %v8408_v20 = vunpack.i.h.bf16 %v12382_v53  ;;  %v6603_v23 = vld [vmem:[%s9046_s21 + $0x252] sm:$0xff]  ;;  %v8929_v22 = vpack.i.bf16 %v12901_v54, %v12895_v27 }
 0x302   : > { %8885 = vrot.lane.b32.xlu0 %v8884_v41, %s8999_s10  ;;  %v4657_v57 = vsel %vm4640_vm12, %v4605_v35, %v8603_v31  ;;  %v4669_v11 = vsel %vm4640_vm12, %v4617_v46, %v8602_v38  ;;  %v8924_v26 = vpack.i.bf16 %v6603_v23, %v6602_v16  ;;  %v4606_v61 = vsel %vm4588_vm11, %v14597_v12, %v8378_v39  ;;  %v6554_v35 = vld [vmem:[%s9046_s21 + $0x269] sm:$0xff] }
 0x303   : > { %v8611_v25 = vpop.permute.xlu1 %8610  ;;  %v4812_v58 = vsel %vm4796_vm15, %v4760_v5, %v8598_v7  ;;  %v4824_v18 = vsel %vm4796_vm15, %v4772_v8, %v8597_v15  ;;  %v4618_v52 = vsel %vm4588_vm11, %v14598_v32, %v8408_v20  ;;  %v8939_v31 = vpack.i.bf16 %v6503_v6, %v6502_v37  ;;  %v6604_v5 = vld [vmem:[%s9046_s21 + $0x262] sm:$0xff]  ;;  %v14599_v8 = vld [vmem:[#allocation37_spill] sm:$0xff] }
 0x304   : > { %v8606_v60 = vpop.permute.xlu0 %8605  ;;  %6909 = vmatmul.mubr.f32.gmra.mrb[30].mxu0 %v4812_v58  ;;  %6945 = vmatmul.mubr.f32.gmra.mrb[2].mxu1 %v4824_v18  ;;  %v8613_v17 = vunpack.i.h.bf16 %v8611_v25  ;;  %v8612_v42 = vunpack.i.l.bf16 %v8611_v25  ;;  %v8934_v38 = vpack.i.bf16 %v12895_v27, %v12867_v59  ;;  %v8382_v25 = vunpack.i.l.bf16 %v14599_v8  ;;  %v14600_v58 = vld [vmem:[#allocation39_spill] sm:$0xff]  ;;  %v6656_v27 = vld [vmem:[%s9046_s21 + $0x26b] sm:$0xff] }
 0x305   : > { %v8608_v24 = vunpack.i.h.bf16 %v8606_v60  ;;  %v8607_v30 = vunpack.i.l.bf16 %v8606_v60  ;;  %8900 = vrot.lane.b32.xlu1 %v8899_v1, %s9003_s20  ;;  %6911 = vmatprep.mubr.msk.f32.mxu0 %vm9000_vm9, %v14584_v34  ;;  %v8412_v18 = vunpack.i.l.bf16 %v14600_v58  ;;  %v14604_v6 = vld [vmem:[#allocation25_spill] sm:$0xff] }
 0x306   : > { %8895 = vrot.lane.b32.xlu0 %v8894_v62, %s9004_s22  ;;  %6947 = vmatprep.mubr.msk.f32.mxu1 %vm9000_vm9, %v14584_v34 }
 0x307   : > { %v8621_v4 = vpop.permute.xlu1 %8620  ;;  %v4709_v56 = vsel %vm4692_vm13, %v4657_v57, %v8608_v24  ;;  %v4721_v29 = vsel %vm4692_vm13, %v4669_v11, %v8607_v30 }
 0x308   : > { %v8616_v47 = vpop.permute.xlu0 %8615  ;;  %v8623_v41 = vunpack.i.h.bf16 %v8621_v4  ;;  %v8622_v14 = vunpack.i.l.bf16 %v8621_v4  ;;  %v4761_v49 = vsel %vm4744_vm14, %v4709_v56, %v8613_v17  ;;  %v4773_v13 = vsel %vm4744_vm14, %v4721_v29, %v8612_v42  ;;  %v14601_v42 = vld [vmem:[#allocation69_spill] sm:$0xff] }
 0x309   : > { %v8618_v55 = vunpack.i.h.bf16 %v8616_v47  ;;  %v8617_v28 = vunpack.i.l.bf16 %v8616_v47  ;;  %8910 = vrot.lane.b32.xlu1 %v8909_v50, %s8999_s10  ;;  %v8944_v17 = vpack.i.bf16 %v6554_v35, %v6553_v0  ;;  %v4607_v4 = vsel %vm4588_vm11, %v14601_v42, %v8382_v25  ;;  %v14602_v56 = vld [vmem:[#allocation85_spill] sm:$0xff]  ;;  %v14608_v42 = vld [vmem:[#allocation16_spill] sm:$0xff] }
 0x30a   : > { %8905 = vrot.lane.b32.xlu0 %v8904_v21, %s9005_s23  ;;  %v4658_v19 = vsel %vm4640_vm12, %v4606_v61, %v8623_v41  ;;  %v4670_v1 = vsel %vm4640_vm12, %v4618_v52, %v8622_v14  ;;  %v6605_v21 = vld [vmem:[%s9046_s21 + $0x26a] sm:$0xff]  ;;  %v4619_v29 = vsel %vm4588_vm11, %v14602_v56, %v8412_v18  ;;  %v14606_v18 = vld [vmem:[#allocation40_spill] sm:$0xff] }
 0x30b   : > { %v8631_v9 = vpop.permute.xlu1 %8630  ;;  %v4813_v53 = vsel %vm4796_vm15, %v4761_v49, %v8618_v55  ;;  %v4825_v48 = vsel %vm4796_vm15, %v4773_v13, %v8617_v28  ;;  %v8949_v11 = vpack.i.bf16 %v6605_v21, %v6604_v5  ;;  %v8383_v13 = vunpack.i.h.bf16 %v14599_v8  ;;  %v14605_v25 = vld [vmem:[#allocation97_spill] sm:$0xff] }
 0x30c   : > { %v8626_v36 = vpop.permute.xlu0 %8625  ;;  %6912 = vmatmul.mubr.f32.gmra.mrb[32].mxu0 %v4813_v53  ;;  %6948 = vmatmul.mubr.f32.gmra.mrb[4].mxu1 %v4825_v48  ;;  %v8633_v62 = vunpack.i.h.bf16 %v8631_v9  ;;  %v8632_v2 = vunpack.i.l.bf16 %v8631_v9  ;;  %v8413_v9 = vunpack.i.h.bf16 %v14600_v58  ;;  %v8387_v58 = vunpack.i.l.bf16 %v14605_v25 }
 0x30d   : > { %v8628_v10 = vunpack.i.h.bf16 %v8626_v36  ;;  %v8627_v3 = vunpack.i.l.bf16 %v8626_v36  ;;  %8920 = vrot.lane.b32.xlu1 %v8919_v40, %s9004_s22  ;;  %6914 = vmatprep.mubr.msk.f32.mxu0 %vm9000_vm9, %v14584_v34 }
 0x30e   : > { %8915 = vrot.lane.b32.xlu0 %v8914_v43, %s9002_s19  ;;  %6950 = vmatprep.mubr.msk.f32.mxu1 %vm9000_vm9, %v14584_v34  ;;  %v6655_v43 = vld [vmem:[%s9046_s21 + $0x263] sm:$0xff] }
 0x30f   : > { %v8641_v45 = vpop.permute.xlu1 %8640  ;;  %v4710_v7 = vsel %vm4692_vm13, %v4658_v19, %v8628_v10  ;;  %v4722_v15 = vsel %vm4692_vm13, %v4670_v1, %v8627_v3  ;;  %v8954_v49 = vpack.i.bf16 %v6656_v27, %v6655_v43  ;;  %v14603_v3 = vld [vmem:[#allocation22_spill] sm:$0xff]  ;;  %v4620_v19 = vsel %vm4588_vm11, %v14604_v6, %v8413_v9 }
 0x310   : > { %v8636_v51 = vpop.permute.xlu0 %8635  ;;  %v8643_v46 = vunpack.i.h.bf16 %v8641_v45  ;;  %v8642_v24 = vunpack.i.l.bf16 %v8641_v45  ;;  %v4762_v30 = vsel %vm4744_vm14, %v4710_v7, %v8633_v62  ;;  %v4774_v59 = vsel %vm4744_vm14, %v4722_v15, %v8632_v2 }
 0x311   : > { %v8638_v60 = vunpack.i.h.bf16 %v8636_v51  ;;  %v8637_v50 = vunpack.i.l.bf16 %v8636_v51  ;;  %8930 = vrot.lane.b32.xlu1 %v8929_v22, %s9005_s23  ;;  %v4608_v37 = vsel %vm4588_vm11, %v14603_v3, %v8383_v13  ;;  %v6555_v51 = vld [vmem:[%s9046_s21 + $0x271] sm:$0xff] }
 0x312   : > { %8925 = vrot.lane.b32.xlu0 %v8924_v26, %s9003_s20  ;;  %v4659_v39 = vsel %vm4640_vm12, %v4607_v4, %v8643_v46  ;;  %v4671_v20 = vsel %vm4640_vm12, %v4619_v29, %v8642_v24 }
 0x313   : > { %v8651_v63 = vpop.permute.xlu1 %8650  ;;  %v4814_v33 = vsel %vm4796_vm15, %v4762_v30, %v8638_v60  ;;  %v4826_v44 = vsel %vm4796_vm15, %v4774_v59, %v8637_v50  ;;  %v8417_v60 = vunpack.i.l.bf16 %v14606_v18  ;;  %v6657_v30 = vld [vmem:[%s9046_s21 + $0x273] sm:$0xff] }
 0x314   : > { %v8646_v57 = vpop.permute.xlu0 %8645  ;;  %6915 = vmatmul.mubr.f32.gmra.mrb[34].mxu0 %v4814_v33  ;;  %6951 = vmatmul.mubr.f32.gmra.mrb[6].mxu1 %v4826_v44  ;;  %v8653_v55 = vunpack.i.h.bf16 %v8651_v63  ;;  %v8652_v28 = vunpack.i.l.bf16 %v8651_v63  ;;  %v6606_v44 = vld [vmem:[%s9046_s21 + $0x272] sm:$0xff] }
 0x315   : > { %v8648_v47 = vunpack.i.h.bf16 %v8646_v57  ;;  %v8647_v40 = vunpack.i.l.bf16 %v8646_v57  ;;  %8940 = vrot.lane.b32.xlu1 %v8939_v31, %s9002_s19  ;;  %6917 = vmatprep.mubr.msk.f32.mxu0 %vm9000_vm9, %v14584_v34  ;;  %v4621_v4 = vsel %vm4588_vm11, %v14608_v42, %v8417_v60 }
 0x316   : > { %8935 = vrot.lane.b32.xlu0 %v8934_v38, %s8999_s10  ;;  %6953 = vmatprep.mubr.msk.f32.mxu1 %vm9000_vm9, %v14584_v34  ;;  %v6504_v38 = vld [vmem:[%s9046_s21 + $0x270] sm:$0xff]  ;;  %s5184_s21 = smul.u32 408, %s9037_s16 }
 0x317   : > { %v8661_v16 = vpop.permute.xlu1 %8660  ;;  %v4711_v23 = vsel %vm4692_vm13, %v4659_v39, %v8648_v47  ;;  %v4723_v41 = vsel %vm4692_vm13, %v4671_v20, %v8647_v40 }
 0x318   : > { %v8656_v14 = vpop.permute.xlu0 %8655  ;;  %v8663_v36 = vunpack.i.h.bf16 %v8661_v16  ;;  %v8662_v22 = vunpack.i.l.bf16 %v8661_v16  ;;  %v4763_v26 = vsel %vm4744_vm14, %v4711_v23, %v8653_v55  ;;  %v4775_v12 = vsel %vm4744_vm14, %v4723_v41, %v8652_v28  ;;  %s13198_s25 = scalar_lea.vmem %s14164_s4, %s5184_s21 }
 0x319   : > { %v8658_v53 = vunpack.i.h.bf16 %v8656_v14  ;;  %v8657_v48 = vunpack.i.l.bf16 %v8656_v14  ;;  %8950 = vrot.lane.b32.xlu1 %v8949_v11, %s9003_s20  ;;  %v14607_v11 = vld [vmem:[#allocation28_spill] sm:$0xff]  ;;  %v8388_v28 = vunpack.i.h.bf16 %v14605_v25  ;;  %v8418_v16 = vunpack.i.h.bf16 %v14606_v18 }
 0x31a   : > { %8945 = vrot.lane.b32.xlu0 %v8944_v17, %s9004_s22  ;;  %v4660_v2 = vsel %vm4640_vm12, %v4608_v37, %v8663_v36  ;;  %v4672_v45 = vsel %vm4640_vm12, %v4620_v19, %v8662_v22  ;;  %v4609_v17 = vsel %vm4588_vm11, %v14607_v11, %v8387_v58 }
 0x31b   : > { %v8671_v61 = vpop.permute.xlu1 %8670  ;;  %v4815_v32 = vsel %vm4796_vm15, %v4763_v26, %v8658_v53  ;;  %v4827_v52 = vsel %vm4796_vm15, %v4775_v12, %v8657_v48  ;;  %v14609_v26 = vld [vmem:[#allocation30_spill] sm:$0xff] }
 0x31c   : > { %v8666_v10 = vpop.permute.xlu0 %8665  ;;  %6918 = vmatmul.mubr.f32.gmra.mrb[36].mxu0 %v4815_v32  ;;  %6954 = vmatmul.mubr.f32.gmra.mrb[8].mxu1 %v4827_v52  ;;  %v8673_v7 = vunpack.i.h.bf16 %v8671_v61  ;;  %v8672_v15 = vunpack.i.l.bf16 %v8671_v61  ;;  %v4610_v12 = vsel %vm4588_vm11, %v14609_v26, %v8388_v28  ;;  %v14610_v61 = vld [vmem:[#allocation103_spill] sm:$0xff] }
 0x31d   : > { %v8668_v1 = vunpack.i.h.bf16 %v8666_v10  ;;  %v8667_v62 = vunpack.i.l.bf16 %v8666_v10  ;;  %3199 = vrot.lane.b32.xlu1 %v12901_v54, %s8999_s10  ;;  %6920 = vmatprep.mubr.msk.f32.mxu0 %vm9000_vm9, %v14584_v34  ;;  %v4622_v32 = vsel %vm4588_vm11, %v14610_v61, %v8418_v16 }
 0x31e   : > { %8955 = vrot.lane.b32.xlu0 %v8954_v49, %s9005_s23  ;;  %6956 = vmatprep.mubr.msk.f32.mxu1 %vm9000_vm9, %v14584_v34 }
 0x31f   : > { %v8681_v31 = vpop.permute.xlu1 %8680  ;;  %v4712_v54 = vsel %vm4692_vm13, %v4660_v2, %v8668_v1  ;;  %v4724_v5 = vsel %vm4692_vm13, %v4672_v45, %v8667_v62 }
 0x320   : > { %v8676_v8 = vpop.permute.xlu0 %8675  ;;  %v8683_v0 = vunpack.i.h.bf16 %v8681_v31  ;;  %v8682_v35 = vunpack.i.l.bf16 %v8681_v31  ;;  %v4764_v46 = vsel %vm4744_vm14, %v4712_v54, %v8673_v7  ;;  %v4776_v24 = vsel %vm4744_vm14, %v4724_v5, %v8672_v15  ;;  %v14611_v54 = vld [vmem:[#allocation38_spill] sm:$0xff] }
 0x321   : > { %v8678_v50 = vunpack.i.h.bf16 %v8676_v8  ;;  %v8677_v21 = vunpack.i.l.bf16 %v8676_v8  ;;  %3607 = vrot.lane.b32.xlu1 %v6555_v51, %s9004_s22  ;;  %v8392_v5 = vunpack.i.l.bf16 %v14611_v54 }
 0x322   : > { %3403 = vrot.lane.b32.xlu0 %v6504_v38, %s9002_s19  ;;  %v4661_v47 = vsel %vm4640_vm12, %v4609_v17, %v8683_v0  ;;  %v4673_v40 = vsel %vm4640_vm12, %v4621_v4, %v8682_v35  ;;  %v14612_v0 = vld [vmem:[#allocation24_spill] sm:$0xff] }
 0x323   : > { %v8691_v59 = vpop.permute.xlu1 %8690  ;;  %v4816_v63 = vsel %vm4796_vm15, %v4764_v46, %v8678_v50  ;;  %v4828_v33 = vsel %vm4796_vm15, %v4776_v24, %v8677_v21  ;;  %v4611_v35 = vsel %vm4588_vm11, %v14612_v0, %v8392_v5  ;;  %v14613_v46 = vld [vmem:[#allocation14_spill] sm:$0xff]  ;;  %v14617_v5 = vld [vmem:[#allocation13_spill] sm:$0xff] }
 0x324   : > { %v8686_v57 = vpop.permute.xlu0 %8685  ;;  %6921 = vmatmul.mubr.f32.gmra.mrb[38].mxu0 %v4816_v63  ;;  %6957 = vmatmul.mubr.f32.gmra.mrb[10].mxu1 %v4828_v33  ;;  %v8693_v43 = vunpack.i.h.bf16 %v8691_v59  ;;  %v8692_v27 = vunpack.i.l.bf16 %v8691_v59 }
 0x325   : > { %v8688_v56 = vunpack.i.h.bf16 %v8686_v57  ;;  %v8687_v29 = vunpack.i.l.bf16 %v8686_v57  ;;  %4015 = vrot.lane.b32.xlu1 %v6657_v30, %s9005_s23  ;;  %6923 = vmatprep.mubr.msk.f32.mxu0 %vm9000_vm9, %v14584_v34 }
 0x326   : > { %3811 = vrot.lane.b32.xlu0 %v6606_v44, %s9003_s20  ;;  %6959 = vmatprep.mubr.msk.f32.mxu1 %vm9000_vm9, %v14584_v34 }
 0x327   : > { %v8701_v39 = vpop.permute.xlu1 %8700  ;;  %v4713_v20 = vsel %vm4692_vm13, %v4661_v47, %v8688_v56  ;;  %v4725_v55 = vsel %vm4692_vm13, %v4673_v40, %v8687_v29 }
 0x328   : > { %v8696_v23 = vpop.permute.xlu0 %8695  ;;  %v8703_v49 = vunpack.i.h.bf16 %v8701_v39  ;;  %v8702_v13 = vunpack.i.l.bf16 %v8701_v39  ;;  %v4765_v9 = vsel %vm4744_vm14, %v4713_v20, %v8693_v43  ;;  %v4777_v53 = vsel %vm4744_vm14, %v4725_v55, %v8692_v27 }
 0x329   : > { %v8698_v41 = vunpack.i.h.bf16 %v8696_v23  ;;  %v8697_v14 = vunpack.i.l.bf16 %v8696_v23  ;;  %v8393_v55 = vunpack.i.h.bf16 %v14611_v54 }
 0x32a   : > { %v4662_v19 = vsel %vm4640_vm12, %v4610_v12, %v8703_v49  ;;  %v4674_v1 = vsel %vm4640_vm12, %v4622_v32, %v8702_v13  ;;  %v14614_v49 = vld [vmem:[#allocation27_spill] sm:$0xff] }
 0x32b   : > { %v8711_v48 = vpop.permute.xlu1 %8710  ;;  %v4817_v36 = vsel %vm4796_vm15, %v4765_v9, %v8698_v41  ;;  %v4829_v22 = vsel %vm4796_vm15, %v4777_v53, %v8697_v14  ;;  %v4612_v13 = vsel %vm4588_vm11, %v14614_v49, %v8393_v55  ;;  %v14615_v9 = vld [vmem:[#allocation15_spill] sm:$0xff] }
 0x32c   : > { %v8706_v52 = vpop.permute.xlu0 %8705  ;;  %6924 = vmatmul.mubr.f32.gmra.mrb[40].mxu0 %v4817_v36  ;;  %6960 = vmatmul.mubr.f32.gmra.mrb[12].mxu1 %v4829_v22  ;;  %v8713_v10 = vunpack.i.h.bf16 %v8711_v48  ;;  %v8712_v3 = vunpack.i.l.bf16 %v8711_v48 }
 0x32d   : > { %v8708_v37 = vunpack.i.h.bf16 %v8706_v52  ;;  %v8707_v6 = vunpack.i.l.bf16 %v8706_v52  ;;  %6926 = vmatprep.mubr.msk.f32.mxu0 %vm9000_vm9, %v14584_v34  ;;  %6962 = vmatprep.mubr.msk.f32.mxu1 %vm9000_vm9, %v14584_v34  ;;  %v14616_v52 = vld [vmem:[#allocation87_spill] sm:$0xff] }
 0x32f   : > { %v8721_v62 = vpop.permute.xlu1 %8720  ;;  %v4714_v2 = vsel %vm4692_vm13, %v4662_v19, %v8708_v37  ;;  %v4726_v45 = vsel %vm4692_vm13, %v4674_v1, %v8707_v6 }
 0x330   : > { %v8723_v7 = vunpack.i.h.bf16 %v8721_v62  ;;  %v8722_v15 = vunpack.i.l.bf16 %v8721_v62  ;;  %v8716_v51 = vpop.permute.xlu0 %8715  ;;  %v4766_v31 = vsel %vm4744_vm14, %v4714_v2, %v8713_v10  ;;  %v4778_v38 = vsel %vm4744_vm14, %v4726_v45, %v8712_v3 }
 0x331   : > { %v8717_v8 = vunpack.i.l.bf16 %v8716_v51  ;;  %v8718_v28 = vunpack.i.h.bf16 %v8716_v51  ;;  %v8397_v10 = vunpack.i.l.bf16 %v14616_v52 }
 0x332   : > { %v4818_v25 = vsel %vm4796_vm15, %v4766_v31, %v8723_v7  ;;  %v4830_v58 = vsel %vm4796_vm15, %v4778_v38, %v8722_v15 }
 0x333   : > { %v8731_v18 = vpop.permute.xlu1 %8730  ;;  %6927 = vmatmul.mubr.f32.gmra.mrb[42].mxu0 %v4818_v25  ;;  %6963 = vmatmul.mubr.f32.gmra.mrb[14].mxu1 %v4830_v58  ;;  %v4623_v24 = vsel %vm4588_vm11, %v14613_v46, %v8717_v8  ;;  %v4624_v53 = vsel %vm4588_vm11, %v14615_v9, %v8718_v28  ;;  %v4613_v8 = vsel %vm4588_vm11, %v14617_v5, %v8397_v10  ;;  %v14618_v25 = vld [vmem:[#allocation18_spill] sm:$0xff] }
 0x334   : > { %v8726_v60 = vpop.permute.xlu0 %8725  ;;  %6929 = vmatprep.mubr.msk.f32.mxu0 %vm9000_vm9, %v14584_v34  ;;  %6965 = vmatprep.mubr.msk.f32.mxu1 %vm9000_vm9, %v14584_v34  ;;  %v8733_v30 = vunpack.i.h.bf16 %v8731_v18  ;;  %v8732_v59 = vunpack.i.l.bf16 %v8731_v18 }
 0x335   : > { %v8728_v50 = vunpack.i.h.bf16 %v8726_v60  ;;  %v8727_v21 = vunpack.i.l.bf16 %v8726_v60 }
 0x337   : > { %v4663_v63 = vsel %vm4640_vm12, %v4611_v35, %v8728_v50  ;;  %v4675_v33 = vsel %vm4640_vm12, %v4623_v24, %v8727_v21  ;;  %v8741_v44 = vpop.permute.xlu1 %8740 }
 0x338   : > { %v8743_v57 = vunpack.i.h.bf16 %v8741_v44  ;;  %v8742_v11 = vunpack.i.l.bf16 %v8741_v44  ;;  %v8736_v17 = vpop.permute.xlu0 %8735  ;;  %v4715_v56 = vsel %vm4692_vm13, %v4663_v63, %v8733_v30  ;;  %v4727_v29 = vsel %vm4692_vm13, %v4675_v33, %v8732_v59 }
 0x339   : > { %v8738_v42 = vunpack.i.h.bf16 %v8736_v17  ;;  %v8737_v4 = vunpack.i.l.bf16 %v8736_v17  ;;  %v8398_v59 = vunpack.i.h.bf16 %v14616_v52 }
 0x33b   : > { %v8751_v47 = vpop.permute.xlu1 %8750  ;;  %v4767_v40 = vsel %vm4744_vm14, %v4715_v56, %v8738_v42  ;;  %v4779_v43 = vsel %vm4744_vm14, %v4727_v29, %v8737_v4 }
 0x33c   : > { %v8746_v27 = vpop.permute.xlu0 %8745  ;;  %v4819_v39 = vsel %vm4796_vm15, %v4767_v40, %v8743_v57  ;;  %v4831_v20 = vsel %vm4796_vm15, %v4779_v43, %v8742_v11  ;;  %v8753_v48 = vunpack.i.h.bf16 %v8751_v47  ;;  %v8752_v36 = vunpack.i.l.bf16 %v8751_v47  ;;  %v14619_v40 = vld [vmem:[#allocation82_spill] sm:$0xff] }
 0x33d   : > { %6930 = vmatmul.mubr.f32.gmra.mrb[44].mxu0 %v4819_v39  ;;  %6966 = vmatmul.mubr.f32.gmra.mrb[16].mxu1 %v4831_v20  ;;  %v8748_v16 = vunpack.i.h.bf16 %v8746_v27  ;;  %v8747_v23 = vunpack.i.l.bf16 %v8746_v27  ;;  %v4614_v43 = vsel %vm4588_vm11, %v14619_v40, %v8398_v59  ;;  %v14620_v27 = vld [vmem:[#allocation17_spill] sm:$0xff]  ;;  %v14623_v59 = vld [vmem:[#allocation84_spill] sm:$0xff] }
 0x33e   : > { %6932 = vmatprep.mubr.msk.f32.mxu0 %vm9000_vm9, %v14584_v34  ;;  %6968 = vmatprep.mubr.msk.f32.mxu1 %vm9000_vm9, %v14584_v34 }
 0x33f   : > { %v8761_v41 = vpop.permute.xlu1 %8760  ;;  %v4664_v22 = vsel %vm4640_vm12, %v4612_v13, %v8748_v16  ;;  %v4676_v26 = vsel %vm4640_vm12, %v4624_v53, %v8747_v23 }
 0x340   : > { %v8756_v14 = vpop.permute.xlu0 %8755  ;;  %v8762_v3 = vunpack.i.l.bf16 %v8761_v41  ;;  %v4716_v1 = vsel %vm4692_vm13, %v4664_v22, %v8753_v48  ;;  %v4728_v62 = vsel %vm4692_vm13, %v4676_v26, %v8752_v36  ;;  %v8763_v63 = vunpack.i.h.bf16 %v8761_v41 }
 0x341   : > { %v8758_v12 = vunpack.i.h.bf16 %v8756_v14  ;;  %v8757_v61 = vunpack.i.l.bf16 %v8756_v14 }
 0x342   : > { %v4625_v58 = vsel %vm4588_vm11, %v14618_v25, %v8762_v3  ;;  %v4626_v39 = vsel %vm4588_vm11, %v14620_v27, %v8763_v63 }
 0x343   : > { %v8771_v32 = vpop.permute.xlu1 %8770  ;;  %v4768_v7 = vsel %vm4744_vm14, %v4716_v1, %v8758_v12  ;;  %v4780_v15 = vsel %vm4744_vm14, %v4728_v62, %v8757_v61 }
 0x344   : > { %v8766_v37 = vpop.permute.xlu0 %8765  ;;  %v8773_v2 = vunpack.i.h.bf16 %v8771_v32  ;;  %v8772_v45 = vunpack.i.l.bf16 %v8771_v32 }
 0x345   : > { %v8768_v6 = vunpack.i.h.bf16 %v8766_v37  ;;  %v8767_v19 = vunpack.i.l.bf16 %v8766_v37 }
 0x346   : > { %v4665_v50 = vsel %vm4640_vm12, %v4613_v8, %v8773_v2  ;;  %v4677_v21 = vsel %vm4640_vm12, %v4625_v58, %v8772_v45 }
 0x347   : > { %v8781_v51 = vpop.permute.xlu1 %8780  ;;  %v4820_v31 = vsel %vm4796_vm15, %v4768_v7, %v8768_v6  ;;  %v4832_v38 = vsel %vm4796_vm15, %v4780_v15, %v8767_v19  ;;  %v14621_v19 = vld [vmem:[#allocation86_spill] sm:$0xff]  ;;  %v14622_v7 = vld [vmem:[#allocation83_spill] sm:$0xff] }
 0x348   : > { %v8776_v54 = vpop.permute.xlu0 %8775  ;;  %6933 = vmatmul.mubr.f32.gmra.mrb[46].mxu0 %v4820_v31  ;;  %6969 = vmatmul.mubr.f32.gmra.mrb[18].mxu1 %v4832_v38  ;;  %v8783_v0 = vunpack.i.h.bf16 %v8781_v51  ;;  %v8782_v35 = vunpack.i.l.bf16 %v8781_v51 }
 0x349   : > { %v8778_v18 = vunpack.i.h.bf16 %v8776_v54  ;;  %v8777_v60 = vunpack.i.l.bf16 %v8776_v54  ;;  %6935 = vmatprep.mubr.msk.f32.mxu0 %vm9000_vm9, %v14584_v34  ;;  %6971 = vmatprep.mubr.msk.f32.mxu1 %vm9000_vm9, %v14584_v34 }
 0x34b   : > { %v8791_v46 = vpop.permute.xlu1 %8790  ;;  %v4717_v24 = vsel %vm4692_vm13, %v4665_v50, %v8778_v18  ;;  %v4729_v30 = vsel %vm4692_vm13, %v4677_v21, %v8777_v60 }
 0x34c   : > { %v8786_v33 = vpop.permute.xlu0 %8785  ;;  %v8793_v11 = vunpack.i.h.bf16 %v8791_v46  ;;  %v8792_v17 = vunpack.i.l.bf16 %v8791_v46  ;;  %v4769_v42 = vsel %vm4744_vm14, %v4717_v24, %v8783_v0  ;;  %v4781_v4 = vsel %vm4744_vm14, %v4729_v30, %v8782_v35 }
 0x34d   : > { %v8788_v44 = vunpack.i.h.bf16 %v8786_v33  ;;  %v8787_v57 = vunpack.i.l.bf16 %v8786_v33 }
 0x34e   : > { %v4666_v41 = vsel %vm4640_vm12, %v4614_v43, %v8793_v11  ;;  %v4678_v14 = vsel %vm4640_vm12, %v4626_v39, %v8792_v17 }
 0x34f   : > { %v8801_v56 = vpop.permute.xlu1 %8800  ;;  %v4821_v29 = vsel %vm4796_vm15, %v4769_v42, %v8788_v44  ;;  %v4833_v47 = vsel %vm4796_vm15, %v4781_v4, %v8787_v57 }
 0x350   : > { %v8796_v20 = vpop.permute.xlu0 %8795  ;;  %6936 = vmatmul.mubr.f32.gmra.mrb[48].mxu0 %v4821_v29  ;;  %6972 = vmatmul.mubr.f32.gmra.mrb[20].mxu1 %v4833_v47  ;;  %v8803_v55 = vunpack.i.h.bf16 %v8801_v56  ;;  %v8802_v28 = vunpack.i.l.bf16 %v8801_v56  ;;  %v14624_v56 = vld [vmem:[#allocation90_spill] sm:$0xff] }
 0x351   : > { %v8798_v16 = vunpack.i.h.bf16 %v8796_v20  ;;  %v8797_v23 = vunpack.i.l.bf16 %v8796_v20  ;;  %6938 = vmatprep.mubr.msk.f32.mxu0 %vm9000_vm9, %v14584_v34  ;;  %6974 = vmatprep.mubr.msk.f32.mxu1 %vm9000_vm9, %v14584_v34 }
 0x353   : > { %v8811_v49 = vpop.permute.xlu1 %8810  ;;  %v4718_v13 = vsel %vm4692_vm13, %v4666_v41, %v8798_v16  ;;  %v4730_v9 = vsel %vm4692_vm13, %v4678_v14, %v8797_v23 }
 0x354   : > { %v8813_v53 = vunpack.i.h.bf16 %v8811_v49  ;;  %v8812_v48 = vunpack.i.l.bf16 %v8811_v49  ;;  %v8806_v36 = vpop.permute.xlu0 %8805  ;;  %v4770_v22 = vsel %vm4744_vm14, %v4718_v13, %v8803_v55  ;;  %v4782_v26 = vsel %vm4744_vm14, %v4730_v9, %v8802_v28 }
 0x355   : > { %v8807_v12 = vunpack.i.l.bf16 %v8806_v36  ;;  %v8808_v10 = vunpack.i.h.bf16 %v8806_v36  ;;  %v14625_v36 = vld [vmem:[#allocation29_spill] sm:$0xff] }
 0x356   : > { %v4822_v61 = vsel %vm4796_vm15, %v4770_v22, %v8813_v53  ;;  %v4834_v32 = vsel %vm4796_vm15, %v4782_v26, %v8812_v48 }
 0x357   : > { %v8821_v52 = vpop.permute.xlu1 %8820  ;;  %6939 = vmatmul.mubr.f32.gmra.mrb[50].mxu0 %v4822_v61  ;;  %6975 = vmatmul.mubr.f32.gmra.mrb[22].mxu1 %v4834_v32  ;;  %v4627_v1 = vsel %vm4588_vm11, %v14621_v19, %v8807_v12  ;;  %v4628_v15 = vsel %vm4588_vm11, %v14622_v7, %v8808_v10  ;;  %v14626_v10 = vld [vmem:[#allocation31_spill] sm:$0xff] }
 0x358   : > { %v8816_v3 = vpop.permute.xlu0 %8815  ;;  %6977 = vmatprep.mubr.msk.f32.mxu1 %vm9000_vm9, %v14584_v34  ;;  %v8822_v62 = vunpack.i.l.bf16 %v8821_v52  ;;  %v8823_v51 = vunpack.i.h.bf16 %v8821_v52 }
 0x359   : > { %v8818_v37 = vunpack.i.h.bf16 %v8816_v3  ;;  %v8817_v6 = vunpack.i.l.bf16 %v8816_v3 }
 0x35b   : > { %v4679_v2 = vsel %vm4640_vm12, %v4627_v1, %v8817_v6  ;;  %v8831_v45 = vpop.permute.xlu1 %8830  ;;  %v4680_v54 = vsel %vm4640_vm12, %v4628_v15, %v8818_v37 }
 0x35c   : > { %v8832_v31 = vunpack.i.l.bf16 %v8831_v45  ;;  %v8826_v38 = vpop.permute.xlu0 %8825  ;;  %v4731_v25 = vsel %vm4692_vm13, %v4679_v2, %v8822_v62  ;;  %v8833_v60 = vunpack.i.h.bf16 %v8831_v45  ;;  %v4732_v0 = vsel %vm4692_vm13, %v4680_v54, %v8823_v51 }
 0x35d   : > { %v8828_v5 = vunpack.i.h.bf16 %v8826_v38  ;;  %v8827_v8 = vunpack.i.l.bf16 %v8826_v38 }
 0x35f   : > { %v8841_v58 = vpop.permute.xlu1 %8840  ;;  %v4783_v18 = vsel %vm4744_vm14, %v4731_v25, %v8827_v8  ;;  %v4784_v46 = vsel %vm4744_vm14, %v4732_v0, %v8828_v5 }
 0x360   : > { %v8836_v50 = vpop.permute.xlu0 %8835  ;;  %v4835_v21 = vsel %vm4796_vm15, %v4783_v18, %v8832_v31  ;;  %v8842_v24 = vunpack.i.l.bf16 %v8841_v58  ;;  %v4836_v57 = vsel %vm4796_vm15, %v4784_v46, %v8833_v60  ;;  %v8843_v17 = vunpack.i.h.bf16 %v8841_v58  ;;  %v14627_v18 = vld [vmem:[#allocation34_spill] sm:$0xff] }
 0x361   : > { %v8837_v35 = vunpack.i.l.bf16 %v8836_v50  ;;  %6978 = vmatmul.mubr.f32.gmra.mrb[24].mxu1 %v4835_v21  ;;  %v8838_v30 = vunpack.i.h.bf16 %v8836_v50 }
 0x362   : > { %6980 = vmatprep.mubr.msk.f32.mxu1 %vm9000_vm9, %v14584_v34 }
 0x363   : > { %v4629_v63 = vsel %vm4588_vm11, %v14623_v59, %v8837_v35  ;;  %v8851_v33 = vpop.permute.xlu1 %8850  ;;  %v4630_v29 = vsel %vm4588_vm11, %v14624_v56, %v8838_v30  ;;  %v14628_v59 = vld [vmem:[#allocation100_spill] sm:$0xff] }
 0x364   : > { %v8846_v44 = vpop.permute.xlu0 %8845  ;;  %v8852_v42 = vunpack.i.l.bf16 %v8851_v33  ;;  %v4681_v4 = vsel %vm4640_vm12, %v4629_v63, %v8842_v24  ;;  %v8853_v20 = vunpack.i.h.bf16 %v8851_v33  ;;  %v4682_v16 = vsel %vm4640_vm12, %v4630_v29, %v8843_v17 }
 0x365   : > { %v8847_v11 = vunpack.i.l.bf16 %v8846_v44  ;;  %6981 = vmatmul.mubr.f32.gmra.mrb[26].mxu1 %v4836_v57  ;;  %v8848_v47 = vunpack.i.h.bf16 %v8846_v44 }
 0x366   : > { %6983 = vmatprep.mubr.msk.f32.mxu1 %vm9000_vm9, %v14584_v34 }
 0x367   : > { %v8861_v40 = vpop.permute.xlu1 %8860  ;;  %v4733_v43 = vsel %vm4692_vm13, %v4681_v4, %v8847_v11  ;;  %v4734_v49 = vsel %vm4692_vm13, %v4682_v16, %v8848_v47  ;;  %v14629_v16 = vld [vmem:[#allocation32_spill] sm:$0xff] }
 0x368   : > { %v8856_v27 = vpop.permute.xlu0 %8855  ;;  %v8862_v55 = vunpack.i.l.bf16 %v8861_v40  ;;  %v4785_v28 = vsel %vm4744_vm14, %v4733_v43, %v8852_v42  ;;  %v8863_v13 = vunpack.i.h.bf16 %v8861_v40  ;;  %v4786_v12 = vsel %vm4744_vm14, %v4734_v49, %v8853_v20 }
 0x369   : > { %v8857_v39 = vunpack.i.l.bf16 %v8856_v27  ;;  %v8858_v23 = vunpack.i.h.bf16 %v8856_v27 }
 0x36a   : > { %v4631_v22 = vsel %vm4588_vm11, %v14625_v36, %v8862_v55  ;;  %v4632_v3 = vsel %vm4588_vm11, %v14626_v10, %v8863_v13 }
 0x36b   : > { %v8871_v41 = vpop.permute.xlu1 %8870  ;;  %v4837_v14 = vsel %vm4796_vm15, %v4785_v28, %v8857_v39  ;;  %v4838_v52 = vsel %vm4796_vm15, %v4786_v12, %v8858_v23 }
 0x36c   : > { %v8866_v9 = vpop.permute.xlu0 %8865  ;;  %6984 = vmatmul.mubr.f32.gmra.mrb[28].mxu1 %v4837_v14  ;;  %v8872_v26 = vunpack.i.l.bf16 %v8871_v41  ;;  %v8873_v37 = vunpack.i.h.bf16 %v8871_v41 }
 0x36d   : > { %v8868_v53 = vunpack.i.h.bf16 %v8866_v9  ;;  %v8867_v48 = vunpack.i.l.bf16 %v8866_v9  ;;  %6986 = vmatprep.mubr.msk.f32.mxu1 %vm9000_vm9, %v14584_v34 }
 0x36f   : > { %v4683_v61 = vsel %vm4640_vm12, %v4631_v22, %v8867_v48  ;;  %v8881_v32 = vpop.permute.xlu1 %8880  ;;  %v4684_v1 = vsel %vm4640_vm12, %v4632_v3, %v8868_v53  ;;  %v14630_v53 = vld [vmem:[#allocation33_spill] sm:$0xff] }
 0x370   : > { %v8882_v6 = vunpack.i.l.bf16 %v8881_v32  ;;  %v8876_v19 = vpop.permute.xlu0 %8875  ;;  %6987 = vmatmul.mubr.f32.gmra.mrb[30].mxu1 %v4838_v52  ;;  %v4735_v45 = vsel %vm4692_vm13, %v4683_v61, %v8872_v26  ;;  %v8883_v51 = vunpack.i.h.bf16 %v8881_v32  ;;  %v4736_v54 = vsel %vm4692_vm13, %v4684_v1, %v8873_v37 }
 0x371   : > { %v8878_v62 = vunpack.i.h.bf16 %v8876_v19  ;;  %v8877_v2 = vunpack.i.l.bf16 %v8876_v19  ;;  %6989 = vmatprep.mubr.msk.f32.mxu1 %vm9000_vm9, %v14584_v34 }
 0x373   : > { %v8891_v7 = vpop.permute.xlu1 %8890  ;;  %v4787_v15 = vsel %vm4744_vm14, %v4735_v45, %v8877_v2  ;;  %v4788_v8 = vsel %vm4744_vm14, %v4736_v54, %v8878_v62 }
 0x374   : > { %v8886_v31 = vpop.permute.xlu0 %8885  ;;  %v4839_v38 = vsel %vm4796_vm15, %v4787_v15, %v8882_v6  ;;  %v8892_v25 = vunpack.i.l.bf16 %v8891_v7  ;;  %v4840_v0 = vsel %vm4796_vm15, %v4788_v8, %v8883_v51  ;;  %v8893_v46 = vunpack.i.h.bf16 %v8891_v7  ;;  %v14631_v15 = vld [vmem:[#allocation35_spill] sm:$0xff] }
 0x375   : > { %v8887_v5 = vunpack.i.l.bf16 %v8886_v31  ;;  %6990 = vmatmul.mubr.f32.gmra.mrb[32].mxu1 %v4839_v38  ;;  %v8888_v58 = vunpack.i.h.bf16 %v8886_v31 }
 0x376   : > { %6992 = vmatprep.mubr.msk.f32.mxu1 %vm9000_vm9, %v14584_v34 }
 0x377   : > { %v4633_v60 = vsel %vm4588_vm11, %v14627_v18, %v8887_v5  ;;  %v8901_v50 = vpop.permute.xlu1 %8900  ;;  %v4634_v63 = vsel %vm4588_vm11, %v14628_v59, %v8888_v58  ;;  %v5237_v18 = vlaneseq }
 0x378   : > { %v8896_v21 = vpop.permute.xlu0 %8895  ;;  %v8902_v24 = vunpack.i.l.bf16 %v8901_v50  ;;  %v4685_v30 = vsel %vm4640_vm12, %v4633_v60, %v8892_v25  ;;  %v8903_v42 = vunpack.i.h.bf16 %v8901_v50  ;;  %v4686_v29 = vsel %vm4640_vm12, %v4634_v63, %v8893_v46  ;;  %v14632_v60 = vld [vmem:[#allocation36_spill] sm:$0xff] }
 0x379   : > { %v8897_v35 = vunpack.i.l.bf16 %v8896_v21  ;;  %6993 = vmatmul.mubr.f32.gmra.mrb[34].mxu1 %v4840_v0  ;;  %v8898_v33 = vunpack.i.h.bf16 %v8896_v21 }
 0x37a   : > { %6995 = vmatprep.mubr.msk.f32.mxu1 %vm9000_vm9, %v14584_v34 }
 0x37b   : > { %v8911_v44 = vpop.permute.xlu1 %8910  ;;  %v4737_v57 = vsel %vm4692_vm13, %v4685_v30, %v8897_v35  ;;  %v4738_v27 = vsel %vm4692_vm13, %v4686_v29, %v8898_v33  ;;  %v13188_v33 = vshrl.u32 %v5237_v18, 7 }
 0x37c   : > { %v8906_v11 = vpop.permute.xlu0 %8905  ;;  %v8912_v4 = vunpack.i.l.bf16 %v8911_v44  ;;  %v4789_v56 = vsel %vm4744_vm14, %v4737_v57, %v8902_v24  ;;  %v8913_v39 = vunpack.i.h.bf16 %v8911_v44  ;;  %v4790_v14 = vsel %vm4744_vm14, %v4738_v27, %v8903_v42  ;;  %v14633_v42 = vld [vmem:[#allocation91_spill] sm:$0xff] }
 0x37d   : > { %v8907_v17 = vunpack.i.l.bf16 %v8906_v11  ;;  %v8908_v47 = vunpack.i.h.bf16 %v8906_v11 }
 0x37e   : > { %v4635_v23 = vsel %vm4588_vm11, %v14629_v16, %v8912_v4  ;;  %v4636_v48 = vsel %vm4588_vm11, %v14630_v53, %v8913_v39 }
 0x37f   : > { %v8921_v40 = vpop.permute.xlu1 %8920  ;;  %v4841_v43 = vsel %vm4796_vm15, %v4789_v56, %v8907_v17  ;;  %v4842_v9 = vsel %vm4796_vm15, %v4790_v14, %v8908_v47 }
 0x380   : > { %v8916_v20 = vpop.permute.xlu0 %8915  ;;  %6996 = vmatmul.mubr.f32.gmra.mrb[36].mxu1 %v4841_v43  ;;  %v8922_v41 = vunpack.i.l.bf16 %v8921_v40  ;;  %v8923_v36 = vunpack.i.h.bf16 %v8921_v40  ;;  %v5240_v40 = vadd.s32 16, %v13188_v33 }
 0x381   : > { %v8918_v55 = vunpack.i.h.bf16 %v8916_v20  ;;  %v8917_v28 = vunpack.i.l.bf16 %v8916_v20  ;;  %6998 = vmatprep.mubr.msk.f32.mxu1 %vm9000_vm9, %v14584_v34 }
 0x382   : > { %vm5243_vm0 = vcmp.lt.s32.totalorder %v5240_v40, 17 }
 0x383   : > { %v4687_v49 = vsel %vm4640_vm12, %v4635_v23, %v8917_v28  ;;  %v8931_v13 = vpop.permute.xlu1 %8930  ;;  %v4688_v12 = vsel %vm4640_vm12, %v4636_v48, %v8918_v55  ;;  %v13213_v53 = vsel %vm5243_vm0, 1.0, %v14584_v34 }
 0x384   : > { %v8932_v22 = vunpack.i.l.bf16 %v8931_v13  ;;  %v8926_v26 = vpop.permute.xlu0 %8925  ;;  %6999 = vmatmul.mubr.f32.gmra.mrb[38].mxu1 %v4842_v9  ;;  %v4739_v52 = vsel %vm4692_vm13, %v4687_v49, %v8922_v41  ;;  %v8933_v37 = vunpack.i.h.bf16 %v8931_v13  ;;  %v4740_v1 = vsel %vm4692_vm13, %v4688_v12, %v8923_v36 }
 0x385   : > { %v8928_v61 = vunpack.i.h.bf16 %v8926_v26  ;;  %v8927_v32 = vunpack.i.l.bf16 %v8926_v26  ;;  %7001 = vmatprep.mubr.msk.f32.mxu1 %vm9000_vm9, %v14584_v34 }
 0x387   : > { %v8941_v10 = vpop.permute.xlu1 %8940  ;;  %v4791_v3 = vsel %vm4744_vm14, %v4739_v52, %v8927_v32  ;;  %v4792_v2 = vsel %vm4744_vm14, %v4740_v1, %v8928_v61 }
 0x388   : > { %v8936_v6 = vpop.permute.xlu0 %8935  ;;  %v4843_v19 = vsel %vm4796_vm15, %v4791_v3, %v8932_v22  ;;  %v8942_v45 = vunpack.i.l.bf16 %v8941_v10  ;;  %v4844_v54 = vsel %vm4796_vm15, %v4792_v2, %v8933_v37  ;;  %v8943_v8 = vunpack.i.h.bf16 %v8941_v10 }
 0x389   : > { %v8937_v62 = vunpack.i.l.bf16 %v8936_v6  ;;  %7002 = vmatmul.mubr.f32.gmra.mrb[40].mxu1 %v4843_v19  ;;  %v8938_v7 = vunpack.i.h.bf16 %v8936_v6 }
 0x38a   : > { %7004 = vmatprep.mubr.msk.f32.mxu1 %vm9000_vm9, %v14584_v34 }
 0x38b   : > { %v4637_v51 = vsel %vm4588_vm11, %v14631_v15, %v8937_v62  ;;  %v8951_v31 = vpop.permute.xlu1 %8950  ;;  %v4638_v50 = vsel %vm4588_vm11, %v14632_v60, %v8938_v7 }
 0x38c   : > { %v8946_v38 = vpop.permute.xlu0 %8945  ;;  %v8952_v25 = vunpack.i.l.bf16 %v8951_v31  ;;  %v4689_v58 = vsel %vm4640_vm12, %v4637_v51, %v8942_v45  ;;  %v8953_v30 = vunpack.i.h.bf16 %v8951_v31  ;;  %v4690_v63 = vsel %vm4640_vm12, %v4638_v50, %v8943_v8 }
 0x38d   : > { %v8947_v5 = vunpack.i.l.bf16 %v8946_v38  ;;  %7005 = vmatmul.mubr.f32.gmra.mrb[42].mxu1 %v4844_v54  ;;  %v8948_v21 = vunpack.i.h.bf16 %v8946_v38 }
 0x38e   : > { %7007 = vmatprep.mubr.msk.f32.mxu1 %vm9000_vm9, %v14584_v34 }
 0x38f   : > { %v3200_v0 = vpop.permute.xlu1 %3199  ;;  %v4741_v35 = vsel %vm4692_vm13, %v4689_v58, %v8947_v5  ;;  %v4742_v17 = vsel %vm4692_vm13, %v4690_v63, %v8948_v21 }
 0x390   : > { %v8956_v46 = vpop.permute.xlu0 %8955  ;;  %v4793_v59 = vsel %vm4744_vm14, %v4741_v35, %v8952_v25  ;;  %v4639_v4 = vsel %vm4588_vm11, %v14633_v42, %v3200_v0  ;;  %v4794_v47 = vsel %vm4744_vm14, %v4742_v17, %v8953_v30 }
 0x391   : > { %v8957_v24 = vunpack.i.l.bf16 %v8956_v46  ;;  %v8958_v44 = vunpack.i.h.bf16 %v8956_v46 }
 0x393   : > { %v4845_v57 = vsel %vm4796_vm15, %v4793_v59, %v8957_v24  ;;  %v3608_v11 = vpop.permute.xlu1 %3607  ;;  %v4846_v27 = vsel %vm4796_vm15, %v4794_v47, %v8958_v44 }
 0x394   : > { %v3404_v56 = vpop.permute.xlu0 %3403  ;;  %7008 = vmatmul.mubr.f32.gmra.mrb[44].mxu1 %v4845_v57 }
 0x395   : > { %v4691_v29 = vsel %vm4640_vm12, %v4639_v4, %v3404_v56  ;;  %7010 = vmatprep.mubr.msk.f32.mxu1 %vm9000_vm9, %v14584_v34 }
 0x396   : > { %v4743_v20 = vsel %vm4692_vm13, %v4691_v29, %v3608_v11 }
 0x397   : > { %v4930_v43 = vpop.f32.mrb[0].mxu0  ;;  %v4016_v39 = vpop.permute.xlu1 %4015 }
 0x398   : > { %5186 = vst [vmem:[%s13198_s25] sm:$0xff] %v4930_v43  ;;  %v3812_v55 = vpop.permute.xlu0 %3811  ;;  %v6865_v28 = vpop.f32.mrb[1].mxu0  ;;  %7011 = vmatmul.mubr.f32.gmra.mrb[46].mxu1 %v4846_v27  ;;  %v5361_v14 = vmul.f32 %v4930_v43, %v4930_v43 }
 0x399   : > { %v4795_v16 = vsel %vm4744_vm14, %v4743_v20, %v3812_v55  ;;  %7013 = vmatprep.mubr.msk.f32.mxu1 %vm9000_vm9, %v14584_v34 }
 0x39a   : > { %v4847_v23 = vsel %vm4796_vm15, %v4795_v16, %v4016_v39 }
 0x39b   : > { %v4935_v41 = vpop.f32.mrb[2].mxu0 }
 0x39c   : > { %5187 = vst [vmem:[%s13198_s25 + $0x8] sm:$0xff] %v4935_v41  ;;  %v5302_v49 = vadd.f32 %v4935_v41, %v4930_v43  ;;  %v5362_v13 = vmul.f32 %v4935_v41, %v4935_v41  ;;  %v6868_v9 = vpop.f32.mrb[3].mxu0  ;;  %7014 = vmatmul.mubr.f32.gmra.mrb[48].mxu1 %v4847_v23 }
 0x39e   : > { %v5412_v48 = vadd.f32 %v5362_v13, %v5361_v14 }
 0x39f   : > { %v4940_v36 = vpop.f32.mrb[4].mxu0 }
 0x3a0   : > { %5188 = vst [vmem:[%s13198_s25 + $0x10] sm:$0xff] %v4940_v36  ;;  %v5252_v22 = vmul.f32 %v13213_v53, %v4940_v36  ;;  %v6871_v26 = vpop.f32.mrb[5].mxu0 }
 0x3a2   : > { %v5303_v12 = vadd.f32 %v5302_v49, %v5252_v22  ;;  %v5363_v61 = vmul.f32 %v5252_v22, %v5252_v22 }
 0x3a3   : > { %v4945_v32 = vpop.f32.mrb[6].mxu0 }
 0x3a4   : > { %v5413_v52 = vadd.f32 %v5412_v48, %v5363_v61  ;;  %5189 = vst [vmem:[%s13198_s25 + $0x18] sm:$0xff] %v4945_v32  ;;  %v5304_v10 = vadd.f32 %v5303_v12, %v4945_v32  ;;  %v5364_v3 = vmul.f32 %v4945_v32, %v4945_v32  ;;  %v6874_v37 = vpop.f32.mrb[7].mxu0 }
 0x3a6   : > { %v5414_v6 = vadd.f32 %v5413_v52, %v5364_v3 }
 0x3a7   : > { %v4950_v34 = vpop.f32.mrb[8].mxu0 }
 0x3a8   : > { %5190 = vst [vmem:[%s13198_s25 + $0x20] sm:$0xff] %v4950_v34  ;;  %v5305_v19 = vadd.f32 %v5304_v10, %v4950_v34  ;;  %v5365_v1 = vmul.f32 %v4950_v34, %v4950_v34  ;;  %v6877_v62 = vpop.f32.mrb[9].mxu0 }
 0x3aa   : > { %v5415_v2 = vadd.f32 %v5414_v6, %v5365_v1 }
 0x3ab   : > { %v4955_v45 = vpop.f32.mrb[10].mxu0 }
 0x3ac   : > { %5191 = vst [vmem:[%s13198_s25 + $0x28] sm:$0xff] %v4955_v45  ;;  %v5255_v7 = vmul.f32 %v13213_v53, %v4955_v45  ;;  %v6880_v15 = vpop.f32.mrb[11].mxu0 }
 0x3ae   : > { %v5306_v51 = vadd.f32 %v5305_v19, %v5255_v7  ;;  %v5366_v31 = vmul.f32 %v5255_v7, %v5255_v7 }
 0x3af   : > { %v4960_v38 = vpop.f32.mrb[12].mxu0 }
 0x3b0   : > { %v5416_v54 = vadd.f32 %v5415_v2, %v5366_v31  ;;  %5192 = vst [vmem:[%s13198_s25 + $0x30] sm:$0xff] %v4960_v38  ;;  %v5307_v5 = vadd.f32 %v5306_v51, %v4960_v38  ;;  %v5367_v8 = vmul.f32 %v4960_v38, %v4960_v38  ;;  %v6883_v25 = vpop.f32.mrb[13].mxu0 }
 0x3b2   : > { %v5417_v58 = vadd.f32 %v5416_v54, %v5367_v8 }
 0x3b3   : > { %v4965_v18 = vpop.f32.mrb[14].mxu0 }
 0x3b4   : > { %5193 = vst [vmem:[%s13198_s25 + $0x38] sm:$0xff] %v4965_v18  ;;  %v5308_v60 = vadd.f32 %v5307_v5, %v4965_v18  ;;  %v5368_v50 = vmul.f32 %v4965_v18, %v4965_v18  ;;  %v6886_v21 = vpop.f32.mrb[15].mxu0 }
 0x3b6   : > { %v5418_v0 = vadd.f32 %v5417_v58, %v5368_v50 }
 0x3b7   : > { %v4970_v35 = vpop.f32.mrb[16].mxu0 }
 0x3b8   : > { %5194 = vst [vmem:[%s13198_s25 + $0x40] sm:$0xff] %v4970_v35  ;;  %v5258_v46 = vmul.f32 %v13213_v53, %v4970_v35  ;;  %v6889_v24 = vpop.f32.mrb[17].mxu0 }
 0x3ba   : > { %v5309_v30 = vadd.f32 %v5308_v60, %v5258_v46  ;;  %v5369_v59 = vmul.f32 %v5258_v46, %v5258_v46 }
 0x3bb   : > { %v4975_v63 = vpop.f32.mrb[18].mxu0 }
 0x3bc   : > { %v5419_v44 = vadd.f32 %v5418_v0, %v5369_v59  ;;  %5195 = vst [vmem:[%s13198_s25 + $0x48] sm:$0xff] %v4975_v63  ;;  %v5310_v57 = vadd.f32 %v5309_v30, %v4975_v63  ;;  %v5370_v11 = vmul.f32 %v4975_v63, %v4975_v63  ;;  %v6892_v17 = vpop.f32.mrb[19].mxu0 }
 0x3be   : > { %v5420_v42 = vadd.f32 %v5419_v44, %v5370_v11 }
 0x3bf   : > { %v4980_v4 = vpop.f32.mrb[20].mxu0 }
 0x3c0   : > { %5196 = vst [vmem:[%s13198_s25 + $0x50] sm:$0xff] %v4980_v4  ;;  %v5311_v56 = vadd.f32 %v5310_v57, %v4980_v4  ;;  %v5371_v29 = vmul.f32 %v4980_v4, %v4980_v4  ;;  %v6895_v47 = vpop.f32.mrb[21].mxu0 }
 0x3c2   : > { %v5421_v40 = vadd.f32 %v5420_v42, %v5371_v29 }
 0x3c3   : > { %v4985_v43 = vpop.f32.mrb[22].mxu0 }
 0x3c4   : > { %5197 = vst [vmem:[%s13198_s25 + $0x58] sm:$0xff] %v4985_v43  ;;  %v5261_v27 = vmul.f32 %v13213_v53, %v4985_v43  ;;  %v6898_v39 = vpop.f32.mrb[23].mxu0 }
 0x3c6   : > { %v5312_v20 = vadd.f32 %v5311_v56, %v5261_v27  ;;  %v5372_v55 = vmul.f32 %v5261_v27, %v5261_v27 }
 0x3c7   : > { %v4990_v28 = vpop.f32.mrb[24].mxu0 }
 0x3c8   : > { %v5422_v16 = vadd.f32 %v5421_v40, %v5372_v55  ;;  %5198 = vst [vmem:[%s13198_s25 + $0x60] sm:$0xff] %v4990_v28  ;;  %v5313_v23 = vadd.f32 %v5312_v20, %v4990_v28  ;;  %v5373_v41 = vmul.f32 %v4990_v28, %v4990_v28  ;;  %v6901_v14 = vpop.f32.mrb[25].mxu0 }
 0x3ca   : > { %v5423_v49 = vadd.f32 %v5422_v16, %v5373_v41 }
 0x3cb   : > { %v4995_v13 = vpop.f32.mrb[26].mxu0 }
 0x3cc   : > { %5199 = vst [vmem:[%s13198_s25 + $0x68] sm:$0xff] %v4995_v13  ;;  %v5314_v9 = vadd.f32 %v5313_v23, %v4995_v13  ;;  %v5374_v48 = vmul.f32 %v4995_v13, %v4995_v13  ;;  %v6904_v36 = vpop.f32.mrb[27].mxu0 }
 0x3ce   : > { %v5424_v22 = vadd.f32 %v5423_v49, %v5374_v48 }
 0x3cf   : > { %v5000_v26 = vpop.f32.mrb[28].mxu0  ;;  %v13231_v12 = vpop.f32.mrb[0].mxu1 }
 0x3d0   : > { %5200 = vst [vmem:[%s13198_s25 + $0x70] sm:$0xff] %v5000_v26  ;;  %v5264_v61 = vmul.f32 %v13213_v53, %v5000_v26  ;;  %5212 = vst [vmem:[%s13198_s25 + $0xd0] sm:$0xff] %v13231_v12  ;;  %v6907_v32 = vpop.f32.mrb[29].mxu0  ;;  %v6943_v52 = vpop.f32.mrb[1].mxu1 }
 0x3d2   : > { %v5315_v10 = vadd.f32 %v5314_v9, %v5264_v61  ;;  %v5375_v3 = vmul.f32 %v5264_v61, %v5264_v61 }
 0x3d4   : > { %v5425_v37 = vadd.f32 %v5424_v22, %v5375_v3 }
 0x3d7   : > { %v5005_v6 = vpop.f32.mrb[30].mxu0  ;;  %v13237_v34 = vpop.f32.mrb[2].mxu1 }
 0x3d8   : > { %5201 = vst [vmem:[%s13198_s25 + $0x78] sm:$0xff] %v5005_v6  ;;  %v5316_v19 = vadd.f32 %v5315_v10, %v5005_v6  ;;  %v5376_v1 = vmul.f32 %v5005_v6, %v5005_v6  ;;  %5213 = vst [vmem:[%s13198_s25 + $0xd8] sm:$0xff] %v13237_v34  ;;  %v6910_v62 = vpop.f32.mrb[31].mxu0  ;;  %v6946_v2 = vpop.f32.mrb[3].mxu1 }
 0x3da   : > { %v5426_v45 = vadd.f32 %v5425_v37, %v5376_v1 }
 0x3df   : > { %v5010_v7 = vpop.f32.mrb[32].mxu0  ;;  %v13242_v15 = vpop.f32.mrb[4].mxu1 }
 0x3e0   : > { %5202 = vst [vmem:[%s13198_s25 + $0x80] sm:$0xff] %v5010_v7  ;;  %v5317_v51 = vadd.f32 %v5316_v19, %v5010_v7  ;;  %v5377_v31 = vmul.f32 %v5010_v7, %v5010_v7  ;;  %5214 = vst [vmem:[%s13198_s25 + $0xe0] sm:$0xff] %v13242_v15  ;;  %v6913_v38 = vpop.f32.mrb[33].mxu0  ;;  %v6949_v54 = vpop.f32.mrb[5].mxu1 }
 0x3e2   : > { %v5427_v5 = vadd.f32 %v5426_v45, %v5377_v31 }
 0x3e7   : > { %v5015_v8 = vpop.f32.mrb[34].mxu0  ;;  %v13247_v25 = vpop.f32.mrb[6].mxu1 }
 0x3e8   : > { %5203 = vst [vmem:[%s13198_s25 + $0x88] sm:$0xff] %v5015_v8  ;;  %v5267_v58 = vmul.f32 %v13213_v53, %v5015_v8  ;;  %5215 = vst [vmem:[%s13198_s25 + $0xe8] sm:$0xff] %v13247_v25  ;;  %v6916_v18 = vpop.f32.mrb[35].mxu0  ;;  %v6952_v60 = vpop.f32.mrb[7].mxu1  ;;  %v5276_v8 = vmul.f32 %v13213_v53, %v13231_v12 }
 0x3ea   : > { %v5318_v50 = vadd.f32 %v5317_v51, %v5267_v58  ;;  %v5378_v21 = vmul.f32 %v5267_v58, %v5267_v58 }
 0x3ec   : > { %v5428_v0 = vadd.f32 %v5427_v5, %v5378_v21 }
 0x3ef   : > { %v5020_v35 = vpop.f32.mrb[36].mxu0  ;;  %v13253_v46 = vpop.f32.mrb[8].mxu1 }
 0x3f0   : > { %5204 = vst [vmem:[%s13198_s25 + $0x90] sm:$0xff] %v5020_v35  ;;  %v5319_v24 = vadd.f32 %v5318_v50, %v5020_v35  ;;  %v5379_v30 = vmul.f32 %v5020_v35, %v5020_v35  ;;  %5216 = vst [vmem:[%s13198_s25 + $0xf0] sm:$0xff] %v13253_v46  ;;  %v6919_v59 = vpop.f32.mrb[37].mxu0  ;;  %v6955_v63 = vpop.f32.mrb[9].mxu1  ;;  %v5387_v35 = vmul.f32 %v5276_v8, %v5276_v8 }
 0x3f1   : > { %v5388_v59 = vmul.f32 %v13237_v34, %v13237_v34  ;;  %v5279_v63 = vmul.f32 %v13213_v53, %v13247_v25 }
 0x3f2   : > { %v5429_v44 = vadd.f32 %v5428_v0, %v5379_v30 }
 0x3f7   : > { %v5025_v57 = vpop.f32.mrb[38].mxu0  ;;  %v13258_v11 = vpop.f32.mrb[10].mxu1 }
 0x3f8   : > { %5205 = vst [vmem:[%s13198_s25 + $0x98] sm:$0xff] %v5025_v57  ;;  %v5320_v17 = vadd.f32 %v5319_v24, %v5025_v57  ;;  %v5380_v42 = vmul.f32 %v5025_v57, %v5025_v57  ;;  %5217 = vst [vmem:[%s13198_s25 + $0xf8] sm:$0xff] %v13258_v11  ;;  %v6922_v4 = vpop.f32.mrb[39].mxu0  ;;  %v6958_v56 = vpop.f32.mrb[11].mxu1  ;;  %v5389_v57 = vmul.f32 %v13242_v15, %v13242_v15 }
 0x3f9   : > { %v5390_v4 = vmul.f32 %v5279_v63, %v5279_v63 }
 0x3fa   : > { %v5430_v29 = vadd.f32 %v5429_v44, %v5380_v42 }
 0x3ff   : > { %v5030_v47 = vpop.f32.mrb[40].mxu0  ;;  %v13263_v40 = vpop.f32.mrb[12].mxu1 }
 0x400   : > { %5206 = vst [vmem:[%s13198_s25 + $0xa0] sm:$0xff] %v5030_v47  ;;  %v5270_v43 = vmul.f32 %v13213_v53, %v5030_v47  ;;  %5218 = vst [vmem:[%s13198_s25 + $0x100] sm:$0xff] %v13263_v40  ;;  %v6925_v27 = vpop.f32.mrb[41].mxu0  ;;  %v6961_v39 = vpop.f32.mrb[13].mxu1  ;;  %v5282_v25 = vmul.f32 %v13213_v53, %v13263_v40 }
 0x402   : > { %v5321_v20 = vadd.f32 %v5320_v17, %v5270_v43  ;;  %v5381_v55 = vmul.f32 %v5270_v43, %v5270_v43  ;;  %v5391_v43 = vmul.f32 %v13253_v46, %v13253_v46 }
 0x404   : > { %v5431_v28 = vadd.f32 %v5430_v29, %v5381_v55 }
 0x406   : > { %v5035_v16 = vpop.f32.mrb[42].mxu0  ;;  %v13269_v23 = vpop.f32.mrb[14].mxu1 }
 0x407   : > { %5207 = vst [vmem:[%s13198_s25 + $0xa8] sm:$0xff] %v5035_v16  ;;  %v5322_v41 = vadd.f32 %v5321_v20, %v5035_v16  ;;  %v5382_v14 = vmul.f32 %v5035_v16, %v5035_v16  ;;  %5219 = vst [vmem:[%s13198_s25 + $0x108] sm:$0xff] %v13269_v23  ;;  %v6928_v49 = vpop.f32.mrb[43].mxu0  ;;  %v6964_v13 = vpop.f32.mrb[15].mxu1  ;;  %v5393_v16 = vmul.f32 %v5282_v25, %v5282_v25 }
 0x408   : > { %v5394_v40 = vmul.f32 %v13269_v23, %v13269_v23 }
 0x409   : > { %v5432_v9 = vadd.f32 %v5431_v28, %v5382_v14 }
 0x410   : > { %v5040_v48 = vpop.f32.mrb[44].mxu0  ;;  %v13274_v36 = vpop.f32.mrb[16].mxu1 }
 0x411   : > { %5208 = vst [vmem:[%s13198_s25 + $0xb0] sm:$0xff] %v5040_v48  ;;  %v5323_v22 = vadd.f32 %v5322_v41, %v5040_v48  ;;  %v5383_v26 = vmul.f32 %v5040_v48, %v5040_v48  ;;  %5220 = vst [vmem:[%s13198_s25 + $0x110] sm:$0xff] %v13274_v36  ;;  %v6931_v61 = vpop.f32.mrb[45].mxu0  ;;  %v6967_v32 = vpop.f32.mrb[17].mxu1  ;;  %v5395_v48 = vmul.f32 %v13274_v36, %v13274_v36 }
 0x413   : > { %v5433_v52 = vadd.f32 %v5432_v9, %v5383_v26 }
 0x41b   : > { %v5045_v10 = vpop.f32.mrb[46].mxu0  ;;  %v5105_v3 = vpop.f32.mrb[18].mxu1 }
 0x41c   : > { %5209 = vst [vmem:[%s13198_s25 + $0xb8] sm:$0xff] %v5045_v10  ;;  %v5273_v37 = vmul.f32 %v13213_v53, %v5045_v10  ;;  %5221 = vst [vmem:[%s13198_s25 + $0x118] sm:$0xff] %v5105_v3  ;;  %v6934_v6 = vpop.f32.mrb[47].mxu0  ;;  %v6970_v19 = vpop.f32.mrb[19].mxu1 }
 0x41e   : > { %v5324_v1 = vadd.f32 %v5323_v22, %v5273_v37  ;;  %v5384_v62 = vmul.f32 %v5273_v37, %v5273_v37 }
 0x420   : > { %v5434_v2 = vadd.f32 %v5433_v52, %v5384_v62 }
 0x423   : > { %v5050_v45 = vpop.f32.mrb[48].mxu0  ;;  %v5110_v7 = vpop.f32.mrb[20].mxu1 }
 0x424   : > { %5210 = vst [vmem:[%s13198_s25 + $0xc0] sm:$0xff] %v5050_v45  ;;  %v5325_v51 = vadd.f32 %v5324_v1, %v5050_v45  ;;  %v5385_v31 = vmul.f32 %v5050_v45, %v5050_v45  ;;  %5222 = vst [vmem:[%s13198_s25 + $0x120] sm:$0xff] %v5110_v7  ;;  %v6937_v38 = vpop.f32.mrb[49].mxu0  ;;  %v6973_v54 = vpop.f32.mrb[21].mxu1  ;;  %v5397_v37 = vmul.f32 %v5110_v7, %v5110_v7 }
 0x426   : > { %v5435_v5 = vadd.f32 %v5434_v2, %v5385_v31 }
 0x42a   : > { %v5055_v58 = vpop.f32.mrb[50].mxu0  ;;  %v5115_v18 = vpop.f32.mrb[22].mxu1 }
 0x42b   : > { %5211 = vst [vmem:[%s13198_s25 + $0xc8] sm:$0xff] %v5055_v58  ;;  %v5326_v60 = vadd.f32 %v5325_v51, %v5055_v58  ;;  %v5386_v50 = vmul.f32 %v5055_v58, %v5055_v58  ;;  %5223 = vst [vmem:[%s13198_s25 + $0x128] sm:$0xff] %v5115_v18  ;;  %v6940_v21 = vpop.f32.mrb[51].mxu0  ;;  %v6976_v0 = vpop.f32.mrb[23].mxu1  ;;  %v5398_v1 = vmul.f32 %v5115_v18, %v5115_v18 }
 0x42d   : > { %v5327_v24 = vadd.f32 %v5326_v60, %v5276_v8  ;;  %v5436_v30 = vadd.f32 %v5435_v5, %v5386_v50 }
 0x42f   : > { %v5328_v12 = vadd.f32 %v5327_v24, %v13237_v34  ;;  %v5437_v44 = vadd.f32 %v5436_v30, %v5387_v35 }
 0x431   : > { %v5329_v17 = vadd.f32 %v5328_v12, %v13242_v15  ;;  %v5438_v42 = vadd.f32 %v5437_v44, %v5388_v59  ;;  %v5392_v15 = vmul.f32 %v13258_v11, %v13258_v11 }
 0x433   : > { %v5330_v56 = vadd.f32 %v5329_v17, %v5279_v63  ;;  %v5439_v29 = vadd.f32 %v5438_v42, %v5389_v57 }
 0x434   : > { %v5120_v47 = vpop.f32.mrb[24].mxu1 }
 0x435   : > { %v5331_v34 = vadd.f32 %v5330_v56, %v13253_v46  ;;  %v5440_v27 = vadd.f32 %v5439_v29, %v5390_v4  ;;  %5224 = vst [vmem:[%s13198_s25 + $0x130] sm:$0xff] %v5120_v47  ;;  %v6979_v39 = vpop.f32.mrb[25].mxu1  ;;  %v5285_v46 = vmul.f32 %v13213_v53, %v5105_v3  ;;  %v5288_v3 = vmul.f32 %v13213_v53, %v5120_v47 }
 0x437   : > { %v5441_v20 = vadd.f32 %v5440_v27, %v5391_v43  ;;  %v5332_v55 = vadd.f32 %v5331_v34, %v13258_v11  ;;  %v5396_v26 = vmul.f32 %v5285_v46, %v5285_v46  ;;  %v5399_v31 = vmul.f32 %v5288_v3, %v5288_v3 }
 0x438   : > { %v5125_v28 = vpop.f32.mrb[26].mxu1 }
 0x439   : > { %v5333_v41 = vadd.f32 %v5332_v55, %v5282_v25  ;;  %v5442_v14 = vadd.f32 %v5441_v20, %v5392_v15  ;;  %5225 = vst [vmem:[%s13198_s25 + $0x138] sm:$0xff] %v5125_v28  ;;  %v6982_v49 = vpop.f32.mrb[27].mxu1  ;;  %v5400_v5 = vmul.f32 %v5125_v28, %v5125_v28 }
 0x43b   : > { %v5334_v13 = vadd.f32 %v5333_v41, %v13269_v23  ;;  %v5443_v9 = vadd.f32 %v5442_v14, %v5393_v16 }
 0x43d   : > { %v5335_v11 = vadd.f32 %v5334_v13, %v13274_v36  ;;  %v5444_v22 = vadd.f32 %v5443_v9, %v5394_v40 }
 0x43f   : > { %v5336_v61 = vadd.f32 %v5335_v11, %v5285_v46  ;;  %v5445_v32 = vadd.f32 %v5444_v22, %v5395_v48  ;;  %v5130_v52 = vpop.f32.mrb[28].mxu1 }
 0x440   : > { %5226 = vst [vmem:[%s13198_s25 + $0x140] sm:$0xff] %v5130_v52  ;;  %v6985_v10 = vpop.f32.mrb[29].mxu1  ;;  %v5401_v50 = vmul.f32 %v5130_v52, %v5130_v52 }
 0x441   : > { %v5337_v6 = vadd.f32 %v5336_v61, %v5110_v7  ;;  %v5446_v19 = vadd.f32 %v5445_v32, %v5396_v26 }
 0x443   : > { %v5338_v23 = vadd.f32 %v5337_v6, %v5115_v18  ;;  %v5447_v62 = vadd.f32 %v5446_v19, %v5397_v37  ;;  %v5135_v2 = vpop.f32.mrb[30].mxu1 }
 0x444   : > { %5227 = vst [vmem:[%s13198_s25 + $0x148] sm:$0xff] %v5135_v2  ;;  %v6988_v36 = vpop.f32.mrb[31].mxu1  ;;  %v5291_v8 = vmul.f32 %v13213_v53, %v5135_v2 }
 0x445   : > { %v5448_v45 = vadd.f32 %v5447_v62, %v5398_v1  ;;  %v5339_v51 = vadd.f32 %v5338_v23, %v5288_v3 }
 0x446   : > { %v5402_v35 = vmul.f32 %v5291_v8, %v5291_v8 }
 0x447   : > { %v5449_v38 = vadd.f32 %v5448_v45, %v5399_v31  ;;  %v5340_v54 = vadd.f32 %v5339_v51, %v5125_v28 }
 0x448   : > { %v5140_v7 = vpop.f32.mrb[32].mxu1 }
 0x449   : > { %v5450_v58 = vadd.f32 %v5449_v38, %v5400_v5  ;;  %v5341_v60 = vadd.f32 %v5340_v54, %v5130_v52  ;;  %5228 = vst [vmem:[%s13198_s25 + $0x150] sm:$0xff] %v5140_v7  ;;  %v6991_v18 = vpop.f32.mrb[33].mxu1  ;;  %v5403_v63 = vmul.f32 %v5140_v7, %v5140_v7 }
 0x44b   : > { %v5451_v21 = vadd.f32 %v5450_v58, %v5401_v50  ;;  %v5342_v0 = vadd.f32 %v5341_v60, %v5291_v8  ;;  %v5301_v60 = vld [vmem:[#allocation2] sm:$0x1] }
 0x44c   : > { %v5145_v24 = vpop.f32.mrb[34].mxu1 }
 0x44d   : > { %v5452_v30 = vadd.f32 %v5451_v21, %v5402_v35  ;;  %v5343_v59 = vadd.f32 %v5342_v0, %v5140_v7  ;;  %5229 = vst [vmem:[%s13198_s25 + $0x158] sm:$0xff] %v5145_v24  ;;  %v6994_v12 = vpop.f32.mrb[35].mxu1  ;;  %v5404_v17 = vmul.f32 %v5145_v24, %v5145_v24  ;;  %v5360_v21 = vld [vmem:[#allocation3] sm:$0x1] }
 0x44f   : > { %v5453_v44 = vadd.f32 %v5452_v30, %v5403_v63  ;;  %v5344_v57 = vadd.f32 %v5343_v59, %v5145_v24 }
 0x451   : > { %v5454_v42 = vadd.f32 %v5453_v44, %v5404_v17  ;;  %v5480_v17 = vld [vmem:[%s14162_s2] sm:$0x1] (!%p6659_p5) }
 0x453   : > { %v5150_v4 = vpop.f32.mrb[36].mxu1 }
 0x454   : > { %5230 = vst [vmem:[%s13198_s25 + $0x160] sm:$0xff] %v5150_v4  ;;  %v5294_v56 = vmul.f32 %v13213_v53, %v5150_v4  ;;  %v6997_v29 = vpop.f32.mrb[37].mxu1 }
 0x455   : > { %v5484_v29 = vld [vmem:[%s14163_s3] sm:$0x1] (!%p6659_p5) }
 0x456   : > { %v5345_v47 = vadd.f32 %v5344_v57, %v5294_v56  ;;  %v5405_v43 = vmul.f32 %v5294_v56, %v5294_v56 }
 0x457   : > { %v5155_v25 = vpop.f32.mrb[38].mxu1 }
 0x458   : > { %v5455_v34 = vadd.f32 %v5454_v42, %v5405_v43  ;;  %5231 = vst [vmem:[%s13198_s25 + $0x168] sm:$0xff] %v5155_v25  ;;  %v5346_v27 = vadd.f32 %v5345_v47, %v5155_v25  ;;  %v5406_v39 = vmul.f32 %v5155_v25, %v5155_v25  ;;  %v7000_v15 = vpop.f32.mrb[39].mxu1  ;;  %v5541_v42 = vsub.s32 (!%p6659_p5), 0, %v13188_v33 }
 0x45a   : > { %v5456_v20 = vadd.f32 %v5455_v34, %v5406_v39 }
 0x45c   : > { %v5160_v55 = vpop.f32.mrb[40].mxu1 }
 0x45d   : > { %5232 = vst [vmem:[%s13198_s25 + $0x170] sm:$0xff] %v5160_v55  ;;  %v5347_v28 = vadd.f32 %v5346_v27, %v5160_v55  ;;  %v5407_v16 = vmul.f32 %v5160_v55, %v5160_v55  ;;  %v7003_v41 = vpop.f32.mrb[41].mxu1 }
 0x45f   : > { %v5457_v14 = vadd.f32 %v5456_v20, %v5407_v16 }
 0x460   : > { %v5165_v49 = vpop.f32.mrb[42].mxu1 }
 0x461   : > { %5233 = vst [vmem:[%s13198_s25 + $0x178] sm:$0xff] %v5165_v49  ;;  %v5297_v40 = vmul.f32 %v13213_v53, %v5165_v49  ;;  %v7006_v46 = vpop.f32.mrb[43].mxu1 }
 0x463   : > { %v5348_v13 = vadd.f32 %v5347_v28, %v5297_v40  ;;  %v5408_v9 = vmul.f32 %v5297_v40, %v5297_v40 }
 0x465   : > { %v5458_v48 = vadd.f32 %v5457_v14, %v5408_v9 }
 0x467   : > { %v5170_v11 = vpop.f32.mrb[44].mxu1 }
 0x468   : > { %5234 = vst [vmem:[%s13198_s25 + $0x180] sm:$0xff] %v5170_v11  ;;  %v5349_v22 = vadd.f32 %v5348_v13, %v5170_v11  ;;  %v5409_v26 = vmul.f32 %v5170_v11, %v5170_v11  ;;  %v7009_v61 = vpop.f32.mrb[45].mxu1 }
 0x46a   : > { %v5459_v32 = vadd.f32 %v5458_v48, %v5409_v26 }
 0x46b   : > { %v5175_v52 = vpop.f32.mrb[46].mxu1 }
 0x46c   : > { %5235 = vst [vmem:[%s13198_s25 + $0x188] sm:$0xff] %v5175_v52  ;;  %v5350_v10 = vadd.f32 %v5349_v22, %v5175_v52  ;;  %v5410_v37 = vmul.f32 %v5175_v52, %v5175_v52  ;;  %v7012_v6 = vpop.f32.mrb[47].mxu1 }
 0x46e   : > { %v5460_v19 = vadd.f32 %v5459_v32, %v5410_v37 }
 0x46f   : > { %v5180_v3 = vpop.f32.mrb[48].mxu1 }
 0x470   : > { %5236 = vst [vmem:[%s13198_s25 + $0x190] sm:$0xff] %v5180_v3  ;;  %v5300_v23 = vmul.f32 %v13213_v53, %v5180_v3  ;;  %v7015_v1 = vpop.f32.mrb[49].mxu1 }
 0x472   : > { %v5351_v62 = vadd.f32 %v5350_v10, %v5300_v23  ;;  %v5411_v2 = vmul.f32 %v5300_v23, %v5300_v23 }
 0x474   : > { %v5352_v36 = vrot.slane %v5351_v62, 4  ;;  %v5461_v45 = vadd.f32 %v5460_v19, %v5411_v2 }
 0x476   : > { %v5353_v51 = vadd.f32 %v5352_v36, %v5351_v62  ;;  %v5462_v31 = vrot.slane %v5461_v45, 4 }
 0x477   : > { %v5487_v47 = vld [vmem:[%s14164_s4] sm:$0xff] (!%p6659_p5)  ;;  %v5488_v43 = vld [vmem:[%s14164_s4 + $0x8] sm:$0xff] (!%p6659_p5)  ;;  %v5489_v25 = vld [vmem:[%s14164_s4 + $0x10] sm:$0xff] (!%p6659_p5) }
 0x478   : > { %v5354_v38 = vrot.slane %v5353_v51, 2  ;;  %v5463_v54 = vadd.f32 %v5462_v31, %v5461_v45  ;;  %v5490_v33 = vld [vmem:[%s14164_s4 + $0x18] sm:$0xff] (!%p6659_p5)  ;;  %v5491_v34 = vld [vmem:[%s14164_s4 + $0x20] sm:$0xff] (!%p6659_p5)  ;;  %v5492_v15 = vld [vmem:[%s14164_s4 + $0x28] sm:$0xff] (!%p6659_p5) }
 0x479   : > { %v5493_v20 = vld [vmem:[%s14164_s4 + $0x30] sm:$0xff] (!%p6659_p5)  ;;  %v5494_v55 = vld [vmem:[%s14164_s4 + $0x38] sm:$0xff] (!%p6659_p5)  ;;  %v5495_v28 = vld [vmem:[%s14164_s4 + $0x40] sm:$0xff] (!%p6659_p5) }
 0x47a   : > { %v5355_v5 = vadd.f32 %v5354_v38, %v5353_v51  ;;  %v5464_v8 = vrot.slane %v5463_v54, 2  ;;  %v5496_v16 = vld [vmem:[%s14164_s4 + $0x48] sm:$0xff] (!%p6659_p5)  ;;  %v5497_v41 = vld [vmem:[%s14164_s4 + $0x50] sm:$0xff] (!%p6659_p5)  ;;  %v5498_v13 = vld [vmem:[%s14164_s4 + $0x58] sm:$0xff] (!%p6659_p5) }
 0x47b   : > { %v5499_v9 = vld [vmem:[%s14164_s4 + $0x60] sm:$0xff] (!%p6659_p5)  ;;  %v5500_v48 = vld [vmem:[%s14164_s4 + $0x68] sm:$0xff] (!%p6659_p5) }
 0x47c   : > { %v5356_v7 = vrot.slane %v5355_v5, 1  ;;  %v5465_v58 = vadd.f32 %v5464_v8, %v5463_v54 }
 0x47e   : > { %v5357_v50 = vadd.f32 %v5356_v7, %v5355_v5  ;;  %v5466_v18 = vrot.slane %v5465_v58, 1  ;;  %5473 = sbr.rel (%p6659_p5) target bundleno = 1267 (0x4f3), region = 44 }
 0x480   : > { %v5358_v0 = vadd.f32 %v5357_v50, %v5301_v60  ;;  %v5467_v35 = vadd.f32 %v5466_v18, %v5465_v58  ;;  %v5501_v58 = vld [vmem:[%s14164_s4 + $0x70] sm:$0xff] (!%p6659_p5)  ;;  %v5502_v60 = vld [vmem:[%s14164_s4 + $0x78] sm:$0xff] (!%p6659_p5) }
 0x482   : > { %5359 = vst [vmem:[#allocation2] sm:$0x1] %v5358_v0  ;;  %v5468_v53 = vadd.f32 %v5467_v35, %v5360_v21 }
 0x484   : > { %5469 = vst [vmem:[#allocation3] sm:$0x1] %v5468_v53 }
 0x489   : > { %v5474_v24 = vld [vmem:[#allocation2] sm:$0x1] }
 0x48a   : > { %v5475_v59 = vmul.f32 0.0017301039, %v5474_v24 }
 0x48b   : > { %v5476_v30 = vld [vmem:[#allocation3] sm:$0x1] }
 0x48c   : > { %v5477_v63 = vmul.f32 0.0017301039, %v5476_v30  ;;  %v5478_v12 = vmul.f32 %v5475_v59, %v5475_v59 }
 0x48e   : > { %v5479_v44 = vsub.f32 %v5477_v63, %v5478_v12 }
 0x490   : > { %v5481_v57 = vadd.f32 1e-05, %v5479_v44 }
 0x492   : > { %8977 = vrsqrt.f32 %v5481_v57 }
 0x49c   : > { %v8978_v4 = vpop.eup %8977 }
 0x49d   : > { %v5483_v56 = vmul.f32 %v8978_v4, %v5480_v17  ;;  %v5504_v17 = vld [vmem:[%s14164_s4 + $0x88] sm:$0xff]  ;;  %v5506_v4 = vld [vmem:[%s14164_s4 + $0x98] sm:$0xff] }
 0x49f   : > { %v5485_v27 = vmul.f32 %v5483_v56, %v5475_v59  ;;  %v13352_v39 = vrot.slane %v5483_v56, %v5541_v42  ;;  %v5503_v59 = vld [vmem:[%s14164_s4 + $0x80] sm:$0xff] }
 0x4a1   : > { %v5486_v14 = vsub.f32 %v5484_v29, %v5485_v27  ;;  %v5544_v49 = vmul.f32 %v13352_v39, %v5487_v47  ;;  %v5545_v40 = vmul.f32 %v13352_v39, %v5488_v43  ;;  %v5546_v46 = vmul.f32 %v13352_v39, %v5489_v25  ;;  %v5507_v25 = vld [vmem:[%s14164_s4 + $0xa0] sm:$0xff] }
 0x4a2   : > { %v5547_v11 = vmul.f32 %v13352_v39, %v5490_v33  ;;  %v5548_v22 = vmul.f32 %v13352_v39, %v5491_v34  ;;  %v5549_v26 = vmul.f32 %v13352_v39, %v5492_v15  ;;  %v5550_v61 = vmul.f32 %v13352_v39, %v5493_v20  ;;  %v5508_v33 = vld [vmem:[%s14164_s4 + $0xa8] sm:$0xff] }
 0x4a3   : > { %v13388_v32 = vrot.slane %v5486_v14, %v5541_v42  ;;  %v5551_v52 = vmul.f32 %v13352_v39, %v5494_v55  ;;  %v5552_v10 = vmul.f32 %v13352_v39, %v5495_v28  ;;  %v5553_v37 = vmul.f32 %v13352_v39, %v5496_v16  ;;  %v5505_v42 = vld [vmem:[%s14164_s4 + $0x90] sm:$0xff] }
 0x4a4   : > { %v5554_v6 = vmul.f32 %v13352_v39, %v5497_v41  ;;  %v5555_v19 = vmul.f32 %v13352_v39, %v5498_v13  ;;  %v5556_v3 = vmul.f32 %v13352_v39, %v5499_v9  ;;  %v5557_v23 = vmul.f32 %v13352_v39, %v5500_v48  ;;  %v5509_v14 = vld [vmem:[%s14164_s4 + $0xb0] sm:$0xff] }
 0x4a5   : > { %v5601_v1 = vadd.f32 %v13388_v32, %v5544_v49  ;;  %v5602_v62 = vadd.f32 %v13388_v32, %v5545_v40  ;;  %v5603_v2 = vadd.f32 %v13388_v32, %v5546_v46  ;;  %v5604_v36 = vadd.f32 %v13388_v32, %v5547_v11  ;;  %v5510_v49 = vld [vmem:[%s14164_s4 + $0xb8] sm:$0xff] }
 0x4a6   : > { %v5605_v45 = vadd.f32 %v13388_v32, %v5548_v22  ;;  %v5606_v51 = vadd.f32 %v13388_v32, %v5549_v26  ;;  %v5607_v31 = vadd.f32 %v13388_v32, %v5550_v61  ;;  %v5608_v38 = vadd.f32 %v13388_v32, %v5551_v52  ;;  %v5511_v61 = vld [vmem:[%s14164_s4 + $0xc0] sm:$0xff] }
 0x4a7   : > { %v5652_v54 = vmax.f32 %v5601_v1, 0.0  ;;  %v5653_v5 = vmax.f32 %v5602_v62, 0.0  ;;  %v5654_v8 = vmax.f32 %v5603_v2, 0.0  ;;  %v5655_v7 = vmax.f32 %v5604_v36, 0.0 }
 0x4a8   : > { %v5656_v50 = vmax.f32 %v5605_v45, 0.0  ;;  %v5657_v18 = vmax.f32 %v5606_v51, 0.0  ;;  %v5658_v21 = vmax.f32 %v5607_v31, 0.0  ;;  %v5659_v0 = vmax.f32 %v5608_v38, 0.0  ;;  %v5515_v45 = vld [vmem:[%s14164_s4 + $0xe0] sm:$0xff]  ;;  %v5516_v51 = vld [vmem:[%s14164_s4 + $0xe8] sm:$0xff] }
 0x4a9   : > { %5703 = vst [vmem:[%s14164_s4] sm:$0xff] %v5652_v54  ;;  %5704 = vst [vmem:[%s14164_s4 + $0x8] sm:$0xff] %v5653_v5  ;;  %v5609_v35 = vadd.f32 %v13388_v32, %v5552_v10  ;;  %v5610_v53 = vadd.f32 %v13388_v32, %v5553_v37  ;;  %v5611_v24 = vadd.f32 %v13388_v32, %v5554_v6 }
 0x4aa   : > { %5705 = vst [vmem:[%s14164_s4 + $0x10] sm:$0xff] %v5654_v8  ;;  %5706 = vst [vmem:[%s14164_s4 + $0x18] sm:$0xff] %v5655_v7  ;;  %v5612_v30 = vadd.f32 %v13388_v32, %v5555_v19  ;;  %v5613_v63 = vadd.f32 %v13388_v32, %v5556_v3  ;;  %v5614_v12 = vadd.f32 %v13388_v32, %v5557_v23  ;;  %v5512_v19 = vld [vmem:[%s14164_s4 + $0xc8] sm:$0xff]  ;;  %v5513_v3 = vld [vmem:[%s14164_s4 + $0xd0] sm:$0xff] }
 0x4ab   : > { %5707 = vst [vmem:[%s14164_s4 + $0x20] sm:$0xff] %v5656_v50  ;;  %5708 = vst [vmem:[%s14164_s4 + $0x28] sm:$0xff] %v5657_v18  ;;  %v5558_v44 = vmul.f32 %v13352_v39, %v5501_v58  ;;  %v5559_v57 = vmul.f32 %v13352_v39, %v5502_v60  ;;  %v5660_v56 = vmax.f32 %v5609_v35, 0.0  ;;  %v5661_v29 = vmax.f32 %v5610_v53, 0.0  ;;  %v5514_v23 = vld [vmem:[%s14164_s4 + $0xd8] sm:$0xff]  ;;  %v5517_v50 = vld [vmem:[%s14164_s4 + $0xf0] sm:$0xff] }
 0x4ac   : > { %5709 = vst [vmem:[%s14164_s4 + $0x30] sm:$0xff] %v5658_v21  ;;  %5710 = vst [vmem:[%s14164_s4 + $0x38] sm:$0xff] %v5659_v0  ;;  %v5662_v47 = vmax.f32 %v5611_v24, 0.0  ;;  %v5663_v43 = vmax.f32 %v5612_v30, 0.0  ;;  %v5664_v34 = vmax.f32 %v5613_v63, 0.0  ;;  %v5665_v27 = vmax.f32 %v5614_v12, 0.0 }
 0x4ad   : > { %v5615_v15 = vadd.f32 %v13388_v32, %v5558_v44  ;;  %v5616_v20 = vadd.f32 %v13388_v32, %v5559_v57  ;;  %5711 = vst [vmem:[%s14164_s4 + $0x40] sm:$0xff] %v5660_v56  ;;  %5712 = vst [vmem:[%s14164_s4 + $0x48] sm:$0xff] %v5661_v29  ;;  %v5560_v55 = vmul.f32 %v13352_v39, %v5503_v59  ;;  %v5518_v18 = vld [vmem:[%s14164_s4 + $0xf8] sm:$0xff]  ;;  %v5519_v12 = vld [vmem:[%s14164_s4 + $0x100] sm:$0xff] }
 0x4ae   : > { %5713 = vst [vmem:[%s14164_s4 + $0x50] sm:$0xff] %v5662_v47  ;;  %5714 = vst [vmem:[%s14164_s4 + $0x58] sm:$0xff] %v5663_v43  ;;  %v5561_v28 = vmul.f32 %v13352_v39, %v5504_v17  ;;  %v5562_v16 = vmul.f32 %v13352_v39, %v5505_v42  ;;  %v5563_v41 = vmul.f32 %v13352_v39, %v5506_v4  ;;  %v5520_v4 = vld [vmem:[%s14164_s4 + $0x108] sm:$0xff]  ;;  %v5521_v56 = vld [vmem:[%s14164_s4 + $0x110] sm:$0xff] }
 0x4af   : > { %5715 = vst [vmem:[%s14164_s4 + $0x60] sm:$0xff] %v5664_v34  ;;  %5716 = vst [vmem:[%s14164_s4 + $0x68] sm:$0xff] %v5665_v27  ;;  %v5666_v40 = vmax.f32 %v5615_v15, 0.0  ;;  %v5667_v46 = vmax.f32 %v5616_v20, 0.0  ;;  %v5564_v13 = vmul.f32 %v13352_v39, %v5507_v25  ;;  %v5565_v9 = vmul.f32 %v13352_v39, %v5508_v33  ;;  %v5522_v29 = vld [vmem:[%s14164_s4 + $0x118] sm:$0xff]  ;;  %v5523_v34 = vld [vmem:[%s14164_s4 + $0x120] sm:$0xff] }
 0x4b0   : > { %v5617_v48 = vadd.f32 %v13388_v32, %v5560_v55  ;;  %v5618_v11 = vadd.f32 %v13388_v32, %v5561_v28  ;;  %v5619_v22 = vadd.f32 %v13388_v32, %v5562_v16  ;;  %v5620_v26 = vadd.f32 %v13388_v32, %v5563_v41  ;;  %v5524_v27 = vld [vmem:[%s14164_s4 + $0x128] sm:$0xff] }
 0x4b1   : > { %5717 = vst [vmem:[%s14164_s4 + $0x70] sm:$0xff] %v5666_v40  ;;  %5718 = vst [vmem:[%s14164_s4 + $0x78] sm:$0xff] %v5667_v46  ;;  %v5621_v52 = vadd.f32 %v13388_v32, %v5564_v13  ;;  %v5622_v10 = vadd.f32 %v13388_v32, %v5565_v9  ;;  %v5566_v37 = vmul.f32 %v13352_v39, %v5509_v14  ;;  %v5525_v40 = vld [vmem:[%s14164_s4 + $0x130] sm:$0xff]  ;;  %v5526_v46 = vld [vmem:[%s14164_s4 + $0x138] sm:$0xff] }
 0x4b2   : > { %v5567_v6 = vmul.f32 %v13352_v39, %v5510_v49  ;;  %v5668_v1 = vmax.f32 %v5617_v48, 0.0  ;;  %v5669_v62 = vmax.f32 %v5618_v11, 0.0  ;;  %v5670_v2 = vmax.f32 %v5619_v22, 0.0 }
 0x4b3   : > { %v5671_v36 = vmax.f32 %v5620_v26, 0.0  ;;  %v5672_v31 = vmax.f32 %v5621_v52, 0.0  ;;  %v5673_v38 = vmax.f32 %v5622_v10, 0.0  ;;  %v5623_v54 = vadd.f32 %v13388_v32, %v5566_v37  ;;  %v5527_v10 = vld [vmem:[%s14164_s4 + $0x140] sm:$0xff] }
 0x4b4   : > { %v5624_v5 = vadd.f32 %v13388_v32, %v5567_v6  ;;  %5719 = vst [vmem:[%s14164_s4 + $0x80] sm:$0xff] %v5668_v1  ;;  %5720 = vst [vmem:[%s14164_s4 + $0x88] sm:$0xff] %v5669_v62  ;;  %v5568_v8 = vmul.f32 %v13352_v39, %v5511_v61  ;;  %v5569_v7 = vmul.f32 %v13352_v39, %v5512_v19  ;;  %v5529_v1 = vld [vmem:[%s14164_s4 + $0x150] sm:$0xff]  ;;  %v5530_v62 = vld [vmem:[%s14164_s4 + $0x158] sm:$0xff] }
 0x4b5   : > { %5721 = vst [vmem:[%s14164_s4 + $0x90] sm:$0xff] %v5670_v2  ;;  %5722 = vst [vmem:[%s14164_s4 + $0x98] sm:$0xff] %v5671_v36  ;;  %v5570_v58 = vmul.f32 %v13352_v39, %v5513_v3  ;;  %v5571_v60 = vmul.f32 %v13352_v39, %v5514_v23  ;;  %v5674_v21 = vmax.f32 %v5623_v54, 0.0  ;;  %v5572_v35 = vmul.f32 %v13352_v39, %v5515_v45  ;;  %v5528_v23 = vld [vmem:[%s14164_s4 + $0x148] sm:$0xff] }
 0x4b6   : > { %5723 = vst [vmem:[%s14164_s4 + $0xa0] sm:$0xff] %v5672_v31  ;;  %5724 = vst [vmem:[%s14164_s4 + $0xa8] sm:$0xff] %v5673_v38  ;;  %v5675_v0 = vmax.f32 %v5624_v5, 0.0  ;;  %v5573_v53 = vmul.f32 %v13352_v39, %v5516_v51  ;;  %v5625_v24 = vadd.f32 %v13388_v32, %v5568_v8  ;;  %v5626_v30 = vadd.f32 %v13388_v32, %v5569_v7  ;;  %v5531_v31 = vld [vmem:[%s14164_s4 + $0x160] sm:$0xff]  ;;  %v5532_v38 = vld [vmem:[%s14164_s4 + $0x168] sm:$0xff] }
 0x4b7   : > { %v5627_v59 = vadd.f32 %v13388_v32, %v5570_v58  ;;  %v5628_v63 = vadd.f32 %v13388_v32, %v5571_v60  ;;  %5725 = vst [vmem:[%s14164_s4 + $0xb0] sm:$0xff] %v5674_v21  ;;  %v5629_v44 = vadd.f32 %v13388_v32, %v5572_v35  ;;  %v5574_v17 = vmul.f32 %v13352_v39, %v5517_v50  ;;  %v5533_v21 = vld [vmem:[%s14164_s4 + $0x170] sm:$0xff] }
 0x4b8   : > { %5726 = vst [vmem:[%s14164_s4 + $0xb8] sm:$0xff] %v5675_v0  ;;  %v5630_v57 = vadd.f32 %v13388_v32, %v5573_v53  ;;  %v5575_v42 = vmul.f32 %v13352_v39, %v5518_v18  ;;  %v5676_v47 = vmax.f32 %v5625_v24, 0.0  ;;  %v5677_v43 = vmax.f32 %v5626_v30, 0.0  ;;  %v5534_v0 = vld [vmem:[%s14164_s4 + $0x178] sm:$0xff] }
 0x4b9   : > { %v5678_v25 = vmax.f32 %v5627_v59, 0.0  ;;  %v5679_v33 = vmax.f32 %v5628_v63, 0.0  ;;  %v5680_v15 = vmax.f32 %v5629_v44, 0.0  ;;  %v5631_v55 = vadd.f32 %v13388_v32, %v5574_v17 }
 0x4ba   : > { %v5681_v20 = vmax.f32 %v5630_v57, 0.0  ;;  %v5632_v28 = vadd.f32 %v13388_v32, %v5575_v42  ;;  %5727 = vst [vmem:[%s14164_s4 + $0xc0] sm:$0xff] %v5676_v47  ;;  %5728 = vst [vmem:[%s14164_s4 + $0xc8] sm:$0xff] %v5677_v43  ;;  %v5576_v16 = vmul.f32 %v13352_v39, %v5519_v12  ;;  %v5577_v41 = vmul.f32 %v13352_v39, %v5520_v4  ;;  %v5535_v57 = vld [vmem:[%s14164_s4 + $0x180] sm:$0xff]  ;;  %v5537_v47 = vld [vmem:[%s14164_s4 + $0x190] sm:$0xff] }
 0x4bb   : > { %5729 = vst [vmem:[%s14164_s4 + $0xd0] sm:$0xff] %v5678_v25  ;;  %5730 = vst [vmem:[%s14164_s4 + $0xd8] sm:$0xff] %v5679_v33  ;;  %v5578_v14 = vmul.f32 %v13352_v39, %v5521_v56  ;;  %v5579_v49 = vmul.f32 %v13352_v39, %v5522_v29  ;;  %v5682_v13 = vmax.f32 %v5631_v55, 0.0  ;;  %v5580_v48 = vmul.f32 %v13352_v39, %v5523_v34  ;;  %v5536_v29 = vld [vmem:[%s14164_s4 + $0x188] sm:$0xff]  ;;  %v6660_v43 = vld [vmem:[%s14164_s4 + $0x198] sm:$0xff] }
 0x4bc   : > { %5731 = vst [vmem:[%s14164_s4 + $0xe0] sm:$0xff] %v5680_v15  ;;  %5732 = vst [vmem:[%s14164_s4 + $0xe8] sm:$0xff] %v5681_v20  ;;  %v5683_v9 = vmax.f32 %v5632_v28, 0.0  ;;  %v5581_v11 = vmul.f32 %v13352_v39, %v5524_v27  ;;  %v5633_v22 = vadd.f32 %v13388_v32, %v5576_v16  ;;  %v5634_v26 = vadd.f32 %v13388_v32, %v5577_v41  ;;  %v6661_v15 = vld [vmem:[%s14164_s4 + $0x1a0] sm:$0xff]  ;;  %v6662_v20 = vld [vmem:[%s14164_s4 + $0x1a8] sm:$0xff] }
 0x4bd   : > { %v5635_v61 = vadd.f32 %v13388_v32, %v5578_v14  ;;  %v5636_v52 = vadd.f32 %v13388_v32, %v5579_v49  ;;  %5733 = vst [vmem:[%s14164_s4 + $0xf0] sm:$0xff] %v5682_v13  ;;  %v5637_v37 = vadd.f32 %v13388_v32, %v5580_v48  ;;  %v5582_v19 = vmul.f32 %v13352_v39, %v5525_v40  ;;  %v6663_v13 = vld [vmem:[%s14164_s4 + $0x1b0] sm:$0xff] }
 0x4be   : > { %5734 = vst [vmem:[%s14164_s4 + $0xf8] sm:$0xff] %v5683_v9  ;;  %v5638_v6 = vadd.f32 %v13388_v32, %v5581_v11  ;;  %v5583_v3 = vmul.f32 %v13352_v39, %v5526_v46  ;;  %v5684_v2 = vmax.f32 %v5633_v22, 0.0  ;;  %v5685_v36 = vmax.f32 %v5634_v26, 0.0  ;;  %v6664_v9 = vld [vmem:[%s14164_s4 + $0x1b8] sm:$0xff] }
 0x4bf   : > { %v5686_v45 = vmax.f32 %v5635_v61, 0.0  ;;  %v5687_v51 = vmax.f32 %v5636_v52, 0.0  ;;  %v5688_v54 = vmax.f32 %v5637_v37, 0.0  ;;  %v5639_v8 = vadd.f32 %v13388_v32, %v5582_v19 }
 0x4c0   : > { %v5689_v5 = vmax.f32 %v5638_v6, 0.0  ;;  %v5640_v7 = vadd.f32 %v13388_v32, %v5583_v3  ;;  %5735 = vst [vmem:[%s14164_s4 + $0x100] sm:$0xff] %v5684_v2  ;;  %5736 = vst [vmem:[%s14164_s4 + $0x108] sm:$0xff] %v5685_v36  ;;  %v5584_v58 = vmul.f32 %v13352_v39, %v5527_v10  ;;  %v5585_v60 = vmul.f32 %v13352_v39, %v5528_v23  ;;  %v6665_v6 = vld [vmem:[%s14164_s4 + $0x1c0] sm:$0xff]  ;;  %v6667_v2 = vld [vmem:[%s14164_s4 + $0x1d0] sm:$0xff] }
 0x4c1   : > { %5737 = vst [vmem:[%s14164_s4 + $0x110] sm:$0xff] %v5686_v45  ;;  %5738 = vst [vmem:[%s14164_s4 + $0x118] sm:$0xff] %v5687_v51  ;;  %v5586_v50 = vmul.f32 %v13352_v39, %v5529_v1  ;;  %v5587_v18 = vmul.f32 %v13352_v39, %v5530_v62  ;;  %v5690_v35 = vmax.f32 %v5639_v8, 0.0  ;;  %v5588_v24 = vmul.f32 %v13352_v39, %v5531_v31  ;;  %v6666_v62 = vld [vmem:[%s14164_s4 + $0x1c8] sm:$0xff]  ;;  %v6668_v36 = vld [vmem:[%s14164_s4 + $0x1d8] sm:$0xff] }
 0x4c2   : > { %5739 = vst [vmem:[%s14164_s4 + $0x120] sm:$0xff] %v5688_v54  ;;  %5740 = vst [vmem:[%s14164_s4 + $0x128] sm:$0xff] %v5689_v5  ;;  %v5691_v53 = vmax.f32 %v5640_v7, 0.0  ;;  %v5589_v30 = vmul.f32 %v13352_v39, %v5532_v38  ;;  %v5641_v59 = vadd.f32 %v13388_v32, %v5584_v58  ;;  %v5642_v63 = vadd.f32 %v13388_v32, %v5585_v60  ;;  %v6669_v54 = vld [vmem:[%s14164_s4 + $0x1e0] sm:$0xff]  ;;  %v6670_v5 = vld [vmem:[%s14164_s4 + $0x1e8] sm:$0xff] }
 0x4c3   : > { %v5643_v12 = vadd.f32 %v13388_v32, %v5586_v50  ;;  %v5644_v44 = vadd.f32 %v13388_v32, %v5587_v18  ;;  %5741 = vst [vmem:[%s14164_s4 + $0x130] sm:$0xff] %v5690_v35  ;;  %v5645_v17 = vadd.f32 %v13388_v32, %v5588_v24  ;;  %v5590_v4 = vmul.f32 %v13352_v39, %v5533_v21  ;;  %v6671_v35 = vld [vmem:[%s14164_s4 + $0x1f0] sm:$0xff] }
 0x4c4   : > { %5742 = vst [vmem:[%s14164_s4 + $0x138] sm:$0xff] %v5691_v53  ;;  %v5646_v42 = vadd.f32 %v13388_v32, %v5589_v30  ;;  %v5591_v56 = vmul.f32 %v13352_v39, %v5534_v0  ;;  %v5692_v25 = vmax.f32 %v5641_v59, 0.0  ;;  %v5693_v33 = vmax.f32 %v5642_v63, 0.0  ;;  %v6672_v53 = vld [vmem:[%s14164_s4 + $0x1f8] sm:$0xff] }
 0x4c5   : > { %v5694_v34 = vmax.f32 %v5643_v12, 0.0  ;;  %v5695_v27 = vmax.f32 %v5644_v44, 0.0  ;;  %v5696_v55 = vmax.f32 %v5645_v17, 0.0  ;;  %v5647_v16 = vadd.f32 %v13388_v32, %v5590_v4 }
 0x4c6   : > { %v5697_v28 = vmax.f32 %v5646_v42, 0.0  ;;  %v5648_v41 = vadd.f32 %v13388_v32, %v5591_v56  ;;  %5743 = vst [vmem:[%s14164_s4 + $0x140] sm:$0xff] %v5692_v25  ;;  %5744 = vst [vmem:[%s14164_s4 + $0x148] sm:$0xff] %v5693_v33  ;;  %v5592_v14 = vmul.f32 %v13352_v39, %v5535_v57  ;;  %v5593_v49 = vmul.f32 %v13352_v39, %v5536_v29  ;;  %v6673_v42 = vld [vmem:[%s14164_s4 + $0x200] sm:$0xff]  ;;  %v6675_v25 = vld [vmem:[%s14164_s4 + $0x210] sm:$0xff] }
 0x4c7   : > { %5745 = vst [vmem:[%s14164_s4 + $0x150] sm:$0xff] %v5694_v34  ;;  %5746 = vst [vmem:[%s14164_s4 + $0x158] sm:$0xff] %v5695_v27  ;;  %v5594_v40 = vmul.f32 %v13352_v39, %v5537_v47  ;;  %v5806_v46 = vmul.f32 %v6660_v43, %v13352_v39  ;;  %v5698_v48 = vmax.f32 %v5647_v16, 0.0  ;;  %v5807_v22 = vmul.f32 %v6661_v15, %v13352_v39  ;;  %v6674_v43 = vld [vmem:[%s14164_s4 + $0x208] sm:$0xff]  ;;  %v6676_v33 = vld [vmem:[%s14164_s4 + $0x218] sm:$0xff] }
 0x4c8   : > { %5747 = vst [vmem:[%s14164_s4 + $0x160] sm:$0xff] %v5696_v55  ;;  %5748 = vst [vmem:[%s14164_s4 + $0x168] sm:$0xff] %v5697_v28  ;;  %v5699_v11 = vmax.f32 %v5648_v41, 0.0  ;;  %v5808_v26 = vmul.f32 %v6662_v20, %v13352_v39  ;;  %v5649_v61 = vadd.f32 %v13388_v32, %v5592_v14  ;;  %v5650_v52 = vadd.f32 %v13388_v32, %v5593_v49  ;;  %v6677_v55 = vld [vmem:[%s14164_s4 + $0x220] sm:$0xff]  ;;  %v6678_v28 = vld [vmem:[%s14164_s4 + $0x228] sm:$0xff] }
 0x4c9   : > { %v5651_v10 = vadd.f32 %v13388_v32, %v5594_v40  ;;  %v5857_v37 = vadd.f32 %v5806_v46, %v13388_v32  ;;  %5749 = vst [vmem:[%s14164_s4 + $0x170] sm:$0xff] %v5698_v48  ;;  %v5858_v19 = vadd.f32 %v5807_v22, %v13388_v32  ;;  %v5809_v23 = vmul.f32 %v6663_v13, %v13352_v39  ;;  %v6679_v48 = vld [vmem:[%s14164_s4 + $0x230] sm:$0xff] }
 0x4ca   : > { %5750 = vst [vmem:[%s14164_s4 + $0x178] sm:$0xff] %v5699_v11  ;;  %v5859_v3 = vadd.f32 %v5808_v26, %v13388_v32  ;;  %v5810_v1 = vmul.f32 %v6664_v9, %v13352_v39  ;;  %v5700_v45 = vmax.f32 %v5649_v61, 0.0  ;;  %v5701_v51 = vmax.f32 %v5650_v52, 0.0  ;;  %v6680_v11 = vld [vmem:[%s14164_s4 + $0x238] sm:$0xff] }
 0x4cb   : > { %v5702_v31 = vmax.f32 %v5651_v10, 0.0  ;;  %v5908_v38 = vmax.f32 %v5857_v37, 0.0  ;;  %v5909_v8 = vmax.f32 %v5858_v19, 0.0  ;;  %v5860_v58 = vadd.f32 %v5809_v23, %v13388_v32 }
 0x4cc   : > { %v5910_v7 = vmax.f32 %v5859_v3, 0.0  ;;  %v5861_v60 = vadd.f32 %v5810_v1, %v13388_v32  ;;  %5751 = vst [vmem:[%s14164_s4 + $0x180] sm:$0xff] %v5700_v45  ;;  %5752 = vst [vmem:[%s14164_s4 + $0x188] sm:$0xff] %v5701_v51  ;;  %v5811_v50 = vmul.f32 %v6665_v6, %v13352_v39  ;;  %v5812_v18 = vmul.f32 %v6666_v62, %v13352_v39  ;;  %v6681_v3 = vld [vmem:[%s14164_s4 + $0x240] sm:$0xff]  ;;  %v6683_v45 = vld [vmem:[%s14164_s4 + $0x250] sm:$0xff] }
 0x4cd   : > { %5753 = vst [vmem:[%s14164_s4 + $0x190] sm:$0xff] %v5702_v31  ;;  %6711 = vst [vmem:[%s14164_s4 + $0x198] sm:$0xff] %v5908_v38  ;;  %v5813_v21 = vmul.f32 %v6667_v2, %v13352_v39  ;;  %v5814_v0 = vmul.f32 %v6668_v36, %v13352_v39  ;;  %v5911_v24 = vmax.f32 %v5860_v58, 0.0  ;;  %v5815_v59 = vmul.f32 %v6669_v54, %v13352_v39  ;;  %v6682_v36 = vld [vmem:[%s14164_s4 + $0x248] sm:$0xff]  ;;  %v6684_v51 = vld [vmem:[%s14164_s4 + $0x258] sm:$0xff] }
 0x4ce   : > { %6712 = vst [vmem:[%s14164_s4 + $0x1a0] sm:$0xff] %v5909_v8  ;;  %6713 = vst [vmem:[%s14164_s4 + $0x1a8] sm:$0xff] %v5910_v7  ;;  %v5912_v30 = vmax.f32 %v5861_v60, 0.0  ;;  %v5816_v63 = vmul.f32 %v6670_v5, %v13352_v39  ;;  %v5862_v12 = vadd.f32 %v5811_v50, %v13388_v32  ;;  %v5863_v44 = vadd.f32 %v5812_v18, %v13388_v32  ;;  %v6685_v8 = vld [vmem:[%s14164_s4 + $0x260] sm:$0xff]  ;;  %v6686_v7 = vld [vmem:[%s14164_s4 + $0x268] sm:$0xff] }
 0x4cf   : > { %v5864_v57 = vadd.f32 %v5813_v21, %v13388_v32  ;;  %v5865_v17 = vadd.f32 %v5814_v0, %v13388_v32  ;;  %6714 = vst [vmem:[%s14164_s4 + $0x1b0] sm:$0xff] %v5911_v24  ;;  %v5866_v4 = vadd.f32 %v5815_v59, %v13388_v32  ;;  %v5817_v29 = vmul.f32 %v6671_v35, %v13352_v39  ;;  %v6687_v24 = vld [vmem:[%s14164_s4 + $0x270] sm:$0xff] }
 0x4d0   : > { %6715 = vst [vmem:[%s14164_s4 + $0x1b8] sm:$0xff] %v5912_v30  ;;  %v5867_v56 = vadd.f32 %v5816_v63, %v13388_v32  ;;  %v5818_v47 = vmul.f32 %v6672_v53, %v13352_v39  ;;  %v5913_v34 = vmax.f32 %v5862_v12, 0.0  ;;  %v5914_v27 = vmax.f32 %v5863_v44, 0.0  ;;  %v6688_v30 = vld [vmem:[%s14164_s4 + $0x278] sm:$0xff] }
 0x4d1   : > { %v5915_v15 = vmax.f32 %v5864_v57, 0.0  ;;  %v5916_v20 = vmax.f32 %v5865_v17, 0.0  ;;  %v5917_v16 = vmax.f32 %v5866_v4, 0.0  ;;  %v5868_v14 = vadd.f32 %v5817_v29, %v13388_v32 }
 0x4d2   : > { %v5918_v41 = vmax.f32 %v5867_v56, 0.0  ;;  %v5869_v49 = vadd.f32 %v5818_v47, %v13388_v32  ;;  %6716 = vst [vmem:[%s14164_s4 + $0x1c0] sm:$0xff] %v5913_v34  ;;  %6717 = vst [vmem:[%s14164_s4 + $0x1c8] sm:$0xff] %v5914_v27  ;;  %v5819_v40 = vmul.f32 %v6673_v42, %v13352_v39  ;;  %v5820_v46 = vmul.f32 %v6674_v43, %v13352_v39  ;;  %v6689_v56 = vld [vmem:[%s14164_s4 + $0x280] sm:$0xff]  ;;  %v6691_v34 = vld [vmem:[%s14164_s4 + $0x290] sm:$0xff] }
 0x4d3   : > { %6718 = vst [vmem:[%s14164_s4 + $0x1d0] sm:$0xff] %v5915_v15  ;;  %6719 = vst [vmem:[%s14164_s4 + $0x1d8] sm:$0xff] %v5916_v20  ;;  %v5821_v13 = vmul.f32 %v6675_v25, %v13352_v39  ;;  %v5822_v9 = vmul.f32 %v6676_v33, %v13352_v39  ;;  %v5919_v22 = vmax.f32 %v5868_v14, 0.0  ;;  %v5823_v61 = vmul.f32 %v6677_v55, %v13352_v39  ;;  %v6690_v33 = vld [vmem:[%s14164_s4 + $0x288] sm:$0xff]  ;;  %v6692_v27 = vld [vmem:[%s14164_s4 + $0x298] sm:$0xff] }
 0x4d4   : > { %6720 = vst [vmem:[%s14164_s4 + $0x1e0] sm:$0xff] %v5917_v16  ;;  %6721 = vst [vmem:[%s14164_s4 + $0x1e8] sm:$0xff] %v5918_v41  ;;  %v5920_v26 = vmax.f32 %v5869_v49, 0.0  ;;  %v5824_v52 = vmul.f32 %v6678_v28, %v13352_v39  ;;  %v5870_v10 = vadd.f32 %v5819_v40, %v13388_v32  ;;  %v5871_v37 = vadd.f32 %v5820_v46, %v13388_v32  ;;  %v6693_v16 = vld [vmem:[%s14164_s4 + $0x2a0] sm:$0xff]  ;;  %v6694_v41 = vld [vmem:[%s14164_s4 + $0x2a8] sm:$0xff] }
 0x4d5   : > { %v5872_v6 = vadd.f32 %v5821_v13, %v13388_v32  ;;  %v5873_v19 = vadd.f32 %v5822_v9, %v13388_v32  ;;  %6722 = vst [vmem:[%s14164_s4 + $0x1f0] sm:$0xff] %v5919_v22  ;;  %v5874_v23 = vadd.f32 %v5823_v61, %v13388_v32  ;;  %v5825_v62 = vmul.f32 %v6679_v48, %v13352_v39  ;;  %v6695_v22 = vld [vmem:[%s14164_s4 + $0x2b0] sm:$0xff] }
 0x4d6   : > { %6723 = vst [vmem:[%s14164_s4 + $0x1f8] sm:$0xff] %v5920_v26  ;;  %v5875_v1 = vadd.f32 %v5824_v52, %v13388_v32  ;;  %v5826_v2 = vmul.f32 %v6680_v11, %v13352_v39  ;;  %v5921_v31 = vmax.f32 %v5870_v10, 0.0  ;;  %v5922_v38 = vmax.f32 %v5871_v37, 0.0  ;;  %v6696_v26 = vld [vmem:[%s14164_s4 + $0x2b8] sm:$0xff] }
 0x4d7   : > { %v5923_v54 = vmax.f32 %v5872_v6, 0.0  ;;  %v5924_v5 = vmax.f32 %v5873_v19, 0.0  ;;  %v5925_v58 = vmax.f32 %v5874_v23, 0.0  ;;  %v5876_v50 = vadd.f32 %v5825_v62, %v13388_v32 }
 0x4d8   : > { %v5926_v60 = vmax.f32 %v5875_v1, 0.0  ;;  %v5877_v18 = vadd.f32 %v5826_v2, %v13388_v32  ;;  %6724 = vst [vmem:[%s14164_s4 + $0x200] sm:$0xff] %v5921_v31  ;;  %6725 = vst [vmem:[%s14164_s4 + $0x208] sm:$0xff] %v5922_v38  ;;  %v5827_v21 = vmul.f32 %v6681_v3, %v13352_v39  ;;  %v5828_v0 = vmul.f32 %v6682_v36, %v13352_v39  ;;  %v6697_v1 = vld [vmem:[%s14164_s4 + $0x2c0] sm:$0xff]  ;;  %v6699_v31 = vld [vmem:[%s14164_s4 + $0x2d0] sm:$0xff] }
 0x4d9   : > { %6726 = vst [vmem:[%s14164_s4 + $0x210] sm:$0xff] %v5923_v54  ;;  %6727 = vst [vmem:[%s14164_s4 + $0x218] sm:$0xff] %v5924_v5  ;;  %v5829_v35 = vmul.f32 %v6683_v45, %v13352_v39  ;;  %v5830_v53 = vmul.f32 %v6684_v51, %v13352_v39  ;;  %v5927_v59 = vmax.f32 %v5876_v50, 0.0  ;;  %v5831_v12 = vmul.f32 %v6685_v8, %v13352_v39  ;;  %v6698_v51 = vld [vmem:[%s14164_s4 + $0x2c8] sm:$0xff]  ;;  %v6700_v38 = vld [vmem:[%s14164_s4 + $0x2d8] sm:$0xff] }
 0x4da   : > { %6728 = vst [vmem:[%s14164_s4 + $0x220] sm:$0xff] %v5925_v58  ;;  %6729 = vst [vmem:[%s14164_s4 + $0x228] sm:$0xff] %v5926_v60  ;;  %v5928_v63 = vmax.f32 %v5877_v18, 0.0  ;;  %v5832_v44 = vmul.f32 %v6686_v7, %v13352_v39  ;;  %v5878_v57 = vadd.f32 %v5827_v21, %v13388_v32  ;;  %v5879_v17 = vadd.f32 %v5828_v0, %v13388_v32  ;;  %v6701_v58 = vld [vmem:[%s14164_s4 + $0x2e0] sm:$0xff]  ;;  %v6702_v60 = vld [vmem:[%s14164_s4 + $0x2e8] sm:$0xff] }
 0x4db   : > { %v5880_v42 = vadd.f32 %v5829_v35, %v13388_v32  ;;  %v5881_v4 = vadd.f32 %v5830_v53, %v13388_v32  ;;  %6730 = vst [vmem:[%s14164_s4 + $0x230] sm:$0xff] %v5927_v59  ;;  %v5882_v29 = vadd.f32 %v5831_v12, %v13388_v32  ;;  %v5833_v43 = vmul.f32 %v6687_v24, %v13352_v39  ;;  %v6703_v59 = vld [vmem:[%s14164_s4 + $0x2f0] sm:$0xff] }
 0x4dc   : > { %6731 = vst [vmem:[%s14164_s4 + $0x238] sm:$0xff] %v5928_v63  ;;  %v5883_v47 = vadd.f32 %v5832_v44, %v13388_v32  ;;  %v5834_v25 = vmul.f32 %v6688_v30, %v13352_v39  ;;  %v5929_v15 = vmax.f32 %v5878_v57, 0.0  ;;  %v5930_v20 = vmax.f32 %v5879_v17, 0.0  ;;  %v6704_v63 = vld [vmem:[%s14164_s4 + $0x2f8] sm:$0xff] }
 0x4dd   : > { %v5931_v55 = vmax.f32 %v5880_v42, 0.0  ;;  %v5932_v28 = vmax.f32 %v5881_v4, 0.0  ;;  %v5933_v14 = vmax.f32 %v5882_v29, 0.0  ;;  %v5884_v40 = vadd.f32 %v5833_v43, %v13388_v32 }
 0x4de   : > { %v5934_v49 = vmax.f32 %v5883_v47, 0.0  ;;  %v5885_v46 = vadd.f32 %v5834_v25, %v13388_v32  ;;  %6732 = vst [vmem:[%s14164_s4 + $0x240] sm:$0xff] %v5929_v15  ;;  %6733 = vst [vmem:[%s14164_s4 + $0x248] sm:$0xff] %v5930_v20  ;;  %v5835_v13 = vmul.f32 %v6689_v56, %v13352_v39  ;;  %v5836_v9 = vmul.f32 %v6690_v33, %v13352_v39  ;;  %v6705_v47 = vld [vmem:[%s14164_s4 + $0x300] sm:$0xff]  ;;  %v6707_v15 = vld [vmem:[%s14164_s4 + $0x310] sm:$0xff] }
 0x4df   : > { %6734 = vst [vmem:[%s14164_s4 + $0x250] sm:$0xff] %v5931_v55  ;;  %6735 = vst [vmem:[%s14164_s4 + $0x258] sm:$0xff] %v5932_v28  ;;  %v5837_v48 = vmul.f32 %v6691_v34, %v13352_v39  ;;  %v5838_v11 = vmul.f32 %v6692_v27, %v13352_v39  ;;  %v5935_v61 = vmax.f32 %v5884_v40, 0.0  ;;  %v5839_v10 = vmul.f32 %v6693_v16, %v13352_v39  ;;  %v6706_v27 = vld [vmem:[%s14164_s4 + $0x308] sm:$0xff]  ;;  %v6708_v20 = vld [vmem:[%s14164_s4 + $0x318] sm:$0xff] }
 0x4e0   : > { %6736 = vst [vmem:[%s14164_s4 + $0x260] sm:$0xff] %v5933_v14  ;;  %6737 = vst [vmem:[%s14164_s4 + $0x268] sm:$0xff] %v5934_v49  ;;  %v5936_v52 = vmax.f32 %v5885_v46, 0.0  ;;  %v5840_v37 = vmul.f32 %v6694_v41, %v13352_v39  ;;  %v5886_v6 = vadd.f32 %v5835_v13, %v13388_v32  ;;  %v5887_v19 = vadd.f32 %v5836_v9, %v13388_v32  ;;  %v6709_v14 = vld [vmem:[%s14164_s4 + $0x320] sm:$0xff]  ;;  %v6710_v49 = vld [vmem:[%s14164_s4 + $0x328] sm:$0xff] }
 0x4e1   : > { %v5888_v3 = vadd.f32 %v5837_v48, %v13388_v32  ;;  %v5889_v23 = vadd.f32 %v5838_v11, %v13388_v32  ;;  %6738 = vst [vmem:[%s14164_s4 + $0x270] sm:$0xff] %v5935_v61  ;;  %v5890_v62 = vadd.f32 %v5839_v10, %v13388_v32  ;;  %v5841_v36 = vmul.f32 %v6695_v22, %v13352_v39 }
 0x4e2   : > { %6739 = vst [vmem:[%s14164_s4 + $0x278] sm:$0xff] %v5936_v52  ;;  %v5891_v2 = vadd.f32 %v5840_v37, %v13388_v32  ;;  %v5842_v45 = vmul.f32 %v6696_v26, %v13352_v39  ;;  %v5937_v54 = vmax.f32 %v5886_v6, 0.0  ;;  %v5938_v5 = vmax.f32 %v5887_v19, 0.0 }
 0x4e3   : > { %v5939_v8 = vmax.f32 %v5888_v3, 0.0  ;;  %v5940_v7 = vmax.f32 %v5889_v23, 0.0  ;;  %v5941_v50 = vmax.f32 %v5890_v62, 0.0  ;;  %v5892_v21 = vadd.f32 %v5841_v36, %v13388_v32 }
 0x4e4   : > { %v5942_v18 = vmax.f32 %v5891_v2, 0.0  ;;  %v5893_v0 = vadd.f32 %v5842_v45, %v13388_v32  ;;  %6740 = vst [vmem:[%s14164_s4 + $0x280] sm:$0xff] %v5937_v54  ;;  %6741 = vst [vmem:[%s14164_s4 + $0x288] sm:$0xff] %v5938_v5  ;;  %v5843_v35 = vmul.f32 %v6697_v1, %v13352_v39  ;;  %v5844_v53 = vmul.f32 %v6698_v51, %v13352_v39 }
 0x4e5   : > { %6742 = vst [vmem:[%s14164_s4 + $0x290] sm:$0xff] %v5939_v8  ;;  %6743 = vst [vmem:[%s14164_s4 + $0x298] sm:$0xff] %v5940_v7  ;;  %v5845_v24 = vmul.f32 %v6699_v31, %v13352_v39  ;;  %v5846_v30 = vmul.f32 %v6700_v38, %v13352_v39  ;;  %v5943_v12 = vmax.f32 %v5892_v21, 0.0  ;;  %v5847_v57 = vmul.f32 %v6701_v58, %v13352_v39 }
 0x4e6   : > { %6744 = vst [vmem:[%s14164_s4 + $0x2a0] sm:$0xff] %v5941_v50  ;;  %6745 = vst [vmem:[%s14164_s4 + $0x2a8] sm:$0xff] %v5942_v18  ;;  %v5944_v44 = vmax.f32 %v5893_v0, 0.0  ;;  %v5848_v17 = vmul.f32 %v6702_v60, %v13352_v39  ;;  %v5894_v42 = vadd.f32 %v5843_v35, %v13388_v32  ;;  %v5895_v4 = vadd.f32 %v5844_v53, %v13388_v32 }
 0x4e7   : > { %v5896_v56 = vadd.f32 %v5845_v24, %v13388_v32  ;;  %v5897_v29 = vadd.f32 %v5846_v30, %v13388_v32  ;;  %6746 = vst [vmem:[%s14164_s4 + $0x2b0] sm:$0xff] %v5943_v12  ;;  %v5898_v43 = vadd.f32 %v5847_v57, %v13388_v32  ;;  %v5849_v33 = vmul.f32 %v6703_v59, %v13352_v39 }
 0x4e8   : > { %6747 = vst [vmem:[%s14164_s4 + $0x2b8] sm:$0xff] %v5944_v44  ;;  %v5899_v25 = vadd.f32 %v5848_v17, %v13388_v32  ;;  %v5850_v34 = vmul.f32 %v6704_v63, %v13352_v39  ;;  %v5945_v55 = vmax.f32 %v5894_v42, 0.0  ;;  %v5946_v28 = vmax.f32 %v5895_v4, 0.0 }
 0x4e9   : > { %v5947_v16 = vmax.f32 %v5896_v56, 0.0  ;;  %v5948_v41 = vmax.f32 %v5897_v29, 0.0  ;;  %v5949_v40 = vmax.f32 %v5898_v43, 0.0  ;;  %v5900_v13 = vadd.f32 %v5849_v33, %v13388_v32 }
 0x4ea   : > { %v5950_v46 = vmax.f32 %v5899_v25, 0.0  ;;  %v5901_v9 = vadd.f32 %v5850_v34, %v13388_v32  ;;  %6748 = vst [vmem:[%s14164_s4 + $0x2c0] sm:$0xff] %v5945_v55  ;;  %6749 = vst [vmem:[%s14164_s4 + $0x2c8] sm:$0xff] %v5946_v28  ;;  %v5851_v48 = vmul.f32 %v6705_v47, %v13352_v39  ;;  %v5852_v11 = vmul.f32 %v6706_v27, %v13352_v39 }
 0x4eb   : > { %6750 = vst [vmem:[%s14164_s4 + $0x2d0] sm:$0xff] %v5947_v16  ;;  %6751 = vst [vmem:[%s14164_s4 + $0x2d8] sm:$0xff] %v5948_v41  ;;  %v5853_v22 = vmul.f32 %v6707_v15, %v13352_v39  ;;  %v5854_v26 = vmul.f32 %v6708_v20, %v13352_v39  ;;  %v5951_v61 = vmax.f32 %v5900_v13, 0.0  ;;  %v5855_v10 = vmul.f32 %v6709_v14, %v13352_v39 }
 0x4ec   : > { %6752 = vst [vmem:[%s14164_s4 + $0x2e0] sm:$0xff] %v5949_v40  ;;  %6753 = vst [vmem:[%s14164_s4 + $0x2e8] sm:$0xff] %v5950_v46  ;;  %v5952_v52 = vmax.f32 %v5901_v9, 0.0  ;;  %v5856_v37 = vmul.f32 %v6710_v49, %v13352_v39  ;;  %v5902_v6 = vadd.f32 %v5851_v48, %v13388_v32  ;;  %v5903_v19 = vadd.f32 %v5852_v11, %v13388_v32 }
 0x4ed   : > { %v5904_v3 = vadd.f32 %v5853_v22, %v13388_v32  ;;  %v5905_v23 = vadd.f32 %v5854_v26, %v13388_v32  ;;  %6754 = vst [vmem:[%s14164_s4 + $0x2f0] sm:$0xff] %v5951_v61  ;;  %v5906_v1 = vadd.f32 %v5855_v10, %v13388_v32 }
 0x4ee   : > { %6755 = vst [vmem:[%s14164_s4 + $0x2f8] sm:$0xff] %v5952_v52  ;;  %v5907_v39 = vadd.f32 %v5856_v37, %v13388_v32  ;;  %v5953_v62 = vmax.f32 %v5902_v6, 0.0  ;;  %v5954_v2 = vmax.f32 %v5903_v19, 0.0 }
 0x4ef   : > { %v5955_v36 = vmax.f32 %v5904_v3, 0.0  ;;  %v5956_v45 = vmax.f32 %v5905_v23, 0.0  ;;  %v5957_v51 = vmax.f32 %v5906_v1, 0.0 }
 0x4f0   : > { %v5958_v31 = vmax.f32 %v5907_v39, 0.0  ;;  %6756 = vst [vmem:[%s14164_s4 + $0x300] sm:$0xff] %v5953_v62  ;;  %6757 = vst [vmem:[%s14164_s4 + $0x308] sm:$0xff] %v5954_v2 }
 0x4f1   : > { %6758 = vst [vmem:[%s14164_s4 + $0x310] sm:$0xff] %v5955_v36  ;;  %6759 = vst [vmem:[%s14164_s4 + $0x318] sm:$0xff] %v5956_v45 }
 0x4f2   : > { %6760 = vst [vmem:[%s14164_s4 + $0x320] sm:$0xff] %v5957_v51  ;;  %6761 = vst [vmem:[%s14164_s4 + $0x328] sm:$0xff] %v5958_v31 }
 0x4f3 PF: > { %s14_s15 = sadd.s32 1, %s8985_s15  }
 0x4f4   : > { %p11_p6 = scmp.ge.s32.totalorder %s14_s15, 4  }
 0x4f6   :  { %13 = sbr.rel (!%p11_p6) target bundleno = 1 (0x1), region = 75 }

</bundles_post_ra>
